<compile_context>
chip_gen: v6e
topology: v6e:2x2x1
jax: 0.10.0
libtpu: 0.0.40
codegen_flags: <defaults>
</compile_context>

<pallas_src>
import functools

import jax
import jax.numpy as jnp
from jax import lax
from jax.experimental import pallas as pl
from jax.experimental.pallas import tpu as pltpu

F32 = jnp.float32
BF16 = jnp.bfloat16
_EPS = 1e-5


def _ru(x, m):
    return (x + m - 1) // m * m


# ---------------------------------------------------------------------------
# Generation-aware VMEM budgets
# ---------------------------------------------------------------------------

def _vmem_capacity_bytes():
    try:
        return int(pltpu.get_tpu_info().vmem_capacity_bytes)
    except Exception:
        pass
    try:
        kind = jax.devices()[0].device_kind.lower()
        if ("v5" in kind) or ("v6" in kind):
            return 128 * 1024 * 1024
    except Exception:
        pass
    return 64 * 1024 * 1024                 # conservative: v7x per-TC VMEM


def _is_multi_tensorcore_chip():
    try:
        return "v7" in jax.devices()[0].device_kind.lower()
    except Exception:
        return False


_VMEM_CAP = _vmem_capacity_bytes()
_MULTI_TC = _is_multi_tensorcore_chip()

if _VMEM_CAP >= 128 * 1024 * 1024:          # v5e / v6e (128 MiB VMEM)
    _MM_VMEM_BUDGET = 24 * 1024 * 1024
    _VMEM_LIMIT = 64 * 1024 * 1024
    _ELEM_BLOCK_BUDGET = 4 * 1024 * 1024
else:                                       # v7x (64 MiB physical per TC)
    _MM_VMEM_BUDGET = 9 * 1024 * 1024
    _VMEM_LIMIT = 32 * 1024 * 1024
    _ELEM_BLOCK_BUDGET = 2 * 1024 * 1024


# ---------------------------------------------------------------------------
# Fused matmul kernels (single full-M output tile)
# ---------------------------------------------------------------------------

def _mm_bn_kernel(*refs, inv_m, relu, has_res, multi_k, valid_m):
    """bf16 matmul, f32 accumulation; epilogue = BN batch stats + affine
    (+ residual add) (+ ReLU), written once as bf16.  Requires the output
    block to hold all M rows (stats are per channel over the full M)."""
    a_ref, b_ref, g_ref, bt_ref = refs[:4]
    pos = 4
    r_ref = None
    if has_res:
        r_ref = refs[pos]
        pos += 1
    o_ref = refs[pos]
    pos += 1
    acc_ref = refs[pos] if multi_k else None

    def epilogue(acc):
        s = jnp.sum(acc, axis=0, keepdims=True)
        q = jnp.sum(acc * acc, axis=0, keepdims=True)
        # TODO(synk): single-pass E[x^2]-E[x]^2 in f32; a mean-shifted two-pass
        # variance would be numerically safer if |mean| >> std.
        mean = s * inv_m
        var = jnp.maximum(q * inv_m - mean * mean, 0.0)
        scale = g_ref[...] * lax.rsqrt(var + _EPS)
        shift = bt_ref[...] - mean * scale
        y = acc * scale + shift
        if r_ref is not None:
            y = y + r_ref[...].astype(jnp.float32)
        if relu:
            y = jnp.maximum(y, 0.0)
        if valid_m is not None:
            # keep padded rows exactly zero so the next layer's in-kernel
            # stats (which sum the whole slab) stay exact.
            rid = lax.broadcasted_iota(jnp.int32, y.shape, 0)
            y = jnp.where(rid < valid_m, y, 0.0)
        o_ref[...] = y.astype(o_ref.dtype)

    if multi_k:
        @pl.when(pl.program_id(1) == 0)
        def _():
            acc_ref[...] = jnp.zeros_like(acc_ref)

        acc_ref[...] += jnp.dot(a_ref[...], b_ref[...],
                                preferred_element_type=jnp.float32)

        @pl.when(pl.program_id(1) == pl.num_programs(1) - 1)
        def _():
            epilogue(acc_ref[...])
    else:
        epilogue(jnp.dot(a_ref[...], b_ref[...],
                         preferred_element_type=jnp.float32))


def _mm_affine_kernel(*refs, relu, multi_k, valid_m):
    """bf16 matmul with fused y = acc*scale + shift (+ReLU) epilogue (AuxConv
    conv+bias paths)."""
    a_ref, b_ref, s_ref, t_ref, o_ref = refs[:5]
    acc_ref = refs[5] if multi_k else None

    def epilogue(acc):
        y = acc * s_ref[...] + t_ref[...]
        if relu:
            y = jnp.maximum(y, 0.0)
        if valid_m is not None:
            rid = lax.broadcasted_iota(jnp.int32, y.shape, 0)
            y = jnp.where(rid < valid_m, y, 0.0)
        o_ref[...] = y.astype(o_ref.dtype)

    if multi_k:
        @pl.when(pl.program_id(1) == 0)
        def _():
            acc_ref[...] = jnp.zeros_like(acc_ref)

        acc_ref[...] += jnp.dot(a_ref[...], b_ref[...],
                                preferred_element_type=jnp.float32)

        @pl.when(pl.program_id(1) == pl.num_programs(1) - 1)
        def _():
            epilogue(acc_ref[...])
    else:
        epilogue(jnp.dot(a_ref[...], b_ref[...],
                         preferred_element_type=jnp.float32))


def _launch_fused(kern, a, b, vecs, res, out_dtype, tiles):
    tn, tk, nj, nk = tiles
    Mp, Kp = a.shape
    Np = b.shape[1]
    in_specs = [pl.BlockSpec((Mp, tk), lambda j, k: (0, k)),
                pl.BlockSpec((tk, tn), lambda j, k: (k, j))]
    args = [a, b]
    for v in vecs:
        in_specs.append(pl.BlockSpec((1, tn), lambda j, k: (0, j)))
        args.append(v)
    if res is not None:
        in_specs.append(pl.BlockSpec((Mp, tn), lambda j, k: (0, j)))
        args.append(res)
    scratch = [pltpu.VMEM((Mp, tn), jnp.float32)] if nk > 1 else []
    return pl.pallas_call(
        kern,
        out_shape=jax.ShapeDtypeStruct((Mp, Np), out_dtype),
        grid_spec=pltpu.PrefetchScalarGridSpec(
            num_scalar_prefetch=0,
            grid=(nj, nk),
            in_specs=in_specs,
            out_specs=pl.BlockSpec((Mp, tn), lambda j, k: (0, j)),
            scratch_shapes=scratch),
        compiler_params=pltpu.CompilerParams(
            dimension_semantics=("parallel", "arbitrary"),
            vmem_limit_bytes=_VMEM_LIMIT),
    )(*args)


def matmul_bn_fused(a, b, g, bt, res, *, M, relu, tiles, valid_m):
    kern = functools.partial(_mm_bn_kernel, inv_m=1.0 / float(M), relu=relu,
                             has_res=res is not None, multi_k=tiles[3] > 1,
                             valid_m=valid_m)
    return _launch_fused(kern, a, b, (g, bt), res, BF16, tiles)


def matmul_affine_fused(a, b, s, t, *, relu, tiles, valid_m):
    kern = functools.partial(_mm_affine_kernel, relu=relu,
                             multi_k=tiles[3] > 1, valid_m=valid_m)
    return _launch_fused(kern, a, b, (s, t), None, BF16, tiles)


# ---------------------------------------------------------------------------
# Fused tile selection
# ---------------------------------------------------------------------------

def _divisor_tiles(xp, unit=128):
    """Divisors of xp that are multiples of `unit`, largest first."""
    out = []
    d = 1
    while xp // d >= unit:
        t = xp // d
        if xp % d == 0 and t % unit == 0:
            out.append(t)
        d += 1
    return out or [xp]


def _fused_footprint(mp, tk, tn, has_res, multi_k):
    inp = (mp * tk + tk * tn) * 2 + 2 * tn * 4        # bf16 A/B tiles + vectors
    if has_res:
        inp += mp * tn * 2
    total = 2 * (inp + mp * tn * 2)                   # double-buffered, bf16 out
    if multi_k:
        total += mp * tn * 4                          # f32 accumulator scratch
    return total


def _pick_fused_tiles(Mp, Kp, Np, has_res):
    tn_cands = _divisor_tiles(Np)
    if _MULTI_TC and Np >= 256 and (Np // 2) in tn_cands:
        # give the 'parallel' N axis >= 2 iterations so both v7x TensorCores
        # get work (and DMA overlaps compute instead of a serial prologue).
        tn_cands = [Np // 2] + [t for t in tn_cands if t != Np // 2]
    tk_cands = _divisor_tiles(Kp)
    for tn in tn_cands:
        for tk in tk_cands:
            nk = Kp // tk
            if _fused_footprint(Mp, tk, tn, has_res, nk > 1) <= _MM_VMEM_BUDGET:
                return tn, tk, Np // tn, nk
    return None


# ---------------------------------------------------------------------------
# Fallback kernels (multi-M-tile path; unused at the shapes in __main__)
# ---------------------------------------------------------------------------

def _mm_tiled_kernel(a_ref, b_ref, s_ref, t_ref, o_ref, *, relu):
    @pl.when(pl.program_id(2) == 0)
    def _():
        o_ref[...] = jnp.zeros_like(o_ref)

    o_ref[...] += jnp.dot(a_ref[...], b_ref[...],
                          preferred_element_type=jnp.float32)

    @pl.when(pl.program_id(2) == pl.num_programs(2) - 1)
    def _():
        y = o_ref[...] * s_ref[...] + t_ref[...]
        if relu:
            y = jnp.maximum(y, 0.0)
        o_ref[...] = y


def _pick_fallback_tiles(Mp, Kp, Np):
    def fits(tm, tn, tk):
        return 2 * 2 * (tm * tk + tk * tn) + 2 * 4 * tm * tn <= _MM_VMEM_BUDGET

    tm = Mp if Mp <= 1024 else 256
    tn, tk = Np, Kp
    if not fits(tm, tn, tk) and tn > 256:
        tn = 256
    if not fits(tm, tn, tk) and tk > 512:
        tk = 512
    if not fits(tm, tn, tk) and tm > 128:
        tm = 128
    if not fits(tm, tn, tk):
        tm, tn, tk = 128, 256, 512
    return (tm, tn, tk), (_ru(Mp, tm), _ru(Np, tn), _ru(Kp, tk))


def matmul_tiled_affine(a, b, s, t, relu):
    """General tiled matmul (f32 out) with affine epilogue at the last k."""
    Mp, Kp = a.shape
    Np = b.shape[1]
    (tm, tn, tk), (Mg, Ng, Kg) = _pick_fallback_tiles(Mp, Kp, Np)
    if (Mg, Kg) != (Mp, Kp):
        a = jnp.pad(a, ((0, Mg - Mp), (0, Kg - Kp)))
    if (Kg, Ng) != (Kp, Np):
        b = jnp.pad(b, ((0, Kg - Kp), (0, Ng - Np)))
    if Ng != Np:
        s = jnp.pad(s, ((0, 0), (0, Ng - Np)))
        t = jnp.pad(t, ((0, 0), (0, Ng - Np)))
    out = pl.pallas_call(
        functools.partial(_mm_tiled_kernel, relu=relu),
        out_shape=jax.ShapeDtypeStruct((Mg, Ng), F32),
        grid_spec=pltpu.PrefetchScalarGridSpec(
            num_scalar_prefetch=0,
            grid=(Mg // tm, Ng // tn, Kg // tk),
            in_specs=[pl.BlockSpec((tm, tk), lambda i, j, k: (i, k)),
                      pl.BlockSpec((tk, tn), lambda i, j, k: (k, j)),
                      pl.BlockSpec((1, tn), lambda i, j, k: (0, j)),
                      pl.BlockSpec((1, tn), lambda i, j, k: (0, j))],
            out_specs=pl.BlockSpec((tm, tn), lambda i, j, k: (i, j))),
        compiler_params=pltpu.CompilerParams(
            dimension_semantics=("parallel", "parallel", "arbitrary"),
            vmem_limit_bytes=_VMEM_LIMIT),
    )(a, b, s, t)
    if (Mg, Ng) != (Mp, Np):
        out = out[:Mp, :Np]
    return out


def _row_tile(Mp, Cp):
    if Mp * Cp * 4 <= _ELEM_BLOCK_BUDGET:
        return Mp
    for rt in (2048, 1024, 512, 256, 128, 64, 32, 16):
        if Mp % rt == 0 and rt * Cp * 4 <= _ELEM_BLOCK_BUDGET:
            return rt
    return 16


def _stats_kernel(x_ref, s_ref, q_ref):
    @pl.when(pl.program_id(0) == 0)
    def _():
        s_ref[...] = jnp.zeros_like(s_ref)
        q_ref[...] = jnp.zeros_like(q_ref)

    xb = x_ref[...]
    s_ref[...] += jnp.sum(xb, axis=0, keepdims=True)
    q_ref[...] += jnp.sum(xb * xb, axis=0, keepdims=True)


def channel_stats(x2):
    Mp, Cp = x2.shape
    rt = _row_tile(Mp, Cp)
    ssum, ssq = pl.pallas_call(
        _stats_kernel,
        out_shape=(jax.ShapeDtypeStruct((1, Cp), F32),
                   jax.ShapeDtypeStruct((1, Cp), F32)),
        grid=(Mp // rt,),
        in_specs=[pl.BlockSpec((rt, Cp), lambda i: (i, 0))],
        out_specs=(pl.BlockSpec((1, Cp), lambda i: (0, 0)),
                   pl.BlockSpec((1, Cp), lambda i: (0, 0))),
        compiler_params=pltpu.CompilerParams(
            dimension_semantics=("arbitrary",),
            vmem_limit_bytes=_VMEM_LIMIT),
    )(x2)
    return ssum[0], ssq[0]


def _affine_out_kernel(*refs, relu, has_res):
    x_ref, s_ref, t_ref = refs[:3]
    r_ref = refs[3] if has_res else None
    o_ref = refs[-1]
    y = x_ref[...] * s_ref[...] + t_ref[...]
    if has_res:
        y = y + r_ref[...].astype(jnp.float32)
    if relu:
        y = jnp.maximum(y, 0.0)
    o_ref[...] = y.astype(o_ref.dtype)


def affine_out(x2, scale, shift, relu, residual=None):
    Mp, Cp = x2.shape
    rt = _row_tile(Mp, Cp)
    s = scale.astype(F32).reshape(1, Cp)
    t = shift.astype(F32).reshape(1, Cp)
    in_specs = [pl.BlockSpec((rt, Cp), lambda i: (i, 0)),
                pl.BlockSpec((1, Cp), lambda i: (0, 0)),
                pl.BlockSpec((1, Cp), lambda i: (0, 0))]
    args = [x2, s, t]
    if residual is not None:
        in_specs.append(pl.BlockSpec((rt, Cp), lambda i: (i, 0)))
        args.append(residual)
    return pl.pallas_call(
        functools.partial(_affine_out_kernel, relu=relu,
                          has_res=residual is not None),
        out_shape=jax.ShapeDtypeStruct((Mp, Cp), BF16),
        grid=(Mp // rt,),
        in_specs=in_specs,
        out_specs=pl.BlockSpec((rt, Cp), lambda i: (i, 0)),
        compiler_params=pltpu.CompilerParams(
            dimension_semantics=("arbitrary",),
            vmem_limit_bytes=_VMEM_LIMIT),
    )(*args)


def _conv_bn_fallback(a2, wm, g, bt, r2, *, M, relu):
    Mp = a2.shape[0]
    y2 = matmul_tiled_affine(a2, wm, jnp.ones_like(g), jnp.zeros_like(bt),
                             relu=False)
    ssum, ssq = channel_stats(y2)
    mean = ssum / M
    var = jnp.maximum(ssq / M - mean * mean, 0.0)
    scale = g[0] * lax.rsqrt(var + _EPS)
    shift = bt[0] - mean * scale
    out2 = affine_out(y2, scale, shift, relu=relu, residual=r2)
    if Mp != M:
        out2 = out2.at[M:].set(jnp.zeros((), out2.dtype))
    return out2


# ---------------------------------------------------------------------------
# Activation container: lane/sublane zero-padded 2-D slab + lazy NHWC view
# ---------------------------------------------------------------------------

class Act:
    def __init__(self, nhw, c, slab=None, nhwc=None):
        self.nhw = tuple(int(v) for v in nhw)
        self.c = int(c)
        self._slab = slab
        self._nhwc = nhwc

    @property
    def m(self):
        n, h, w = self.nhw
        return n * h * w

    def slab(self):
        if self._slab is None:
            mp, cp = _ru(self.m, 16), _ru(self.c, 128)
            s = self._nhwc.reshape(self.m, self.c)
            if (mp, cp) != (self.m, self.c):
                s = jnp.pad(s, ((0, mp - self.m), (0, cp - self.c)))
            self._slab = s
        return self._slab

    def nhwc(self):
        if self._nhwc is None:
            n, h, w = self.nhw
            self._nhwc = self._slab[:self.m, :self.c].reshape(n, h, w, self.c)
        return self._nhwc


# ---------------------------------------------------------------------------
# Conv layers built on the fused matmul
# ---------------------------------------------------------------------------

def _im2col(x, kh, kw, stride, padding):
    """NHWC -> padded (Mp, Kp) patch matrix.  Returns (a2, (N,OH,OW), K)."""
    N, H, W, C = x.shape
    sh, sw = stride
    ph, pw = padding
    if ph or pw:
        x = jnp.pad(x, ((0, 0), (ph, ph), (pw, pw), (0, 0)))
    Hp, Wp = x.shape[1], x.shape[2]
    OH = (Hp - kh) // sh + 1
    OW = (Wp - kw) // sw + 1
    # TODO(synk): folding the kh*kw taps into the matmul K grid axis (strided
    # BlockSpec indexing of the padded NHWC input) would avoid materializing
    # this kh*kw-expanded copy; modest win at batch 1, dominant at larger M.
    cols = []
    for dh in range(kh):
        for dw in range(kw):
            cols.append(x[:, dh:dh + sh * (OH - 1) + 1:sh,
                          dw:dw + sw * (OW - 1) + 1:sw, :])
    patches = cols[0] if len(cols) == 1 else jnp.concatenate(cols, axis=-1)
    K = kh * kw * C
    M = N * OH * OW
    a2 = patches.reshape(M, K)
    Mp, Kp = _ru(M, 16), _ru(K, 128)
    if (Mp, Kp) != (M, K):
        a2 = jnp.pad(a2, ((0, Mp - M), (0, Kp - K)))
    return a2, (N, OH, OW), K


def _pad_vec(v, n, fill=0.0):
    v = v.astype(F32)
    if v.shape[0] == n:
        return v
    return jnp.concatenate([v, jnp.full((n - v.shape[0],), fill, F32)])


def _prep_conv(act, w, stride, padding):
    """OIHW weights -> padded bf16 operands.  Returns (a2, wm, nhw, O, M)."""
    O, I, kh, kw = w.shape
    assert I == act.c
    if kh == 1 and kw == 1 and stride == (1, 1) and padding == (0, 0):
        a2 = act.slab().astype(BF16)     # im2col is a no-op for 1x1 stride-1
        nhw = act.nhw
    else:
        x = act.nhwc().astype(BF16)
        a2, nhw, _ = _im2col(x, kh, kw, stride, padding)
    M = nhw[0] * nhw[1] * nhw[2]
    Kp = a2.shape[1]
    Np = _ru(O, 128)
    wm = jnp.transpose(w, (2, 3, 1, 0)).reshape(kh * kw * I, O).astype(BF16)
    if wm.shape != (Kp, Np):
        wm = jnp.pad(wm, ((0, Kp - kh * kw * I), (0, Np - O)))
    return a2, wm, nhw, O, M


def conv_bn(act, w, bn, stride=(1, 1), padding=(0, 0), relu=True,
            residual=None):
    """Conv -> BatchNorm(batch stats) [-> +residual] [-> ReLU], fully fused."""
    gamma, beta = bn
    a2, wm, nhw, O, M = _prep_conv(act, w, stride, padding)
    Mp, Kp = a2.shape
    Np = wm.shape[1]
    g = _pad_vec(gamma, Np, 0.0).reshape(1, Np)     # zero scale on padded cols
    bt = _pad_vec(beta, Np, 0.0).reshape(1, Np)
    r2 = None
    if residual is not None:
        r2 = residual.slab()
        assert r2.shape == (Mp, Np), (r2.shape, (Mp, Np))
        r2 = r2.astype(BF16)
    tiles = _pick_fused_tiles(Mp, Kp, Np, r2 is not None)
    if tiles is not None:
        out2 = matmul_bn_fused(a2, wm, g, bt, r2, M=M, relu=relu, tiles=tiles,
                               valid_m=None if Mp == M else M)
    else:
        out2 = _conv_bn_fallback(a2, wm, g, bt, r2, M=M, relu=relu)
    return Act(nhw, O, slab=out2)


def conv_bias(act, w, bias, stride=(1, 1), padding=(0, 0), relu=False):
    """Conv + bias (+ReLU) with the bias/ReLU fused into the matmul epilogue."""
    a2, wm, nhw, O, M = _prep_conv(act, w, stride, padding)
    Mp, Kp = a2.shape
    Np = wm.shape[1]
    s = _pad_vec(jnp.ones((O,), F32), Np, 0.0).reshape(1, Np)
    t = _pad_vec(bias, Np, 0.0).reshape(1, Np)
    tiles = _pick_fused_tiles(Mp, Kp, Np, False)
    if tiles is not None:
        out2 = matmul_affine_fused(a2, wm, s, t, relu=relu, tiles=tiles,
                                   valid_m=None if Mp == M else M)
    else:
        out2 = matmul_tiled_affine(a2, wm, s, t, relu)
        if Mp != M:
            out2 = out2.at[M:].set(jnp.zeros((), out2.dtype))
    return Act(nhw, O, slab=out2)


def conv_transpose_bn(act, w, bn, stride, padding):
    """ConvTranspose2d (PyTorch (I,O,kh,kw) weights) + BN + ReLU."""
    I, O, kh, kw = w.shape
    sh, sw = stride
    ph, pw = padding
    x = act.nhwc()
    N, H, W, C = x.shape
    assert I == C
    if sh > 1 or sw > 1:
        xd = jnp.zeros((N, (H - 1) * sh + 1, (W - 1) * sw + 1, C), x.dtype)
        xd = xd.at[:, ::sh, ::sw, :].set(x)
    else:
        xd = x
    # TODO(synk): sub-pixel (polyphase) decomposition would avoid multiplying
    # the inserted zeros; the deconv feature maps here are tiny (<= 3x9).
    w_conv = jnp.transpose(jnp.flip(w, axis=(2, 3)), (1, 0, 2, 3))
    up = Act((N, xd.shape[1], xd.shape[2]), C, nhwc=xd)
    return conv_bn(up, w_conv, bn, stride=(1, 1),
                   padding=(kh - 1 - ph, kw - 1 - pw), relu=True)


def maxpool_3x3_s2_p1(act):
    # TODO(synk): max-pool kept in plain JAX (lax.reduce_window); one tiny op,
    # not on the matmul hot path.
    x = act.nhwc()
    y = lax.reduce_window(
        x, jnp.array(-jnp.inf, x.dtype), lax.max,
        window_dimensions=(1, 3, 3, 1),
        window_strides=(1, 2, 2, 1),
        padding=((0, 0), (1, 1), (1, 1), (0, 0)))
    n, oh, ow, c = y.shape
    return Act((n, oh, ow), c, nhwc=y)


# ---------------------------------------------------------------------------
# Deterministic parameter construction (synthetic weights, no checkpoint)
# ---------------------------------------------------------------------------

_KEY = jax.random.PRNGKey(0)
_CNT = [0]


def _next_key():
    _CNT[0] += 1
    return jax.random.fold_in(_KEY, _CNT[0])


def conv_weight(o, i, kh, kw):
    fan_in = i * kh * kw
    std = (2.0 / fan_in) ** 0.5
    return std * jax.random.normal(_next_key(), (o, i, kh, kw), F32)


def convT_weight(i, o, kh, kw):
    fan_in = o * kh * kw
    std = (2.0 / fan_in) ** 0.5
    return std * jax.random.normal(_next_key(), (i, o, kh, kw), F32)


def xavier_uniform(o, i, kh, kw):
    fan_in, fan_out = i * kh * kw, o * kh * kw
    bound = (6.0 / (fan_in + fan_out)) ** 0.5
    return jax.random.uniform(_next_key(), (o, i, kh, kw), F32, -bound, bound)


def bias_param(c, fan_in):
    bound = 1.0 / (fan_in ** 0.5)
    return jax.random.uniform(_next_key(), (c,), F32, -bound, bound)


def bn_params(c):
    return jnp.ones((c,), F32), jnp.zeros((c,), F32)   # PyTorch default BN


def make_bottleneck(inplanes, planes, stride, downsample):
    p = {
        "w1": conv_weight(planes, inplanes, 1, 1), "bn1": bn_params(planes),
        "w2": conv_weight(planes, planes, 3, 3), "bn2": bn_params(planes),
        "w3": conv_weight(planes * 4, planes, 1, 1),
        "bn3": bn_params(planes * 4),
        "stride": (stride, stride), "down": None,
    }
    if downsample:
        p["down"] = {"w": conv_weight(planes * 4, inplanes, 1, 1),
                     "bn": bn_params(planes * 4)}
    return p


def make_layer(inplanes, planes, blocks, stride):
    layers = [make_bottleneck(inplanes, planes, stride,
                              stride != 1 or inplanes != planes * 4)]
    inplanes = planes * 4
    for _ in range(blocks - 1):
        layers.append(make_bottleneck(inplanes, planes, 1, False))
    return layers, inplanes


def make_aux(in_channels, c_tag, downsample):
    p = {
        "w1": xavier_uniform(c_tag, in_channels, 3, 1),
        "b1": bias_param(c_tag, in_channels * 3),
        "w2": xavier_uniform(c_tag, c_tag, 1, 3),
        "b2": bias_param(c_tag, c_tag * 3),
        "downsample": downsample,
    }
    if downsample:
        p["wd"] = xavier_uniform(c_tag, c_tag, 3, 3)
        p["bd"] = bias_param(c_tag, c_tag * 9)
    return p


def make_deconv_block(in_c, ksize, stride, pad):
    half, quarter = in_c // 2, in_c // 4
    # conv / convT biases omitted: they cancel exactly under the following
    # training-mode (batch statistics) BatchNorm.
    return {
        "wt": convT_weight(in_c, in_c, ksize[0], ksize[1]),
        "bnt": bn_params(in_c),
        "ksize": ksize, "stride": stride, "pad": pad,
        "ws": [conv_weight(half, in_c, 3, 3),
               conv_weight(half, half, 3, 3),
               conv_weight(half, half, 3, 3),
               conv_weight(quarter, half, 3, 3)],
        "bns": [bn_params(half), bn_params(half),
                bn_params(half), bn_params(quarter)],
    }


def build_den_params():
    params = {"conv1": conv_weight(64, 3, 7, 7), "bn1": bn_params(64)}
    inplanes = 64
    params["layer1"], inplanes = make_layer(inplanes, 64, 3, 1)
    params["layer2"], inplanes = make_layer(inplanes, 128, 8, 2)
    params["layer3"], inplanes = make_layer(inplanes, 256, 36, 2)
    params["layer4"], inplanes = make_layer(inplanes, 512, 3, 2)
    params["aux"] = ([make_aux(1024, 16, True) for _ in range(13)]
                     + [make_aux(2048, 16, False) for _ in range(3)])
    params["deconv"] = [
        make_deconv_block(256, (3, 3), (2, 2), (1, 1)),
        make_deconv_block(64, (3, 3), (2, 2), (2, 1)),
        make_deconv_block(16, (3, 3), (2, 2), (2, 1)),
        make_deconv_block(4, (3, 4), (1, 1), (2, 2)),
    ]
    return params


# ---------------------------------------------------------------------------
# Module forward passes
# ---------------------------------------------------------------------------

def bottleneck_forward(act, p):
    out = conv_bn(act, p["w1"], p["bn1"], relu=True)
    out = conv_bn(out, p["w2"], p["bn2"], stride=p["stride"], padding=(1, 1),
                  relu=True)
    if p["down"] is not None:
        res = conv_bn(act, p["down"]["w"], p["down"]["bn"],
                      stride=p["stride"], relu=False)
    else:
        res = act
    # conv3 + bn3 + residual add + ReLU fused into a single pallas_call.
    return conv_bn(out, p["w3"], p["bn3"], relu=True, residual=res)


def aux_forward(act, p):
    # Conv(3,1)+bias -> ReLU -> Dropout(0) -> Conv(1,3)+bias -> ReLU -> Dropout(0)
    a = conv_bias(act, p["w1"], p["b1"], relu=True)
    a = conv_bias(a, p["w2"], p["b2"], relu=True)
    if p["downsample"]:
        a = conv_bias(a, p["wd"], p["bd"], stride=(2, 2), relu=False)
    return a


def deconv_block_forward(act, p):
    act = conv_transpose_bn(act, p["wt"], p["bnt"], p["stride"], p["pad"])
    for w, bn in zip(p["ws"], p["bns"]):
        act = conv_bn(act, w, bn, padding=(1, 1), relu=True)
    return act


def den_forward(x_nchw, params):
    x = jnp.transpose(x_nchw.astype(F32), (0, 2, 3, 1)).astype(BF16)  # NHWC
    N, H, W, C = x.shape
    act = Act((N, H, W), C, nhwc=x)

    # resnet_top: stem + layer1 + layer2 + layer3[:23]  (flattened[:38])
    act = conv_bn(act, params["conv1"], params["bn1"],
                  stride=(2, 2), padding=(3, 3), relu=True)
    act = maxpool_3x3_s2_p1(act)
    for p in params["layer1"]:
        act = bottleneck_forward(act, p)
    for p in params["layer2"]:
        act = bottleneck_forward(act, p)
    for p in params["layer3"][:23]:
        act = bottleneck_forward(act, p)

    # resnet_mid (flattened[38:54]) interleaved with the aux heads
    mid_blocks = params["layer3"][23:] + params["layer4"]
    outs = []
    for i, p in enumerate(mid_blocks):
        act = bottleneck_forward(act, p)
        outs.append(aux_forward(act, params["aux"][i]).nhwc().astype(BF16))

    xcat = jnp.concatenate(outs, axis=-1)   # torch.cat(dim=1) == NHWC chan cat
    act = Act(xcat.shape[:3], xcat.shape[3], nhwc=xcat)

    for dp in params["deconv"]:
        act = deconv_block_forward(act, dp)

    y = act.nhwc().astype(F32)
    n = y.shape[0]
    return jnp.transpose(y, (0, 3, 1, 2)).reshape(n, -1)  # x.view(N,-1), NCHW


# ---------------------------------------------------------------------------
# Main
# ---------------------------------------------------------------------------

if __name__ == "__main__":
    # Smallest clean input: 112x112 keeps every conv/deconv stage valid
    # (layer3 -> 7x7, layer4 -> 4x4, aux outputs -> 2x2, final map 1x8).
    batch = 1
    x = jax.random.normal(jax.random.PRNGKey(0), (batch, 3, 112, 112), F32)
    params = build_den_params()
    out = den_forward(x, params)
    out = jax.block_until_ready(out)
    assert out.shape == (batch, 8), out.shape
    assert bool(jnp.all(jnp.isfinite(out)))
    print("KERNEL_OK")
</pallas_src>

<mosaic_0001>
module attributes {stable_mosaic.version = 11 : i64} {
  func.func @_mm_bn_kernel(%arg0: i32, %arg1: i32, %arg2: memref<3136x256xbf16, #tpu.memory_space<vmem>>, %arg3: memref<256x128xbf16, #tpu.memory_space<vmem>>, %arg4: memref<1x128xf32, #tpu.memory_space<vmem>>, %arg5: memref<1x128xf32, #tpu.memory_space<vmem>>, %arg6: memref<3136x128xbf16, #tpu.memory_space<vmem>>) attributes {dimension_semantics = [#tpu.dimension_semantics<parallel>, #tpu.dimension_semantics<arbitrary>], iteration_bounds = array<i64: 1, 1>, scalar_prefetch = 0 : i64, scratch_operands = 0 : i64, tpu.core_type = #tpu.core_type<tc>, window_params = [{transform_indices = @transform_0, window_bounds = array<i64: 3136, 256>}, {transform_indices = @transform_1, window_bounds = array<i64: 256, 128>}, {transform_indices = @transform_2, window_bounds = array<i64: 1, 128>}, {transform_indices = @transform_3, window_bounds = array<i64: 1, 128>}, {transform_indices = @transform_4, window_bounds = array<i64: 3136, 128>}]} {
    %c0 = arith.constant 0 : index
    %c0_0 = arith.constant 0 : index
    %0 = vector.load %arg2[%c0, %c0_0] : memref<3136x256xbf16, #tpu.memory_space<vmem>>, vector<3136x256xbf16>
    %c0_1 = arith.constant 0 : index
    %c0_2 = arith.constant 0 : index
    %1 = vector.load %arg3[%c0_1, %c0_2] : memref<256x128xbf16, #tpu.memory_space<vmem>>, vector<256x128xbf16>
    %cst = arith.constant dense<0.000000e+00> : vector<3136x128xf32>
    %2 = tpu.matmul %0, %1, %cst {dimension_numbers = #tpu.dot_dimension_numbers<[1], [0], [0], [1], [0, 0, 1, 1], [], []>} : vector<3136x256xbf16>, vector<256x128xbf16>, vector<3136x128xf32> -> vector<3136x128xf32>
    %cst_3 = arith.constant dense<0.000000e+00> : vector<128xf32>
    %3 = vector.multi_reduction <add>, %2, %cst_3 [0] : vector<3136x128xf32> to vector<128xf32>
    %4 = vector.shape_cast %3 : vector<128xf32> to vector<1x128xf32>
    %5 = arith.mulf %2, %2 : vector<3136x128xf32>
    %cst_4 = arith.constant dense<0.000000e+00> : vector<128xf32>
    %6 = vector.multi_reduction <add>, %5, %cst_4 [0] : vector<3136x128xf32> to vector<128xf32>
    %7 = vector.shape_cast %6 : vector<128xf32> to vector<1x128xf32>
    %cst_5 = arith.constant 3.18877544E-4 : f32
    %8 = vector.broadcast %cst_5 : f32 to vector<1x128xf32>
    %9 = arith.mulf %4, %8 : vector<1x128xf32>
    %cst_6 = arith.constant 3.18877544E-4 : f32
    %10 = vector.broadcast %cst_6 : f32 to vector<1x128xf32>
    %11 = arith.mulf %7, %10 : vector<1x128xf32>
    %12 = arith.mulf %9, %9 : vector<1x128xf32>
    %13 = arith.subf %11, %12 : vector<1x128xf32>
    %cst_7 = arith.constant 0.000000e+00 : f32
    %14 = vector.broadcast %cst_7 : f32 to vector<1x128xf32>
    %15 = arith.maximumf %13, %14 : vector<1x128xf32>
    %c0_8 = arith.constant 0 : index
    %c0_9 = arith.constant 0 : index
    %16 = vector.load %arg4[%c0_8, %c0_9] : memref<1x128xf32, #tpu.memory_space<vmem>>, vector<1x128xf32>
    %cst_10 = arith.constant 9.99999974E-6 : f32
    %17 = vector.broadcast %cst_10 : f32 to vector<1x128xf32>
    %18 = arith.addf %15, %17 : vector<1x128xf32>
    %19 = math.rsqrt %18 : vector<1x128xf32>
    %20 = arith.mulf %16, %19 : vector<1x128xf32>
    %c0_11 = arith.constant 0 : index
    %c0_12 = arith.constant 0 : index
    %21 = vector.load %arg5[%c0_11, %c0_12] : memref<1x128xf32, #tpu.memory_space<vmem>>, vector<1x128xf32>
    %22 = arith.mulf %9, %20 : vector<1x128xf32>
    %23 = arith.subf %21, %22 : vector<1x128xf32>
    %24 = vector.broadcast %20 : vector<1x128xf32> to vector<3136x128xf32>
    %25 = arith.mulf %2, %24 : vector<3136x128xf32>
    %26 = vector.broadcast %23 : vector<1x128xf32> to vector<3136x128xf32>
    %27 = arith.addf %25, %26 : vector<3136x128xf32>
    %cst_13 = arith.constant 0.000000e+00 : f32
    %28 = vector.broadcast %cst_13 : f32 to vector<3136x128xf32>
    %29 = arith.maximumf %27, %28 : vector<3136x128xf32>
    %30 = arith.truncf %29 : vector<3136x128xf32> to vector<3136x128xbf16>
    %c0_14 = arith.constant 0 : index
    %c0_15 = arith.constant 0 : index
    %31 = vector.load %arg6[%c0_14, %c0_15] : memref<3136x128xbf16, #tpu.memory_space<vmem>>, vector<3136x128xbf16>
    tpu.vector_store %arg6[%c0_14, %c0_15], %30 {strides = array<i32>} : memref<3136x128xbf16, #tpu.memory_space<vmem>>, vector<3136x128xbf16>,
    return
  }
  func.func @transform_0(%arg0: i32, %arg1: i32) -> (i32, i32) {
    %c0_i32 = arith.constant 0 : i32
    %c0_i32_0 = arith.constant 0 : i32
    return %c0_i32, %arg1 : i32, i32
  }
  func.func @transform_1(%arg0: i32, %arg1: i32) -> (i32, i32) {
    %c0_i32 = arith.constant 0 : i32
    return %arg1, %arg0 : i32, i32
  }
  func.func @transform_2(%arg0: i32, %arg1: i32) -> (i32, i32) {
    %c0_i32 = arith.constant 0 : i32
    %c0_i32_0 = arith.constant 0 : i32
    return %c0_i32, %arg0 : i32, i32
  }
  func.func @transform_3(%arg0: i32, %arg1: i32) -> (i32, i32) {
    %c0_i32 = arith.constant 0 : i32
    %c0_i32_0 = arith.constant 0 : i32
    return %c0_i32, %arg0 : i32, i32
  }
  func.func @transform_4(%arg0: i32, %arg1: i32) -> (i32, i32) {
    %c0_i32 = arith.constant 0 : i32
    %c0_i32_0 = arith.constant 0 : i32
    return %c0_i32, %arg0 : i32, i32
  }
}

</mosaic_0001>

<bundles_post_ra>
// kernel: tpu_custom_call.1
= control target key start
LH: loop header
LB: loop body
LE: loop exit
PB: predicated region body
PF: predicated region fallthrough
CT: control target
= control target key end

     0   :  { %9 = vsyncpa [#allocation3], 0  ;;  %s17987_s0 = inlined_call_operand.hbm [shape: bf16[3136,256], index: 0, kind: input, shape index: {}]   ;;  %s17988_s1 = inlined_call_operand.hbm [shape: bf16[256,128], index: 1, kind: input, shape index: {}]   ;;  %s17989_s2 = inlined_call_operand.hbm [shape: f32[1,128], index: 2, kind: input, shape index: {}]   ;;  %s17990_s3 = inlined_call_operand.hbm [shape: f32[1,128], index: 3, kind: input, shape index: {}]   ;;  %s17991_s4 = inlined_call_operand.hbm [shape: bf16[3136,128], index: 4, kind: output, shape index: {}]  }
   0x1   :  { %10 = vsyncpa [#allocation6], 0 }
   0x2   :  { %11 = vsyncpa [#allocation9], 0 }
   0x3   :  { %12 = vsyncpa [#allocation4], 0  ;;  %s11639_s15 = smov [#allocation5]  }
   0x4   :  { %s30_s16 = sshll.u32 %s11639_s15, 4  ;;  %s31_s16 = int_to_ptr.vmem [resolvable:$true] %s30_s16 }
   0x5   :  { %s11539_s17 = scalar_lea.vmem %s31_s16, 2048  ;;  %p11544_p1 = scmp.lt.s32.totalorder %s31_s16, %s31_s16 }
   0x6   :  { %p11540_p0 = scmp.ne.s32.totalorder %s31_s16, %s11539_s17  ;;  %p11545_p2 = scmp.lt.s32.totalorder %s11539_s17, %s11539_s17 }
   0x8   :  { %p11546_p3 = por %p11545_p2, %p11544_p1 }
   0xa   :  { %p11547_p4 = pnand %p11546_p3, %p11540_p0 }
   0xc   :  { %11550 = shalt.err (!%p11547_p4)
}
   0xd   :  { %s11640_s18 = smov 64   ;;  %s11641_s19 = smov 4  }
   0xe   :  { %36 = dma.hbm_to_vmem [thread:$0]  %s17988_s1, 2048, %s31_s16, [#allocation6], %s11640_s18, %s11640_s18, %s11641_s19  }
   0xf   :  { %s11642_s22 = smov [#allocation2]  }
  0x10   :  { %s18_s23 = sshll.u32 %s11642_s22, 4  ;;  %s19_s23 = int_to_ptr.vmem [resolvable:$true] %s18_s23 }
  0x11   :  { %s11559_s24 = scalar_lea.vmem %s19_s23, 50176  ;;  %p11564_p6 = scmp.lt.s32.totalorder %s19_s23, %s19_s23 }
  0x12   :  { %p11560_p5 = scmp.ne.s32.totalorder %s19_s23, %s11559_s24  ;;  %p11565_p7 = scmp.lt.s32.totalorder %s11559_s24, %s11559_s24 }
  0x14   :  { %p11566_p8 = por %p11565_p7, %p11564_p6 }
  0x16   :  { %p11567_p9 = pnand %p11566_p8, %p11560_p5 }
  0x18   :  { %11570 = shalt.err (!%p11567_p9)
}
  0x19   :  { %s11643_s25 = smov 128   ;;  %s11644_s26 = smov 8  }
  0x1a   :  { %24 = dma.hbm_to_vmem [thread:$0]  %s17987_s0, 50176, %s19_s23, [#allocation3], %s11643_s25, %s11643_s25, %s11644_s26  }
  0x1b   :  { %s11645_s29 = smov [#allocation7]   ;;  %s11646_s5 = smov [#allocation8]  }
  0x1c   :  { %s43_s30 = sshll.u32 %s11645_s29, 4  ;;  %s53_s1 = sshll.u32 %s11646_s5, 4  ;;  %s44_s30 = int_to_ptr.vmem [resolvable:$true] %s43_s30  ;;  %s54_s1 = int_to_ptr.vmem [resolvable:$true] %s53_s1 }
  0x1d   :  { %s11579_s6 = scalar_lea.vmem %s44_s30, 16  ;;  %s11583_s7 = scalar_lea.vmem %s44_s30, 32 }
  0x1e   :  { %p11580_p10 = scmp.ne.s32.totalorder %s44_s30, %s11579_s6  ;;  %p11584_p11 = scmp.lt.s32.totalorder %s44_s30, %s44_s30 }
  0x1f   :  { %p11585_p12 = scmp.lt.s32.totalorder %s11583_s7, %s11579_s6 }
  0x21   :  { %p11586_p13 = por %p11585_p12, %p11584_p11 }
  0x23   :  { %p11587_p0 = pnand %p11586_p13, %p11580_p10 }
  0x25   :  { %11590 = shalt.err (!%p11587_p0)
}
  0x26   :  { %46 = dma.hbm_to_vmem [thread:$0]  %s17989_s2, 16, %s44_s30, [#allocation6]  }
  0x27   :  { %s11599_s10 = scalar_lea.vmem %s54_s1, 16  ;;  %s11603_s0 = scalar_lea.vmem %s54_s1, 32 }
  0x28   :  { %p11600_p1 = scmp.ne.s32.totalorder %s54_s1, %s11599_s10  ;;  %p11604_p2 = scmp.lt.s32.totalorder %s54_s1, %s54_s1 }
  0x29   :  { %p11605_p3 = scmp.lt.s32.totalorder %s11603_s0, %s11599_s10 }
  0x2b   :  { %p11606_p4 = por %p11605_p3, %p11604_p2 }
  0x2d   :  { %p11607_p5 = pnand %p11606_p4, %p11600_p1 }
  0x2f   :  { %11610 = shalt.err (!%p11607_p5)
}
  0x30   :  { %56 = dma.hbm_to_vmem [thread:$0]  %s17990_s3, 16, %s54_s1, [#allocation9]  }
  0x31   :  { %11631 = dma.done.wait [#allocation3], 50176  }
  0x32   :  { %11632 = vsyncadd [#allocation3], 4294917120 }
  0x33   :  { %11633 = dma.done.wait [#allocation6], 2064  }
  0x34   :  { %11634 = vsyncadd [#allocation6], 4294965232 }
  0x35   :  { %11635 = dma.done.wait [#allocation9], 16  }
  0x36   :  { %11636 = vsyncadd [#allocation9], 4294967280  ;;  %v11647_v0 = vmov 0   ;;  %v10925_v1 = vld [vmem:[#allocation5 + $0x38] sm:$0xff]   ;;  %v10926_v2 = vld [vmem:[#allocation5 + $0x30] sm:$0xff]   ;;  %s11648_s2 = smov [#allocation10]  }
  0x37   :  { %2550 = vmatprep.subr.bf16.mxu0 %v11647_v0  ;;  %10883 = vmatprep.subr.bf16.mxu1 %v11647_v0  ;;  %v10927_v3 = vld [vmem:[#allocation5 + $0x28] sm:$0xff]   ;;  %v10928_v4 = vld [vmem:[#allocation5 + $0x20] sm:$0xff]   ;;  %v10929_v5 = vld [vmem:[#allocation5 + $0x18] sm:$0xff]   ;;  %s8502_s3 = sshll.u32 %s11648_s2, 4  ;;  %s8503_s3 = int_to_ptr.vmem [resolvable:$true] %s8502_s3 }
  0x38   :  { %2551 = vmatpush1.bf16.msra.mxu0 %v10925_v1  ;;  %10899 = vmatpush1.bf16.msra.mxu1 %v10925_v1  ;;  %v10943_v6 = vld [vmem:[#allocation2 + $0x4] ss:$8 sps:$4 sm:$0xff]   ;;  %v10930_v7 = vld [vmem:[#allocation5 + $0x10] sm:$0xff]   ;;  %v10933_v10 = vld [vmem:[#allocation5 + $0x78] sm:$0xff]   ;;  %s11611_s13 = scalar_lea.vmem %s8503_s3, 25088  ;;  %p11616_p7 = scmp.lt.s32.totalorder %s8503_s3, %s8503_s3 }
  0x39   :  { %2552 = vmatprep.subr.bf16.mxu0 %v11647_v0  ;;  %10884 = vmatprep.subr.bf16.mxu1 %v11647_v0  ;;  %v10931_v8 = vld [vmem:[#allocation5 + $0x8] sm:$0xff]   ;;  %v10932_v9 = vld [vmem:[#allocation5] sm:$0xff]   ;;  %v10934_v11 = vld [vmem:[#allocation5 + $0x70] sm:$0xff]   ;;  %p11612_p6 = scmp.ne.s32.totalorder %s8503_s3, %s11611_s13  ;;  %p11617_p8 = scmp.lt.s32.totalorder %s11611_s13, %s11611_s13 }
  0x3a   :  { %2582 = vmatprep.mubr.bf16.mxu0 %v10943_v6  ;;  %v10935_v12 = vld [vmem:[#allocation5 + $0x68] sm:$0xff]   ;;  %v10936_v13 = vld [vmem:[#allocation5 + $0x60] sm:$0xff]   ;;  %v10937_v14 = vld [vmem:[#allocation5 + $0x58] sm:$0xff]  }
  0x3b   :  { %v10938_v15 = vld [vmem:[#allocation5 + $0x50] sm:$0xff]   ;;  %v10939_v16 = vld [vmem:[#allocation5 + $0x48] sm:$0xff]   ;;  %v10940_v17 = vld [vmem:[#allocation5 + $0x40] sm:$0xff]   ;;  %p11618_p9 = por %p11617_p8, %p11616_p7 }
  0x3c   :  { %2553 = vmatpush1.bf16.msra.mxu0 %v10926_v2  ;;  %10900 = vmatpush1.bf16.msra.mxu1 %v10926_v2  ;;  %v10941_v18 = vld [vmem:[#allocation2] ss:$8 sps:$4 sm:$0xff]   ;;  %v10944_v19 = vld [vmem:[#allocation2 + $0x14] ss:$8 sps:$4 sm:$0xff]   ;;  %v10946_v20 = vld [vmem:[#allocation2 + $0x10] ss:$8 sps:$4 sm:$0xff]  }
  0x3d   :  { %2554 = vmatprep.subr.bf16.mxu0 %v11647_v0  ;;  %10885 = vmatprep.subr.bf16.mxu1 %v11647_v0  ;;  %v10947_v21 = vld [vmem:[#allocation2 + $0x24] ss:$8 sps:$4 sm:$0xff]   ;;  %v10949_v22 = vld [vmem:[#allocation2 + $0x20] ss:$8 sps:$4 sm:$0xff]   ;;  %v10950_v23 = vld [vmem:[#allocation2 + $0x34] ss:$8 sps:$4 sm:$0xff]   ;;  %p11619_p10 = pnand %p11618_p9, %p11612_p6 }
  0x3e   :  { %v10952_v24 = vld [vmem:[#allocation2 + $0x30] ss:$8 sps:$4 sm:$0xff]   ;;  %v10953_v25 = vld [vmem:[#allocation2 + $0x44] ss:$8 sps:$4 sm:$0xff]   ;;  %v10955_v26 = vld [vmem:[#allocation2 + $0x40] ss:$8 sps:$4 sm:$0xff]  }
  0x3f   :  { %v10956_v27 = vld [vmem:[#allocation2 + $0x54] ss:$8 sps:$4 sm:$0xff]   ;;  %v10958_v28 = vld [vmem:[#allocation2 + $0x50] ss:$8 sps:$4 sm:$0xff]   ;;  %v10959_v29 = vld [vmem:[#allocation2 + $0x64] ss:$8 sps:$4 sm:$0xff]  }
  0x40   :  { %2555 = vmatpush1.bf16.msra.mxu0 %v10927_v3  ;;  %10901 = vmatpush1.bf16.msra.mxu1 %v10927_v3  ;;  %v10961_v30 = vld [vmem:[#allocation2 + $0x60] ss:$8 sps:$4 sm:$0xff]   ;;  %v10962_v31 = vld [vmem:[#allocation2 + $0x74] ss:$8 sps:$4 sm:$0xff]   ;;  %v10964_v32 = vld [vmem:[#allocation2 + $0x70] ss:$8 sps:$4 sm:$0xff]  }
  0x41   :  { %2556 = vmatprep.subr.bf16.mxu0 %v11647_v0  ;;  %10886 = vmatprep.subr.bf16.mxu1 %v11647_v0  ;;  %v10965_v33 = vld [vmem:[#allocation2 + $0x84] ss:$8 sps:$4 sm:$0xff]   ;;  %v10967_v34 = vld [vmem:[#allocation2 + $0x80] ss:$8 sps:$4 sm:$0xff]   ;;  %v10968_v35 = vld [vmem:[#allocation2 + $0x94] ss:$8 sps:$4 sm:$0xff]  }
  0x42   :  { %v10970_v36 = vld [vmem:[#allocation2 + $0x90] ss:$8 sps:$4 sm:$0xff]   ;;  %v10971_v37 = vld [vmem:[#allocation2 + $0xa4] ss:$8 sps:$4 sm:$0xff]   ;;  %v10973_v38 = vld [vmem:[#allocation2 + $0xa0] ss:$8 sps:$4 sm:$0xff]  }
  0x43   :  { %v10974_v39 = vld [vmem:[#allocation2 + $0xb4] ss:$8 sps:$4 sm:$0xff]   ;;  %v10976_v40 = vld [vmem:[#allocation2 + $0xb0] ss:$8 sps:$4 sm:$0xff]   ;;  %v10977_v41 = vld [vmem:[#allocation2 + $0xc4] ss:$8 sps:$4 sm:$0xff]  }
  0x44   :  { %2557 = vmatpush1.bf16.msra.mxu0 %v10928_v4  ;;  %10902 = vmatpush1.bf16.msra.mxu1 %v10928_v4  ;;  %v10979_v42 = vld [vmem:[#allocation2 + $0xc0] ss:$8 sps:$4 sm:$0xff]   ;;  %v10980_v43 = vld [vmem:[#allocation2 + $0xd4] ss:$8 sps:$4 sm:$0xff]   ;;  %v10982_v44 = vld [vmem:[#allocation2 + $0xd0] ss:$8 sps:$4 sm:$0xff]  }
  0x45   :  { %2558 = vmatprep.subr.bf16.mxu0 %v11647_v0  ;;  %10887 = vmatprep.subr.bf16.mxu1 %v11647_v0  ;;  %v10983_v45 = vld [vmem:[#allocation2 + $0xe4] ss:$8 sps:$4 sm:$0xff]   ;;  %v10985_v46 = vld [vmem:[#allocation2 + $0xe0] ss:$8 sps:$4 sm:$0xff]   ;;  %v10986_v47 = vld [vmem:[#allocation2 + $0xf4] ss:$8 sps:$4 sm:$0xff]  }
  0x46   :  { %v10988_v48 = vld [vmem:[#allocation2 + $0xf0] ss:$8 sps:$4 sm:$0xff]   ;;  %v10989_v49 = vld [vmem:[#allocation2 + $0x104] ss:$8 sps:$4 sm:$0xff]   ;;  %v10991_v50 = vld [vmem:[#allocation2 + $0x100] ss:$8 sps:$4 sm:$0xff]  }
  0x47   :  { %v10992_v51 = vld [vmem:[#allocation2 + $0x114] ss:$8 sps:$4 sm:$0xff]   ;;  %v10994_v52 = vld [vmem:[#allocation2 + $0x110] ss:$8 sps:$4 sm:$0xff]   ;;  %v10995_v53 = vld [vmem:[#allocation2 + $0x124] ss:$8 sps:$4 sm:$0xff]  }
  0x48   :  { %2559 = vmatpush1.bf16.msra.mxu0 %v10929_v5  ;;  %10903 = vmatpush1.bf16.msra.mxu1 %v10929_v5  ;;  %v10997_v54 = vld [vmem:[#allocation2 + $0x120] ss:$8 sps:$4 sm:$0xff]   ;;  %v10998_v55 = vld [vmem:[#allocation2 + $0x134] ss:$8 sps:$4 sm:$0xff]   ;;  %v11000_v56 = vld [vmem:[#allocation2 + $0x130] ss:$8 sps:$4 sm:$0xff]  }
  0x49   :  { %2560 = vmatprep.subr.bf16.mxu0 %v11647_v0  ;;  %10888 = vmatprep.subr.bf16.mxu1 %v11647_v0  ;;  %v11001_v57 = vld [vmem:[#allocation2 + $0x144] ss:$8 sps:$4 sm:$0xff]   ;;  %v11003_v58 = vld [vmem:[#allocation2 + $0x140] ss:$8 sps:$4 sm:$0xff]   ;;  %v11004_v59 = vld [vmem:[#allocation2 + $0x154] ss:$8 sps:$4 sm:$0xff]  }
  0x4a   :  { %v11006_v60 = vld [vmem:[#allocation2 + $0x150] ss:$8 sps:$4 sm:$0xff]   ;;  %v11007_v61 = vld [vmem:[#allocation2 + $0x164] ss:$8 sps:$4 sm:$0xff]   ;;  %v11009_v62 = vld [vmem:[#allocation2 + $0x160] ss:$8 sps:$4 sm:$0xff]  }
  0x4b   :  { %v11010_v63 = vld [vmem:[#allocation2 + $0x174] ss:$8 sps:$4 sm:$0xff]   ;;  %v11013_v1 = vld [vmem:[#allocation2 + $0x184] ss:$8 sps:$4 sm:$0xff]   ;;  %v11015_v2 = vld [vmem:[#allocation2 + $0x180] ss:$8 sps:$4 sm:$0xff]  }
  0x4c   :  { %2561 = vmatpush1.bf16.msra.mxu0 %v10930_v7  ;;  %10904 = vmatpush1.bf16.msra.mxu1 %v10930_v7  ;;  %v11016_v3 = vld [vmem:[#allocation2 + $0x194] ss:$8 sps:$4 sm:$0xff]   ;;  %v11018_v7 = vld [vmem:[#allocation2 + $0x190] ss:$8 sps:$4 sm:$0xff]  }
  0x4d   :  { %2562 = vmatprep.subr.bf16.mxu0 %v11647_v0  ;;  %10889 = vmatprep.subr.bf16.mxu1 %v11647_v0 }
  0x50   :  { %2563 = vmatpush1.bf16.msra.mxu0 %v10931_v8  ;;  %10905 = vmatpush1.bf16.msra.mxu1 %v10931_v8  ;;  %v11019_v8 = vld [vmem:[#allocation2 + $0x1a4] ss:$8 sps:$4 sm:$0xff]  }
  0x51   :  { %2564 = vmatprep.subr.bf16.mxu0 %v11647_v0  ;;  %10890 = vmatprep.subr.bf16.mxu1 %v11647_v0 }
  0x54   :  { %2565 = vmatpush1.bf16.msra.mxu0 %v10932_v9  ;;  %10906 = vmatpush1.bf16.msra.mxu1 %v10932_v9 }
  0x55   :  { %2566 = vmatprep.subr.bf16.mxu0 %v11647_v0  ;;  %10891 = vmatprep.subr.bf16.mxu1 %v11647_v0 }
  0x58   :  { %2567 = vmatpush2.bf16.msra.mxu0 %v10933_v10  ;;  %10907 = vmatpush2.bf16.msra.mxu1 %v10933_v10 }
  0x59   :  { %2568 = vmatprep.subr.bf16.mxu0 %v11647_v0  ;;  %10892 = vmatprep.subr.bf16.mxu1 %v11647_v0 }
  0x5c   :  { %2569 = vmatpush2.bf16.msra.mxu0 %v10934_v11  ;;  %10908 = vmatpush2.bf16.msra.mxu1 %v10934_v11 }
  0x5d   :  { %2570 = vmatprep.subr.bf16.mxu0 %v11647_v0  ;;  %10893 = vmatprep.subr.bf16.mxu1 %v11647_v0 }
  0x60   :  { %2571 = vmatpush2.bf16.msra.mxu0 %v10935_v12  ;;  %10909 = vmatpush2.bf16.msra.mxu1 %v10935_v12 }
  0x61   :  { %2572 = vmatprep.subr.bf16.mxu0 %v11647_v0  ;;  %10894 = vmatprep.subr.bf16.mxu1 %v11647_v0 }
  0x64   :  { %2573 = vmatpush2.bf16.msra.mxu0 %v10936_v13  ;;  %10910 = vmatpush2.bf16.msra.mxu1 %v10936_v13  ;;  %v11021_v13 = vld [vmem:[#allocation2 + $0x1a0] ss:$8 sps:$4 sm:$0xff]  }
  0x65   :  { %2574 = vmatprep.subr.bf16.mxu0 %v11647_v0  ;;  %10895 = vmatprep.subr.bf16.mxu1 %v11647_v0 }
  0x68   :  { %2575 = vmatpush2.bf16.msra.mxu0 %v10937_v14  ;;  %10911 = vmatpush2.bf16.msra.mxu1 %v10937_v14  ;;  %v11022_v14 = vld [vmem:[#allocation2 + $0x1b4] ss:$8 sps:$4 sm:$0xff]  }
  0x69   :  { %2576 = vmatprep.subr.bf16.mxu0 %v11647_v0  ;;  %10896 = vmatprep.subr.bf16.mxu1 %v11647_v0 }
  0x6c   :  { %2577 = vmatpush2.bf16.msra.mxu0 %v10938_v15  ;;  %10912 = vmatpush2.bf16.msra.mxu1 %v10938_v15 }
  0x6d   :  { %2578 = vmatprep.subr.bf16.mxu0 %v11647_v0  ;;  %10897 = vmatprep.subr.bf16.mxu1 %v11647_v0 }
  0x70   :  { %2579 = vmatpush2.bf16.msra.mxu0 %v10939_v16  ;;  %10913 = vmatpush2.bf16.msra.mxu1 %v10939_v16 }
  0x71   :  { %2580 = vmatprep.subr.bf16.mxu0 %v11647_v0  ;;  %10898 = vmatprep.subr.bf16.mxu1 %v11647_v0  ;;  %v11012_v0 = vld [vmem:[#allocation2 + $0x170] ss:$8 sps:$4 sm:$0xff]  }
  0x74   :  { %2581 = vmatpush2.bf16.msra.mxu0 %v10940_v17  ;;  %10914 = vmatpush2.bf16.msra.mxu1 %v10940_v17 }
  0x77   :  { %2583 = vmatmul.mubr.bf16.vlgmr.msra.gmra.mxu0 %v10941_v18 }
  0x78   :  { %2590 = vmatprep.mubr.bf16.mxu0 %v10944_v19  ;;  %v11024_v19 = vld [vmem:[#allocation2 + $0x1b0] ss:$8 sps:$4 sm:$0xff]  }
  0x7f   :  { %2591 = vmatmul.mubr.bf16.gmra.mxu0 %v10946_v20  ;;  %v11027_v20 = vld [vmem:[#allocation2 + $0x1c4] ss:$8 sps:$4 sm:$0xff]  }
  0x80   :  { %2598 = vmatprep.mubr.bf16.mxu0 %v10947_v21 }
  0x87   :  { %2599 = vmatmul.mubr.bf16.gmra.mxu0 %v10949_v22 }
  0x88   :  { %2606 = vmatprep.mubr.bf16.mxu0 %v10950_v23 }
  0x8f   :  { %2607 = vmatmul.mubr.bf16.gmra.mxu0 %v10952_v24 }
  0x90   :  { %2614 = vmatprep.mubr.bf16.mxu0 %v10953_v25  ;;  %v11025_v25 = vld [vmem:[#allocation2 + $0x1c0] ss:$8 sps:$4 sm:$0xff]  }
  0x97   :  { %2615 = vmatmul.mubr.bf16.gmra.mxu0 %v10955_v26  ;;  %v11030_v26 = vld [vmem:[#allocation2 + $0x1d4] ss:$8 sps:$4 sm:$0xff]  }
  0x98   :  { %2622 = vmatprep.mubr.bf16.mxu0 %v10956_v27 }
  0x9f   :  { %2623 = vmatmul.mubr.bf16.gmra.mxu0 %v10958_v28 }
  0xa0   :  { %2630 = vmatprep.mubr.bf16.mxu0 %v10959_v29 }
  0xa7   :  { %2631 = vmatmul.mubr.bf16.gmra.mxu0 %v10961_v30 }
  0xa8   :  { %2638 = vmatprep.mubr.bf16.mxu0 %v10962_v31  ;;  %v11028_v31 = vld [vmem:[#allocation2 + $0x1d0] ss:$8 sps:$4 sm:$0xff]  }
  0xaf   :  { %2639 = vmatmul.mubr.bf16.gmra.mxu0 %v10964_v32  ;;  %v11033_v32 = vld [vmem:[#allocation2 + $0x1e4] ss:$8 sps:$4 sm:$0xff]  }
  0xb0   :  { %2646 = vmatprep.mubr.bf16.mxu0 %v10965_v33 }
  0xb7   :  { %2647 = vmatmul.mubr.bf16.gmra.mxu0 %v10967_v34 }
  0xb8   :  { %2654 = vmatprep.mubr.bf16.mxu0 %v10968_v35 }
  0xbf   :  { %2655 = vmatmul.mubr.bf16.gmra.mxu0 %v10970_v36 }
  0xc0   :  { %2662 = vmatprep.mubr.bf16.mxu0 %v10971_v37  ;;  %v11031_v37 = vld [vmem:[#allocation2 + $0x1e0] ss:$8 sps:$4 sm:$0xff]  }
  0xc7   :  { %2663 = vmatmul.mubr.bf16.gmra.mxu0 %v10973_v38  ;;  %v11036_v38 = vld [vmem:[#allocation2 + $0x1f4] ss:$8 sps:$4 sm:$0xff]  }
  0xc8   :  { %2670 = vmatprep.mubr.bf16.mxu0 %v10974_v39 }
  0xcf   :  { %2671 = vmatmul.mubr.bf16.gmra.mxu0 %v10976_v40 }
  0xd0   :  { %2678 = vmatprep.mubr.bf16.mxu0 %v10977_v41 }
  0xd7   :  { %2679 = vmatmul.mubr.bf16.gmra.mxu0 %v10979_v42 }
  0xd8   :  { %2686 = vmatprep.mubr.bf16.mxu0 %v10980_v43  ;;  %v11034_v43 = vld [vmem:[#allocation2 + $0x1f0] ss:$8 sps:$4 sm:$0xff]  }
  0xdf   :  { %2687 = vmatmul.mubr.bf16.gmra.mxu0 %v10982_v44  ;;  %v11039_v44 = vld [vmem:[#allocation2 + $0x204] ss:$8 sps:$4 sm:$0xff]  }
  0xe0   :  { %2694 = vmatprep.mubr.bf16.mxu0 %v10983_v45 }
  0xe7   :  { %2695 = vmatmul.mubr.bf16.gmra.mxu0 %v10985_v46 }
  0xe8   :  { %2702 = vmatprep.mubr.bf16.mxu0 %v10986_v47 }
  0xef   :  { %2703 = vmatmul.mubr.bf16.gmra.mxu0 %v10988_v48 }
  0xf0   :  { %2710 = vmatprep.mubr.bf16.mxu0 %v10989_v49  ;;  %v11037_v49 = vld [vmem:[#allocation2 + $0x200] ss:$8 sps:$4 sm:$0xff]  }
  0xf7   :  { %2711 = vmatmul.mubr.bf16.gmra.mxu0 %v10991_v50  ;;  %v11042_v50 = vld [vmem:[#allocation2 + $0x214] ss:$8 sps:$4 sm:$0xff]  }
  0xf8   :  { %2718 = vmatprep.mubr.bf16.mxu0 %v10992_v51 }
  0xff   :  { %2719 = vmatmul.mubr.bf16.gmra.mxu0 %v10994_v52  ;;  %v11090_v52 = vld [vmem:[#allocation2 + $0x624] ss:$8 sps:$4 sm:$0xff]  }
 0x100   :  { %2726 = vmatprep.mubr.bf16.mxu0 %v10995_v53  ;;  %3366 = vmatprep.mubr.bf16.mxu1 %v11090_v52  ;;  %v11124_v52 = vld [vmem:[#allocation2 + $0x684] ss:$8 sps:$4 sm:$0xff]  }
 0x107   :  { %2727 = vmatmul.mubr.bf16.gmra.mxu0 %v10997_v54  ;;  %v11088_v54 = vld [vmem:[#allocation2 + $0x620] ss:$8 sps:$4 sm:$0xff]  }
 0x108   :  { %2734 = vmatprep.mubr.bf16.mxu0 %v10998_v55  ;;  %3367 = vmatmul.mubr.bf16.vlgmr.msra.gmra.mxu1 %v11088_v54 }
 0x10f   :  { %2735 = vmatmul.mubr.bf16.gmra.mxu0 %v11000_v56 }
 0x110   :  { %2742 = vmatprep.mubr.bf16.mxu0 %v11001_v57  ;;  %v11040_v57 = vld [vmem:[#allocation2 + $0x210] ss:$8 sps:$4 sm:$0xff]  }
 0x117   :  { %2743 = vmatmul.mubr.bf16.gmra.mxu0 %v11003_v58  ;;  %v11045_v58 = vld [vmem:[#allocation2 + $0x224] ss:$8 sps:$4 sm:$0xff]  }
 0x118   :  { %2750 = vmatprep.mubr.bf16.mxu0 %v11004_v59 }
 0x11f   :  { %2751 = vmatmul.mubr.bf16.gmra.mxu0 %v11006_v60  ;;  %v11094_v60 = vld [vmem:[#allocation2 + $0x634] ss:$8 sps:$4 sm:$0xff]  }
 0x120   :  { %2758 = vmatprep.mubr.bf16.mxu0 %v11007_v61  ;;  %3374 = vmatprep.mubr.bf16.mxu1 %v11094_v60  ;;  %v11063_v60 = vld [vmem:[#allocation2 + $0x284] ss:$8 sps:$4 sm:$0xff]  }
 0x127   :  { %2759 = vmatmul.mubr.bf16.gmra.mxu0 %v11009_v62  ;;  %v11096_v62 = vld [vmem:[#allocation2 + $0x630] ss:$8 sps:$4 sm:$0xff]  }
 0x128   :  { %2766 = vmatprep.mubr.bf16.mxu0 %v11010_v63  ;;  %3375 = vmatmul.mubr.bf16.gmra.mxu1 %v11096_v62 }
 0x12f   :  { %2767 = vmatmul.mubr.bf16.gmra.mxu0 %v11012_v0 }
 0x130   :  { %2774 = vmatprep.mubr.bf16.mxu0 %v11013_v1  ;;  %v11043_v1 = vld [vmem:[#allocation2 + $0x220] ss:$8 sps:$4 sm:$0xff]  }
 0x137   :  { %v11721_v4 = vpop.f32.mrf.mxu0  ;;  %2775 = vmatmul.mubr.bf16.gmra.mxu0 %v11015_v2  ;;  %v11048_v2 = vld [vmem:[#allocation2 + $0x234] ss:$8 sps:$4 sm:$0xff]  }
 0x138   :  { %18905 = vst [vmem:[#allocation15_spill] sm:$0xff] %v11721_v4  ;;  %2782 = vmatprep.mubr.bf16.mxu0 %v11016_v3 }
 0x139   :  { %v2586_v5 = vpop.f32.mrf.mxu0 }
 0x13a   :  { %v11100_v5 = vld [vmem:[#allocation2 + $0x644] ss:$8 sps:$4 sm:$0xff]  }
 0x13b   :  { %v11723_v6 = vpop.f32.mrf.mxu0  ;;  %3382 = vmatprep.mubr.bf16.mxu1 %v11100_v5 }
 0x13c   :  { %18906 = vst [vmem:[#allocation16_spill] sm:$0xff] %v11723_v6 }
 0x13d   :  { %v2589_v9 = vpop.f32.mrf.mxu0 }
 0x13f   :  { %v11725_v10 = vpop.f32.mrf.mxu0  ;;  %2783 = vmatmul.mubr.bf16.gmra.mxu0 %v11018_v7 }
 0x140   :  { %18907 = vst [vmem:[#allocation17_spill] sm:$0xff] %v11725_v10  ;;  %2790 = vmatprep.mubr.bf16.mxu0 %v11019_v8  ;;  %v11102_v8 = vld [vmem:[#allocation2 + $0x640] ss:$8 sps:$4 sm:$0xff]  }
 0x141   :  { %v2594_v11 = vpop.f32.mrf.mxu0  ;;  %3383 = vmatmul.mubr.bf16.gmra.mxu1 %v11102_v8  ;;  %v11061_v8 = vld [vmem:[#allocation2 + $0x280] ss:$8 sps:$4 sm:$0xff]  }
 0x143   :  { %v11727_v12 = vpop.f32.mrf.mxu0 }
 0x144   :  { %18908 = vst [vmem:[#allocation18_spill] sm:$0xff] %v11727_v12 }
 0x145   :  { %v2597_v15 = vpop.f32.mrf.mxu0 }
 0x147   :  { %v11729_v16 = vpop.f32.mrf.mxu0  ;;  %2791 = vmatmul.mubr.bf16.gmra.mxu0 %v11021_v13  ;;  %v11046_v13 = vld [vmem:[#allocation2 + $0x230] ss:$8 sps:$4 sm:$0xff]  }
 0x148   :  { %18909 = vst [vmem:[#allocation19_spill] sm:$0xff] %v11729_v16  ;;  %2798 = vmatprep.mubr.bf16.mxu0 %v11022_v14  ;;  %v11051_v14 = vld [vmem:[#allocation2 + $0x244] ss:$8 sps:$4 sm:$0xff]  }
 0x149   :  { %v2602_v17 = vpop.f32.mrf.mxu0 }
 0x14a   :  { %v11106_v17 = vld [vmem:[#allocation2 + $0x654] ss:$8 sps:$4 sm:$0xff]  }
 0x14b   :  { %v11731_v18 = vpop.f32.mrf.mxu0  ;;  %3390 = vmatprep.mubr.bf16.mxu1 %v11106_v17  ;;  %v11138_v17 = vld [vmem:[#allocation2 + $0x6a0] ss:$8 sps:$4 sm:$0xff]  }
 0x14c   :  { %18910 = vst [vmem:[#allocation20_spill] sm:$0xff] %v11731_v18 }
 0x14d   :  { %v2605_v21 = vpop.f32.mrf.mxu0 }
 0x14f   :  { %v11733_v22 = vpop.f32.mrf.mxu0  ;;  %2799 = vmatmul.mubr.bf16.gmra.mxu0 %v11024_v19 }
 0x150   :  { %18911 = vst [vmem:[#allocation21_spill] sm:$0xff] %v11733_v22  ;;  %2806 = vmatprep.mubr.bf16.mxu0 %v11027_v20  ;;  %v11108_v20 = vld [vmem:[#allocation2 + $0x650] ss:$8 sps:$4 sm:$0xff]  }
 0x151   :  { %v2610_v23 = vpop.f32.mrf.mxu0  ;;  %3391 = vmatmul.mubr.bf16.gmra.mxu1 %v11108_v20 }
 0x153   :  { %v11735_v24 = vpop.f32.mrf.mxu0 }
 0x154   :  { %18912 = vst [vmem:[#allocation22_spill] sm:$0xff] %v11735_v24 }
 0x155   :  { %v2613_v27 = vpop.f32.mrf.mxu0 }
 0x157   :  { %v11737_v28 = vpop.f32.mrf.mxu0  ;;  %2807 = vmatmul.mubr.bf16.gmra.mxu0 %v11025_v25  ;;  %v11049_v25 = vld [vmem:[#allocation2 + $0x240] ss:$8 sps:$4 sm:$0xff]  }
 0x158   :  { %18913 = vst [vmem:[#allocation23_spill] sm:$0xff] %v11737_v28  ;;  %2814 = vmatprep.mubr.bf16.mxu0 %v11030_v26  ;;  %v11054_v26 = vld [vmem:[#allocation2 + $0x254] ss:$8 sps:$4 sm:$0xff]  }
 0x159   :  { %v2618_v29 = vpop.f32.mrf.mxu0 }
 0x15a   :  { %v11112_v29 = vld [vmem:[#allocation2 + $0x664] ss:$8 sps:$4 sm:$0xff]  }
 0x15b   :  { %v11739_v30 = vpop.f32.mrf.mxu0  ;;  %3398 = vmatprep.mubr.bf16.mxu1 %v11112_v29  ;;  %v11142_v29 = vld [vmem:[#allocation2 + $0x6b4] ss:$8 sps:$4 sm:$0xff]  }
 0x15c   :  { %18914 = vst [vmem:[#allocation24_spill] sm:$0xff] %v11739_v30 }
 0x15d   :  { %v2621_v33 = vpop.f32.mrf.mxu0 }
 0x15f   :  { %v11741_v34 = vpop.f32.mrf.mxu0  ;;  %2815 = vmatmul.mubr.bf16.gmra.mxu0 %v11028_v31 }
 0x160   :  { %18915 = vst [vmem:[#allocation25_spill] sm:$0xff] %v11741_v34  ;;  %2822 = vmatprep.mubr.bf16.mxu0 %v11033_v32  ;;  %v11114_v32 = vld [vmem:[#allocation2 + $0x660] ss:$8 sps:$4 sm:$0xff]  }
 0x161   :  { %v2626_v35 = vpop.f32.mrf.mxu0  ;;  %3399 = vmatmul.mubr.bf16.gmra.mxu1 %v11114_v32 }
 0x163   :  { %v11743_v36 = vpop.f32.mrf.mxu0 }
 0x164   :  { %18916 = vst [vmem:[#allocation26_spill] sm:$0xff] %v11743_v36 }
 0x165   :  { %v2629_v39 = vpop.f32.mrf.mxu0 }
 0x167   :  { %v11745_v40 = vpop.f32.mrf.mxu0  ;;  %2823 = vmatmul.mubr.bf16.gmra.mxu0 %v11031_v37  ;;  %v11052_v37 = vld [vmem:[#allocation2 + $0x250] ss:$8 sps:$4 sm:$0xff]  }
 0x168   :  { %18917 = vst [vmem:[#allocation27_spill] sm:$0xff] %v11745_v40  ;;  %2830 = vmatprep.mubr.bf16.mxu0 %v11036_v38  ;;  %v11057_v38 = vld [vmem:[#allocation2 + $0x264] ss:$8 sps:$4 sm:$0xff]  }
 0x169   :  { %v2634_v41 = vpop.f32.mrf.mxu0 }
 0x16a   :  { %v11118_v41 = vld [vmem:[#allocation2 + $0x674] ss:$8 sps:$4 sm:$0xff]  }
 0x16b   :  { %v11747_v42 = vpop.f32.mrf.mxu0  ;;  %3406 = vmatprep.mubr.bf16.mxu1 %v11118_v41  ;;  %v11072_v41 = vld [vmem:[#allocation2 + $0x2b4] ss:$8 sps:$4 sm:$0xff]  }
 0x16c   :  { %18918 = vst [vmem:[#allocation28_spill] sm:$0xff] %v11747_v42 }
 0x16d   :  { %v2637_v45 = vpop.f32.mrf.mxu0 }
 0x16f   :  { %v11749_v46 = vpop.f32.mrf.mxu0  ;;  %2831 = vmatmul.mubr.bf16.gmra.mxu0 %v11034_v43 }
 0x170   :  { %18919 = vst [vmem:[#allocation29_spill] sm:$0xff] %v11749_v46  ;;  %2838 = vmatprep.mubr.bf16.mxu0 %v11039_v44  ;;  %v11120_v44 = vld [vmem:[#allocation2 + $0x670] ss:$8 sps:$4 sm:$0xff]  }
 0x171   :  { %v2642_v47 = vpop.f32.mrf.mxu0  ;;  %3407 = vmatmul.mubr.bf16.gmra.mxu1 %v11120_v44 }
 0x172   :  { %3414 = vmatprep.mubr.bf16.mxu1 %v11124_v52 }
 0x173   :  { %v11751_v48 = vpop.f32.mrf.mxu0 }
 0x174   :  { %18920 = vst [vmem:[#allocation30_spill] sm:$0xff] %v11751_v48 }
 0x175   :  { %v2645_v51 = vpop.f32.mrf.mxu0 }
 0x177   :  { %v11753_v53 = vpop.f32.mrf.mxu0  ;;  %2839 = vmatmul.mubr.bf16.gmra.mxu0 %v11037_v49  ;;  %v11055_v49 = vld [vmem:[#allocation2 + $0x260] ss:$8 sps:$4 sm:$0xff]  }
 0x178   :  { %18921 = vst [vmem:[#allocation31_spill] sm:$0xff] %v11753_v53  ;;  %2846 = vmatprep.mubr.bf16.mxu0 %v11042_v50  ;;  %v11060_v50 = vld [vmem:[#allocation2 + $0x274] ss:$8 sps:$4 sm:$0xff]  }
 0x179   :  { %v2650_v55 = vpop.f32.mrf.mxu0 }
 0x17a   :  { %v11126_v55 = vld [vmem:[#allocation2 + $0x680] ss:$8 sps:$4 sm:$0xff]  }
 0x17b   :  { %v11755_v56 = vpop.f32.mrf.mxu0  ;;  %3415 = vmatmul.mubr.bf16.gmra.mxu1 %v11126_v55  ;;  %v11070_v55 = vld [vmem:[#allocation2 + $0x2b0] ss:$8 sps:$4 sm:$0xff]  }
 0x17c   :  { %18922 = vst [vmem:[#allocation32_spill] sm:$0xff] %v11755_v56 }
 0x17d   :  { %v2653_v59 = vpop.f32.mrf.mxu0 }
 0x17e   :  { %v11058_v59 = vld [vmem:[#allocation2 + $0x270] ss:$8 sps:$4 sm:$0xff]  }
 0x17f   :  { %v11757_v61 = vpop.f32.mrf.mxu0  ;;  %2847 = vmatmul.mubr.bf16.gmra.mxu0 %v11040_v57 }
 0x180   :  { %18923 = vst [vmem:[#allocation33_spill] sm:$0xff] %v11757_v61  ;;  %2854 = vmatprep.mubr.bf16.mxu0 %v11045_v58 }
 0x181   :  { %v2658_v63 = vpop.f32.mrf.mxu0 }
 0x182   :  { %v11130_v63 = vld [vmem:[#allocation2 + $0x694] ss:$8 sps:$4 sm:$0xff]  }
 0x183   :  { %v11759_v0 = vpop.f32.mrf.mxu0  ;;  %3422 = vmatprep.mubr.bf16.mxu1 %v11130_v63  ;;  %v11156_v63 = vld [vmem:[#allocation2 + $0x6d0] ss:$8 sps:$4 sm:$0xff]  }
 0x184   :  { %18924 = vst [vmem:[#allocation34_spill] sm:$0xff] %v11759_v0 }
 0x185   :  { %v2661_v3 = vpop.f32.mrf.mxu0 }
 0x187   :  { %v11761_v7 = vpop.f32.mrf.mxu0  ;;  %2855 = vmatmul.mubr.bf16.gmra.mxu0 %v11043_v1 }
 0x188   :  { %18925 = vst [vmem:[#allocation35_spill] sm:$0xff] %v11761_v7  ;;  %2862 = vmatprep.mubr.bf16.mxu0 %v11048_v2  ;;  %v11132_v2 = vld [vmem:[#allocation2 + $0x690] ss:$8 sps:$4 sm:$0xff]  }
 0x189   :  { %v2666_v9 = vpop.f32.mrf.mxu0  ;;  %3423 = vmatmul.mubr.bf16.gmra.mxu1 %v11132_v2 }
 0x18a   :  { %v11066_v9 = vld [vmem:[#allocation2 + $0x294] ss:$8 sps:$4 sm:$0xff]  }
 0x18b   :  { %v11763_v11 = vpop.f32.mrf.mxu0 }
 0x18c   :  { %18926 = vst [vmem:[#allocation36_spill] sm:$0xff] %v11763_v11 }
 0x18d   :  { %v2669_v15 = vpop.f32.mrf.mxu0 }
 0x18f   :  { %v11765_v19 = vpop.f32.mrf.mxu0  ;;  %2863 = vmatmul.mubr.bf16.gmra.mxu0 %v11046_v13 }
 0x190   :  { %18927 = vst [vmem:[#allocation37_spill] sm:$0xff] %v11765_v19  ;;  %2870 = vmatprep.mubr.bf16.mxu0 %v11051_v14  ;;  %v11136_v14 = vld [vmem:[#allocation2 + $0x6a4] ss:$8 sps:$4 sm:$0xff]  }
 0x191   :  { %v2674_v21 = vpop.f32.mrf.mxu0  ;;  %3430 = vmatprep.mubr.bf16.mxu1 %v11136_v14  ;;  %v11160_v14 = vld [vmem:[#allocation2 + $0x6e4] ss:$8 sps:$4 sm:$0xff]  }
 0x192   :  { %3431 = vmatmul.mubr.bf16.gmra.mxu1 %v11138_v17 }
 0x193   :  { %v11767_v23 = vpop.f32.mrf.mxu0  ;;  %3438 = vmatprep.mubr.bf16.mxu1 %v11142_v29  ;;  %v11081_v29 = vld [vmem:[#allocation2 + $0x2e4] ss:$8 sps:$4 sm:$0xff]  }
 0x194   :  { %18928 = vst [vmem:[#allocation38_spill] sm:$0xff] %v11767_v23 }
 0x195   :  { %v2677_v27 = vpop.f32.mrf.mxu0 }
 0x197   :  { %v11769_v31 = vpop.f32.mrf.mxu0  ;;  %2871 = vmatmul.mubr.bf16.gmra.mxu0 %v11049_v25  ;;  %v11064_v25 = vld [vmem:[#allocation2 + $0x290] ss:$8 sps:$4 sm:$0xff]  }
 0x198   :  { %18929 = vst [vmem:[#allocation39_spill] sm:$0xff] %v11769_v31  ;;  %2878 = vmatprep.mubr.bf16.mxu0 %v11054_v26  ;;  %v11069_v26 = vld [vmem:[#allocation2 + $0x2a4] ss:$8 sps:$4 sm:$0xff]  }
 0x199   :  { %v2682_v33 = vpop.f32.mrf.mxu0 }
 0x19a   :  { %v11144_v33 = vld [vmem:[#allocation2 + $0x6b0] ss:$8 sps:$4 sm:$0xff]  }
 0x19b   :  { %v11771_v35 = vpop.f32.mrf.mxu0  ;;  %3439 = vmatmul.mubr.bf16.gmra.mxu1 %v11144_v33 }
 0x19c   :  { %18930 = vst [vmem:[#allocation40_spill] sm:$0xff] %v11771_v35 }
 0x19d   :  { %v2685_v39 = vpop.f32.mrf.mxu0 }
 0x19e   :  { %v11067_v39 = vld [vmem:[#allocation2 + $0x2a0] ss:$8 sps:$4 sm:$0xff]  }
 0x19f   :  { %v11773_v43 = vpop.f32.mrf.mxu0  ;;  %2879 = vmatmul.mubr.bf16.gmra.mxu0 %v11052_v37 }
 0x1a0   :  { %18931 = vst [vmem:[#allocation41_spill] sm:$0xff] %v11773_v43  ;;  %2886 = vmatprep.mubr.bf16.mxu0 %v11057_v38 }
 0x1a1   :  { %v2690_v45 = vpop.f32.mrf.mxu0 }
 0x1a2   :  { %v11148_v45 = vld [vmem:[#allocation2 + $0x6c4] ss:$8 sps:$4 sm:$0xff]  }
 0x1a3   :  { %v11775_v47 = vpop.f32.mrf.mxu0  ;;  %3446 = vmatprep.mubr.bf16.mxu1 %v11148_v45 }
 0x1a4   :  { %18932 = vst [vmem:[#allocation42_spill] sm:$0xff] %v11775_v47 }
 0x1a5   :  { %v2693_v51 = vpop.f32.mrf.mxu0 }
 0x1a7   :  { %v11777_v54 = vpop.f32.mrf.mxu0  ;;  %2887 = vmatmul.mubr.bf16.gmra.mxu0 %v11055_v49 }
 0x1a8   :  { %18933 = vst [vmem:[#allocation43_spill] sm:$0xff] %v11777_v54  ;;  %2894 = vmatprep.mubr.bf16.mxu0 %v11060_v50  ;;  %v11150_v50 = vld [vmem:[#allocation2 + $0x6c0] ss:$8 sps:$4 sm:$0xff]  }
 0x1a9   :  { %v2698_v57 = vpop.f32.mrf.mxu0  ;;  %3447 = vmatmul.mubr.bf16.gmra.mxu1 %v11150_v50  ;;  %v11079_v50 = vld [vmem:[#allocation2 + $0x2e0] ss:$8 sps:$4 sm:$0xff]  }
 0x1aa   :  { %v11075_v57 = vld [vmem:[#allocation2 + $0x2c4] ss:$8 sps:$4 sm:$0xff]  }
 0x1ab   :  { %v11779_v58 = vpop.f32.mrf.mxu0 }
 0x1ac   :  { %18934 = vst [vmem:[#allocation44_spill] sm:$0xff] %v11779_v58 }
 0x1ad   :  { %v2701_v62 = vpop.f32.mrf.mxu0 }
 0x1af   :  { %v11781_v1 = vpop.f32.mrf.mxu0  ;;  %2895 = vmatmul.mubr.bf16.gmra.mxu0 %v11058_v59 }
 0x1b0   :  { %18935 = vst [vmem:[#allocation45_spill] sm:$0xff] %v11781_v1  ;;  %2902 = vmatprep.mubr.bf16.mxu0 %v11063_v60  ;;  %v11154_v60 = vld [vmem:[#allocation2 + $0x6d4] ss:$8 sps:$4 sm:$0xff]  }
 0x1b1   :  { %v2706_v3 = vpop.f32.mrf.mxu0  ;;  %3454 = vmatprep.mubr.bf16.mxu1 %v11154_v60  ;;  %v11174_v60 = vld [vmem:[#allocation2 + $0x700] ss:$8 sps:$4 sm:$0xff]  }
 0x1b2   :  { %3455 = vmatmul.mubr.bf16.gmra.mxu1 %v11156_v63 }
 0x1b3   :  { %v11783_v5 = vpop.f32.mrf.mxu0  ;;  %3462 = vmatprep.mubr.bf16.mxu1 %v11160_v14  ;;  %v11178_v14 = vld [vmem:[#allocation2 + $0x714] ss:$8 sps:$4 sm:$0xff]  }
 0x1b4   :  { %18936 = vst [vmem:[#allocation46_spill] sm:$0xff] %v11783_v5 }
 0x1b5   :  { %v2709_v13 = vpop.f32.mrf.mxu0 }
 0x1b7   :  { %v11785_v15 = vpop.f32.mrf.mxu0  ;;  %2903 = vmatmul.mubr.bf16.gmra.mxu0 %v11061_v8  ;;  %v11073_v8 = vld [vmem:[#allocation2 + $0x2c0] ss:$8 sps:$4 sm:$0xff]  }
 0x1b8   :  { %18937 = vst [vmem:[#allocation47_spill] sm:$0xff] %v11785_v15  ;;  %2910 = vmatprep.mubr.bf16.mxu0 %v11066_v9  ;;  %v11078_v9 = vld [vmem:[#allocation2 + $0x2d4] ss:$8 sps:$4 sm:$0xff]  }
 0x1b9   :  { %v2714_v20 = vpop.f32.mrf.mxu0 }
 0x1ba   :  { %v11162_v20 = vld [vmem:[#allocation2 + $0x6e0] ss:$8 sps:$4 sm:$0xff]  }
 0x1bb   :  { %v11787_v21 = vpop.f32.mrf.mxu0  ;;  %3463 = vmatmul.mubr.bf16.gmra.mxu1 %v11162_v20 }
 0x1bc   :  { %18938 = vst [vmem:[#allocation48_spill] sm:$0xff] %v11787_v21 }
 0x1bd   :  { %v2717_v27 = vpop.f32.mrf.mxu0 }
 0x1be   :  { %v11076_v27 = vld [vmem:[#allocation2 + $0x2d0] ss:$8 sps:$4 sm:$0xff]  }
 0x1bf   :  { %v11789_v32 = vpop.f32.mrf.mxu0  ;;  %2911 = vmatmul.mubr.bf16.gmra.mxu0 %v11064_v25 }
 0x1c0   :  { %18939 = vst [vmem:[#allocation49_spill] sm:$0xff] %v11789_v32  ;;  %2918 = vmatprep.mubr.bf16.mxu0 %v11069_v26 }
 0x1c1   :  { %v2722_v37 = vpop.f32.mrf.mxu0 }
 0x1c2   :  { %v11166_v37 = vld [vmem:[#allocation2 + $0x6f4] ss:$8 sps:$4 sm:$0xff]  }
 0x1c3   :  { %v11791_v38 = vpop.f32.mrf.mxu0  ;;  %3470 = vmatprep.mubr.bf16.mxu1 %v11166_v37  ;;  %v11093_v37 = vld [vmem:[#allocation2 + $0x314] ss:$8 sps:$4 sm:$0xff]  }
 0x1c4   :  { %18940 = vst [vmem:[#allocation50_spill] sm:$0xff] %v11791_v38 }
 0x1c5   :  { %v2725_v44 = vpop.f32.mrf.mxu0 }
 0x1c7   :  { %v11793_v49 = vpop.f32.mrf.mxu0  ;;  %2919 = vmatmul.mubr.bf16.gmra.mxu0 %v11067_v39 }
 0x1c8   :  { %18941 = vst [vmem:[#allocation51_spill] sm:$0xff] %v11793_v49  ;;  %2926 = vmatprep.mubr.bf16.mxu0 %v11072_v41  ;;  %v11168_v41 = vld [vmem:[#allocation2 + $0x6f0] ss:$8 sps:$4 sm:$0xff]  }
 0x1c9   :  { %v2730_v51 = vpop.f32.mrf.mxu0  ;;  %3471 = vmatmul.mubr.bf16.gmra.mxu1 %v11168_v41 }
 0x1ca   :  { %v11084_v51 = vld [vmem:[#allocation2 + $0x2f4] ss:$8 sps:$4 sm:$0xff]  }
 0x1cb   :  { %v11795_v52 = vpop.f32.mrf.mxu0 }
 0x1cc   :  { %18942 = vst [vmem:[#allocation52_spill] sm:$0xff] %v11795_v52 }
 0x1cd   :  { %v2733_v59 = vpop.f32.mrf.mxu0 }
 0x1cf   :  { %v11797_v62 = vpop.f32.mrf.mxu0  ;;  %2927 = vmatmul.mubr.bf16.gmra.mxu0 %v11070_v55 }
 0x1d0   :  { %18943 = vst [vmem:[#allocation53_spill] sm:$0xff] %v11797_v62  ;;  %2934 = vmatprep.mubr.bf16.mxu0 %v11075_v57  ;;  %v11172_v57 = vld [vmem:[#allocation2 + $0x704] ss:$8 sps:$4 sm:$0xff]  }
 0x1d1   :  { %v2738_v2 = vpop.f32.mrf.mxu0  ;;  %3478 = vmatprep.mubr.bf16.mxu1 %v11172_v57 }
 0x1d2   :  { %3479 = vmatmul.mubr.bf16.gmra.mxu1 %v11174_v60  ;;  %v11091_v60 = vld [vmem:[#allocation2 + $0x310] ss:$8 sps:$4 sm:$0xff]  }
 0x1d3   :  { %v11799_v3 = vpop.f32.mrf.mxu0  ;;  %3486 = vmatprep.mubr.bf16.mxu1 %v11178_v14  ;;  %v11192_v14 = vld [vmem:[#allocation2 + $0x730] ss:$8 sps:$4 sm:$0xff]  }
 0x1d4   :  { %18944 = vst [vmem:[#allocation54_spill] sm:$0xff] %v11799_v3 }
 0x1d5   :  { %v2741_v13 = vpop.f32.mrf.mxu0 }
 0x1d7   :  { %v11801_v17 = vpop.f32.mrf.mxu0  ;;  %2935 = vmatmul.mubr.bf16.gmra.mxu0 %v11073_v8  ;;  %v11082_v8 = vld [vmem:[#allocation2 + $0x2f0] ss:$8 sps:$4 sm:$0xff]  }
 0x1d8   :  { %18945 = vst [vmem:[#allocation55_spill] sm:$0xff] %v11801_v17  ;;  %2942 = vmatprep.mubr.bf16.mxu0 %v11078_v9  ;;  %v11087_v9 = vld [vmem:[#allocation2 + $0x304] ss:$8 sps:$4 sm:$0xff]  }
 0x1d9   :  { %v2746_v25 = vpop.f32.mrf.mxu0 }
 0x1da   :  { %v11180_v25 = vld [vmem:[#allocation2 + $0x710] ss:$8 sps:$4 sm:$0xff]  }
 0x1db   :  { %v11803_v26 = vpop.f32.mrf.mxu0  ;;  %3487 = vmatmul.mubr.bf16.gmra.mxu1 %v11180_v25 }
 0x1dc   :  { %18946 = vst [vmem:[#allocation56_spill] sm:$0xff] %v11803_v26 }
 0x1dd   :  { %v2749_v33 = vpop.f32.mrf.mxu0 }
 0x1de   :  { %v11085_v33 = vld [vmem:[#allocation2 + $0x300] ss:$8 sps:$4 sm:$0xff]  }
 0x1df   :  { %v11805_v39 = vpop.f32.mrf.mxu0  ;;  %2943 = vmatmul.mubr.bf16.gmra.mxu0 %v11076_v27 }
 0x1e0   :  { %18947 = vst [vmem:[#allocation57_spill] sm:$0xff] %v11805_v39  ;;  %2950 = vmatprep.mubr.bf16.mxu0 %v11081_v29 }
 0x1e1   :  { %v2754_v44 = vpop.f32.mrf.mxu0 }
 0x1e2   :  { %v11184_v44 = vld [vmem:[#allocation2 + $0x724] ss:$8 sps:$4 sm:$0xff]  }
 0x1e3   :  { %v11807_v45 = vpop.f32.mrf.mxu0  ;;  %3494 = vmatprep.mubr.bf16.mxu1 %v11184_v44  ;;  %v11196_v44 = vld [vmem:[#allocation2 + $0x744] ss:$8 sps:$4 sm:$0xff]  }
 0x1e4   :  { %18948 = vst [vmem:[#allocation58_spill] sm:$0xff] %v11807_v45 }
 0x1e5   :  { %v2757_v55 = vpop.f32.mrf.mxu0 }
 0x1e7   :  { %v11809_v59 = vpop.f32.mrf.mxu0  ;;  %2951 = vmatmul.mubr.bf16.gmra.mxu0 %v11079_v50 }
 0x1e8   :  { %18949 = vst [vmem:[#allocation59_spill] sm:$0xff] %v11809_v59  ;;  %2958 = vmatprep.mubr.bf16.mxu0 %v11084_v51  ;;  %v11186_v51 = vld [vmem:[#allocation2 + $0x720] ss:$8 sps:$4 sm:$0xff]  }
 0x1e9   :  { %v2762_v63 = vpop.f32.mrf.mxu0  ;;  %3495 = vmatmul.mubr.bf16.gmra.mxu1 %v11186_v51 }
 0x1ea   :  { %v11099_v63 = vld [vmem:[#allocation2 + $0x324] ss:$8 sps:$4 sm:$0xff]  }
 0x1eb   :  { %v11811_v2 = vpop.f32.mrf.mxu0 }
 0x1ec   :  { %18950 = vst [vmem:[#allocation60_spill] sm:$0xff] %v11811_v2 }
 0x1ed   :  { %v2765_v13 = vpop.f32.mrf.mxu0 }
 0x1ef   :  { %v11813_v20 = vpop.f32.mrf.mxu0  ;;  %2959 = vmatmul.mubr.bf16.gmra.mxu0 %v11082_v8 }
 0x1f0   :  { %18951 = vst [vmem:[#allocation61_spill] sm:$0xff] %v11813_v20  ;;  %2966 = vmatprep.mubr.bf16.mxu0 %v11087_v9  ;;  %v11190_v9 = vld [vmem:[#allocation2 + $0x734] ss:$8 sps:$4 sm:$0xff]  }
 0x1f1   :  { %v2770_v27 = vpop.f32.mrf.mxu0  ;;  %3502 = vmatprep.mubr.bf16.mxu1 %v11190_v9  ;;  %v11111_v9 = vld [vmem:[#allocation2 + $0x344] ss:$8 sps:$4 sm:$0xff]  }
 0x1f2   :  { %3503 = vmatmul.mubr.bf16.gmra.mxu1 %v11192_v14  ;;  %v11202_v14 = vld [vmem:[#allocation2 + $0x754] ss:$8 sps:$4 sm:$0xff]  }
 0x1f3   :  { %v11815_v29 = vpop.f32.mrf.mxu0  ;;  %3510 = vmatprep.mubr.bf16.mxu1 %v11196_v44  ;;  %v11117_v44 = vld [vmem:[#allocation2 + $0x354] ss:$8 sps:$4 sm:$0xff]  }
 0x1f4   :  { %18952 = vst [vmem:[#allocation62_spill] sm:$0xff] %v11815_v29 }
 0x1f5   :  { %v2773_v41 = vpop.f32.mrf.mxu0 }
 0x1f7   :  { %v11817_v50 = vpop.f32.mrf.mxu0  ;;  %2967 = vmatmul.mubr.bf16.gmra.mxu0 %v11085_v33  ;;  %v11097_v33 = vld [vmem:[#allocation2 + $0x320] ss:$8 sps:$4 sm:$0xff]  }
 0x1f8   :  { %18953 = vst [vmem:[#allocation63_spill] sm:$0xff] %v11817_v50  ;;  %2974 = vmatprep.mubr.bf16.mxu0 %v11093_v37  ;;  %v11105_v37 = vld [vmem:[#allocation2 + $0x334] ss:$8 sps:$4 sm:$0xff]  }
 0x1f9   :  { %v2778_v55 = vpop.f32.mrf.mxu0 }
 0x1fa   :  { %v11198_v55 = vld [vmem:[#allocation2 + $0x740] ss:$8 sps:$4 sm:$0xff]  }
 0x1fb   :  { %v11819_v57 = vpop.f32.mrf.mxu0  ;;  %3511 = vmatmul.mubr.bf16.gmra.mxu1 %v11198_v55  ;;  %v11208_v55 = vld [vmem:[#allocation2 + $0x764] ss:$8 sps:$4 sm:$0xff]  }
 0x1fc   :  { %18954 = vst [vmem:[#allocation64_spill] sm:$0xff] %v11819_v57  ;;  %3518 = vmatprep.mubr.bf16.mxu1 %v11202_v14  ;;  %v11123_v14 = vld [vmem:[#allocation2 + $0x364] ss:$8 sps:$4 sm:$0xff]  }
 0x1fd   :  { %v2781_v8 = vpop.f32.mrf.mxu0 }
 0x1ff   :  { %v11821_v13 = vpop.f32.mrf.mxu0  ;;  %2975 = vmatmul.mubr.bf16.gmra.mxu0 %v11091_v60 }
 0x200   :  { %18955 = vst [vmem:[#allocation65_spill] sm:$0xff] %v11821_v13  ;;  %2982 = vmatprep.mubr.bf16.mxu0 %v11099_v63  ;;  %v11103_v63 = vld [vmem:[#allocation2 + $0x330] ss:$8 sps:$4 sm:$0xff]  }
 0x201   :  { %v2786_v25 = vpop.f32.mrf.mxu0 }
 0x203   :  { %v11823_v27 = vpop.f32.mrf.mxu0 }
 0x204   :  { %18956 = vst [vmem:[#allocation66_spill] sm:$0xff] %v11823_v27  ;;  %v11204_v27 = vld [vmem:[#allocation2 + $0x750] ss:$8 sps:$4 sm:$0xff]  }
 0x205   :  { %v2789_v41 = vpop.f32.mrf.mxu0  ;;  %3519 = vmatmul.mubr.bf16.gmra.mxu1 %v11204_v27  ;;  %v11214_v27 = vld [vmem:[#allocation2 + $0x774] ss:$8 sps:$4 sm:$0xff]  }
 0x206   :  { %3526 = vmatprep.mubr.bf16.mxu1 %v11208_v55  ;;  %v11129_v55 = vld [vmem:[#allocation2 + $0x374] ss:$8 sps:$4 sm:$0xff]  }
 0x207   :  { %v11825_v51 = vpop.f32.mrf.mxu0  ;;  %2983 = vmatmul.mubr.bf16.gmra.mxu0 %v11097_v33 }
 0x208   :  { %18957 = vst [vmem:[#allocation67_spill] sm:$0xff] %v11825_v51  ;;  %2990 = vmatprep.mubr.bf16.mxu0 %v11105_v37  ;;  %v11109_v37 = vld [vmem:[#allocation2 + $0x340] ss:$8 sps:$4 sm:$0xff]  }
 0x209   :  { %v2794_v8 = vpop.f32.mrf.mxu0 }
 0x20b   :  { %v11827_v60 = vpop.f32.mrf.mxu0 }
 0x20c   :  { %18958 = vst [vmem:[#allocation68_spill] sm:$0xff] %v11827_v60  ;;  %v11210_v60 = vld [vmem:[#allocation2 + $0x760] ss:$8 sps:$4 sm:$0xff]  }
 0x20d   :  { %v2797_v25 = vpop.f32.mrf.mxu0  ;;  %3527 = vmatmul.mubr.bf16.gmra.mxu1 %v11210_v60  ;;  %v11220_v60 = vld [vmem:[#allocation2 + $0x784] ss:$8 sps:$4 sm:$0xff]  }
 0x20e   :  { %3534 = vmatprep.mubr.bf16.mxu1 %v11214_v27  ;;  %v11135_v27 = vld [vmem:[#allocation2 + $0x384] ss:$8 sps:$4 sm:$0xff]  }
 0x20f   :  { %v11829_v13 = vpop.f32.mrf.mxu0  ;;  %2991 = vmatmul.mubr.bf16.gmra.mxu0 %v11103_v63 }
 0x210   :  { %18959 = vst [vmem:[#allocation69_spill] sm:$0xff] %v11829_v13  ;;  %2998 = vmatprep.mubr.bf16.mxu0 %v11111_v9  ;;  %v11115_v9 = vld [vmem:[#allocation2 + $0x350] ss:$8 sps:$4 sm:$0xff]  }
 0x211   :  { %v2802_v41 = vpop.f32.mrf.mxu0 }
 0x213   :  { %v11831_v33 = vpop.f32.mrf.mxu0 }
 0x214   :  { %18960 = vst [vmem:[#allocation70_spill] sm:$0xff] %v11831_v33  ;;  %v11216_v33 = vld [vmem:[#allocation2 + $0x770] ss:$8 sps:$4 sm:$0xff]  }
 0x215   :  { %v2805_v8 = vpop.f32.mrf.mxu0  ;;  %3535 = vmatmul.mubr.bf16.gmra.mxu1 %v11216_v33  ;;  %v11226_v33 = vld [vmem:[#allocation2 + $0x794] ss:$8 sps:$4 sm:$0xff]  }
 0x216   :  { %3542 = vmatprep.mubr.bf16.mxu1 %v11220_v60  ;;  %v11141_v60 = vld [vmem:[#allocation2 + $0x394] ss:$8 sps:$4 sm:$0xff]  }
 0x217   :  { %v11833_v51 = vpop.f32.mrf.mxu0  ;;  %2999 = vmatmul.mubr.bf16.gmra.mxu0 %v11109_v37 }
 0x218   :  { %18961 = vst [vmem:[#allocation71_spill] sm:$0xff] %v11833_v51  ;;  %3006 = vmatprep.mubr.bf16.mxu0 %v11117_v44  ;;  %v11121_v44 = vld [vmem:[#allocation2 + $0x360] ss:$8 sps:$4 sm:$0xff]  }
 0x219   :  { %v2810_v25 = vpop.f32.mrf.mxu0 }
 0x21b   :  { %v11835_v63 = vpop.f32.mrf.mxu0 }
 0x21c   :  { %18962 = vst [vmem:[#allocation72_spill] sm:$0xff] %v11835_v63  ;;  %v11222_v63 = vld [vmem:[#allocation2 + $0x780] ss:$8 sps:$4 sm:$0xff]  }
 0x21d   :  { %v2813_v41 = vpop.f32.mrf.mxu0  ;;  %3543 = vmatmul.mubr.bf16.gmra.mxu1 %v11222_v63  ;;  %v11232_v63 = vld [vmem:[#allocation2 + $0x7a4] ss:$8 sps:$4 sm:$0xff]  }
 0x21e   :  { %3550 = vmatprep.mubr.bf16.mxu1 %v11226_v33  ;;  %v11147_v33 = vld [vmem:[#allocation2 + $0x3a4] ss:$8 sps:$4 sm:$0xff]  }
 0x21f   :  { %v11837_v13 = vpop.f32.mrf.mxu0  ;;  %3007 = vmatmul.mubr.bf16.gmra.mxu0 %v11115_v9 }
 0x220   :  { %18963 = vst [vmem:[#allocation73_spill] sm:$0xff] %v11837_v13  ;;  %3014 = vmatprep.mubr.bf16.mxu0 %v11123_v14  ;;  %v11127_v14 = vld [vmem:[#allocation2 + $0x370] ss:$8 sps:$4 sm:$0xff]  }
 0x221   :  { %v2818_v8 = vpop.f32.mrf.mxu0 }
 0x223   :  { %v11839_v37 = vpop.f32.mrf.mxu0 }
 0x224   :  { %18964 = vst [vmem:[#allocation74_spill] sm:$0xff] %v11839_v37  ;;  %v11228_v37 = vld [vmem:[#allocation2 + $0x790] ss:$8 sps:$4 sm:$0xff]  }
 0x225   :  { %v2821_v25 = vpop.f32.mrf.mxu0  ;;  %3551 = vmatmul.mubr.bf16.gmra.mxu1 %v11228_v37 }
 0x226   :  { %3558 = vmatprep.mubr.bf16.mxu1 %v11232_v63 }
 0x227   :  { %v11841_v51 = vpop.f32.mrf.mxu0  ;;  %3015 = vmatmul.mubr.bf16.gmra.mxu0 %v11121_v44 }
 0x228   :  { %18965 = vst [vmem:[#allocation75_spill] sm:$0xff] %v11841_v51  ;;  %3022 = vmatprep.mubr.bf16.mxu0 %v11129_v55  ;;  %v11133_v55 = vld [vmem:[#allocation2 + $0x380] ss:$8 sps:$4 sm:$0xff]  }
 0x229   :  { %v2826_v41 = vpop.f32.mrf.mxu0 }
 0x22b   :  { %v11843_v9 = vpop.f32.mrf.mxu0 }
 0x22c   :  { %18966 = vst [vmem:[#allocation76_spill] sm:$0xff] %v11843_v9  ;;  %v11234_v9 = vld [vmem:[#allocation2 + $0x7a0] ss:$8 sps:$4 sm:$0xff]  }
 0x22d   :  { %v2829_v8 = vpop.f32.mrf.mxu0  ;;  %3559 = vmatmul.mubr.bf16.gmra.mxu1 %v11234_v9 }
 0x22f   :  { %v11845_v13 = vpop.f32.mrf.mxu0  ;;  %3023 = vmatmul.mubr.bf16.gmra.mxu0 %v11127_v14 }
 0x230   :  { %18967 = vst [vmem:[#allocation77_spill] sm:$0xff] %v11845_v13  ;;  %3030 = vmatprep.mubr.bf16.mxu0 %v11135_v27  ;;  %v11851_v13 = vpop.f32.mrf.mxu1  ;;  %v11139_v27 = vld [vmem:[#allocation2 + $0x390] ss:$8 sps:$4 sm:$0xff]  }
 0x231   :  { %v2834_v25 = vpop.f32.mrf.mxu0  ;;  %18970 = vst [vmem:[#allocation80_spill] sm:$0xff] %v11851_v13  ;;  %v11153_v13 = vld [vmem:[#allocation2 + $0x3b4] ss:$8 sps:$4 sm:$0xff]  }
 0x232   :  { %v3370_v37 = vpop.f32.mrf.mxu1 }
 0x233   :  { %v11847_v44 = vpop.f32.mrf.mxu0 }
 0x234   :  { %18968 = vst [vmem:[#allocation78_spill] sm:$0xff] %v11847_v44  ;;  %v11855_v44 = vpop.f32.mrf.mxu1 }
 0x235   :  { %v2837_v41 = vpop.f32.mrf.mxu0  ;;  %18972 = vst [vmem:[#allocation82_spill] sm:$0xff] %v11855_v44  ;;  %v11244_v44 = vld [vmem:[#allocation2 + $0x7c4] ss:$8 sps:$4 sm:$0xff]  }
 0x236   :  { %v11238_v41 = vld [vmem:[#allocation2 + $0x7b4] ss:$8 sps:$4 sm:$0xff]  }
 0x237   :  { %v11849_v51 = vpop.f32.mrf.mxu0  ;;  %3031 = vmatmul.mubr.bf16.gmra.mxu0 %v11133_v55  ;;  %v3373_v55 = vpop.f32.mrf.mxu1  ;;  %3566 = vmatprep.mubr.bf16.mxu1 %v11238_v41 }
 0x238   :  { %18969 = vst [vmem:[#allocation79_spill] sm:$0xff] %v11849_v51  ;;  %3038 = vmatprep.mubr.bf16.mxu0 %v11141_v60  ;;  %v11240_v51 = vld [vmem:[#allocation2 + $0x7b0] ss:$8 sps:$4 sm:$0xff]   ;;  %v11246_v55 = vld [vmem:[#allocation2 + $0x7c0] ss:$8 sps:$4 sm:$0xff]  }
 0x239   :  { %v2842_v8 = vpop.f32.mrf.mxu0  ;;  %v11859_v63 = vpop.f32.mrf.mxu1  ;;  %3567 = vmatmul.mubr.bf16.gmra.mxu1 %v11240_v51 }
 0x23a   :  { %18974 = vst [vmem:[#allocation84_spill] sm:$0xff] %v11859_v63  ;;  %v11145_v8 = vld [vmem:[#allocation2 + $0x3a0] ss:$8 sps:$4 sm:$0xff]   ;;  %3574 = vmatprep.mubr.bf16.mxu1 %v11244_v44  ;;  %v11159_v63 = vld [vmem:[#allocation2 + $0x3c4] ss:$8 sps:$4 sm:$0xff]  }
 0x23b   :  { %v11853_v14 = vpop.f32.mrf.mxu0  ;;  %v3378_v37 = vpop.f32.mrf.mxu1 }
 0x23c   :  { %18971 = vst [vmem:[#allocation81_spill] sm:$0xff] %v11853_v14 }
 0x23d   :  { %v2845_v25 = vpop.f32.mrf.mxu0  ;;  %v11863_v14 = vpop.f32.mrf.mxu1 }
 0x23e   :  { %18976 = vst [vmem:[#allocation86_spill] sm:$0xff] %v11863_v14  ;;  %v11250_v14 = vld [vmem:[#allocation2 + $0x7d4] ss:$8 sps:$4 sm:$0xff]  }
 0x23f   :  { %v11857_v57 = vpop.f32.mrf.mxu0  ;;  %3039 = vmatmul.mubr.bf16.gmra.mxu0 %v11139_v27  ;;  %v3381_v27 = vpop.f32.mrf.mxu1 }
 0x240   :  { %18973 = vst [vmem:[#allocation83_spill] sm:$0xff] %v11857_v57  ;;  %3046 = vmatprep.mubr.bf16.mxu0 %v11147_v33  ;;  %v11252_v27 = vld [vmem:[#allocation2 + $0x7d0] ss:$8 sps:$4 sm:$0xff]  }
 0x241   :  { %v2850_v60 = vpop.f32.mrf.mxu0  ;;  %v11867_v41 = vpop.f32.mrf.mxu1  ;;  %3575 = vmatmul.mubr.bf16.gmra.mxu1 %v11246_v55 }
 0x242   :  { %18978 = vst [vmem:[#allocation88_spill] sm:$0xff] %v11867_v41  ;;  %v11151_v60 = vld [vmem:[#allocation2 + $0x3b0] ss:$8 sps:$4 sm:$0xff]   ;;  %3582 = vmatprep.mubr.bf16.mxu1 %v11250_v14  ;;  %v11165_v41 = vld [vmem:[#allocation2 + $0x3d4] ss:$8 sps:$4 sm:$0xff]  }
 0x243   :  { %v11861_v9 = vpop.f32.mrf.mxu0  ;;  %v3386_v37 = vpop.f32.mrf.mxu1 }
 0x244   :  { %18975 = vst [vmem:[#allocation85_spill] sm:$0xff] %v11861_v9 }
 0x245   :  { %v2853_v25 = vpop.f32.mrf.mxu0  ;;  %v11871_v9 = vpop.f32.mrf.mxu1 }
 0x246   :  { %18980 = vst [vmem:[#allocation90_spill] sm:$0xff] %v11871_v9  ;;  %v11258_v9 = vld [vmem:[#allocation2 + $0x7e4] ss:$8 sps:$4 sm:$0xff]  }
 0x247   :  { %v11865_v50 = vpop.f32.mrf.mxu0  ;;  %3047 = vmatmul.mubr.bf16.gmra.mxu0 %v11145_v8  ;;  %v3389_v8 = vpop.f32.mrf.mxu1 }
 0x248   :  { %18977 = vst [vmem:[#allocation87_spill] sm:$0xff] %v11865_v50  ;;  %3054 = vmatprep.mubr.bf16.mxu0 %v11153_v13  ;;  %v11256_v8 = vld [vmem:[#allocation2 + $0x7e0] ss:$8 sps:$4 sm:$0xff]  }
 0x249   :  { %v2858_v33 = vpop.f32.mrf.mxu0  ;;  %v11875_v44 = vpop.f32.mrf.mxu1  ;;  %3583 = vmatmul.mubr.bf16.gmra.mxu1 %v11252_v27 }
 0x24a   :  { %18982 = vst [vmem:[#allocation92_spill] sm:$0xff] %v11875_v44  ;;  %v11157_v33 = vld [vmem:[#allocation2 + $0x3c0] ss:$8 sps:$4 sm:$0xff]   ;;  %3590 = vmatprep.mubr.bf16.mxu1 %v11258_v9  ;;  %v11171_v44 = vld [vmem:[#allocation2 + $0x3e4] ss:$8 sps:$4 sm:$0xff]  }
 0x24b   :  { %v11869_v51 = vpop.f32.mrf.mxu0  ;;  %v3394_v37 = vpop.f32.mrf.mxu1 }
 0x24c   :  { %18979 = vst [vmem:[#allocation89_spill] sm:$0xff] %v11869_v51 }
 0x24d   :  { %v2861_v25 = vpop.f32.mrf.mxu0  ;;  %v11879_v51 = vpop.f32.mrf.mxu1 }
 0x24e   :  { %18984 = vst [vmem:[#allocation94_spill] sm:$0xff] %v11879_v51  ;;  %v11264_v51 = vld [vmem:[#allocation2 + $0x7f4] ss:$8 sps:$4 sm:$0xff]  }
 0x24f   :  { %v11873_v57 = vpop.f32.mrf.mxu0  ;;  %3055 = vmatmul.mubr.bf16.gmra.mxu0 %v11151_v60  ;;  %v3397_v60 = vpop.f32.mrf.mxu1 }
 0x250   :  { %18981 = vst [vmem:[#allocation91_spill] sm:$0xff] %v11873_v57  ;;  %3062 = vmatprep.mubr.bf16.mxu0 %v11159_v63  ;;  %v11262_v60 = vld [vmem:[#allocation2 + $0x7f0] ss:$8 sps:$4 sm:$0xff]  }
 0x251   :  { %v2866_v13 = vpop.f32.mrf.mxu0  ;;  %v11883_v63 = vpop.f32.mrf.mxu1  ;;  %3591 = vmatmul.mubr.bf16.gmra.mxu1 %v11256_v8 }
 0x252   :  { %18986 = vst [vmem:[#allocation96_spill] sm:$0xff] %v11883_v63  ;;  %v11163_v13 = vld [vmem:[#allocation2 + $0x3d0] ss:$8 sps:$4 sm:$0xff]   ;;  %3598 = vmatprep.mubr.bf16.mxu1 %v11264_v51  ;;  %v11177_v63 = vld [vmem:[#allocation2 + $0x3f4] ss:$8 sps:$4 sm:$0xff]  }
 0x253   :  { %v11877_v55 = vpop.f32.mrf.mxu0  ;;  %v3402_v37 = vpop.f32.mrf.mxu1 }
 0x254   :  { %18983 = vst [vmem:[#allocation93_spill] sm:$0xff] %v11877_v55 }
 0x255   :  { %v2869_v25 = vpop.f32.mrf.mxu0  ;;  %v11887_v55 = vpop.f32.mrf.mxu1 }
 0x256   :  { %18988 = vst [vmem:[#allocation98_spill] sm:$0xff] %v11887_v55  ;;  %v11270_v55 = vld [vmem:[#allocation2 + $0x804] ss:$8 sps:$4 sm:$0xff]  }
 0x257   :  { %v11881_v50 = vpop.f32.mrf.mxu0  ;;  %3063 = vmatmul.mubr.bf16.gmra.mxu0 %v11157_v33  ;;  %v3405_v33 = vpop.f32.mrf.mxu1 }
 0x258   :  { %18985 = vst [vmem:[#allocation95_spill] sm:$0xff] %v11881_v50  ;;  %3070 = vmatprep.mubr.bf16.mxu0 %v11165_v41  ;;  %v11268_v33 = vld [vmem:[#allocation2 + $0x800] ss:$8 sps:$4 sm:$0xff]  }
 0x259   :  { %v2874_v14 = vpop.f32.mrf.mxu0  ;;  %v11891_v41 = vpop.f32.mrf.mxu1  ;;  %3599 = vmatmul.mubr.bf16.gmra.mxu1 %v11262_v60 }
 0x25a   :  { %18990 = vst [vmem:[#allocation100_spill] sm:$0xff] %v11891_v41  ;;  %v11169_v14 = vld [vmem:[#allocation2 + $0x3e0] ss:$8 sps:$4 sm:$0xff]   ;;  %3606 = vmatprep.mubr.bf16.mxu1 %v11270_v55  ;;  %v11183_v41 = vld [vmem:[#allocation2 + $0x404] ss:$8 sps:$4 sm:$0xff]  }
 0x25b   :  { %v11885_v27 = vpop.f32.mrf.mxu0  ;;  %v3410_v37 = vpop.f32.mrf.mxu1 }
 0x25c   :  { %18987 = vst [vmem:[#allocation97_spill] sm:$0xff] %v11885_v27 }
 0x25d   :  { %v2877_v25 = vpop.f32.mrf.mxu0  ;;  %v11895_v27 = vpop.f32.mrf.mxu1 }
 0x25e   :  { %18992 = vst [vmem:[#allocation102_spill] sm:$0xff] %v11895_v27  ;;  %v11276_v27 = vld [vmem:[#allocation2 + $0x814] ss:$8 sps:$4 sm:$0xff]  }
 0x25f   :  { %v11889_v57 = vpop.f32.mrf.mxu0  ;;  %3071 = vmatmul.mubr.bf16.gmra.mxu0 %v11163_v13  ;;  %v3413_v13 = vpop.f32.mrf.mxu1 }
 0x260   :  { %18989 = vst [vmem:[#allocation99_spill] sm:$0xff] %v11889_v57  ;;  %3078 = vmatprep.mubr.bf16.mxu0 %v11171_v44  ;;  %v11274_v13 = vld [vmem:[#allocation2 + $0x810] ss:$8 sps:$4 sm:$0xff]  }
 0x261   :  { %v2882_v9 = vpop.f32.mrf.mxu0  ;;  %v11899_v44 = vpop.f32.mrf.mxu1  ;;  %3607 = vmatmul.mubr.bf16.gmra.mxu1 %v11268_v33 }
 0x262   :  { %18994 = vst [vmem:[#allocation104_spill] sm:$0xff] %v11899_v44  ;;  %v11175_v9 = vld [vmem:[#allocation2 + $0x3f0] ss:$8 sps:$4 sm:$0xff]   ;;  %3614 = vmatprep.mubr.bf16.mxu1 %v11276_v27  ;;  %v11189_v44 = vld [vmem:[#allocation2 + $0x414] ss:$8 sps:$4 sm:$0xff]  }
 0x263   :  { %v11893_v8 = vpop.f32.mrf.mxu0  ;;  %v3418_v37 = vpop.f32.mrf.mxu1 }
 0x264   :  { %18991 = vst [vmem:[#allocation101_spill] sm:$0xff] %v11893_v8 }
 0x265   :  { %v2885_v25 = vpop.f32.mrf.mxu0  ;;  %v11903_v8 = vpop.f32.mrf.mxu1 }
 0x266   :  { %18996 = vst [vmem:[#allocation106_spill] sm:$0xff] %v11903_v8  ;;  %v11282_v8 = vld [vmem:[#allocation2 + $0x824] ss:$8 sps:$4 sm:$0xff]  }
 0x267   :  { %v11897_v50 = vpop.f32.mrf.mxu0  ;;  %3079 = vmatmul.mubr.bf16.gmra.mxu0 %v11169_v14  ;;  %v3421_v14 = vpop.f32.mrf.mxu1 }
 0x268   :  { %18993 = vst [vmem:[#allocation103_spill] sm:$0xff] %v11897_v50  ;;  %3086 = vmatprep.mubr.bf16.mxu0 %v11177_v63  ;;  %v11280_v14 = vld [vmem:[#allocation2 + $0x820] ss:$8 sps:$4 sm:$0xff]  }
 0x269   :  { %v2890_v51 = vpop.f32.mrf.mxu0  ;;  %v11907_v63 = vpop.f32.mrf.mxu1  ;;  %3615 = vmatmul.mubr.bf16.gmra.mxu1 %v11274_v13 }
 0x26a   :  { %18998 = vst [vmem:[#allocation108_spill] sm:$0xff] %v11907_v63  ;;  %v11181_v51 = vld [vmem:[#allocation2 + $0x400] ss:$8 sps:$4 sm:$0xff]   ;;  %3622 = vmatprep.mubr.bf16.mxu1 %v11282_v8  ;;  %v11195_v63 = vld [vmem:[#allocation2 + $0x424] ss:$8 sps:$4 sm:$0xff]  }
 0x26b   :  { %v11901_v60 = vpop.f32.mrf.mxu0  ;;  %v3426_v37 = vpop.f32.mrf.mxu1 }
 0x26c   :  { %18995 = vst [vmem:[#allocation105_spill] sm:$0xff] %v11901_v60 }
 0x26d   :  { %v2893_v25 = vpop.f32.mrf.mxu0  ;;  %v11911_v60 = vpop.f32.mrf.mxu1 }
 0x26e   :  { %19000 = vst [vmem:[#allocation110_spill] sm:$0xff] %v11911_v60  ;;  %v11288_v60 = vld [vmem:[#allocation2 + $0x834] ss:$8 sps:$4 sm:$0xff]  }
 0x26f   :  { %v11905_v57 = vpop.f32.mrf.mxu0  ;;  %3087 = vmatmul.mubr.bf16.gmra.mxu0 %v11175_v9  ;;  %v3429_v9 = vpop.f32.mrf.mxu1 }
 0x270   :  { %18997 = vst [vmem:[#allocation107_spill] sm:$0xff] %v11905_v57  ;;  %3094 = vmatprep.mubr.bf16.mxu0 %v11183_v41  ;;  %v11286_v9 = vld [vmem:[#allocation2 + $0x830] ss:$8 sps:$4 sm:$0xff]  }
 0x271   :  { %v2898_v55 = vpop.f32.mrf.mxu0  ;;  %v11915_v41 = vpop.f32.mrf.mxu1  ;;  %3623 = vmatmul.mubr.bf16.gmra.mxu1 %v11280_v14 }
 0x272   :  { %19002 = vst [vmem:[#allocation112_spill] sm:$0xff] %v11915_v41  ;;  %v11187_v55 = vld [vmem:[#allocation2 + $0x410] ss:$8 sps:$4 sm:$0xff]   ;;  %3630 = vmatprep.mubr.bf16.mxu1 %v11288_v60  ;;  %v11201_v41 = vld [vmem:[#allocation2 + $0x434] ss:$8 sps:$4 sm:$0xff]  }
 0x273   :  { %v11909_v33 = vpop.f32.mrf.mxu0  ;;  %v3434_v37 = vpop.f32.mrf.mxu1 }
 0x274   :  { %18999 = vst [vmem:[#allocation109_spill] sm:$0xff] %v11909_v33 }
 0x275   :  { %v2901_v25 = vpop.f32.mrf.mxu0  ;;  %v11919_v33 = vpop.f32.mrf.mxu1 }
 0x276   :  { %19004 = vst [vmem:[#allocation114_spill] sm:$0xff] %v11919_v33  ;;  %v11294_v33 = vld [vmem:[#allocation2 + $0x844] ss:$8 sps:$4 sm:$0xff]  }
 0x277   :  { %v11913_v50 = vpop.f32.mrf.mxu0  ;;  %3095 = vmatmul.mubr.bf16.gmra.mxu0 %v11181_v51  ;;  %v3437_v51 = vpop.f32.mrf.mxu1 }
 0x278   :  { %19001 = vst [vmem:[#allocation111_spill] sm:$0xff] %v11913_v50  ;;  %3102 = vmatprep.mubr.bf16.mxu0 %v11189_v44  ;;  %v11292_v51 = vld [vmem:[#allocation2 + $0x840] ss:$8 sps:$4 sm:$0xff]  }
 0x279   :  { %v2906_v27 = vpop.f32.mrf.mxu0  ;;  %v11923_v44 = vpop.f32.mrf.mxu1  ;;  %3631 = vmatmul.mubr.bf16.gmra.mxu1 %v11286_v9 }
 0x27a   :  { %19006 = vst [vmem:[#allocation116_spill] sm:$0xff] %v11923_v44  ;;  %v11193_v27 = vld [vmem:[#allocation2 + $0x420] ss:$8 sps:$4 sm:$0xff]   ;;  %3638 = vmatprep.mubr.bf16.mxu1 %v11294_v33  ;;  %v11207_v44 = vld [vmem:[#allocation2 + $0x444] ss:$8 sps:$4 sm:$0xff]  }
 0x27b   :  { %v11917_v13 = vpop.f32.mrf.mxu0  ;;  %v3442_v37 = vpop.f32.mrf.mxu1 }
 0x27c   :  { %19003 = vst [vmem:[#allocation113_spill] sm:$0xff] %v11917_v13 }
 0x27d   :  { %v2909_v25 = vpop.f32.mrf.mxu0  ;;  %v11927_v13 = vpop.f32.mrf.mxu1 }
 0x27e   :  { %19008 = vst [vmem:[#allocation118_spill] sm:$0xff] %v11927_v13  ;;  %v11300_v13 = vld [vmem:[#allocation2 + $0x854] ss:$8 sps:$4 sm:$0xff]  }
 0x27f   :  { %v11921_v57 = vpop.f32.mrf.mxu0  ;;  %3103 = vmatmul.mubr.bf16.gmra.mxu0 %v11187_v55  ;;  %v3445_v55 = vpop.f32.mrf.mxu1 }
 0x280   :  { %19005 = vst [vmem:[#allocation115_spill] sm:$0xff] %v11921_v57  ;;  %3110 = vmatprep.mubr.bf16.mxu0 %v11195_v63  ;;  %v11298_v55 = vld [vmem:[#allocation2 + $0x850] ss:$8 sps:$4 sm:$0xff]  }
 0x281   :  { %v2914_v8 = vpop.f32.mrf.mxu0  ;;  %v11931_v63 = vpop.f32.mrf.mxu1  ;;  %3639 = vmatmul.mubr.bf16.gmra.mxu1 %v11292_v51 }
 0x282   :  { %19010 = vst [vmem:[#allocation120_spill] sm:$0xff] %v11931_v63  ;;  %v11199_v8 = vld [vmem:[#allocation2 + $0x430] ss:$8 sps:$4 sm:$0xff]   ;;  %3646 = vmatprep.mubr.bf16.mxu1 %v11300_v13  ;;  %v11213_v63 = vld [vmem:[#allocation2 + $0x454] ss:$8 sps:$4 sm:$0xff]  }
 0x283   :  { %v11925_v14 = vpop.f32.mrf.mxu0  ;;  %v3450_v37 = vpop.f32.mrf.mxu1 }
 0x284   :  { %19007 = vst [vmem:[#allocation117_spill] sm:$0xff] %v11925_v14 }
 0x285   :  { %v2917_v25 = vpop.f32.mrf.mxu0  ;;  %v11935_v14 = vpop.f32.mrf.mxu1 }
 0x286   :  { %19012 = vst [vmem:[#allocation122_spill] sm:$0xff] %v11935_v14  ;;  %v11306_v14 = vld [vmem:[#allocation2 + $0x864] ss:$8 sps:$4 sm:$0xff]  }
 0x287   :  { %v11929_v50 = vpop.f32.mrf.mxu0  ;;  %3111 = vmatmul.mubr.bf16.gmra.mxu0 %v11193_v27  ;;  %v3453_v27 = vpop.f32.mrf.mxu1 }
 0x288   :  { %19009 = vst [vmem:[#allocation119_spill] sm:$0xff] %v11929_v50  ;;  %3118 = vmatprep.mubr.bf16.mxu0 %v11201_v41  ;;  %v11304_v27 = vld [vmem:[#allocation2 + $0x860] ss:$8 sps:$4 sm:$0xff]  }
 0x289   :  { %v2922_v60 = vpop.f32.mrf.mxu0  ;;  %v11939_v41 = vpop.f32.mrf.mxu1  ;;  %3647 = vmatmul.mubr.bf16.gmra.mxu1 %v11298_v55 }
 0x28a   :  { %19014 = vst [vmem:[#allocation124_spill] sm:$0xff] %v11939_v41  ;;  %v11205_v60 = vld [vmem:[#allocation2 + $0x440] ss:$8 sps:$4 sm:$0xff]   ;;  %3654 = vmatprep.mubr.bf16.mxu1 %v11306_v14  ;;  %v11219_v41 = vld [vmem:[#allocation2 + $0x464] ss:$8 sps:$4 sm:$0xff]  }
 0x28b   :  { %v11933_v9 = vpop.f32.mrf.mxu0  ;;  %v3458_v37 = vpop.f32.mrf.mxu1 }
 0x28c   :  { %19011 = vst [vmem:[#allocation121_spill] sm:$0xff] %v11933_v9 }
 0x28d   :  { %v2925_v25 = vpop.f32.mrf.mxu0  ;;  %v11943_v9 = vpop.f32.mrf.mxu1 }
 0x28e   :  { %19016 = vst [vmem:[#allocation126_spill] sm:$0xff] %v11943_v9  ;;  %v11312_v9 = vld [vmem:[#allocation2 + $0x874] ss:$8 sps:$4 sm:$0xff]  }
 0x28f   :  { %v11937_v57 = vpop.f32.mrf.mxu0  ;;  %3119 = vmatmul.mubr.bf16.gmra.mxu0 %v11199_v8  ;;  %v3461_v8 = vpop.f32.mrf.mxu1 }
 0x290   :  { %19013 = vst [vmem:[#allocation123_spill] sm:$0xff] %v11937_v57  ;;  %3126 = vmatprep.mubr.bf16.mxu0 %v11207_v44  ;;  %v11310_v8 = vld [vmem:[#allocation2 + $0x870] ss:$8 sps:$4 sm:$0xff]  }
 0x291   :  { %v2930_v33 = vpop.f32.mrf.mxu0  ;;  %v11947_v44 = vpop.f32.mrf.mxu1  ;;  %3655 = vmatmul.mubr.bf16.gmra.mxu1 %v11304_v27 }
 0x292   :  { %19018 = vst [vmem:[#allocation128_spill] sm:$0xff] %v11947_v44  ;;  %v11211_v33 = vld [vmem:[#allocation2 + $0x450] ss:$8 sps:$4 sm:$0xff]   ;;  %3662 = vmatprep.mubr.bf16.mxu1 %v11312_v9  ;;  %v11225_v44 = vld [vmem:[#allocation2 + $0x474] ss:$8 sps:$4 sm:$0xff]  }
 0x293   :  { %v11941_v51 = vpop.f32.mrf.mxu0  ;;  %v3466_v37 = vpop.f32.mrf.mxu1 }
 0x294   :  { %19015 = vst [vmem:[#allocation125_spill] sm:$0xff] %v11941_v51 }
 0x295   :  { %v2933_v25 = vpop.f32.mrf.mxu0  ;;  %v11951_v51 = vpop.f32.mrf.mxu1 }
 0x296   :  { %19020 = vst [vmem:[#allocation130_spill] sm:$0xff] %v11951_v51  ;;  %v11318_v51 = vld [vmem:[#allocation2 + $0x884] ss:$8 sps:$4 sm:$0xff]  }
 0x297   :  { %v11945_v50 = vpop.f32.mrf.mxu0  ;;  %3127 = vmatmul.mubr.bf16.gmra.mxu0 %v11205_v60  ;;  %v3469_v60 = vpop.f32.mrf.mxu1 }
 0x298   :  { %19017 = vst [vmem:[#allocation127_spill] sm:$0xff] %v11945_v50  ;;  %3134 = vmatprep.mubr.bf16.mxu0 %v11213_v63  ;;  %v11316_v60 = vld [vmem:[#allocation2 + $0x880] ss:$8 sps:$4 sm:$0xff]  }
 0x299   :  { %v2938_v13 = vpop.f32.mrf.mxu0  ;;  %v11955_v63 = vpop.f32.mrf.mxu1  ;;  %3663 = vmatmul.mubr.bf16.gmra.mxu1 %v11310_v8 }
 0x29a   :  { %19022 = vst [vmem:[#allocation132_spill] sm:$0xff] %v11955_v63  ;;  %v11217_v13 = vld [vmem:[#allocation2 + $0x460] ss:$8 sps:$4 sm:$0xff]   ;;  %3670 = vmatprep.mubr.bf16.mxu1 %v11318_v51  ;;  %v11231_v63 = vld [vmem:[#allocation2 + $0x484] ss:$8 sps:$4 sm:$0xff]  }
 0x29b   :  { %v11949_v55 = vpop.f32.mrf.mxu0  ;;  %v3474_v37 = vpop.f32.mrf.mxu1 }
 0x29c   :  { %19019 = vst [vmem:[#allocation129_spill] sm:$0xff] %v11949_v55 }
 0x29d   :  { %v2941_v25 = vpop.f32.mrf.mxu0  ;;  %v11959_v55 = vpop.f32.mrf.mxu1 }
 0x29e   :  { %19024 = vst [vmem:[#allocation134_spill] sm:$0xff] %v11959_v55  ;;  %v11324_v55 = vld [vmem:[#allocation2 + $0x894] ss:$8 sps:$4 sm:$0xff]  }
 0x29f   :  { %v11953_v57 = vpop.f32.mrf.mxu0  ;;  %3135 = vmatmul.mubr.bf16.gmra.mxu0 %v11211_v33  ;;  %v3477_v33 = vpop.f32.mrf.mxu1 }
 0x2a0   :  { %19021 = vst [vmem:[#allocation131_spill] sm:$0xff] %v11953_v57  ;;  %3142 = vmatprep.mubr.bf16.mxu0 %v11219_v41  ;;  %v11322_v33 = vld [vmem:[#allocation2 + $0x890] ss:$8 sps:$4 sm:$0xff]  }
 0x2a1   :  { %v2946_v14 = vpop.f32.mrf.mxu0  ;;  %v11963_v41 = vpop.f32.mrf.mxu1  ;;  %3671 = vmatmul.mubr.bf16.gmra.mxu1 %v11316_v60 }
 0x2a2   :  { %19026 = vst [vmem:[#allocation136_spill] sm:$0xff] %v11963_v41  ;;  %v11223_v14 = vld [vmem:[#allocation2 + $0x470] ss:$8 sps:$4 sm:$0xff]   ;;  %3678 = vmatprep.mubr.bf16.mxu1 %v11324_v55  ;;  %v11237_v41 = vld [vmem:[#allocation2 + $0x494] ss:$8 sps:$4 sm:$0xff]  }
 0x2a3   :  { %v11957_v27 = vpop.f32.mrf.mxu0  ;;  %v3482_v37 = vpop.f32.mrf.mxu1 }
 0x2a4   :  { %19023 = vst [vmem:[#allocation133_spill] sm:$0xff] %v11957_v27 }
 0x2a5   :  { %v2949_v25 = vpop.f32.mrf.mxu0  ;;  %v11967_v27 = vpop.f32.mrf.mxu1 }
 0x2a6   :  { %19028 = vst [vmem:[#allocation138_spill] sm:$0xff] %v11967_v27  ;;  %v11330_v27 = vld [vmem:[#allocation2 + $0x8a4] ss:$8 sps:$4 sm:$0xff]  }
 0x2a7   :  { %v11961_v50 = vpop.f32.mrf.mxu0  ;;  %3143 = vmatmul.mubr.bf16.gmra.mxu0 %v11217_v13  ;;  %v3485_v13 = vpop.f32.mrf.mxu1 }
 0x2a8   :  { %19025 = vst [vmem:[#allocation135_spill] sm:$0xff] %v11961_v50  ;;  %3150 = vmatprep.mubr.bf16.mxu0 %v11225_v44  ;;  %v11328_v13 = vld [vmem:[#allocation2 + $0x8a0] ss:$8 sps:$4 sm:$0xff]  }
 0x2a9   :  { %v2954_v9 = vpop.f32.mrf.mxu0  ;;  %v11971_v44 = vpop.f32.mrf.mxu1  ;;  %3679 = vmatmul.mubr.bf16.gmra.mxu1 %v11322_v33 }
 0x2aa   :  { %19030 = vst [vmem:[#allocation140_spill] sm:$0xff] %v11971_v44  ;;  %v11229_v9 = vld [vmem:[#allocation2 + $0x480] ss:$8 sps:$4 sm:$0xff]   ;;  %3686 = vmatprep.mubr.bf16.mxu1 %v11330_v27  ;;  %v11243_v44 = vld [vmem:[#allocation2 + $0x4a4] ss:$8 sps:$4 sm:$0xff]  }
 0x2ab   :  { %v11965_v8 = vpop.f32.mrf.mxu0  ;;  %v3490_v37 = vpop.f32.mrf.mxu1 }
 0x2ac   :  { %19027 = vst [vmem:[#allocation137_spill] sm:$0xff] %v11965_v8 }
 0x2ad   :  { %v2957_v25 = vpop.f32.mrf.mxu0  ;;  %v11975_v8 = vpop.f32.mrf.mxu1 }
 0x2ae   :  { %19032 = vst [vmem:[#allocation142_spill] sm:$0xff] %v11975_v8  ;;  %v4549_v8 = vmul.f32 %v11723_v6, %v11723_v6 }
 0x2af   :  { %v11969_v57 = vpop.f32.mrf.mxu0  ;;  %3151 = vmatmul.mubr.bf16.gmra.mxu0 %v11223_v14  ;;  %v3493_v14 = vpop.f32.mrf.mxu1 }
 0x2b0   :  { %19029 = vst [vmem:[#allocation139_spill] sm:$0xff] %v11969_v57  ;;  %3158 = vmatprep.mubr.bf16.mxu0 %v11231_v63 }
 0x2b1   :  { %v2962_v51 = vpop.f32.mrf.mxu0  ;;  %v11979_v63 = vpop.f32.mrf.mxu1  ;;  %3687 = vmatmul.mubr.bf16.gmra.mxu1 %v11328_v13  ;;  %v4548_v13 = vmul.f32 %v11721_v4, %v11721_v4 }
 0x2b2   :  { %19034 = vst [vmem:[#allocation144_spill] sm:$0xff] %v11979_v63  ;;  %v11235_v51 = vld [vmem:[#allocation2 + $0x490] ss:$8 sps:$4 sm:$0xff]  }
 0x2b3   :  { %v11973_v60 = vpop.f32.mrf.mxu0  ;;  %v3498_v37 = vpop.f32.mrf.mxu1  ;;  %v4940_v63 = vadd.f32 %v4549_v8, %v4548_v13  ;;  %v4553_v13 = vmul.f32 %v11731_v18, %v11731_v18 }
 0x2b4   :  { %19031 = vst [vmem:[#allocation141_spill] sm:$0xff] %v11973_v60  ;;  %v4550_v37 = vmul.f32 %v11725_v10, %v11725_v10 }
 0x2b5   :  { %v2965_v25 = vpop.f32.mrf.mxu0  ;;  %v11983_v60 = vpop.f32.mrf.mxu1 }
 0x2b6   :  { %19036 = vst [vmem:[#allocation146_spill] sm:$0xff] %v11983_v60 }
 0x2b7   :  { %v11977_v50 = vpop.f32.mrf.mxu0  ;;  %3159 = vmatmul.mubr.bf16.gmra.mxu0 %v11229_v9  ;;  %v11336_v9 = vld [vmem:[#allocation2 + $0x8b4] ss:$8 sps:$4 sm:$0xff]   ;;  %v3501_v27 = vpop.f32.mrf.mxu1 }
 0x2b8   :  { %19033 = vst [vmem:[#allocation143_spill] sm:$0xff] %v11977_v50  ;;  %3166 = vmatprep.mubr.bf16.mxu0 %v11237_v41  ;;  %v11334_v41 = vld [vmem:[#allocation2 + $0x8b0] ss:$8 sps:$4 sm:$0xff]   ;;  %3694 = vmatprep.mubr.bf16.mxu1 %v11336_v9  ;;  %v4551_v27 = vmul.f32 %v11727_v12, %v11727_v12  ;;  %v11249_v9 = vld [vmem:[#allocation2 + $0x4b4] ss:$8 sps:$4 sm:$0xff]  }
 0x2b9   :  { %v2970_v55 = vpop.f32.mrf.mxu0  ;;  %v11995_v60 = vpop.f32.mrf.mxu1  ;;  %3695 = vmatmul.mubr.bf16.gmra.mxu1 %v11334_v41 }
 0x2ba   :  { %v4151_v55 = vadd.f32 %v11723_v6, %v11721_v4  ;;  %19038 = vst [vmem:[#allocation148_spill] sm:$0xff] %v11995_v60  ;;  %v4941_v6 = vadd.f32 %v4940_v63, %v4550_v37  ;;  %v11340_v63 = vld [vmem:[#allocation2 + $0x8c0] ss:$8 sps:$4 sm:$0xff]  }
 0x2bb   :  { %v11981_v33 = vpop.f32.mrf.mxu0  ;;  %v3506_v50 = vpop.f32.mrf.mxu1 }
 0x2bc   :  { %19035 = vst [vmem:[#allocation145_spill] sm:$0xff] %v11981_v33  ;;  %v11241_v33 = vld [vmem:[#allocation2 + $0x4a0] ss:$8 sps:$4 sm:$0xff]   ;;  %v4942_v8 = vadd.f32 %v4941_v6, %v4551_v27 }
 0x2bd   :  { %v2973_v25 = vpop.f32.mrf.mxu0  ;;  %v12005_v60 = vpop.f32.mrf.mxu1 }
 0x2be   :  { %19040 = vst [vmem:[#allocation150_spill] sm:$0xff] %v12005_v60 }
 0x2bf   :  { %v11987_v14 = vpop.f32.mrf.mxu0  ;;  %3167 = vmatmul.mubr.bf16.gmra.mxu0 %v11235_v51  ;;  %v4152_v51 = vadd.f32 %v4151_v55, %v11725_v10  ;;  %v11342_v55 = vld [vmem:[#allocation2 + $0x8c4] ss:$8 sps:$4 sm:$0xff]   ;;  %v3509_v50 = vpop.f32.mrf.mxu1 }
 0x2c0   :  { %19037 = vst [vmem:[#allocation147_spill] sm:$0xff] %v11987_v14  ;;  %3174 = vmatprep.mubr.bf16.mxu0 %v11243_v44  ;;  %v4552_v44 = vmul.f32 %v11729_v16, %v11729_v16  ;;  %3702 = vmatprep.mubr.bf16.mxu1 %v11342_v55  ;;  %v11255_v55 = vld [vmem:[#allocation2 + $0x4c4] ss:$8 sps:$4 sm:$0xff]  }
 0x2c1   :  { %v2978_v25 = vpop.f32.mrf.mxu0  ;;  %v4153_v4 = vadd.f32 %v4152_v51, %v11727_v12  ;;  %v12015_v27 = vpop.f32.mrf.mxu1  ;;  %3703 = vmatmul.mubr.bf16.gmra.mxu1 %v11340_v63 }
 0x2c2   :  { %v4943_v37 = vadd.f32 %v4942_v8, %v4552_v44  ;;  %19042 = vst [vmem:[#allocation152_spill] sm:$0xff] %v12015_v27  ;;  %v11247_v44 = vld [vmem:[#allocation2 + $0x4b0] ss:$8 sps:$4 sm:$0xff]   ;;  %v19164_v27 = vld [vmem:[#allocation127_spill] sm:$0xff] }
 0x2c3   :  { %v12000_v14 = vpop.f32.mrf.mxu0  ;;  %v4154_v41 = vadd.f32 %v4153_v4, %v11729_v16  ;;  %v3514_v8 = vpop.f32.mrf.mxu1 }
 0x2c4   :  { %19039 = vst [vmem:[#allocation149_spill] sm:$0xff] %v12000_v14  ;;  %v4944_v4 = vadd.f32 %v4943_v37, %v4553_v13  ;;  %v4557_v37 = vmul.f32 %v11739_v30, %v11739_v30 }
 0x2c5   :  { %v2981_v25 = vpop.f32.mrf.mxu0  ;;  %v4155_v51 = vadd.f32 %v4154_v41, %v11731_v18  ;;  %v12025_v12 = vpop.f32.mrf.mxu1 }
 0x2c6   :  { %v4554_v25 = vmul.f32 %v11733_v22, %v11733_v22  ;;  %19044 = vst [vmem:[#allocation154_spill] sm:$0xff] %v12025_v12 }
 0x2c7   :  { %v12010_v10 = vpop.f32.mrf.mxu0  ;;  %3175 = vmatmul.mubr.bf16.gmra.mxu0 %v11241_v33  ;;  %v4156_v16 = vadd.f32 %v4155_v51, %v11733_v22  ;;  %v4555_v33 = vmul.f32 %v11735_v24, %v11735_v24  ;;  %v11348_v51 = vld [vmem:[#allocation2 + $0x8d4] ss:$8 sps:$4 sm:$0xff]  }
 0x2c8   :  { %19041 = vst [vmem:[#allocation151_spill] sm:$0xff] %v12010_v10  ;;  %3182 = vmatprep.mubr.bf16.mxu0 %v11249_v9  ;;  %v4945_v41 = vadd.f32 %v4944_v4, %v4554_v25  ;;  %v4556_v9 = vmul.f32 %v11737_v28, %v11737_v28  ;;  %v3517_v25 = vpop.f32.mrf.mxu1  ;;  %v11346_v4 = vld [vmem:[#allocation2 + $0x8d0] ss:$8 sps:$4 sm:$0xff]   ;;  %3710 = vmatprep.mubr.bf16.mxu1 %v11348_v51  ;;  %v11261_v51 = vld [vmem:[#allocation2 + $0x4d4] ss:$8 sps:$4 sm:$0xff]  }
 0x2c9   :  { %v2986_v6 = vpop.f32.mrf.mxu0  ;;  %v4157_v18 = vadd.f32 %v4156_v16, %v11735_v24  ;;  %3711 = vmatmul.mubr.bf16.gmra.mxu1 %v11346_v4 }
 0x2ca   :  { %v4946_v13 = vadd.f32 %v4945_v41, %v4555_v33  ;;  %v12035_v41 = vpop.f32.mrf.mxu1 }
 0x2cb   :  { %v12020_v50 = vpop.f32.mrf.mxu0  ;;  %v4158_v63 = vadd.f32 %v4157_v18, %v11737_v28  ;;  %19046 = vst [vmem:[#allocation156_spill] sm:$0xff] %v12035_v41  ;;  %v19156_v41 = vld [vmem:[#allocation119_spill] sm:$0xff] }
 0x2cc   :  { %19043 = vst [vmem:[#allocation153_spill] sm:$0xff] %v12020_v50  ;;  %v4947_v16 = vadd.f32 %v4946_v13, %v4556_v9  ;;  %v11253_v9 = vld [vmem:[#allocation2 + $0x4c0] ss:$8 sps:$4 sm:$0xff]   ;;  %v3522_v13 = vpop.f32.mrf.mxu1 }
 0x2cd   :  { %v2989_v6 = vpop.f32.mrf.mxu0  ;;  %v4159_v8 = vadd.f32 %v4158_v63, %v11739_v30 }
 0x2ce   :  { %v4558_v6 = vmul.f32 %v11741_v34, %v11741_v34  ;;  %v4948_v18 = vadd.f32 %v4947_v16, %v4557_v37  ;;  %v12045_v24 = vpop.f32.mrf.mxu1  ;;  %v4561_v16 = vmul.f32 %v11747_v42, %v11747_v42 }
 0x2cf   :  { %v12030_v22 = vpop.f32.mrf.mxu0  ;;  %3183 = vmatmul.mubr.bf16.gmra.mxu0 %v11247_v44  ;;  %v4160_v28 = vadd.f32 %v4159_v8, %v11741_v34  ;;  %v4559_v44 = vmul.f32 %v11743_v36, %v11743_v36  ;;  %19048 = vst [vmem:[#allocation158_spill] sm:$0xff] %v12045_v24  ;;  %v11354_v8 = vld [vmem:[#allocation2 + $0x8e4] ss:$8 sps:$4 sm:$0xff]  }
 0x2d0   :  { %19045 = vst [vmem:[#allocation155_spill] sm:$0xff] %v12030_v22  ;;  %3190 = vmatprep.mubr.bf16.mxu0 %v11255_v55  ;;  %v4949_v63 = vadd.f32 %v4948_v18, %v4558_v6  ;;  %v4560_v55 = vmul.f32 %v11745_v40, %v11745_v40  ;;  %v3525_v6 = vpop.f32.mrf.mxu1  ;;  %v11352_v18 = vld [vmem:[#allocation2 + $0x8e0] ss:$8 sps:$4 sm:$0xff]   ;;  %3718 = vmatprep.mubr.bf16.mxu1 %v11354_v8  ;;  %v11267_v8 = vld [vmem:[#allocation2 + $0x4e4] ss:$8 sps:$4 sm:$0xff]  }
 0x2d1   :  { %v2994_v33 = vpop.f32.mrf.mxu0  ;;  %v4161_v30 = vadd.f32 %v4160_v28, %v11743_v36  ;;  %3719 = vmatmul.mubr.bf16.gmra.mxu1 %v11352_v18 }
 0x2d2   :  { %v4950_v37 = vadd.f32 %v4949_v63, %v4559_v44  ;;  %v12055_v63 = vpop.f32.mrf.mxu1 }
 0x2d3   :  { %v12040_v25 = vpop.f32.mrf.mxu0  ;;  %v4162_v4 = vadd.f32 %v4161_v30, %v11745_v40  ;;  %19050 = vst [vmem:[#allocation160_spill] sm:$0xff] %v12055_v63  ;;  %v19148_v63 = vld [vmem:[#allocation111_spill] sm:$0xff] }
 0x2d4   :  { %19047 = vst [vmem:[#allocation157_spill] sm:$0xff] %v12040_v25  ;;  %v4951_v28 = vadd.f32 %v4950_v37, %v4560_v55  ;;  %v11259_v55 = vld [vmem:[#allocation2 + $0x4d0] ss:$8 sps:$4 sm:$0xff]   ;;  %v3530_v37 = vpop.f32.mrf.mxu1 }
 0x2d5   :  { %v2997_v33 = vpop.f32.mrf.mxu0  ;;  %v4163_v13 = vadd.f32 %v4162_v4, %v11747_v42 }
 0x2d6   :  { %v4562_v33 = vmul.f32 %v11749_v46, %v11749_v46  ;;  %v4952_v30 = vadd.f32 %v4951_v28, %v4561_v16  ;;  %v12065_v36 = vpop.f32.mrf.mxu1  ;;  %v4565_v28 = vmul.f32 %v11755_v56, %v11755_v56 }
 0x2d7   :  { %v12050_v34 = vpop.f32.mrf.mxu0  ;;  %3191 = vmatmul.mubr.bf16.gmra.mxu0 %v11253_v9  ;;  %v4164_v40 = vadd.f32 %v4163_v13, %v11749_v46  ;;  %v4563_v9 = vmul.f32 %v11751_v48, %v11751_v48  ;;  %19052 = vst [vmem:[#allocation162_spill] sm:$0xff] %v12065_v36  ;;  %v11360_v13 = vld [vmem:[#allocation2 + $0x8f4] ss:$8 sps:$4 sm:$0xff]  }
 0x2d8   :  { %19049 = vst [vmem:[#allocation159_spill] sm:$0xff] %v12050_v34  ;;  %3198 = vmatprep.mubr.bf16.mxu0 %v11261_v51  ;;  %v4953_v4 = vadd.f32 %v4952_v30, %v4562_v33  ;;  %v4564_v51 = vmul.f32 %v11753_v53, %v11753_v53  ;;  %v3533_v33 = vpop.f32.mrf.mxu1  ;;  %v11358_v30 = vld [vmem:[#allocation2 + $0x8f0] ss:$8 sps:$4 sm:$0xff]   ;;  %3726 = vmatprep.mubr.bf16.mxu1 %v11360_v13  ;;  %v11273_v13 = vld [vmem:[#allocation2 + $0x4f4] ss:$8 sps:$4 sm:$0xff]  }
 0x2d9   :  { %v3002_v44 = vpop.f32.mrf.mxu0  ;;  %v4165_v42 = vadd.f32 %v4164_v40, %v11751_v48  ;;  %3727 = vmatmul.mubr.bf16.gmra.mxu1 %v11358_v30 }
 0x2da   :  { %v4954_v16 = vadd.f32 %v4953_v4, %v4563_v9  ;;  %v12075_v4 = vpop.f32.mrf.mxu1 }
 0x2db   :  { %v12060_v6 = vpop.f32.mrf.mxu0  ;;  %v4166_v18 = vadd.f32 %v4165_v42, %v11753_v53  ;;  %19054 = vst [vmem:[#allocation164_spill] sm:$0xff] %v12075_v4  ;;  %v19140_v4 = vld [vmem:[#allocation103_spill] sm:$0xff] }
 0x2dc   :  { %19051 = vst [vmem:[#allocation161_spill] sm:$0xff] %v12060_v6  ;;  %v4955_v40 = vadd.f32 %v4954_v16, %v4564_v51  ;;  %v11265_v51 = vld [vmem:[#allocation2 + $0x4e0] ss:$8 sps:$4 sm:$0xff]   ;;  %v3538_v16 = vpop.f32.mrf.mxu1 }
 0x2dd   :  { %v3005_v44 = vpop.f32.mrf.mxu0  ;;  %v4167_v37 = vadd.f32 %v4166_v18, %v11755_v56 }
 0x2de   :  { %v4566_v44 = vmul.f32 %v11757_v61, %v11757_v61  ;;  %v4956_v42 = vadd.f32 %v4955_v40, %v4565_v28  ;;  %v12085_v48 = vpop.f32.mrf.mxu1  ;;  %v4569_v40 = vmul.f32 %v11763_v11, %v11763_v11 }
 0x2df   :  { %v12070_v46 = vpop.f32.mrf.mxu0  ;;  %3199 = vmatmul.mubr.bf16.gmra.mxu0 %v11259_v55  ;;  %v4168_v53 = vadd.f32 %v4167_v37, %v11757_v61  ;;  %v4567_v55 = vmul.f32 %v11759_v0, %v11759_v0  ;;  %19056 = vst [vmem:[#allocation166_spill] sm:$0xff] %v12085_v48  ;;  %v11366_v37 = vld [vmem:[#allocation2 + $0x904] ss:$8 sps:$4 sm:$0xff]  }
 0x2e0   :  { %19053 = vst [vmem:[#allocation163_spill] sm:$0xff] %v12070_v46  ;;  %3206 = vmatprep.mubr.bf16.mxu0 %v11267_v8  ;;  %v4957_v18 = vadd.f32 %v4956_v42, %v4566_v44  ;;  %v4568_v8 = vmul.f32 %v11761_v7, %v11761_v7  ;;  %v3541_v44 = vpop.f32.mrf.mxu1  ;;  %v11364_v42 = vld [vmem:[#allocation2 + $0x900] ss:$8 sps:$4 sm:$0xff]   ;;  %3734 = vmatprep.mubr.bf16.mxu1 %v11366_v37  ;;  %v11279_v37 = vld [vmem:[#allocation2 + $0x504] ss:$8 sps:$4 sm:$0xff]  }
 0x2e1   :  { %v3010_v9 = vpop.f32.mrf.mxu0  ;;  %v4169_v56 = vadd.f32 %v4168_v53, %v11759_v0  ;;  %3735 = vmatmul.mubr.bf16.gmra.mxu1 %v11364_v42 }
 0x2e2   :  { %v4958_v28 = vadd.f32 %v4957_v18, %v4567_v55  ;;  %v12095_v18 = vpop.f32.mrf.mxu1 }
 0x2e3   :  { %v12080_v33 = vpop.f32.mrf.mxu0  ;;  %v4170_v30 = vadd.f32 %v4169_v56, %v11761_v7  ;;  %19058 = vst [vmem:[#allocation168_spill] sm:$0xff] %v12095_v18  ;;  %v19132_v18 = vld [vmem:[#allocation95_spill] sm:$0xff] }
 0x2e4   :  { %19055 = vst [vmem:[#allocation165_spill] sm:$0xff] %v12080_v33  ;;  %v4959_v53 = vadd.f32 %v4958_v28, %v4568_v8  ;;  %v11271_v8 = vld [vmem:[#allocation2 + $0x4f0] ss:$8 sps:$4 sm:$0xff]   ;;  %v3546_v28 = vpop.f32.mrf.mxu1 }
 0x2e5   :  { %v3013_v9 = vpop.f32.mrf.mxu0  ;;  %v4171_v16 = vadd.f32 %v4170_v30, %v11763_v11 }
 0x2e6   :  { %v4570_v9 = vmul.f32 %v11765_v19, %v11765_v19  ;;  %v4960_v56 = vadd.f32 %v4959_v53, %v4569_v40  ;;  %v12105_v0 = vpop.f32.mrf.mxu1  ;;  %v4573_v53 = vmul.f32 %v11771_v35, %v11771_v35 }
 0x2e7   :  { %v12090_v61 = vpop.f32.mrf.mxu0  ;;  %3207 = vmatmul.mubr.bf16.gmra.mxu0 %v11265_v51  ;;  %v4172_v7 = vadd.f32 %v4171_v16, %v11765_v19  ;;  %v4571_v51 = vmul.f32 %v11767_v23, %v11767_v23  ;;  %19060 = vst [vmem:[#allocation170_spill] sm:$0xff] %v12105_v0  ;;  %v11372_v16 = vld [vmem:[#allocation2 + $0x914] ss:$8 sps:$4 sm:$0xff]  }
 0x2e8   :  { %19057 = vst [vmem:[#allocation167_spill] sm:$0xff] %v12090_v61  ;;  %3214 = vmatprep.mubr.bf16.mxu0 %v11273_v13  ;;  %v4961_v30 = vadd.f32 %v4960_v56, %v4570_v9  ;;  %v4572_v13 = vmul.f32 %v11769_v31, %v11769_v31  ;;  %v3549_v9 = vpop.f32.mrf.mxu1  ;;  %v11370_v56 = vld [vmem:[#allocation2 + $0x910] ss:$8 sps:$4 sm:$0xff]   ;;  %3742 = vmatprep.mubr.bf16.mxu1 %v11372_v16  ;;  %v11285_v16 = vld [vmem:[#allocation2 + $0x514] ss:$8 sps:$4 sm:$0xff]  }
 0x2e9   :  { %v3018_v55 = vpop.f32.mrf.mxu0  ;;  %v4173_v11 = vadd.f32 %v4172_v7, %v11767_v23  ;;  %3743 = vmatmul.mubr.bf16.gmra.mxu1 %v11370_v56 }
 0x2ea   :  { %v4962_v40 = vadd.f32 %v4961_v30, %v4571_v51  ;;  %v12115_v30 = vpop.f32.mrf.mxu1 }
 0x2eb   :  { %v12100_v44 = vpop.f32.mrf.mxu0  ;;  %v4174_v42 = vadd.f32 %v4173_v11, %v11769_v31  ;;  %19062 = vst [vmem:[#allocation172_spill] sm:$0xff] %v12115_v30  ;;  %v19124_v30 = vld [vmem:[#allocation87_spill] sm:$0xff] }
 0x2ec   :  { %19059 = vst [vmem:[#allocation169_spill] sm:$0xff] %v12100_v44  ;;  %v4963_v7 = vadd.f32 %v4962_v40, %v4572_v13  ;;  %v11277_v13 = vld [vmem:[#allocation2 + $0x500] ss:$8 sps:$4 sm:$0xff]   ;;  %v3554_v40 = vpop.f32.mrf.mxu1 }
 0x2ed   :  { %v3021_v55 = vpop.f32.mrf.mxu0  ;;  %v4175_v28 = vadd.f32 %v4174_v42, %v11771_v35 }
 0x2ee   :  { %v4574_v55 = vmul.f32 %v11773_v43, %v11773_v43  ;;  %v4964_v11 = vadd.f32 %v4963_v7, %v4573_v53  ;;  %v12125_v23 = vpop.f32.mrf.mxu1  ;;  %v4577_v7 = vmul.f32 %v11779_v58, %v11779_v58 }
 0x2ef   :  { %v12110_v19 = vpop.f32.mrf.mxu0  ;;  %3215 = vmatmul.mubr.bf16.gmra.mxu0 %v11271_v8  ;;  %v4176_v31 = vadd.f32 %v4175_v28, %v11773_v43  ;;  %v4575_v8 = vmul.f32 %v11775_v47, %v11775_v47  ;;  %19064 = vst [vmem:[#allocation174_spill] sm:$0xff] %v12125_v23  ;;  %v11378_v28 = vld [vmem:[#allocation2 + $0x924] ss:$8 sps:$4 sm:$0xff]  }
 0x2f0   :  { %19061 = vst [vmem:[#allocation171_spill] sm:$0xff] %v12110_v19  ;;  %3222 = vmatprep.mubr.bf16.mxu0 %v11279_v37  ;;  %v4965_v42 = vadd.f32 %v4964_v11, %v4574_v55  ;;  %v4576_v37 = vmul.f32 %v11777_v54, %v11777_v54  ;;  %v3557_v55 = vpop.f32.mrf.mxu1  ;;  %v11376_v11 = vld [vmem:[#allocation2 + $0x920] ss:$8 sps:$4 sm:$0xff]   ;;  %3750 = vmatprep.mubr.bf16.mxu1 %v11378_v28  ;;  %v11291_v28 = vld [vmem:[#allocation2 + $0x524] ss:$8 sps:$4 sm:$0xff]  }
 0x2f1   :  { %v3026_v51 = vpop.f32.mrf.mxu0  ;;  %v4177_v35 = vadd.f32 %v4176_v31, %v11775_v47  ;;  %3751 = vmatmul.mubr.bf16.gmra.mxu1 %v11376_v11 }
 0x2f2   :  { %v4966_v53 = vadd.f32 %v4965_v42, %v4575_v8  ;;  %v12135_v42 = vpop.f32.mrf.mxu1 }
 0x2f3   :  { %v12120_v9 = vpop.f32.mrf.mxu0  ;;  %v4178_v56 = vadd.f32 %v4177_v35, %v11777_v54  ;;  %19066 = vst [vmem:[#allocation176_spill] sm:$0xff] %v12135_v42  ;;  %v19116_v42 = vld [vmem:[#allocation79_spill] sm:$0xff] }
 0x2f4   :  { %19063 = vst [vmem:[#allocation173_spill] sm:$0xff] %v12120_v9  ;;  %v4967_v31 = vadd.f32 %v4966_v53, %v4576_v37  ;;  %v11283_v37 = vld [vmem:[#allocation2 + $0x510] ss:$8 sps:$4 sm:$0xff]   ;;  %v3562_v53 = vpop.f32.mrf.mxu1 }
 0x2f5   :  { %v3029_v51 = vpop.f32.mrf.mxu0  ;;  %v4179_v40 = vadd.f32 %v4178_v56, %v11779_v58 }
 0x2f6   :  { %v4578_v51 = vmul.f32 %v11781_v1, %v11781_v1  ;;  %v4968_v35 = vadd.f32 %v4967_v31, %v4577_v7  ;;  %v12145_v47 = vpop.f32.mrf.mxu1  ;;  %v4581_v31 = vmul.f32 %v11787_v21, %v11787_v21 }
 0x2f7   :  { %v12130_v43 = vpop.f32.mrf.mxu0  ;;  %3223 = vmatmul.mubr.bf16.gmra.mxu0 %v11277_v13  ;;  %v4180_v54 = vadd.f32 %v4179_v40, %v11781_v1  ;;  %v4579_v13 = vmul.f32 %v11783_v5, %v11783_v5  ;;  %19068 = vst [vmem:[#allocation178_spill] sm:$0xff] %v12145_v47  ;;  %v11384_v40 = vld [vmem:[#allocation2 + $0x934] ss:$8 sps:$4 sm:$0xff]  }
 0x2f8   :  { %19065 = vst [vmem:[#allocation175_spill] sm:$0xff] %v12130_v43  ;;  %3230 = vmatprep.mubr.bf16.mxu0 %v11285_v16  ;;  %v4969_v56 = vadd.f32 %v4968_v35, %v4578_v51  ;;  %v4580_v16 = vmul.f32 %v11785_v15, %v11785_v15  ;;  %v3565_v51 = vpop.f32.mrf.mxu1  ;;  %v11382_v35 = vld [vmem:[#allocation2 + $0x930] ss:$8 sps:$4 sm:$0xff]   ;;  %3758 = vmatprep.mubr.bf16.mxu1 %v11384_v40  ;;  %v11297_v40 = vld [vmem:[#allocation2 + $0x534] ss:$8 sps:$4 sm:$0xff]  }
 0x2f9   :  { %v3034_v8 = vpop.f32.mrf.mxu0  ;;  %v4181_v58 = vadd.f32 %v4180_v54, %v11783_v5  ;;  %3759 = vmatmul.mubr.bf16.gmra.mxu1 %v11382_v35 }
 0x2fa   :  { %v4970_v7 = vadd.f32 %v4969_v56, %v4579_v13  ;;  %v12155_v56 = vpop.f32.mrf.mxu1 }
 0x2fb   :  { %v12140_v55 = vpop.f32.mrf.mxu0  ;;  %v4182_v11 = vadd.f32 %v4181_v58, %v11785_v15  ;;  %19070 = vst [vmem:[#allocation180_spill] sm:$0xff] %v12155_v56  ;;  %v19108_v56 = vld [vmem:[#allocation75_spill] sm:$0xff] }
 0x2fc   :  { %19067 = vst [vmem:[#allocation177_spill] sm:$0xff] %v12140_v55  ;;  %v4971_v54 = vadd.f32 %v4970_v7, %v4580_v16  ;;  %v11289_v16 = vld [vmem:[#allocation2 + $0x520] ss:$8 sps:$4 sm:$0xff]   ;;  %v3570_v7 = vpop.f32.mrf.mxu1 }
 0x2fd   :  { %v3037_v8 = vpop.f32.mrf.mxu0  ;;  %v4183_v53 = vadd.f32 %v4182_v11, %v11787_v21 }
 0x2fe   :  { %v4582_v8 = vmul.f32 %v11789_v32, %v11789_v32  ;;  %v4972_v58 = vadd.f32 %v4971_v54, %v4581_v31  ;;  %v12165_v5 = vpop.f32.mrf.mxu1  ;;  %v4585_v54 = vmul.f32 %v11795_v52, %v11795_v52 }
 0x2ff   :  { %v12150_v1 = vpop.f32.mrf.mxu0  ;;  %3231 = vmatmul.mubr.bf16.gmra.mxu0 %v11283_v37  ;;  %v4184_v15 = vadd.f32 %v4183_v53, %v11789_v32  ;;  %v4583_v37 = vmul.f32 %v11791_v38, %v11791_v38  ;;  %19072 = vst [vmem:[#allocation182_spill] sm:$0xff] %v12165_v5  ;;  %v11387_v53 = vld [vmem:[#allocation2 + $0x944] ss:$8 sps:$4 sm:$0xff]  }
 0x300   :  { %19069 = vst [vmem:[#allocation179_spill] sm:$0xff] %v12150_v1  ;;  %3238 = vmatprep.mubr.bf16.mxu0 %v11291_v28  ;;  %v4973_v11 = vadd.f32 %v4972_v58, %v4582_v8  ;;  %v4584_v28 = vmul.f32 %v11793_v49, %v11793_v49  ;;  %v3573_v8 = vpop.f32.mrf.mxu1  ;;  %v11385_v58 = vld [vmem:[#allocation2 + $0x940] ss:$8 sps:$4 sm:$0xff]   ;;  %3766 = vmatprep.mubr.bf16.mxu1 %v11387_v53  ;;  %v11303_v53 = vld [vmem:[#allocation2 + $0x544] ss:$8 sps:$4 sm:$0xff]  }
 0x301   :  { %v3042_v13 = vpop.f32.mrf.mxu0  ;;  %v4185_v21 = vadd.f32 %v4184_v15, %v11791_v38  ;;  %3767 = vmatmul.mubr.bf16.gmra.mxu1 %v11385_v58 }
 0x302   :  { %v4974_v31 = vadd.f32 %v4973_v11, %v4583_v37  ;;  %v12175_v11 = vpop.f32.mrf.mxu1 }
 0x303   :  { %v12160_v51 = vpop.f32.mrf.mxu0  ;;  %v4186_v35 = vadd.f32 %v4185_v21, %v11793_v49  ;;  %19074 = vst [vmem:[#allocation184_spill] sm:$0xff] %v12175_v11  ;;  %v19100_v11 = vld [vmem:[#allocation71_spill] sm:$0xff] }
 0x304   :  { %19071 = vst [vmem:[#allocation181_spill] sm:$0xff] %v12160_v51  ;;  %v4975_v15 = vadd.f32 %v4974_v31, %v4584_v28  ;;  %v11295_v28 = vld [vmem:[#allocation2 + $0x530] ss:$8 sps:$4 sm:$0xff]   ;;  %v3578_v31 = vpop.f32.mrf.mxu1 }
 0x305   :  { %v3045_v13 = vpop.f32.mrf.mxu0  ;;  %v4187_v7 = vadd.f32 %v4186_v35, %v11795_v52 }
 0x306   :  { %v4586_v13 = vmul.f32 %v11797_v62, %v11797_v62  ;;  %v4976_v21 = vadd.f32 %v4975_v15, %v4585_v54  ;;  %v12185_v38 = vpop.f32.mrf.mxu1  ;;  %v4589_v15 = vmul.f32 %v11803_v26, %v11803_v26 }
 0x307   :  { %v12170_v32 = vpop.f32.mrf.mxu0  ;;  %3239 = vmatmul.mubr.bf16.gmra.mxu0 %v11289_v16  ;;  %v4188_v49 = vadd.f32 %v4187_v7, %v11797_v62  ;;  %v4587_v16 = vmul.f32 %v11799_v3, %v11799_v3  ;;  %19076 = vst [vmem:[#allocation186_spill] sm:$0xff] %v12185_v38  ;;  %v11390_v7 = vld [vmem:[#allocation2 + $0x954] ss:$8 sps:$4 sm:$0xff]  }
 0x308   :  { %19073 = vst [vmem:[#allocation183_spill] sm:$0xff] %v12170_v32  ;;  %3246 = vmatprep.mubr.bf16.mxu0 %v11297_v40  ;;  %v4977_v35 = vadd.f32 %v4976_v21, %v4586_v13  ;;  %v4588_v40 = vmul.f32 %v11801_v17, %v11801_v17  ;;  %v3581_v13 = vpop.f32.mrf.mxu1  ;;  %v11388_v21 = vld [vmem:[#allocation2 + $0x950] ss:$8 sps:$4 sm:$0xff]   ;;  %3774 = vmatprep.mubr.bf16.mxu1 %v11390_v7  ;;  %v11309_v7 = vld [vmem:[#allocation2 + $0x554] ss:$8 sps:$4 sm:$0xff]  }
 0x309   :  { %v3050_v37 = vpop.f32.mrf.mxu0  ;;  %v4189_v52 = vadd.f32 %v4188_v49, %v11799_v3  ;;  %3775 = vmatmul.mubr.bf16.gmra.mxu1 %v11388_v21 }
 0x30a   :  { %v4978_v54 = vadd.f32 %v4977_v35, %v4587_v16  ;;  %v12195_v35 = vpop.f32.mrf.mxu1 }
 0x30b   :  { %v12180_v8 = vpop.f32.mrf.mxu0  ;;  %v4190_v58 = vadd.f32 %v4189_v52, %v11801_v17  ;;  %19078 = vst [vmem:[#allocation188_spill] sm:$0xff] %v12195_v35  ;;  %v19092_v35 = vld [vmem:[#allocation67_spill] sm:$0xff] }
 0x30c   :  { %19075 = vst [vmem:[#allocation185_spill] sm:$0xff] %v12180_v8  ;;  %v4979_v49 = vadd.f32 %v4978_v54, %v4588_v40  ;;  %v11301_v40 = vld [vmem:[#allocation2 + $0x540] ss:$8 sps:$4 sm:$0xff]   ;;  %v3586_v54 = vpop.f32.mrf.mxu1 }
 0x30d   :  { %v3053_v37 = vpop.f32.mrf.mxu0  ;;  %v4191_v31 = vadd.f32 %v4190_v58, %v11803_v26 }
 0x30e   :  { %v4590_v37 = vmul.f32 %v11805_v39, %v11805_v39  ;;  %v4980_v52 = vadd.f32 %v4979_v49, %v4589_v15  ;;  %v12205_v3 = vpop.f32.mrf.mxu1  ;;  %v4593_v49 = vmul.f32 %v11811_v2, %v11811_v2 }
 0x30f   :  { %v12190_v62 = vpop.f32.mrf.mxu0  ;;  %3247 = vmatmul.mubr.bf16.gmra.mxu0 %v11295_v28  ;;  %v4192_v17 = vadd.f32 %v4191_v31, %v11805_v39  ;;  %v4591_v28 = vmul.f32 %v11807_v45, %v11807_v45  ;;  %19080 = vst [vmem:[#allocation190_spill] sm:$0xff] %v12205_v3  ;;  %v11393_v31 = vld [vmem:[#allocation2 + $0x964] ss:$8 sps:$4 sm:$0xff]  }
 0x310   :  { %19077 = vst [vmem:[#allocation187_spill] sm:$0xff] %v12190_v62  ;;  %3254 = vmatprep.mubr.bf16.mxu0 %v11303_v53  ;;  %v4981_v58 = vadd.f32 %v4980_v52, %v4590_v37  ;;  %v4592_v53 = vmul.f32 %v11809_v59, %v11809_v59  ;;  %v3589_v37 = vpop.f32.mrf.mxu1  ;;  %v11391_v52 = vld [vmem:[#allocation2 + $0x960] ss:$8 sps:$4 sm:$0xff]   ;;  %3782 = vmatprep.mubr.bf16.mxu1 %v11393_v31  ;;  %v11315_v31 = vld [vmem:[#allocation2 + $0x564] ss:$8 sps:$4 sm:$0xff]  }
 0x311   :  { %v3058_v16 = vpop.f32.mrf.mxu0  ;;  %v4193_v26 = vadd.f32 %v4192_v17, %v11807_v45  ;;  %3783 = vmatmul.mubr.bf16.gmra.mxu1 %v11391_v52  ;;  %v19084_v45 = vld [vmem:[#allocation63_spill] sm:$0xff] }
 0x312   :  { %v4982_v15 = vadd.f32 %v4981_v58, %v4591_v28  ;;  %v12215_v58 = vpop.f32.mrf.mxu1 }
 0x313   :  { %v12200_v13 = vpop.f32.mrf.mxu0  ;;  %v4194_v21 = vadd.f32 %v4193_v26, %v11809_v59  ;;  %19082 = vst [vmem:[#allocation192_spill] sm:$0xff] %v12215_v58 }
 0x314   :  { %19079 = vst [vmem:[#allocation189_spill] sm:$0xff] %v12200_v13  ;;  %v4983_v17 = vadd.f32 %v4982_v15, %v4592_v53  ;;  %v11307_v53 = vld [vmem:[#allocation2 + $0x550] ss:$8 sps:$4 sm:$0xff]   ;;  %v3594_v15 = vpop.f32.mrf.mxu1 }
 0x315   :  { %v3061_v16 = vpop.f32.mrf.mxu0  ;;  %v4195_v54 = vadd.f32 %v4194_v21, %v11811_v2 }
 0x316   :  { %v4594_v16 = vmul.f32 %v11813_v20, %v11813_v20  ;;  %v4984_v26 = vadd.f32 %v4983_v17, %v4593_v49  ;;  %v12225_v58 = vpop.f32.mrf.mxu1  ;;  %v19086_v17 = vld [vmem:[#allocation64_spill] sm:$0xff] }
 0x317   :  { %v12210_v39 = vpop.f32.mrf.mxu0  ;;  %3255 = vmatmul.mubr.bf16.gmra.mxu0 %v11301_v40  ;;  %v4196_v59 = vadd.f32 %v4195_v54, %v11813_v20  ;;  %v4595_v40 = vmul.f32 %v11815_v29, %v11815_v29  ;;  %19085 = vst [vmem:[#allocation194_spill] sm:$0xff] %v12225_v58  ;;  %v4597_v54 = vmul.f32 %v19086_v17, %v19086_v17  ;;  %v11396_v20 = vld [vmem:[#allocation2 + $0x974] ss:$8 sps:$4 sm:$0xff]  }
 0x318   :  { %19081 = vst [vmem:[#allocation191_spill] sm:$0xff] %v12210_v39  ;;  %3262 = vmatprep.mubr.bf16.mxu0 %v11309_v7  ;;  %v4985_v21 = vadd.f32 %v4984_v26, %v4594_v16  ;;  %v4596_v7 = vmul.f32 %v19084_v45, %v19084_v45  ;;  %v3597_v16 = vpop.f32.mrf.mxu1  ;;  %v11394_v26 = vld [vmem:[#allocation2 + $0x970] ss:$8 sps:$4 sm:$0xff]   ;;  %3790 = vmatprep.mubr.bf16.mxu1 %v11396_v20  ;;  %v19090_v58 = vld [vmem:[#allocation66_spill] sm:$0xff] }
 0x319   :  { %v3066_v28 = vpop.f32.mrf.mxu0  ;;  %v4197_v2 = vadd.f32 %v4196_v59, %v11815_v29  ;;  %v19088_v29 = vld [vmem:[#allocation65_spill] sm:$0xff]  ;;  %3791 = vmatmul.mubr.bf16.gmra.mxu1 %v11394_v26  ;;  %v4600_v20 = vmul.f32 %v19092_v35, %v19092_v35 }
 0x31a   :  { %v4986_v49 = vadd.f32 %v4985_v21, %v4595_v40  ;;  %v12235_v21 = vpop.f32.mrf.mxu1 }
 0x31b   :  { %v12220_v37 = vpop.f32.mrf.mxu0  ;;  %v4198_v52 = vadd.f32 %v4197_v2, %v19084_v45  ;;  %19089 = vst [vmem:[#allocation196_spill] sm:$0xff] %v12235_v21 }
 0x31c   :  { %19083 = vst [vmem:[#allocation193_spill] sm:$0xff] %v12220_v37  ;;  %v4987_v59 = vadd.f32 %v4986_v49, %v4596_v7  ;;  %v11313_v7 = vld [vmem:[#allocation2 + $0x560] ss:$8 sps:$4 sm:$0xff]   ;;  %v3602_v49 = vpop.f32.mrf.mxu1 }
 0x31d   :  { %v3069_v28 = vpop.f32.mrf.mxu0  ;;  %v4199_v15 = vadd.f32 %v4198_v52, %v19086_v17 }
 0x31e   :  { %v4598_v28 = vmul.f32 %v19088_v29, %v19088_v29  ;;  %v4988_v2 = vadd.f32 %v4987_v59, %v4597_v54  ;;  %v12245_v21 = vpop.f32.mrf.mxu1  ;;  %v19094_v59 = vld [vmem:[#allocation68_spill] sm:$0xff] }
 0x31f   :  { %v12230_v3 = vpop.f32.mrf.mxu0  ;;  %3263 = vmatmul.mubr.bf16.gmra.mxu0 %v11307_v53  ;;  %v4200_v45 = vadd.f32 %v4199_v15, %v19088_v29  ;;  %v4599_v53 = vmul.f32 %v19090_v58, %v19090_v58  ;;  %19093 = vst [vmem:[#allocation198_spill] sm:$0xff] %v12245_v21  ;;  %v4601_v15 = vmul.f32 %v19094_v59, %v19094_v59  ;;  %v11399_v29 = vld [vmem:[#allocation2 + $0x984] ss:$8 sps:$4 sm:$0xff]   ;;  %v19098_v21 = vld [vmem:[#allocation70_spill] sm:$0xff] }
 0x320   :  { %19087 = vst [vmem:[#allocation195_spill] sm:$0xff] %v12230_v3  ;;  %3270 = vmatprep.mubr.bf16.mxu0 %v11315_v31  ;;  %v4989_v52 = vadd.f32 %v4988_v2, %v4598_v28  ;;  %v11321_v31 = vld [vmem:[#allocation2 + $0x574] ss:$8 sps:$4 sm:$0xff]   ;;  %v3605_v28 = vpop.f32.mrf.mxu1  ;;  %v11397_v2 = vld [vmem:[#allocation2 + $0x980] ss:$8 sps:$4 sm:$0xff]   ;;  %3798 = vmatprep.mubr.bf16.mxu1 %v11399_v29  ;;  %v4604_v29 = vmul.f32 %v19100_v11, %v19100_v11 }
 0x321   :  { %v3074_v40 = vpop.f32.mrf.mxu0  ;;  %v4201_v17 = vadd.f32 %v4200_v45, %v19090_v58  ;;  %v19096_v58 = vld [vmem:[#allocation69_spill] sm:$0xff]  ;;  %3799 = vmatmul.mubr.bf16.gmra.mxu1 %v11397_v2 }
 0x322   :  { %v4990_v54 = vadd.f32 %v4989_v52, %v4599_v53  ;;  %v12255_v52 = vpop.f32.mrf.mxu1 }
 0x323   :  { %v12240_v16 = vpop.f32.mrf.mxu0  ;;  %v4202_v26 = vadd.f32 %v4201_v17, %v19092_v35  ;;  %19097 = vst [vmem:[#allocation200_spill] sm:$0xff] %v12255_v52 }
 0x324   :  { %19091 = vst [vmem:[#allocation197_spill] sm:$0xff] %v12240_v16  ;;  %v4991_v45 = vadd.f32 %v4990_v54, %v4600_v20  ;;  %v11319_v20 = vld [vmem:[#allocation2 + $0x570] ss:$8 sps:$4 sm:$0xff]   ;;  %v3610_v54 = vpop.f32.mrf.mxu1 }
 0x325   :  { %v3077_v40 = vpop.f32.mrf.mxu0  ;;  %v4203_v49 = vadd.f32 %v4202_v26, %v19094_v59 }
 0x326   :  { %v4602_v40 = vmul.f32 %v19096_v58, %v19096_v58  ;;  %v4992_v17 = vadd.f32 %v4991_v45, %v4601_v15  ;;  %v12265_v52 = vpop.f32.mrf.mxu1  ;;  %v19102_v45 = vld [vmem:[#allocation72_spill] sm:$0xff] }
 0x327   :  { %v12250_v38 = vpop.f32.mrf.mxu0  ;;  %3271 = vmatmul.mubr.bf16.gmra.mxu0 %v11313_v7  ;;  %v4204_v35 = vadd.f32 %v4203_v49, %v19096_v58  ;;  %v4603_v7 = vmul.f32 %v19098_v21, %v19098_v21  ;;  %19101 = vst [vmem:[#allocation202_spill] sm:$0xff] %v12265_v52  ;;  %v4605_v49 = vmul.f32 %v19102_v45, %v19102_v45  ;;  %v11402_v58 = vld [vmem:[#allocation2 + $0x994] ss:$8 sps:$4 sm:$0xff]  }
 0x328   :  { %19095 = vst [vmem:[#allocation199_spill] sm:$0xff] %v12250_v38  ;;  %3278 = vmatprep.mubr.bf16.mxu0 %v11321_v31  ;;  %v4993_v26 = vadd.f32 %v4992_v17, %v4602_v40  ;;  %v11327_v31 = vld [vmem:[#allocation2 + $0x584] ss:$8 sps:$4 sm:$0xff]   ;;  %v3613_v40 = vpop.f32.mrf.mxu1  ;;  %v11400_v17 = vld [vmem:[#allocation2 + $0x990] ss:$8 sps:$4 sm:$0xff]   ;;  %3806 = vmatprep.mubr.bf16.mxu1 %v11402_v58  ;;  %v19106_v52 = vld [vmem:[#allocation74_spill] sm:$0xff]  ;;  %v4608_v58 = vmul.f32 %v19108_v56, %v19108_v56 }
 0x329   :  { %v3082_v53 = vpop.f32.mrf.mxu0  ;;  %v4205_v59 = vadd.f32 %v4204_v35, %v19098_v21  ;;  %v19104_v21 = vld [vmem:[#allocation73_spill] sm:$0xff]  ;;  %3807 = vmatmul.mubr.bf16.gmra.mxu1 %v11400_v17 }
 0x32a   :  { %v4994_v15 = vadd.f32 %v4993_v26, %v4603_v7  ;;  %v12275_v26 = vpop.f32.mrf.mxu1 }
 0x32b   :  { %v12260_v28 = vpop.f32.mrf.mxu0  ;;  %v4206_v2 = vadd.f32 %v4205_v59, %v19100_v11  ;;  %19105 = vst [vmem:[#allocation204_spill] sm:$0xff] %v12275_v26 }
 0x32c   :  { %19099 = vst [vmem:[#allocation201_spill] sm:$0xff] %v12260_v28  ;;  %v4995_v35 = vadd.f32 %v4994_v15, %v4604_v29  ;;  %v11325_v29 = vld [vmem:[#allocation2 + $0x580] ss:$8 sps:$4 sm:$0xff]   ;;  %v3618_v15 = vpop.f32.mrf.mxu1 }
 0x32d   :  { %v3085_v53 = vpop.f32.mrf.mxu0  ;;  %v4207_v54 = vadd.f32 %v4206_v2, %v19102_v45 }
 0x32e   :  { %v4606_v53 = vmul.f32 %v19104_v21, %v19104_v21  ;;  %v4996_v59 = vadd.f32 %v4995_v35, %v4605_v49  ;;  %v12285_v26 = vpop.f32.mrf.mxu1  ;;  %v19110_v35 = vld [vmem:[#allocation76_spill] sm:$0xff] }
 0x32f   :  { %v12270_v5 = vpop.f32.mrf.mxu0  ;;  %3279 = vmatmul.mubr.bf16.gmra.mxu0 %v11319_v20  ;;  %v4208_v11 = vadd.f32 %v4207_v54, %v19104_v21  ;;  %v4607_v20 = vmul.f32 %v19106_v52, %v19106_v52  ;;  %19109 = vst [vmem:[#allocation206_spill] sm:$0xff] %v12285_v26  ;;  %v4609_v54 = vmul.f32 %v19110_v35, %v19110_v35  ;;  %v11405_v21 = vld [vmem:[#allocation2 + $0x9a4] ss:$8 sps:$4 sm:$0xff]   ;;  %v19114_v26 = vld [vmem:[#allocation78_spill] sm:$0xff] }
 0x330   :  { %19103 = vst [vmem:[#allocation203_spill] sm:$0xff] %v12270_v5  ;;  %3286 = vmatprep.mubr.bf16.mxu0 %v11327_v31  ;;  %v4997_v2 = vadd.f32 %v4996_v59, %v4606_v53  ;;  %v11333_v31 = vld [vmem:[#allocation2 + $0x594] ss:$8 sps:$4 sm:$0xff]   ;;  %v3621_v53 = vpop.f32.mrf.mxu1  ;;  %v11403_v59 = vld [vmem:[#allocation2 + $0x9a0] ss:$8 sps:$4 sm:$0xff]   ;;  %3814 = vmatprep.mubr.bf16.mxu1 %v11405_v21  ;;  %v4612_v21 = vmul.f32 %v19116_v42, %v19116_v42 }
 0x331   :  { %v3090_v7 = vpop.f32.mrf.mxu0  ;;  %v4209_v45 = vadd.f32 %v4208_v11, %v19106_v52  ;;  %v19112_v52 = vld [vmem:[#allocation77_spill] sm:$0xff]  ;;  %3815 = vmatmul.mubr.bf16.gmra.mxu1 %v11403_v59 }
 0x332   :  { %v4998_v49 = vadd.f32 %v4997_v2, %v4607_v20  ;;  %v12295_v2 = vpop.f32.mrf.mxu1 }
 0x333   :  { %v12280_v40 = vpop.f32.mrf.mxu0  ;;  %v4210_v17 = vadd.f32 %v4209_v45, %v19108_v56  ;;  %19113 = vst [vmem:[#allocation208_spill] sm:$0xff] %v12295_v2 }
 0x334   :  { %19107 = vst [vmem:[#allocation205_spill] sm:$0xff] %v12280_v40  ;;  %v4999_v11 = vadd.f32 %v4998_v49, %v4608_v58  ;;  %v11331_v58 = vld [vmem:[#allocation2 + $0x590] ss:$8 sps:$4 sm:$0xff]   ;;  %v3626_v49 = vpop.f32.mrf.mxu1 }
 0x335   :  { %v3093_v7 = vpop.f32.mrf.mxu0  ;;  %v4211_v15 = vadd.f32 %v4210_v17, %v19110_v35 }
 0x336   :  { %v4610_v7 = vmul.f32 %v19112_v52, %v19112_v52  ;;  %v5000_v45 = vadd.f32 %v4999_v11, %v4609_v54  ;;  %v12305_v2 = vpop.f32.mrf.mxu1  ;;  %v19118_v11 = vld [vmem:[#allocation81_spill] sm:$0xff] }
 0x337   :  { %v12290_v47 = vpop.f32.mrf.mxu0  ;;  %3287 = vmatmul.mubr.bf16.gmra.mxu0 %v11325_v29  ;;  %v4212_v56 = vadd.f32 %v4211_v15, %v19112_v52  ;;  %v4611_v29 = vmul.f32 %v19114_v26, %v19114_v26  ;;  %19117 = vst [vmem:[#allocation210_spill] sm:$0xff] %v12305_v2  ;;  %v4613_v15 = vmul.f32 %v19118_v11, %v19118_v11  ;;  %v11408_v52 = vld [vmem:[#allocation2 + $0x9b4] ss:$8 sps:$4 sm:$0xff]  }
 0x338   :  { %19111 = vst [vmem:[#allocation207_spill] sm:$0xff] %v12290_v47  ;;  %3294 = vmatprep.mubr.bf16.mxu0 %v11333_v31  ;;  %v5001_v17 = vadd.f32 %v5000_v45, %v4610_v7  ;;  %v11339_v31 = vld [vmem:[#allocation2 + $0x5a4] ss:$8 sps:$4 sm:$0xff]   ;;  %v3629_v7 = vpop.f32.mrf.mxu1  ;;  %v11406_v45 = vld [vmem:[#allocation2 + $0x9b0] ss:$8 sps:$4 sm:$0xff]   ;;  %3822 = vmatprep.mubr.bf16.mxu1 %v11408_v52  ;;  %v4616_v52 = vmul.f32 %v19124_v30, %v19124_v30 }
 0x339   :  { %v3098_v20 = vpop.f32.mrf.mxu0  ;;  %v4213_v35 = vadd.f32 %v4212_v56, %v19114_v26  ;;  %v19120_v26 = vld [vmem:[#allocation83_spill] sm:$0xff]  ;;  %3823 = vmatmul.mubr.bf16.gmra.mxu1 %v11406_v45  ;;  %v19122_v2 = vld [vmem:[#allocation85_spill] sm:$0xff] }
 0x33a   :  { %v5002_v54 = vadd.f32 %v5001_v17, %v4611_v29  ;;  %v12315_v17 = vpop.f32.mrf.mxu1 }
 0x33b   :  { %v12300_v53 = vpop.f32.mrf.mxu0  ;;  %v4214_v59 = vadd.f32 %v4213_v35, %v19116_v42  ;;  %19121 = vst [vmem:[#allocation212_spill] sm:$0xff] %v12315_v17 }
 0x33c   :  { %19115 = vst [vmem:[#allocation209_spill] sm:$0xff] %v12300_v53  ;;  %v5003_v56 = vadd.f32 %v5002_v54, %v4612_v21  ;;  %v11337_v21 = vld [vmem:[#allocation2 + $0x5a0] ss:$8 sps:$4 sm:$0xff]   ;;  %v3634_v54 = vpop.f32.mrf.mxu1 }
 0x33d   :  { %v3101_v20 = vpop.f32.mrf.mxu0  ;;  %v4215_v49 = vadd.f32 %v4214_v59, %v19118_v11 }
 0x33e   :  { %v4614_v20 = vmul.f32 %v19120_v26, %v19120_v26  ;;  %v5004_v35 = vadd.f32 %v5003_v56, %v4613_v15  ;;  %v12325_v17 = vpop.f32.mrf.mxu1  ;;  %v19126_v56 = vld [vmem:[#allocation89_spill] sm:$0xff] }
 0x33f   :  { %v12310_v23 = vpop.f32.mrf.mxu0  ;;  %3295 = vmatmul.mubr.bf16.gmra.mxu0 %v11331_v58  ;;  %v4216_v42 = vadd.f32 %v4215_v49, %v19120_v26  ;;  %v4615_v58 = vmul.f32 %v19122_v2, %v19122_v2  ;;  %19125 = vst [vmem:[#allocation214_spill] sm:$0xff] %v12325_v17  ;;  %v4617_v49 = vmul.f32 %v19126_v56, %v19126_v56  ;;  %v11411_v26 = vld [vmem:[#allocation2 + $0x9c4] ss:$8 sps:$4 sm:$0xff]   ;;  %v19130_v17 = vld [vmem:[#allocation93_spill] sm:$0xff] }
 0x340   :  { %19119 = vst [vmem:[#allocation211_spill] sm:$0xff] %v12310_v23  ;;  %3302 = vmatprep.mubr.bf16.mxu0 %v11339_v31  ;;  %v5005_v59 = vadd.f32 %v5004_v35, %v4614_v20  ;;  %v11345_v31 = vld [vmem:[#allocation2 + $0x5b4] ss:$8 sps:$4 sm:$0xff]   ;;  %v3637_v20 = vpop.f32.mrf.mxu1  ;;  %v11409_v35 = vld [vmem:[#allocation2 + $0x9c0] ss:$8 sps:$4 sm:$0xff]   ;;  %3830 = vmatprep.mubr.bf16.mxu1 %v11411_v26  ;;  %v4620_v26 = vmul.f32 %v19132_v18, %v19132_v18 }
 0x341   :  { %v3106_v29 = vpop.f32.mrf.mxu0  ;;  %v4217_v11 = vadd.f32 %v4216_v42, %v19122_v2  ;;  %v19128_v2 = vld [vmem:[#allocation91_spill] sm:$0xff]  ;;  %3831 = vmatmul.mubr.bf16.gmra.mxu1 %v11409_v35 }
 0x342   :  { %v5006_v15 = vadd.f32 %v5005_v59, %v4615_v58  ;;  %v12335_v59 = vpop.f32.mrf.mxu1 }
 0x343   :  { %v12320_v7 = vpop.f32.mrf.mxu0  ;;  %v4218_v45 = vadd.f32 %v4217_v11, %v19124_v30  ;;  %19129 = vst [vmem:[#allocation216_spill] sm:$0xff] %v12335_v59 }
 0x344   :  { %19123 = vst [vmem:[#allocation213_spill] sm:$0xff] %v12320_v7  ;;  %v5007_v42 = vadd.f32 %v5006_v15, %v4616_v52  ;;  %v11343_v52 = vld [vmem:[#allocation2 + $0x5b0] ss:$8 sps:$4 sm:$0xff]   ;;  %v3642_v15 = vpop.f32.mrf.mxu1 }
 0x345   :  { %v3109_v29 = vpop.f32.mrf.mxu0  ;;  %v4219_v54 = vadd.f32 %v4218_v45, %v19126_v56 }
 0x346   :  { %v4618_v29 = vmul.f32 %v19128_v2, %v19128_v2  ;;  %v5008_v11 = vadd.f32 %v5007_v42, %v4617_v49  ;;  %v12345_v59 = vpop.f32.mrf.mxu1  ;;  %v19134_v42 = vld [vmem:[#allocation97_spill] sm:$0xff] }
 0x347   :  { %v12330_v0 = vpop.f32.mrf.mxu0  ;;  %3303 = vmatmul.mubr.bf16.gmra.mxu0 %v11337_v21  ;;  %v4220_v30 = vadd.f32 %v4219_v54, %v19128_v2  ;;  %v4619_v21 = vmul.f32 %v19130_v17, %v19130_v17  ;;  %19133 = vst [vmem:[#allocation218_spill] sm:$0xff] %v12345_v59  ;;  %v4621_v54 = vmul.f32 %v19134_v42, %v19134_v42  ;;  %v11414_v2 = vld [vmem:[#allocation2 + $0x9d4] ss:$8 sps:$4 sm:$0xff]  }
 0x348   :  { %19127 = vst [vmem:[#allocation215_spill] sm:$0xff] %v12330_v0  ;;  %3310 = vmatprep.mubr.bf16.mxu0 %v11345_v31  ;;  %v5009_v45 = vadd.f32 %v5008_v11, %v4618_v29  ;;  %v11351_v31 = vld [vmem:[#allocation2 + $0x5c4] ss:$8 sps:$4 sm:$0xff]   ;;  %v3645_v29 = vpop.f32.mrf.mxu1  ;;  %v11412_v11 = vld [vmem:[#allocation2 + $0x9d0] ss:$8 sps:$4 sm:$0xff]   ;;  %3838 = vmatprep.mubr.bf16.mxu1 %v11414_v2  ;;  %v4624_v2 = vmul.f32 %v19140_v4, %v19140_v4 }
 0x349   :  { %v3114_v58 = vpop.f32.mrf.mxu0  ;;  %v4221_v56 = vadd.f32 %v4220_v30, %v19130_v17  ;;  %v19136_v17 = vld [vmem:[#allocation99_spill] sm:$0xff]  ;;  %3839 = vmatmul.mubr.bf16.gmra.mxu1 %v11412_v11  ;;  %v19138_v59 = vld [vmem:[#allocation101_spill] sm:$0xff] }
 0x34a   :  { %v5010_v49 = vadd.f32 %v5009_v45, %v4619_v21  ;;  %v12355_v45 = vpop.f32.mrf.mxu1 }
 0x34b   :  { %v12340_v20 = vpop.f32.mrf.mxu0  ;;  %v4222_v35 = vadd.f32 %v4221_v56, %v19132_v18  ;;  %19137 = vst [vmem:[#allocation220_spill] sm:$0xff] %v12355_v45 }
 0x34c   :  { %19131 = vst [vmem:[#allocation217_spill] sm:$0xff] %v12340_v20  ;;  %v5011_v30 = vadd.f32 %v5010_v49, %v4620_v26  ;;  %v11349_v26 = vld [vmem:[#allocation2 + $0x5c0] ss:$8 sps:$4 sm:$0xff]   ;;  %v3650_v49 = vpop.f32.mrf.mxu1 }
 0x34d   :  { %v3117_v58 = vpop.f32.mrf.mxu0  ;;  %v4223_v15 = vadd.f32 %v4222_v35, %v19134_v42 }
 0x34e   :  { %v4622_v58 = vmul.f32 %v19136_v17, %v19136_v17  ;;  %v5012_v56 = vadd.f32 %v5011_v30, %v4621_v54  ;;  %v12365_v45 = vpop.f32.mrf.mxu1  ;;  %v19142_v30 = vld [vmem:[#allocation105_spill] sm:$0xff] }
 0x34f   :  { %v12350_v48 = vpop.f32.mrf.mxu0  ;;  %3311 = vmatmul.mubr.bf16.gmra.mxu0 %v11343_v52  ;;  %v4224_v18 = vadd.f32 %v4223_v15, %v19136_v17  ;;  %v4623_v52 = vmul.f32 %v19138_v59, %v19138_v59  ;;  %19141 = vst [vmem:[#allocation222_spill] sm:$0xff] %v12365_v45  ;;  %v4625_v15 = vmul.f32 %v19142_v30, %v19142_v30  ;;  %v11417_v17 = vld [vmem:[#allocation2 + $0x9e4] ss:$8 sps:$4 sm:$0xff]   ;;  %v19146_v45 = vld [vmem:[#allocation109_spill] sm:$0xff] }
 0x350   :  { %19135 = vst [vmem:[#allocation219_spill] sm:$0xff] %v12350_v48  ;;  %3318 = vmatprep.mubr.bf16.mxu0 %v11351_v31  ;;  %v5013_v35 = vadd.f32 %v5012_v56, %v4622_v58  ;;  %v11357_v31 = vld [vmem:[#allocation2 + $0x5d4] ss:$8 sps:$4 sm:$0xff]   ;;  %v3653_v58 = vpop.f32.mrf.mxu1  ;;  %v11415_v56 = vld [vmem:[#allocation2 + $0x9e0] ss:$8 sps:$4 sm:$0xff]   ;;  %3846 = vmatprep.mubr.bf16.mxu1 %v11417_v17  ;;  %v4628_v17 = vmul.f32 %v19148_v63, %v19148_v63 }
 0x351   :  { %v3122_v21 = vpop.f32.mrf.mxu0  ;;  %v4225_v42 = vadd.f32 %v4224_v18, %v19138_v59  ;;  %v19144_v59 = vld [vmem:[#allocation107_spill] sm:$0xff]  ;;  %3847 = vmatmul.mubr.bf16.gmra.mxu1 %v11415_v56 }
 0x352   :  { %v5014_v54 = vadd.f32 %v5013_v35, %v4623_v52  ;;  %v12375_v35 = vpop.f32.mrf.mxu1 }
 0x353   :  { %v12360_v29 = vpop.f32.mrf.mxu0  ;;  %v4226_v11 = vadd.f32 %v4225_v42, %v19140_v4  ;;  %19145 = vst [vmem:[#allocation224_spill] sm:$0xff] %v12375_v35 }
 0x354   :  { %19139 = vst [vmem:[#allocation221_spill] sm:$0xff] %v12360_v29  ;;  %v5015_v18 = vadd.f32 %v5014_v54, %v4624_v2  ;;  %v11355_v2 = vld [vmem:[#allocation2 + $0x5d0] ss:$8 sps:$4 sm:$0xff]   ;;  %v3658_v54 = vpop.f32.mrf.mxu1 }
 0x355   :  { %v3125_v21 = vpop.f32.mrf.mxu0  ;;  %v4227_v49 = vadd.f32 %v4226_v11, %v19142_v30 }
 0x356   :  { %v4626_v21 = vmul.f32 %v19144_v59, %v19144_v59  ;;  %v5016_v42 = vadd.f32 %v5015_v18, %v4625_v15  ;;  %v12385_v35 = vpop.f32.mrf.mxu1  ;;  %v19150_v18 = vld [vmem:[#allocation113_spill] sm:$0xff] }
 0x357   :  { %v12370_v36 = vpop.f32.mrf.mxu0  ;;  %3319 = vmatmul.mubr.bf16.gmra.mxu0 %v11349_v26  ;;  %v4228_v4 = vadd.f32 %v4227_v49, %v19144_v59  ;;  %v4627_v26 = vmul.f32 %v19146_v45, %v19146_v45  ;;  %19149 = vst [vmem:[#allocation226_spill] sm:$0xff] %v12385_v35  ;;  %v4629_v49 = vmul.f32 %v19150_v18, %v19150_v18  ;;  %v11420_v59 = vld [vmem:[#allocation2 + $0x9f4] ss:$8 sps:$4 sm:$0xff]  }
 0x358   :  { %19143 = vst [vmem:[#allocation223_spill] sm:$0xff] %v12370_v36  ;;  %3326 = vmatprep.mubr.bf16.mxu0 %v11357_v31  ;;  %v5017_v11 = vadd.f32 %v5016_v42, %v4626_v21  ;;  %v11363_v31 = vld [vmem:[#allocation2 + $0x5e4] ss:$8 sps:$4 sm:$0xff]   ;;  %v3661_v21 = vpop.f32.mrf.mxu1  ;;  %v11418_v42 = vld [vmem:[#allocation2 + $0x9f0] ss:$8 sps:$4 sm:$0xff]   ;;  %3854 = vmatprep.mubr.bf16.mxu1 %v11420_v59  ;;  %v4632_v59 = vmul.f32 %v19156_v41, %v19156_v41 }
 0x359   :  { %v3130_v52 = vpop.f32.mrf.mxu0  ;;  %v4229_v30 = vadd.f32 %v4228_v4, %v19146_v45  ;;  %v19152_v45 = vld [vmem:[#allocation115_spill] sm:$0xff]  ;;  %3855 = vmatmul.mubr.bf16.gmra.mxu1 %v11418_v42  ;;  %v19154_v35 = vld [vmem:[#allocation117_spill] sm:$0xff] }
 0x35a   :  { %v5018_v15 = vadd.f32 %v5017_v11, %v4627_v26  ;;  %v12395_v11 = vpop.f32.mrf.mxu1 }
 0x35b   :  { %v12380_v58 = vpop.f32.mrf.mxu0  ;;  %v4230_v56 = vadd.f32 %v4229_v30, %v19148_v63  ;;  %19153 = vst [vmem:[#allocation228_spill] sm:$0xff] %v12395_v11 }
 0x35c   :  { %19147 = vst [vmem:[#allocation225_spill] sm:$0xff] %v12380_v58  ;;  %v5019_v4 = vadd.f32 %v5018_v15, %v4628_v17  ;;  %v11361_v17 = vld [vmem:[#allocation2 + $0x5e0] ss:$8 sps:$4 sm:$0xff]   ;;  %v3666_v15 = vpop.f32.mrf.mxu1 }
 0x35d   :  { %v3133_v52 = vpop.f32.mrf.mxu0  ;;  %v4231_v54 = vadd.f32 %v4230_v56, %v19150_v18 }
 0x35e   :  { %v4630_v52 = vmul.f32 %v19152_v45, %v19152_v45  ;;  %v5020_v30 = vadd.f32 %v5019_v4, %v4629_v49  ;;  %v12405_v11 = vpop.f32.mrf.mxu1  ;;  %v19158_v4 = vld [vmem:[#allocation121_spill] sm:$0xff] }
 0x35f   :  { %v12390_v24 = vpop.f32.mrf.mxu0  ;;  %3327 = vmatmul.mubr.bf16.gmra.mxu0 %v11355_v2  ;;  %v4232_v63 = vadd.f32 %v4231_v54, %v19152_v45  ;;  %v4631_v2 = vmul.f32 %v19154_v35, %v19154_v35  ;;  %19157 = vst [vmem:[#allocation230_spill] sm:$0xff] %v12405_v11  ;;  %v4633_v54 = vmul.f32 %v19158_v4, %v19158_v4  ;;  %v11423_v45 = vld [vmem:[#allocation2 + $0xa04] ss:$8 sps:$4 sm:$0xff]   ;;  %v19162_v11 = vld [vmem:[#allocation125_spill] sm:$0xff] }
 0x360   :  { %19151 = vst [vmem:[#allocation227_spill] sm:$0xff] %v12390_v24  ;;  %3334 = vmatprep.mubr.bf16.mxu0 %v11363_v31  ;;  %v5021_v56 = vadd.f32 %v5020_v30, %v4630_v52  ;;  %v11369_v31 = vld [vmem:[#allocation2 + $0x5f4] ss:$8 sps:$4 sm:$0xff]   ;;  %v3669_v52 = vpop.f32.mrf.mxu1  ;;  %v11421_v30 = vld [vmem:[#allocation2 + $0xa00] ss:$8 sps:$4 sm:$0xff]   ;;  %3862 = vmatprep.mubr.bf16.mxu1 %v11423_v45  ;;  %v4636_v45 = vmul.f32 %v19164_v27, %v19164_v27 }
 0x361   :  { %v3138_v26 = vpop.f32.mrf.mxu0  ;;  %v4233_v18 = vadd.f32 %v4232_v63, %v19154_v35  ;;  %v19160_v35 = vld [vmem:[#allocation123_spill] sm:$0xff]  ;;  %3863 = vmatmul.mubr.bf16.gmra.mxu1 %v11421_v30 }
 0x362   :  { %v5022_v49 = vadd.f32 %v5021_v56, %v4631_v2  ;;  %v12415_v56 = vpop.f32.mrf.mxu1 }
 0x363   :  { %v12400_v21 = vpop.f32.mrf.mxu0  ;;  %v4234_v42 = vadd.f32 %v4233_v18, %v19156_v41  ;;  %19161 = vst [vmem:[#allocation232_spill] sm:$0xff] %v12415_v56 }
 0x364   :  { %19155 = vst [vmem:[#allocation229_spill] sm:$0xff] %v12400_v21  ;;  %v5023_v63 = vadd.f32 %v5022_v49, %v4632_v59  ;;  %v11367_v59 = vld [vmem:[#allocation2 + $0x5f0] ss:$8 sps:$4 sm:$0xff]   ;;  %v3674_v49 = vpop.f32.mrf.mxu1 }
 0x365   :  { %v3141_v26 = vpop.f32.mrf.mxu0  ;;  %v4235_v15 = vadd.f32 %v4234_v42, %v19158_v4 }
 0x366   :  { %v4634_v26 = vmul.f32 %v19160_v35, %v19160_v35  ;;  %v5024_v18 = vadd.f32 %v5023_v63, %v4633_v54  ;;  %v12425_v56 = vpop.f32.mrf.mxu1  ;;  %v19166_v63 = vld [vmem:[#allocation129_spill] sm:$0xff] }
 0x367   :  { %v12410_v12 = vpop.f32.mrf.mxu0  ;;  %3335 = vmatmul.mubr.bf16.gmra.mxu0 %v11361_v17  ;;  %v4236_v41 = vadd.f32 %v4235_v15, %v19160_v35  ;;  %v4635_v17 = vmul.f32 %v19162_v11, %v19162_v11  ;;  %19165 = vst [vmem:[#allocation234_spill] sm:$0xff] %v12425_v56  ;;  %v4637_v15 = vmul.f32 %v19166_v63, %v19166_v63  ;;  %v11426_v35 = vld [vmem:[#allocation2 + $0xa14] ss:$8 sps:$4 sm:$0xff]  }
 0x368   :  { %19159 = vst [vmem:[#allocation231_spill] sm:$0xff] %v12410_v12  ;;  %3342 = vmatprep.mubr.bf16.mxu0 %v11369_v31  ;;  %v5025_v42 = vadd.f32 %v5024_v18, %v4634_v26  ;;  %v11375_v31 = vld [vmem:[#allocation2 + $0x604] ss:$8 sps:$4 sm:$0xff]   ;;  %v3677_v26 = vpop.f32.mrf.mxu1  ;;  %v11424_v18 = vld [vmem:[#allocation2 + $0xa10] ss:$8 sps:$4 sm:$0xff]   ;;  %3870 = vmatprep.mubr.bf16.mxu1 %v11426_v35 }
 0x369   :  { %v3146_v2 = vpop.f32.mrf.mxu0  ;;  %v4237_v4 = vadd.f32 %v4236_v41, %v19162_v11  ;;  %v19168_v11 = vld [vmem:[#allocation131_spill] sm:$0xff]  ;;  %3871 = vmatmul.mubr.bf16.gmra.mxu1 %v11424_v18  ;;  %v19170_v56 = vld [vmem:[#allocation133_spill] sm:$0xff] }
 0x36a   :  { %v5026_v54 = vadd.f32 %v5025_v42, %v4635_v17  ;;  %v12435_v42 = vpop.f32.mrf.mxu1 }
 0x36b   :  { %v12420_v52 = vpop.f32.mrf.mxu0  ;;  %v4238_v30 = vadd.f32 %v4237_v4, %v19164_v27  ;;  %19169 = vst [vmem:[#allocation236_spill] sm:$0xff] %v12435_v42 }
 0x36c   :  { %19163 = vst [vmem:[#allocation233_spill] sm:$0xff] %v12420_v52  ;;  %v5027_v41 = vadd.f32 %v5026_v54, %v4636_v45  ;;  %v11373_v45 = vld [vmem:[#allocation2 + $0x600] ss:$8 sps:$4 sm:$0xff]   ;;  %v3682_v54 = vpop.f32.mrf.mxu1 }
 0x36d   :  { %v3149_v2 = vpop.f32.mrf.mxu0  ;;  %v4239_v49 = vadd.f32 %v4238_v30, %v19166_v63 }
 0x36e   :  { %v4638_v2 = vmul.f32 %v19168_v11, %v19168_v11  ;;  %v5028_v4 = vadd.f32 %v5027_v41, %v4637_v15  ;;  %v12445_v42 = vpop.f32.mrf.mxu1  ;;  %v19174_v41 = vld [vmem:[#allocation137_spill] sm:$0xff] }
 0x36f   :  { %v12430_v60 = vpop.f32.mrf.mxu0  ;;  %3343 = vmatmul.mubr.bf16.gmra.mxu0 %v11367_v59  ;;  %v4240_v27 = vadd.f32 %v4239_v49, %v19168_v11  ;;  %v4639_v59 = vmul.f32 %v19170_v56, %v19170_v56  ;;  %19173 = vst [vmem:[#allocation238_spill] sm:$0xff] %v12445_v42  ;;  %v4641_v49 = vmul.f32 %v19174_v41, %v19174_v41  ;;  %v11429_v11 = vld [vmem:[#allocation2 + $0xa24] ss:$8 sps:$4 sm:$0xff]  }
 0x370   :  { %19167 = vst [vmem:[#allocation235_spill] sm:$0xff] %v12430_v60  ;;  %3350 = vmatprep.mubr.bf16.mxu0 %v11375_v31  ;;  %v5029_v30 = vadd.f32 %v5028_v4, %v4638_v2  ;;  %v19172_v60 = vld [vmem:[#allocation135_spill] sm:$0xff]  ;;  %v11381_v31 = vld [vmem:[#allocation2 + $0x614] ss:$8 sps:$4 sm:$0xff]   ;;  %v3685_v2 = vpop.f32.mrf.mxu1  ;;  %3878 = vmatprep.mubr.bf16.mxu1 %v11429_v11 }
 0x371   :  { %v3154_v17 = vpop.f32.mrf.mxu0  ;;  %v4241_v63 = vadd.f32 %v4240_v27, %v19170_v56  ;;  %v4640_v35 = vmul.f32 %v19172_v60, %v19172_v60  ;;  %v11427_v4 = vld [vmem:[#allocation2 + $0xa20] ss:$8 sps:$4 sm:$0xff]   ;;  %v19177_v56 = vld [vmem:[#allocation141_spill] sm:$0xff] }
 0x372   :  { %v5030_v15 = vadd.f32 %v5029_v30, %v4639_v59  ;;  %v12455_v30 = vpop.f32.mrf.mxu1  ;;  %3879 = vmatmul.mubr.bf16.gmra.mxu1 %v11427_v4  ;;  %v19179_v42 = vld [vmem:[#allocation143_spill] sm:$0xff] }
 0x373   :  { %v12440_v26 = vpop.f32.mrf.mxu0  ;;  %v4242_v18 = vadd.f32 %v4241_v63, %v19172_v60  ;;  %19176 = vst [vmem:[#allocation240_spill] sm:$0xff] %v12455_v30  ;;  %v4644_v11 = vmul.f32 %v19179_v42, %v19179_v42 }
 0x374   :  { %19171 = vst [vmem:[#allocation237_spill] sm:$0xff] %v12440_v26  ;;  %v5031_v27 = vadd.f32 %v5030_v15, %v4640_v35  ;;  %v11379_v35 = vld [vmem:[#allocation2 + $0x610] ss:$8 sps:$4 sm:$0xff]   ;;  %v3690_v15 = vpop.f32.mrf.mxu1 }
 0x375   :  { %v3157_v17 = vpop.f32.mrf.mxu0  ;;  %v4243_v54 = vadd.f32 %v4242_v18, %v19174_v41 }
 0x376   :  { %v4642_v17 = vmul.f32 %v11969_v57, %v11969_v57  ;;  %v5032_v63 = vadd.f32 %v5031_v27, %v4641_v49  ;;  %v19181_v27 = vld [vmem:[#allocation145_spill] sm:$0xff] }
 0x377   :  { %v12450_v26 = vpop.f32.mrf.mxu0  ;;  %3351 = vmatmul.mubr.bf16.gmra.mxu0 %v11373_v45  ;;  %v4244_v60 = vadd.f32 %v4243_v54, %v11969_v57  ;;  %v4643_v45 = vmul.f32 %v19177_v56, %v19177_v56  ;;  %v4645_v54 = vmul.f32 %v19181_v27, %v19181_v27  ;;  %v11432_v57 = vld [vmem:[#allocation2 + $0xa34] ss:$8 sps:$4 sm:$0xff]  }
 0x378   :  { %19175 = vst [vmem:[#allocation239_spill] sm:$0xff] %v12450_v26  ;;  %3358 = vmatprep.mubr.bf16.mxu0 %v11381_v31  ;;  %v5033_v18 = vadd.f32 %v5032_v63, %v4642_v17  ;;  %v11430_v17 = vld [vmem:[#allocation2 + $0xa30] ss:$8 sps:$4 sm:$0xff]   ;;  %3886 = vmatprep.mubr.bf16.mxu1 %v11432_v57 }
 0x379   :  { %v3162_v59 = vpop.f32.mrf.mxu0  ;;  %v4245_v41 = vadd.f32 %v4244_v60, %v19177_v56  ;;  %v19183_v56 = vld [vmem:[#allocation147_spill] sm:$0xff] }
 0x37a   :  { %v12465_v59 = vpop.f32.mrf.mxu1  ;;  %v5034_v4 = vadd.f32 %v5033_v18, %v4643_v45  ;;  %3887 = vmatmul.mubr.bf16.gmra.mxu1 %v11430_v17  ;;  %v4649_v17 = vmul.f32 %v12020_v50, %v12020_v50 }
 0x37b   :  { %v12460_v2 = vpop.f32.mrf.mxu0  ;;  %19180 = vst [vmem:[#allocation242_spill] sm:$0xff] %v12465_v59  ;;  %v4246_v49 = vadd.f32 %v4245_v41, %v19179_v42  ;;  %v4647_v42 = vmul.f32 %v12000_v14, %v12000_v14 }
 0x37c   :  { %19178 = vst [vmem:[#allocation241_spill] sm:$0xff] %v12460_v2  ;;  %v3693_v15 = vpop.f32.mrf.mxu1  ;;  %v5035_v63 = vadd.f32 %v5034_v4, %v4644_v11 }
 0x37d   :  { %v3165_v31 = vpop.f32.mrf.mxu0  ;;  %v4247_v60 = vadd.f32 %v4246_v49, %v19181_v27  ;;  %v4648_v49 = vmul.f32 %v12010_v10, %v12010_v10 }
 0x37e   :  { %v4646_v31 = vmul.f32 %v19183_v56, %v19183_v56  ;;  %v12475_v45 = vpop.f32.mrf.mxu1  ;;  %v5036_v41 = vadd.f32 %v5035_v63, %v4645_v54  ;;  %v11435_v63 = vld [vmem:[#allocation2 + $0xa44] ss:$8 sps:$4 sm:$0xff]  }
 0x37f   :  { %v12470_v30 = vpop.f32.mrf.mxu0  ;;  %3359 = vmatmul.mubr.bf16.gmra.mxu0 %v11379_v35  ;;  %v4248_v18 = vadd.f32 %v4247_v60, %v19183_v56  ;;  %3894 = vmatprep.mubr.bf16.mxu1 %v11435_v63 }
 0x380   :  { %19182 = vst [vmem:[#allocation243_spill] sm:$0xff] %v12470_v30  ;;  %v3698_v15 = vpop.f32.mrf.mxu1  ;;  %v5037_v11 = vadd.f32 %v5036_v41, %v4646_v31 }
 0x381   :  { %v3170_v59 = vpop.f32.mrf.mxu0  ;;  %v4249_v4 = vadd.f32 %v4248_v18, %v12000_v14  ;;  %v11433_v15 = vld [vmem:[#allocation2 + $0xa40] ss:$8 sps:$4 sm:$0xff]   ;;  %v4650_v18 = vmul.f32 %v12030_v22, %v12030_v22 }
 0x382   :  { %v12485_v59 = vpop.f32.mrf.mxu1  ;;  %v5038_v27 = vadd.f32 %v5037_v11, %v4647_v42  ;;  %3895 = vmatmul.mubr.bf16.gmra.mxu1 %v11433_v15  ;;  %v4653_v15 = vmul.f32 %v12060_v6, %v12060_v6 }
 0x383   :  { %v12480_v35 = vpop.f32.mrf.mxu0  ;;  %19185 = vst [vmem:[#allocation245_spill] sm:$0xff] %v12485_v59  ;;  %v4250_v54 = vadd.f32 %v4249_v4, %v12010_v10  ;;  %v4651_v4 = vmul.f32 %v12040_v25, %v12040_v25 }
 0x384   :  { %19184 = vst [vmem:[#allocation244_spill] sm:$0xff] %v12480_v35  ;;  %v3701_v56 = vpop.f32.mrf.mxu1  ;;  %v5039_v31 = vadd.f32 %v5038_v27, %v4648_v49 }
 0x385   :  { %v3173_v57 = vpop.f32.mrf.mxu0  ;;  %v4251_v41 = vadd.f32 %v4250_v54, %v12020_v50  ;;  %v4652_v54 = vmul.f32 %v12050_v34, %v12050_v34 }
 0x386   :  { %v12495_v14 = vpop.f32.mrf.mxu1  ;;  %v5040_v42 = vadd.f32 %v5039_v31, %v4649_v17  ;;  %v11438_v31 = vld [vmem:[#allocation2 + $0xa54] ss:$8 sps:$4 sm:$0xff]  }
 0x387   :  { %v12490_v60 = vpop.f32.mrf.mxu0  ;;  %v4252_v11 = vadd.f32 %v4251_v41, %v12030_v22  ;;  %3902 = vmatprep.mubr.bf16.mxu1 %v11438_v31 }
 0x388   :  { %19186 = vst [vmem:[#allocation246_spill] sm:$0xff] %v12490_v60  ;;  %v3706_v56 = vpop.f32.mrf.mxu1  ;;  %v5041_v27 = vadd.f32 %v5040_v42, %v4650_v18 }
 0x389   :  { %v3178_v57 = vpop.f32.mrf.mxu0  ;;  %v4253_v49 = vadd.f32 %v4252_v11, %v12040_v25  ;;  %v11436_v56 = vld [vmem:[#allocation2 + $0xa50] ss:$8 sps:$4 sm:$0xff]   ;;  %v4654_v11 = vmul.f32 %v12070_v46, %v12070_v46 }
 0x38a   :  { %v12505_v57 = vpop.f32.mrf.mxu1  ;;  %v5042_v50 = vadd.f32 %v5041_v27, %v4651_v4  ;;  %3903 = vmatmul.mubr.bf16.gmra.mxu1 %v11436_v56  ;;  %v4657_v56 = vmul.f32 %v12100_v44, %v12100_v44 }
 0x38b   :  { %v12500_v10 = vpop.f32.mrf.mxu0  ;;  %19188 = vst [vmem:[#allocation248_spill] sm:$0xff] %v12505_v57  ;;  %v4254_v17 = vadd.f32 %v4253_v49, %v12050_v34  ;;  %v4655_v49 = vmul.f32 %v12080_v33, %v12080_v33 }
 0x38c   :  { %19187 = vst [vmem:[#allocation247_spill] sm:$0xff] %v12500_v10  ;;  %v3709_v22 = vpop.f32.mrf.mxu1  ;;  %v5043_v18 = vadd.f32 %v5042_v50, %v4652_v54 }
 0x38d   :  { %v3181_v63 = vpop.f32.mrf.mxu0  ;;  %v4255_v42 = vadd.f32 %v4254_v17, %v12060_v6  ;;  %v4656_v17 = vmul.f32 %v12090_v61, %v12090_v61 }
 0x38e   :  { %v12515_v25 = vpop.f32.mrf.mxu1  ;;  %v5044_v4 = vadd.f32 %v5043_v18, %v4653_v15  ;;  %v11441_v18 = vld [vmem:[#allocation2 + $0xa64] ss:$8 sps:$4 sm:$0xff]  }
 0x38f   :  { %v12510_v41 = vpop.f32.mrf.mxu0  ;;  %v4256_v27 = vadd.f32 %v4255_v42, %v12070_v46  ;;  %3910 = vmatprep.mubr.bf16.mxu1 %v11441_v18 }
 0x390   :  { %19189 = vst [vmem:[#allocation249_spill] sm:$0xff] %v12510_v41  ;;  %v3714_v22 = vpop.f32.mrf.mxu1  ;;  %v5045_v50 = vadd.f32 %v5044_v4, %v4654_v11 }
 0x391   :  { %v3186_v63 = vpop.f32.mrf.mxu0  ;;  %v4257_v54 = vadd.f32 %v4256_v27, %v12080_v33  ;;  %v11439_v22 = vld [vmem:[#allocation2 + $0xa60] ss:$8 sps:$4 sm:$0xff]   ;;  %v4658_v27 = vmul.f32 %v12110_v19, %v12110_v19 }
 0x392   :  { %v12525_v63 = vpop.f32.mrf.mxu1  ;;  %v5046_v6 = vadd.f32 %v5045_v50, %v4655_v49  ;;  %3911 = vmatmul.mubr.bf16.gmra.mxu1 %v11439_v22  ;;  %v4661_v22 = vmul.f32 %v12140_v55, %v12140_v55 }
 0x393   :  { %v12520_v34 = vpop.f32.mrf.mxu0  ;;  %19191 = vst [vmem:[#allocation251_spill] sm:$0xff] %v12525_v63  ;;  %v4258_v15 = vadd.f32 %v4257_v54, %v12090_v61  ;;  %v4659_v54 = vmul.f32 %v12120_v9, %v12120_v9 }
 0x394   :  { %19190 = vst [vmem:[#allocation250_spill] sm:$0xff] %v12520_v34  ;;  %v3717_v46 = vpop.f32.mrf.mxu1  ;;  %v5047_v11 = vadd.f32 %v5046_v6, %v4656_v17 }
 0x395   :  { %v3189_v31 = vpop.f32.mrf.mxu0  ;;  %v4259_v4 = vadd.f32 %v4258_v15, %v12100_v44  ;;  %v4660_v15 = vmul.f32 %v12130_v43, %v12130_v43 }
 0x396   :  { %v12535_v33 = vpop.f32.mrf.mxu1  ;;  %v5048_v49 = vadd.f32 %v5047_v11, %v4657_v56  ;;  %v11444_v11 = vld [vmem:[#allocation2 + $0xa74] ss:$8 sps:$4 sm:$0xff]  }
 0x397   :  { %v12530_v42 = vpop.f32.mrf.mxu0  ;;  %v4260_v50 = vadd.f32 %v4259_v4, %v12110_v19  ;;  %3918 = vmatprep.mubr.bf16.mxu1 %v11444_v11 }
 0x398   :  { %19192 = vst [vmem:[#allocation252_spill] sm:$0xff] %v12530_v42  ;;  %v3722_v46 = vpop.f32.mrf.mxu1  ;;  %v5049_v6 = vadd.f32 %v5048_v49, %v4658_v27 }
 0x399   :  { %v3194_v31 = vpop.f32.mrf.mxu0  ;;  %v4261_v17 = vadd.f32 %v4260_v50, %v12120_v9  ;;  %v11442_v46 = vld [vmem:[#allocation2 + $0xa70] ss:$8 sps:$4 sm:$0xff]   ;;  %v4662_v50 = vmul.f32 %v12150_v1, %v12150_v1 }
 0x39a   :  { %v12545_v31 = vpop.f32.mrf.mxu1  ;;  %v5050_v44 = vadd.f32 %v5049_v6, %v4659_v54  ;;  %3919 = vmatmul.mubr.bf16.gmra.mxu1 %v11442_v46  ;;  %v4665_v46 = vmul.f32 %v12180_v8, %v12180_v8 }
 0x39b   :  { %v12540_v61 = vpop.f32.mrf.mxu0  ;;  %19194 = vst [vmem:[#allocation254_spill] sm:$0xff] %v12545_v31  ;;  %v4262_v56 = vadd.f32 %v4261_v17, %v12130_v43  ;;  %v4663_v17 = vmul.f32 %v12160_v51, %v12160_v51 }
 0x39c   :  { %19193 = vst [vmem:[#allocation253_spill] sm:$0xff] %v12540_v61  ;;  %v3725_v19 = vpop.f32.mrf.mxu1  ;;  %v5051_v27 = vadd.f32 %v5050_v44, %v4660_v15 }
 0x39d   :  { %v3197_v18 = vpop.f32.mrf.mxu0  ;;  %v4263_v49 = vadd.f32 %v4262_v56, %v12140_v55  ;;  %v4664_v56 = vmul.f32 %v12170_v32, %v12170_v32 }
 0x39e   :  { %v12555_v9 = vpop.f32.mrf.mxu1  ;;  %v5052_v54 = vadd.f32 %v5051_v27, %v4661_v22  ;;  %v11447_v27 = vld [vmem:[#allocation2 + $0xa84] ss:$8 sps:$4 sm:$0xff]  }
 0x39f   :  { %v12550_v4 = vpop.f32.mrf.mxu0  ;;  %v4264_v6 = vadd.f32 %v4263_v49, %v12150_v1  ;;  %3926 = vmatprep.mubr.bf16.mxu1 %v11447_v27 }
 0x3a0   :  { %19195 = vst [vmem:[#allocation255_spill] sm:$0xff] %v12550_v4  ;;  %v3730_v19 = vpop.f32.mrf.mxu1  ;;  %v5053_v44 = vadd.f32 %v5052_v54, %v4662_v50 }
 0x3a1   :  { %v3202_v18 = vpop.f32.mrf.mxu0  ;;  %v4265_v15 = vadd.f32 %v4264_v6, %v12160_v51  ;;  %v11445_v19 = vld [vmem:[#allocation2 + $0xa80] ss:$8 sps:$4 sm:$0xff]   ;;  %v4666_v6 = vmul.f32 %v12190_v62, %v12190_v62 }
 0x3a2   :  { %v12565_v18 = vpop.f32.mrf.mxu1  ;;  %v5054_v55 = vadd.f32 %v5053_v44, %v4663_v17  ;;  %3927 = vmatmul.mubr.bf16.gmra.mxu1 %v11445_v19  ;;  %v4669_v19 = vmul.f32 %v12220_v37, %v12220_v37 }
 0x3a3   :  { %v12560_v43 = vpop.f32.mrf.mxu0  ;;  %19197 = vst [vmem:[#allocation257_spill] sm:$0xff] %v12565_v18  ;;  %v4266_v22 = vadd.f32 %v4265_v15, %v12170_v32  ;;  %v4667_v15 = vmul.f32 %v12200_v13, %v12200_v13 }
 0x3a4   :  { %19196 = vst [vmem:[#allocation256_spill] sm:$0xff] %v12560_v43  ;;  %v3733_v1 = vpop.f32.mrf.mxu1  ;;  %v5055_v50 = vadd.f32 %v5054_v55, %v4664_v56 }
 0x3a5   :  { %v3205_v11 = vpop.f32.mrf.mxu0  ;;  %v4267_v54 = vadd.f32 %v4266_v22, %v12180_v8  ;;  %v4668_v22 = vmul.f32 %v12210_v39, %v12210_v39 }
 0x3a6   :  { %v12575_v51 = vpop.f32.mrf.mxu1  ;;  %v5056_v17 = vadd.f32 %v5055_v50, %v4665_v46  ;;  %v11450_v50 = vld [vmem:[#allocation2 + $0xa94] ss:$8 sps:$4 sm:$0xff]  }
 0x3a7   :  { %v12570_v49 = vpop.f32.mrf.mxu0  ;;  %v4268_v44 = vadd.f32 %v4267_v54, %v12190_v62  ;;  %3934 = vmatprep.mubr.bf16.mxu1 %v11450_v50 }
 0x3a8   :  { %19198 = vst [vmem:[#allocation258_spill] sm:$0xff] %v12570_v49  ;;  %v3738_v1 = vpop.f32.mrf.mxu1  ;;  %v5057_v55 = vadd.f32 %v5056_v17, %v4666_v6 }
 0x3a9   :  { %v3210_v11 = vpop.f32.mrf.mxu0  ;;  %v4269_v56 = vadd.f32 %v4268_v44, %v12200_v13  ;;  %v11448_v1 = vld [vmem:[#allocation2 + $0xa90] ss:$8 sps:$4 sm:$0xff]   ;;  %v4670_v44 = vmul.f32 %v12230_v3, %v12230_v3 }
 0x3aa   :  { %v12585_v11 = vpop.f32.mrf.mxu1  ;;  %v5058_v8 = vadd.f32 %v5057_v55, %v4667_v15  ;;  %3935 = vmatmul.mubr.bf16.gmra.mxu1 %v11448_v1  ;;  %v4673_v1 = vmul.f32 %v12260_v28, %v12260_v28 }
 0x3ab   :  { %v12580_v32 = vpop.f32.mrf.mxu0  ;;  %19200 = vst [vmem:[#allocation260_spill] sm:$0xff] %v12585_v11  ;;  %v4270_v46 = vadd.f32 %v4269_v56, %v12210_v39  ;;  %v4671_v56 = vmul.f32 %v12240_v16, %v12240_v16 }
 0x3ac   :  { %19199 = vst [vmem:[#allocation259_spill] sm:$0xff] %v12580_v32  ;;  %v3741_v62 = vpop.f32.mrf.mxu1  ;;  %v5059_v6 = vadd.f32 %v5058_v8, %v4668_v22 }
 0x3ad   :  { %v3213_v27 = vpop.f32.mrf.mxu0  ;;  %v4271_v17 = vadd.f32 %v4270_v46, %v12220_v37  ;;  %v4672_v46 = vmul.f32 %v12250_v38, %v12250_v38 }
 0x3ae   :  { %v12595_v13 = vpop.f32.mrf.mxu1  ;;  %v5060_v15 = vadd.f32 %v5059_v6, %v4669_v19  ;;  %v11453_v6 = vld [vmem:[#allocation2 + $0xaa4] ss:$8 sps:$4 sm:$0xff]  }
 0x3af   :  { %v12590_v54 = vpop.f32.mrf.mxu0  ;;  %19202 = vst [vmem:[#allocation262_spill] sm:$0xff] %v12595_v13  ;;  %v4272_v55 = vadd.f32 %v4271_v17, %v12230_v3  ;;  %3942 = vmatprep.mubr.bf16.mxu1 %v11453_v6 }
 0x3b0   :  { %19201 = vst [vmem:[#allocation261_spill] sm:$0xff] %v12590_v54  ;;  %v3746_v62 = vpop.f32.mrf.mxu1  ;;  %v5061_v8 = vadd.f32 %v5060_v15, %v4670_v44 }
 0x3b1   :  { %v3218_v27 = vpop.f32.mrf.mxu0  ;;  %v4273_v22 = vadd.f32 %v4272_v55, %v12240_v16  ;;  %v11451_v62 = vld [vmem:[#allocation2 + $0xaa0] ss:$8 sps:$4 sm:$0xff]   ;;  %v4674_v55 = vmul.f32 %v12270_v5, %v12270_v5 }
 0x3b2   :  { %v12605_v27 = vpop.f32.mrf.mxu1  ;;  %v5062_v37 = vadd.f32 %v5061_v8, %v4671_v56  ;;  %3943 = vmatmul.mubr.bf16.gmra.mxu1 %v11451_v62  ;;  %v4677_v62 = vmul.f32 %v12300_v53, %v12300_v53 }
 0x3b3   :  { %v12600_v39 = vpop.f32.mrf.mxu0  ;;  %19204 = vst [vmem:[#allocation264_spill] sm:$0xff] %v12605_v27  ;;  %v4274_v19 = vadd.f32 %v4273_v22, %v12250_v38  ;;  %v4675_v22 = vmul.f32 %v12280_v40, %v12280_v40 }
 0x3b4   :  { %19203 = vst [vmem:[#allocation263_spill] sm:$0xff] %v12600_v39  ;;  %v3749_v3 = vpop.f32.mrf.mxu1  ;;  %v5063_v44 = vadd.f32 %v5062_v37, %v4672_v46 }
 0x3b5   :  { %v3221_v50 = vpop.f32.mrf.mxu0  ;;  %v4275_v15 = vadd.f32 %v4274_v19, %v12260_v28  ;;  %v4676_v19 = vmul.f32 %v12290_v47, %v12290_v47 }
 0x3b6   :  { %v12615_v16 = vpop.f32.mrf.mxu1  ;;  %v5064_v56 = vadd.f32 %v5063_v44, %v4673_v1  ;;  %v11456_v44 = vld [vmem:[#allocation2 + $0xab4] ss:$8 sps:$4 sm:$0xff]  }
 0x3b7   :  { %v12610_v17 = vpop.f32.mrf.mxu0  ;;  %v4276_v8 = vadd.f32 %v4275_v15, %v12270_v5  ;;  %3950 = vmatprep.mubr.bf16.mxu1 %v11456_v44 }
 0x3b8   :  { %19205 = vst [vmem:[#allocation265_spill] sm:$0xff] %v12610_v17  ;;  %v3754_v3 = vpop.f32.mrf.mxu1  ;;  %v5065_v37 = vadd.f32 %v5064_v56, %v4674_v55 }
 0x3b9   :  { %v3226_v50 = vpop.f32.mrf.mxu0  ;;  %v4277_v46 = vadd.f32 %v4276_v8, %v12280_v40  ;;  %v11454_v3 = vld [vmem:[#allocation2 + $0xab0] ss:$8 sps:$4 sm:$0xff]   ;;  %v4678_v8 = vmul.f32 %v12310_v23, %v12310_v23 }
 0x3ba   :  { %v12625_v50 = vpop.f32.mrf.mxu1  ;;  %v5066_v28 = vadd.f32 %v5065_v37, %v4675_v22  ;;  %3951 = vmatmul.mubr.bf16.gmra.mxu1 %v11454_v3  ;;  %v4681_v3 = vmul.f32 %v12340_v20, %v12340_v20 }
 0x3bb   :  { %v12620_v38 = vpop.f32.mrf.mxu0  ;;  %19207 = vst [vmem:[#allocation267_spill] sm:$0xff] %v12625_v50  ;;  %v4278_v1 = vadd.f32 %v4277_v46, %v12290_v47  ;;  %v4679_v46 = vmul.f32 %v12320_v7, %v12320_v7 }
 0x3bc   :  { %19206 = vst [vmem:[#allocation266_spill] sm:$0xff] %v12620_v38  ;;  %v3757_v5 = vpop.f32.mrf.mxu1  ;;  %v5067_v55 = vadd.f32 %v5066_v28, %v4676_v19 }
 0x3bd   :  { %v3229_v6 = vpop.f32.mrf.mxu0  ;;  %v4279_v56 = vadd.f32 %v4278_v1, %v12300_v53  ;;  %v4680_v1 = vmul.f32 %v12330_v0, %v12330_v0 }
 0x3be   :  { %v12635_v40 = vpop.f32.mrf.mxu1  ;;  %v5068_v22 = vadd.f32 %v5067_v55, %v4677_v62  ;;  %v11459_v55 = vld [vmem:[#allocation2 + $0xac4] ss:$8 sps:$4 sm:$0xff]  }
 0x3bf   :  { %v12630_v15 = vpop.f32.mrf.mxu0  ;;  %v4280_v37 = vadd.f32 %v4279_v56, %v12310_v23  ;;  %3958 = vmatprep.mubr.bf16.mxu1 %v11459_v55 }
 0x3c0   :  { %19208 = vst [vmem:[#allocation268_spill] sm:$0xff] %v12630_v15  ;;  %v3762_v5 = vpop.f32.mrf.mxu1  ;;  %v5069_v28 = vadd.f32 %v5068_v22, %v4678_v8 }
 0x3c1   :  { %v3234_v6 = vpop.f32.mrf.mxu0  ;;  %v4281_v19 = vadd.f32 %v4280_v37, %v12320_v7  ;;  %v11457_v5 = vld [vmem:[#allocation2 + $0xac0] ss:$8 sps:$4 sm:$0xff]   ;;  %v4682_v37 = vmul.f32 %v12350_v48, %v12350_v48 }
 0x3c2   :  { %v12645_v6 = vpop.f32.mrf.mxu1  ;;  %v5070_v53 = vadd.f32 %v5069_v28, %v4679_v46  ;;  %3959 = vmatmul.mubr.bf16.gmra.mxu1 %v11457_v5  ;;  %v4685_v5 = vmul.f32 %v12380_v58, %v12380_v58 }
 0x3c3   :  { %v12640_v47 = vpop.f32.mrf.mxu0  ;;  %19210 = vst [vmem:[#allocation270_spill] sm:$0xff] %v12645_v6  ;;  %v4282_v62 = vadd.f32 %v4281_v19, %v12330_v0  ;;  %v4683_v19 = vmul.f32 %v12360_v29, %v12360_v29 }
 0x3c4   :  { %19209 = vst [vmem:[#allocation269_spill] sm:$0xff] %v12640_v47  ;;  %v3765_v23 = vpop.f32.mrf.mxu1  ;;  %v5071_v8 = vadd.f32 %v5070_v53, %v4680_v1 }
 0x3c5   :  { %v3237_v44 = vpop.f32.mrf.mxu0  ;;  %v4283_v22 = vadd.f32 %v4282_v62, %v12340_v20  ;;  %v4684_v62 = vmul.f32 %v12370_v36, %v12370_v36 }
 0x3c6   :  { %v12655_v7 = vpop.f32.mrf.mxu1  ;;  %v5072_v46 = vadd.f32 %v5071_v8, %v4681_v3  ;;  %v11462_v8 = vld [vmem:[#allocation2 + $0xad4] ss:$8 sps:$4 sm:$0xff]  }
 0x3c7   :  { %v12650_v56 = vpop.f32.mrf.mxu0  ;;  %v4284_v28 = vadd.f32 %v4283_v22, %v12350_v48  ;;  %3966 = vmatprep.mubr.bf16.mxu1 %v11462_v8 }
 0x3c8   :  { %19211 = vst [vmem:[#allocation271_spill] sm:$0xff] %v12650_v56  ;;  %v3770_v23 = vpop.f32.mrf.mxu1  ;;  %v5073_v53 = vadd.f32 %v5072_v46, %v4682_v37 }
 0x3c9   :  { %v3242_v44 = vpop.f32.mrf.mxu0  ;;  %v4285_v1 = vadd.f32 %v4284_v28, %v12360_v29  ;;  %v11460_v23 = vld [vmem:[#allocation2 + $0xad0] ss:$8 sps:$4 sm:$0xff]   ;;  %v4686_v28 = vmul.f32 %v12390_v24, %v12390_v24 }
 0x3ca   :  { %v12665_v44 = vpop.f32.mrf.mxu1  ;;  %v5074_v20 = vadd.f32 %v5073_v53, %v4683_v19  ;;  %3967 = vmatmul.mubr.bf16.gmra.mxu1 %v11460_v23  ;;  %v4689_v23 = vmul.f32 %v12420_v52, %v12420_v52 }
 0x3cb   :  { %v12660_v0 = vpop.f32.mrf.mxu0  ;;  %19213 = vst [vmem:[#allocation273_spill] sm:$0xff] %v12665_v44  ;;  %v4286_v3 = vadd.f32 %v4285_v1, %v12370_v36  ;;  %v4687_v1 = vmul.f32 %v12400_v21, %v12400_v21 }
 0x3cc   :  { %19212 = vst [vmem:[#allocation272_spill] sm:$0xff] %v12660_v0  ;;  %v3773_v48 = vpop.f32.mrf.mxu1  ;;  %v5075_v37 = vadd.f32 %v5074_v20, %v4684_v62 }
 0x3cd   :  { %v3245_v55 = vpop.f32.mrf.mxu0  ;;  %v4287_v46 = vadd.f32 %v4286_v3, %v12380_v58  ;;  %v4688_v3 = vmul.f32 %v12410_v12, %v12410_v12 }
 0x3ce   :  { %v12675_v29 = vpop.f32.mrf.mxu1  ;;  %v5076_v19 = vadd.f32 %v5075_v37, %v4685_v5  ;;  %v11465_v37 = vld [vmem:[#allocation2 + $0xae4] ss:$8 sps:$4 sm:$0xff]  }
 0x3cf   :  { %v12670_v22 = vpop.f32.mrf.mxu0  ;;  %19215 = vst [vmem:[#allocation275_spill] sm:$0xff] %v12675_v29  ;;  %v4288_v53 = vadd.f32 %v4287_v46, %v12390_v24  ;;  %3974 = vmatprep.mubr.bf16.mxu1 %v11465_v37 }
 0x3d0   :  { %19214 = vst [vmem:[#allocation274_spill] sm:$0xff] %v12670_v22  ;;  %v3778_v48 = vpop.f32.mrf.mxu1  ;;  %v5077_v20 = vadd.f32 %v5076_v19, %v4686_v28 }
 0x3d1   :  { %v3250_v55 = vpop.f32.mrf.mxu0  ;;  %v4289_v62 = vadd.f32 %v4288_v53, %v12400_v21  ;;  %v11463_v48 = vld [vmem:[#allocation2 + $0xae0] ss:$8 sps:$4 sm:$0xff]  }
 0x3d2   :  { %v12685_v55 = vpop.f32.mrf.mxu1  ;;  %v5078_v58 = vadd.f32 %v5077_v20, %v4687_v1  ;;  %v19219_v53 = vld [vmem:[#allocation235_spill] sm:$0xff]  ;;  %3975 = vmatmul.mubr.bf16.gmra.mxu1 %v11463_v48  ;;  %v4693_v48 = vmul.f32 %v12460_v2, %v12460_v2 }
 0x3d3   :  { %v12680_v36 = vpop.f32.mrf.mxu0  ;;  %19217 = vst [vmem:[#allocation277_spill] sm:$0xff] %v12685_v55  ;;  %v4290_v5 = vadd.f32 %v4289_v62, %v12410_v12  ;;  %v4690_v21 = vmul.f32 %v19219_v53, %v19219_v53  ;;  %v19220_v62 = vld [vmem:[#allocation237_spill] sm:$0xff] }
 0x3d4   :  { %19216 = vst [vmem:[#allocation276_spill] sm:$0xff] %v12680_v36  ;;  %v3781_v24 = vpop.f32.mrf.mxu1  ;;  %v5079_v28 = vadd.f32 %v5078_v58, %v4688_v3  ;;  %v4691_v12 = vmul.f32 %v19220_v62, %v19220_v62 }
 0x3d5   :  { %v3253_v8 = vpop.f32.mrf.mxu0  ;;  %v4291_v19 = vadd.f32 %v4290_v5, %v12420_v52  ;;  %v4692_v5 = vmul.f32 %v12450_v26, %v12450_v26 }
 0x3d6   :  { %v12695_v55 = vpop.f32.mrf.mxu1  ;;  %v5080_v1 = vadd.f32 %v5079_v28, %v4689_v23  ;;  %v11468_v28 = vld [vmem:[#allocation2 + $0xaf4] ss:$8 sps:$4 sm:$0xff]  }
 0x3d7   :  { %v12690_v46 = vpop.f32.mrf.mxu0  ;;  %v4292_v20 = vadd.f32 %v4291_v19, %v19219_v53  ;;  %3982 = vmatprep.mubr.bf16.mxu1 %v11468_v28 }
 0x3d8   :  { %19218 = vst [vmem:[#allocation278_spill] sm:$0xff] %v12690_v46  ;;  %v3786_v24 = vpop.f32.mrf.mxu1  ;;  %v5081_v58 = vadd.f32 %v5080_v1, %v4690_v21 }
 0x3d9   :  { %v3258_v8 = vpop.f32.mrf.mxu0  ;;  %v4293_v3 = vadd.f32 %v4292_v20, %v19220_v62  ;;  %v11466_v24 = vld [vmem:[#allocation2 + $0xaf0] ss:$8 sps:$4 sm:$0xff]   ;;  %v4694_v20 = vmul.f32 %v12470_v30, %v12470_v30 }
 0x3da   :  { %v12705_v8 = vpop.f32.mrf.mxu1  ;;  %v5082_v52 = vadd.f32 %v5081_v58, %v4691_v12  ;;  %3983 = vmatmul.mubr.bf16.gmra.mxu1 %v11466_v24  ;;  %v4697_v24 = vmul.f32 %v12500_v10, %v12500_v10 }
 0x3db   :  { %v12700_v29 = vpop.f32.mrf.mxu0  ;;  %19222 = vst [vmem:[#allocation280_spill] sm:$0xff] %v12705_v8  ;;  %v4294_v23 = vadd.f32 %v4293_v3, %v12450_v26  ;;  %v4695_v3 = vmul.f32 %v12480_v35, %v12480_v35 }
 0x3dc   :  { %19221 = vst [vmem:[#allocation279_spill] sm:$0xff] %v12700_v29  ;;  %v3789_v53 = vpop.f32.mrf.mxu1  ;;  %v5083_v21 = vadd.f32 %v5082_v52, %v4692_v5 }
 0x3dd   :  { %v3261_v37 = vpop.f32.mrf.mxu0  ;;  %v4295_v1 = vadd.f32 %v4294_v23, %v12460_v2  ;;  %v4696_v23 = vmul.f32 %v12490_v60, %v12490_v60 }
 0x3de   :  { %v12715_v62 = vpop.f32.mrf.mxu1  ;;  %v5084_v12 = vadd.f32 %v5083_v21, %v4693_v48  ;;  %v11471_v21 = vld [vmem:[#allocation2 + $0xb04] ss:$8 sps:$4 sm:$0xff]  }
 0x3df   :  { %v12710_v19 = vpop.f32.mrf.mxu0  ;;  %v4296_v58 = vadd.f32 %v4295_v1, %v12470_v30  ;;  %3990 = vmatprep.mubr.bf16.mxu1 %v11471_v21 }
 0x3e0   :  { %19223 = vst [vmem:[#allocation281_spill] sm:$0xff] %v12710_v19  ;;  %v3794_v53 = vpop.f32.mrf.mxu1  ;;  %v5085_v52 = vadd.f32 %v5084_v12, %v4694_v20 }
 0x3e1   :  { %v3266_v37 = vpop.f32.mrf.mxu0  ;;  %v4297_v5 = vadd.f32 %v4296_v58, %v12480_v35  ;;  %v11469_v53 = vld [vmem:[#allocation2 + $0xb00] ss:$8 sps:$4 sm:$0xff]   ;;  %v4698_v58 = vmul.f32 %v12510_v41, %v12510_v41 }
 0x3e2   :  { %v12725_v37 = vpop.f32.mrf.mxu1  ;;  %v5086_v2 = vadd.f32 %v5085_v52, %v4695_v3  ;;  %3991 = vmatmul.mubr.bf16.gmra.mxu1 %v11469_v53  ;;  %v4701_v53 = vmul.f32 %v12540_v61, %v12540_v61 }
 0x3e3   :  { %v12720_v26 = vpop.f32.mrf.mxu0  ;;  %19225 = vst [vmem:[#allocation283_spill] sm:$0xff] %v12725_v37  ;;  %v4298_v48 = vadd.f32 %v4297_v5, %v12490_v60  ;;  %v4699_v5 = vmul.f32 %v12520_v34, %v12520_v34 }
 0x3e4   :  { %19224 = vst [vmem:[#allocation282_spill] sm:$0xff] %v12720_v26  ;;  %v3797_v30 = vpop.f32.mrf.mxu1  ;;  %v5087_v20 = vadd.f32 %v5086_v2, %v4696_v23 }
 0x3e5   :  { %v3269_v28 = vpop.f32.mrf.mxu0  ;;  %v4299_v12 = vadd.f32 %v4298_v48, %v12500_v10  ;;  %v4700_v48 = vmul.f32 %v12530_v42, %v12530_v42 }
 0x3e6   :  { %v12735_v35 = vpop.f32.mrf.mxu1  ;;  %v5088_v3 = vadd.f32 %v5087_v20, %v4697_v24  ;;  %v11474_v20 = vld [vmem:[#allocation2 + $0xb14] ss:$8 sps:$4 sm:$0xff]  }
 0x3e7   :  { %v12730_v1 = vpop.f32.mrf.mxu0  ;;  %v4300_v52 = vadd.f32 %v4299_v12, %v12510_v41  ;;  %3998 = vmatprep.mubr.bf16.mxu1 %v11474_v20 }
 0x3e8   :  { %19226 = vst [vmem:[#allocation284_spill] sm:$0xff] %v12730_v1  ;;  %v3802_v30 = vpop.f32.mrf.mxu1  ;;  %v5089_v2 = vadd.f32 %v5088_v3, %v4698_v58 }
 0x3e9   :  { %v3274_v28 = vpop.f32.mrf.mxu0  ;;  %v4301_v23 = vadd.f32 %v4300_v52, %v12520_v34  ;;  %v11472_v30 = vld [vmem:[#allocation2 + $0xb10] ss:$8 sps:$4 sm:$0xff]   ;;  %v4702_v52 = vmul.f32 %v12550_v4, %v12550_v4 }
 0x3ea   :  { %v12745_v28 = vpop.f32.mrf.mxu1  ;;  %v5090_v10 = vadd.f32 %v5089_v2, %v4699_v5  ;;  %3999 = vmatmul.mubr.bf16.gmra.mxu1 %v11472_v30  ;;  %v4705_v30 = vmul.f32 %v12580_v32, %v12580_v32 }
 0x3eb   :  { %v12740_v60 = vpop.f32.mrf.mxu0  ;;  %19228 = vst [vmem:[#allocation286_spill] sm:$0xff] %v12745_v28  ;;  %v4302_v24 = vadd.f32 %v4301_v23, %v12530_v42  ;;  %v4703_v23 = vmul.f32 %v12560_v43, %v12560_v43 }
 0x3ec   :  { %19227 = vst [vmem:[#allocation285_spill] sm:$0xff] %v12740_v60  ;;  %v3805_v41 = vpop.f32.mrf.mxu1  ;;  %v5091_v58 = vadd.f32 %v5090_v10, %v4700_v48 }
 0x3ed   :  { %v3277_v21 = vpop.f32.mrf.mxu0  ;;  %v4303_v3 = vadd.f32 %v4302_v24, %v12540_v61  ;;  %v4704_v24 = vmul.f32 %v12570_v49, %v12570_v49 }
 0x3ee   :  { %v12755_v34 = vpop.f32.mrf.mxu1  ;;  %v5092_v5 = vadd.f32 %v5091_v58, %v4701_v53  ;;  %v11477_v58 = vld [vmem:[#allocation2 + $0xb24] ss:$8 sps:$4 sm:$0xff]  }
 0x3ef   :  { %v12750_v12 = vpop.f32.mrf.mxu0  ;;  %v4304_v2 = vadd.f32 %v4303_v3, %v12550_v4  ;;  %4006 = vmatprep.mubr.bf16.mxu1 %v11477_v58 }
 0x3f0   :  { %19229 = vst [vmem:[#allocation287_spill] sm:$0xff] %v12750_v12  ;;  %v3810_v41 = vpop.f32.mrf.mxu1  ;;  %v5093_v10 = vadd.f32 %v5092_v5, %v4702_v52 }
 0x3f1   :  { %v3282_v21 = vpop.f32.mrf.mxu0  ;;  %v4305_v48 = vadd.f32 %v4304_v2, %v12560_v43  ;;  %v11475_v41 = vld [vmem:[#allocation2 + $0xb20] ss:$8 sps:$4 sm:$0xff]   ;;  %v4706_v2 = vmul.f32 %v12590_v54, %v12590_v54 }
 0x3f2   :  { %v12765_v21 = vpop.f32.mrf.mxu1  ;;  %v5094_v61 = vadd.f32 %v5093_v10, %v4703_v23  ;;  %4007 = vmatmul.mubr.bf16.gmra.mxu1 %v11475_v41  ;;  %v4709_v41 = vmul.f32 %v12620_v38, %v12620_v38 }
 0x3f3   :  { %v12760_v42 = vpop.f32.mrf.mxu0  ;;  %19231 = vst [vmem:[#allocation289_spill] sm:$0xff] %v12765_v21  ;;  %v4306_v53 = vadd.f32 %v4305_v48, %v12570_v49  ;;  %v4707_v48 = vmul.f32 %v12600_v39, %v12600_v39 }
 0x3f4   :  { %19230 = vst [vmem:[#allocation288_spill] sm:$0xff] %v12760_v42  ;;  %v3813_v4 = vpop.f32.mrf.mxu1  ;;  %v5095_v52 = vadd.f32 %v5094_v61, %v4704_v24 }
 0x3f5   :  { %v3285_v20 = vpop.f32.mrf.mxu0  ;;  %v4307_v5 = vadd.f32 %v4306_v53, %v12580_v32  ;;  %v4708_v53 = vmul.f32 %v12610_v17, %v12610_v17 }
 0x3f6   :  { %v12775_v43 = vpop.f32.mrf.mxu1  ;;  %v5096_v23 = vadd.f32 %v5095_v52, %v4705_v30  ;;  %v11480_v52 = vld [vmem:[#allocation2 + $0xb34] ss:$8 sps:$4 sm:$0xff]  }
 0x3f7   :  { %v12770_v3 = vpop.f32.mrf.mxu0  ;;  %v4308_v10 = vadd.f32 %v4307_v5, %v12590_v54  ;;  %4014 = vmatprep.mubr.bf16.mxu1 %v11480_v52 }
 0x3f8   :  { %19232 = vst [vmem:[#allocation290_spill] sm:$0xff] %v12770_v3  ;;  %v3818_v4 = vpop.f32.mrf.mxu1  ;;  %v5097_v61 = vadd.f32 %v5096_v23, %v4706_v2 }
 0x3f9   :  { %v3290_v20 = vpop.f32.mrf.mxu0  ;;  %v4309_v24 = vadd.f32 %v4308_v10, %v12600_v39  ;;  %v11478_v4 = vld [vmem:[#allocation2 + $0xb30] ss:$8 sps:$4 sm:$0xff]   ;;  %v4710_v10 = vmul.f32 %v12630_v15, %v12630_v15 }
 0x3fa   :  { %v12785_v20 = vpop.f32.mrf.mxu1  ;;  %v5098_v32 = vadd.f32 %v5097_v61, %v4707_v48  ;;  %4015 = vmatmul.mubr.bf16.gmra.mxu1 %v11478_v4  ;;  %v4713_v4 = vmul.f32 %v12660_v0, %v12660_v0 }
 0x3fb   :  { %v12780_v49 = vpop.f32.mrf.mxu0  ;;  %19234 = vst [vmem:[#allocation292_spill] sm:$0xff] %v12785_v20  ;;  %v4310_v30 = vadd.f32 %v4309_v24, %v12610_v17  ;;  %v4711_v24 = vmul.f32 %v12640_v47, %v12640_v47 }
 0x3fc   :  { %19233 = vst [vmem:[#allocation291_spill] sm:$0xff] %v12780_v49  ;;  %v3821_v54 = vpop.f32.mrf.mxu1  ;;  %v5099_v2 = vadd.f32 %v5098_v32, %v4708_v53 }
 0x3fd   :  { %v3293_v58 = vpop.f32.mrf.mxu0  ;;  %v4311_v23 = vadd.f32 %v4310_v30, %v12620_v38  ;;  %v4712_v30 = vmul.f32 %v12650_v56, %v12650_v56 }
 0x3fe   :  { %v12795_v39 = vpop.f32.mrf.mxu1  ;;  %v5100_v48 = vadd.f32 %v5099_v2, %v4709_v41  ;;  %v11483_v2 = vld [vmem:[#allocation2 + $0xb44] ss:$8 sps:$4 sm:$0xff]  }
 0x3ff   :  { %v12790_v5 = vpop.f32.mrf.mxu0  ;;  %v4312_v61 = vadd.f32 %v4311_v23, %v12630_v15  ;;  %4022 = vmatprep.mubr.bf16.mxu1 %v11483_v2 }
 0x400   :  { %19235 = vst [vmem:[#allocation293_spill] sm:$0xff] %v12790_v5  ;;  %v3826_v54 = vpop.f32.mrf.mxu1  ;;  %v5101_v32 = vadd.f32 %v5100_v48, %v4710_v10 }
 0x401   :  { %v3298_v58 = vpop.f32.mrf.mxu0  ;;  %v4313_v53 = vadd.f32 %v4312_v61, %v12640_v47  ;;  %v11481_v54 = vld [vmem:[#allocation2 + $0xb40] ss:$8 sps:$4 sm:$0xff]   ;;  %v4714_v61 = vmul.f32 %v12670_v22, %v12670_v22 }
 0x402   :  { %v12805_v58 = vpop.f32.mrf.mxu1  ;;  %v5102_v38 = vadd.f32 %v5101_v32, %v4711_v24  ;;  %4023 = vmatmul.mubr.bf16.gmra.mxu1 %v11481_v54  ;;  %v4717_v54 = vmul.f32 %v12700_v29, %v12700_v29 }
 0x403   :  { %v12800_v17 = vpop.f32.mrf.mxu0  ;;  %19237 = vst [vmem:[#allocation295_spill] sm:$0xff] %v12805_v58  ;;  %v4314_v41 = vadd.f32 %v4313_v53, %v12650_v56  ;;  %v4715_v53 = vmul.f32 %v12680_v36, %v12680_v36 }
 0x404   :  { %19236 = vst [vmem:[#allocation294_spill] sm:$0xff] %v12800_v17  ;;  %v3829_v15 = vpop.f32.mrf.mxu1  ;;  %v5103_v10 = vadd.f32 %v5102_v38, %v4712_v30 }
 0x405   :  { %v3301_v52 = vpop.f32.mrf.mxu0  ;;  %v4315_v48 = vadd.f32 %v4314_v41, %v12660_v0  ;;  %v4716_v41 = vmul.f32 %v12690_v46, %v12690_v46 }
 0x406   :  { %v12815_v47 = vpop.f32.mrf.mxu1  ;;  %v5104_v24 = vadd.f32 %v5103_v10, %v4713_v4  ;;  %v11486_v10 = vld [vmem:[#allocation2 + $0xb54] ss:$8 sps:$4 sm:$0xff]  }
 0x407   :  { %v12810_v23 = vpop.f32.mrf.mxu0  ;;  %v4316_v32 = vadd.f32 %v4315_v48, %v12670_v22  ;;  %4030 = vmatprep.mubr.bf16.mxu1 %v11486_v10 }
 0x408   :  { %19238 = vst [vmem:[#allocation296_spill] sm:$0xff] %v12810_v23  ;;  %v3834_v15 = vpop.f32.mrf.mxu1  ;;  %v5105_v38 = vadd.f32 %v5104_v24, %v4714_v61 }
 0x409   :  { %v3306_v52 = vpop.f32.mrf.mxu0  ;;  %v4317_v30 = vadd.f32 %v4316_v32, %v12680_v36  ;;  %v11484_v15 = vld [vmem:[#allocation2 + $0xb50] ss:$8 sps:$4 sm:$0xff]   ;;  %v4718_v32 = vmul.f32 %v12710_v19, %v12710_v19 }
 0x40a   :  { %v12825_v52 = vpop.f32.mrf.mxu1  ;;  %v5106_v0 = vadd.f32 %v5105_v38, %v4715_v53  ;;  %4031 = vmatmul.mubr.bf16.gmra.mxu1 %v11484_v15  ;;  %v4721_v15 = vmul.f32 %v12740_v60, %v12740_v60 }
 0x40b   :  { %v12820_v56 = vpop.f32.mrf.mxu0  ;;  %19240 = vst [vmem:[#allocation298_spill] sm:$0xff] %v12825_v52  ;;  %v4318_v4 = vadd.f32 %v4317_v30, %v12690_v46  ;;  %v4719_v30 = vmul.f32 %v12720_v26, %v12720_v26 }
 0x40c   :  { %19239 = vst [vmem:[#allocation297_spill] sm:$0xff] %v12820_v56  ;;  %v3837_v22 = vpop.f32.mrf.mxu1  ;;  %v5107_v61 = vadd.f32 %v5106_v0, %v4716_v41 }
 0x40d   :  { %v3309_v2 = vpop.f32.mrf.mxu0  ;;  %v4319_v24 = vadd.f32 %v4318_v4, %v12700_v29  ;;  %v4720_v4 = vmul.f32 %v12730_v1, %v12730_v1 }
 0x40e   :  { %v12835_v36 = vpop.f32.mrf.mxu1  ;;  %v5108_v53 = vadd.f32 %v5107_v61, %v4717_v54  ;;  %v11489_v61 = vld [vmem:[#allocation2 + $0xb64] ss:$8 sps:$4 sm:$0xff]  }
 0x40f   :  { %v12830_v48 = vpop.f32.mrf.mxu0  ;;  %v4320_v38 = vadd.f32 %v4319_v24, %v12710_v19  ;;  %4038 = vmatprep.mubr.bf16.mxu1 %v11489_v61 }
 0x410   :  { %19241 = vst [vmem:[#allocation299_spill] sm:$0xff] %v12830_v48  ;;  %v3842_v22 = vpop.f32.mrf.mxu1  ;;  %v5109_v0 = vadd.f32 %v5108_v53, %v4718_v32 }
 0x411   :  { %v3314_v2 = vpop.f32.mrf.mxu0  ;;  %v4321_v41 = vadd.f32 %v4320_v38, %v12720_v26  ;;  %v11487_v22 = vld [vmem:[#allocation2 + $0xb60] ss:$8 sps:$4 sm:$0xff]   ;;  %v4722_v38 = vmul.f32 %v12750_v12, %v12750_v12 }
 0x412   :  { %v12845_v2 = vpop.f32.mrf.mxu1  ;;  %v5110_v29 = vadd.f32 %v5109_v0, %v4719_v30  ;;  %4039 = vmatmul.mubr.bf16.gmra.mxu1 %v11487_v22  ;;  %v4725_v22 = vmul.f32 %v12780_v49, %v12780_v49 }
 0x413   :  { %v12840_v46 = vpop.f32.mrf.mxu0  ;;  %19243 = vst [vmem:[#allocation301_spill] sm:$0xff] %v12845_v2  ;;  %v4322_v54 = vadd.f32 %v4321_v41, %v12730_v1  ;;  %v4723_v41 = vmul.f32 %v12760_v42, %v12760_v42 }
 0x414   :  { %19242 = vst [vmem:[#allocation300_spill] sm:$0xff] %v12840_v46  ;;  %v3845_v19 = vpop.f32.mrf.mxu1  ;;  %v5111_v32 = vadd.f32 %v5110_v29, %v4720_v4 }
 0x415   :  { %v3317_v10 = vpop.f32.mrf.mxu0  ;;  %v4323_v53 = vadd.f32 %v4322_v54, %v12740_v60  ;;  %v4724_v54 = vmul.f32 %v12770_v3, %v12770_v3 }
 0x416   :  { %v12855_v26 = vpop.f32.mrf.mxu1  ;;  %v5112_v30 = vadd.f32 %v5111_v32, %v4721_v15  ;;  %v11492_v32 = vld [vmem:[#allocation2 + $0xb74] ss:$8 sps:$4 sm:$0xff]  }
 0x417   :  { %v12850_v24 = vpop.f32.mrf.mxu0  ;;  %v4324_v0 = vadd.f32 %v4323_v53, %v12750_v12  ;;  %4046 = vmatprep.mubr.bf16.mxu1 %v11492_v32 }
 0x418   :  { %19244 = vst [vmem:[#allocation302_spill] sm:$0xff] %v12850_v24  ;;  %v3850_v19 = vpop.f32.mrf.mxu1  ;;  %v5113_v29 = vadd.f32 %v5112_v30, %v4722_v38 }
 0x419   :  { %v3322_v10 = vpop.f32.mrf.mxu0  ;;  %v4325_v4 = vadd.f32 %v4324_v0, %v12760_v42  ;;  %v11490_v19 = vld [vmem:[#allocation2 + $0xb70] ss:$8 sps:$4 sm:$0xff]   ;;  %v4726_v0 = vmul.f32 %v12790_v5, %v12790_v5 }
 0x41a   :  { %v12865_v10 = vpop.f32.mrf.mxu1  ;;  %v5114_v60 = vadd.f32 %v5113_v29, %v4723_v41  ;;  %4047 = vmatmul.mubr.bf16.gmra.mxu1 %v11490_v19  ;;  %v4729_v19 = vmul.f32 %v12820_v56, %v12820_v56 }
 0x41b   :  { %v12860_v1 = vpop.f32.mrf.mxu0  ;;  %19246 = vst [vmem:[#allocation304_spill] sm:$0xff] %v12865_v10  ;;  %v4326_v15 = vadd.f32 %v4325_v4, %v12770_v3  ;;  %v4727_v4 = vmul.f32 %v12800_v17, %v12800_v17 }
 0x41c   :  { %19245 = vst [vmem:[#allocation303_spill] sm:$0xff] %v12860_v1  ;;  %v3853_v12 = vpop.f32.mrf.mxu1  ;;  %v5115_v38 = vadd.f32 %v5114_v60, %v4724_v54 }
 0x41d   :  { %v3325_v61 = vpop.f32.mrf.mxu0  ;;  %v4327_v30 = vadd.f32 %v4326_v15, %v12780_v49  ;;  %v4728_v15 = vmul.f32 %v12810_v23, %v12810_v23 }
 0x41e   :  { %v12875_v42 = vpop.f32.mrf.mxu1  ;;  %v5116_v41 = vadd.f32 %v5115_v38, %v4725_v22  ;;  %v11495_v38 = vld [vmem:[#allocation2 + $0xb84] ss:$8 sps:$4 sm:$0xff]  }
 0x41f   :  { %v12870_v53 = vpop.f32.mrf.mxu0  ;;  %19248 = vst [vmem:[#allocation306_spill] sm:$0xff] %v12875_v42  ;;  %v4328_v29 = vadd.f32 %v4327_v30, %v12790_v5  ;;  %4054 = vmatprep.mubr.bf16.mxu1 %v11495_v38 }
 0x420   :  { %19247 = vst [vmem:[#allocation305_spill] sm:$0xff] %v12870_v53  ;;  %v3858_v12 = vpop.f32.mrf.mxu1  ;;  %v5117_v60 = vadd.f32 %v5116_v41, %v4726_v0 }
 0x421   :  { %v3330_v61 = vpop.f32.mrf.mxu0  ;;  %v4329_v54 = vadd.f32 %v4328_v29, %v12800_v17  ;;  %v11493_v12 = vld [vmem:[#allocation2 + $0xb80] ss:$8 sps:$4 sm:$0xff]   ;;  %v4730_v29 = vmul.f32 %v12830_v48, %v12830_v48 }
 0x422   :  { %v12885_v61 = vpop.f32.mrf.mxu1  ;;  %v5118_v49 = vadd.f32 %v5117_v60, %v4727_v4  ;;  %4055 = vmatmul.mubr.bf16.gmra.mxu1 %v11493_v12  ;;  %v4733_v12 = vmul.f32 %v12860_v1, %v12860_v1 }
 0x423   :  { %v12880_v3 = vpop.f32.mrf.mxu0  ;;  %19250 = vst [vmem:[#allocation308_spill] sm:$0xff] %v12885_v61  ;;  %v4330_v22 = vadd.f32 %v4329_v54, %v12810_v23  ;;  %v4731_v54 = vmul.f32 %v12840_v46, %v12840_v46 }
 0x424   :  { %19249 = vst [vmem:[#allocation307_spill] sm:$0xff] %v12880_v3  ;;  %v3861_v5 = vpop.f32.mrf.mxu1  ;;  %v5119_v0 = vadd.f32 %v5118_v49, %v4728_v15 }
 0x425   :  { %v3333_v32 = vpop.f32.mrf.mxu0  ;;  %v4331_v41 = vadd.f32 %v4330_v22, %v12820_v56  ;;  %v4732_v22 = vmul.f32 %v12850_v24, %v12850_v24 }
 0x426   :  { %v12895_v17 = vpop.f32.mrf.mxu1  ;;  %v5120_v4 = vadd.f32 %v5119_v0, %v4729_v19  ;;  %v11498_v0 = vld [vmem:[#allocation2 + $0xb94] ss:$8 sps:$4 sm:$0xff]  }
 0x427   :  { %v12890_v30 = vpop.f32.mrf.mxu0  ;;  %19252 = vst [vmem:[#allocation310_spill] sm:$0xff] %v12895_v17  ;;  %v4332_v60 = vadd.f32 %v4331_v41, %v12830_v48  ;;  %4062 = vmatprep.mubr.bf16.mxu1 %v11498_v0 }
 0x428   :  { %19251 = vst [vmem:[#allocation309_spill] sm:$0xff] %v12890_v30  ;;  %v3866_v5 = vpop.f32.mrf.mxu1  ;;  %v5121_v49 = vadd.f32 %v5120_v4, %v4730_v29 }
 0x429   :  { %v3338_v32 = vpop.f32.mrf.mxu0  ;;  %v4333_v15 = vadd.f32 %v4332_v60, %v12840_v46  ;;  %v11496_v5 = vld [vmem:[#allocation2 + $0xb90] ss:$8 sps:$4 sm:$0xff]   ;;  %v4734_v60 = vmul.f32 %v12870_v53, %v12870_v53 }
 0x42a   :  { %v12905_v32 = vpop.f32.mrf.mxu1  ;;  %v5122_v56 = vadd.f32 %v5121_v49, %v4731_v54  ;;  %4063 = vmatmul.mubr.bf16.gmra.mxu1 %v11496_v5 }
 0x42b   :  { %v12900_v23 = vpop.f32.mrf.mxu0  ;;  %19254 = vst [vmem:[#allocation312_spill] sm:$0xff] %v12905_v32  ;;  %v4334_v19 = vadd.f32 %v4333_v15, %v12850_v24  ;;  %v4735_v15 = vmul.f32 %v12880_v3, %v12880_v3 }
 0x42c   :  { %19253 = vst [vmem:[#allocation311_spill] sm:$0xff] %v12900_v23  ;;  %v3869_v48 = vpop.f32.mrf.mxu1  ;;  %v5123_v29 = vadd.f32 %v5122_v56, %v4732_v22  ;;  %v4737_v5 = vmul.f32 %v12900_v23, %v12900_v23 }
 0x42d   :  { %v3341_v38 = vpop.f32.mrf.mxu0  ;;  %v4335_v4 = vadd.f32 %v4334_v19, %v12860_v1  ;;  %v4736_v19 = vmul.f32 %v12890_v30, %v12890_v30 }
 0x42e   :  { %v12915_v46 = vpop.f32.mrf.mxu1  ;;  %v5124_v54 = vadd.f32 %v5123_v29, %v4733_v12  ;;  %v11501_v29 = vld [vmem:[#allocation2 + $0xba4] ss:$8 sps:$4 sm:$0xff]  }
 0x42f   :  { %v12910_v41 = vpop.f32.mrf.mxu0  ;;  %19256 = vst [vmem:[#allocation314_spill] sm:$0xff] %v12915_v46  ;;  %v4336_v49 = vadd.f32 %v4335_v4, %v12870_v53  ;;  %4070 = vmatprep.mubr.bf16.mxu1 %v11501_v29 }
 0x430   :  { %19255 = vst [vmem:[#allocation313_spill] sm:$0xff] %v12910_v41  ;;  %v3874_v48 = vpop.f32.mrf.mxu1  ;;  %v5125_v56 = vadd.f32 %v5124_v54, %v4734_v60 }
 0x431   :  { %v3346_v38 = vpop.f32.mrf.mxu0  ;;  %v4337_v22 = vadd.f32 %v4336_v49, %v12880_v3  ;;  %v11499_v48 = vld [vmem:[#allocation2 + $0xba0] ss:$8 sps:$4 sm:$0xff]   ;;  %v4738_v49 = vmul.f32 %v12910_v41, %v12910_v41 }
 0x432   :  { %v12925_v38 = vpop.f32.mrf.mxu1  ;;  %v5126_v1 = vadd.f32 %v5125_v56, %v4735_v15  ;;  %4071 = vmatmul.mubr.bf16.gmra.mxu1 %v11499_v48 }
 0x433   :  { %v12920_v24 = vpop.f32.mrf.mxu0  ;;  %19258 = vst [vmem:[#allocation316_spill] sm:$0xff] %v12925_v38  ;;  %v4338_v12 = vadd.f32 %v4337_v22, %v12890_v30 }
 0x434   :  { %19257 = vst [vmem:[#allocation315_spill] sm:$0xff] %v12920_v24  ;;  %v3877_v53 = vpop.f32.mrf.mxu1  ;;  %v5127_v60 = vadd.f32 %v5126_v1, %v4736_v19  ;;  %v4739_v22 = vmul.f32 %v12920_v24, %v12920_v24 }
 0x435   :  { %v3349_v0 = vpop.f32.mrf.mxu0  ;;  %v4339_v54 = vadd.f32 %v4338_v12, %v12900_v23 }
 0x436   :  { %v12935_v3 = vpop.f32.mrf.mxu1  ;;  %v5128_v15 = vadd.f32 %v5127_v60, %v4737_v5  ;;  %v11504_v60 = vld [vmem:[#allocation2 + $0xbb4] ss:$8 sps:$4 sm:$0xff]  }
 0x437   :  { %v12930_v4 = vpop.f32.mrf.mxu0  ;;  %19260 = vst [vmem:[#allocation318_spill] sm:$0xff] %v12935_v3  ;;  %v4340_v56 = vadd.f32 %v4339_v54, %v12910_v41  ;;  %4078 = vmatprep.mubr.bf16.mxu1 %v11504_v60  ;;  %v19267_v60 = vld [vmem:[#allocation80_spill] sm:$0xff] }
 0x438   :  { %19259 = vst [vmem:[#allocation317_spill] sm:$0xff] %v12930_v4  ;;  %v3882_v53 = vpop.f32.mrf.mxu1  ;;  %v5129_v1 = vadd.f32 %v5128_v15, %v4738_v49  ;;  %v4740_v12 = vmul.f32 %v12930_v4, %v12930_v4 }
 0x439   :  { %v3354_v0 = vpop.f32.mrf.mxu0  ;;  %v4341_v19 = vadd.f32 %v4340_v56, %v12920_v24  ;;  %v11502_v53 = vld [vmem:[#allocation2 + $0xbb0] ss:$8 sps:$4 sm:$0xff]  }
 0x43a   :  { %v12945_v0 = vpop.f32.mrf.mxu1  ;;  %v5130_v23 = vadd.f32 %v5129_v1, %v4739_v22  ;;  %4079 = vmatmul.mubr.bf16.gmra.mxu1 %v11502_v53 }
 0x43b   :  { %v12940_v30 = vpop.f32.mrf.mxu0  ;;  %19262 = vst [vmem:[#allocation320_spill] sm:$0xff] %v12945_v0  ;;  %v4342_v5 = vadd.f32 %v4341_v19, %v12930_v4 }
 0x43c   :  { %19261 = vst [vmem:[#allocation319_spill] sm:$0xff] %v12940_v30  ;;  %v4741_v48 = vmul.f32 %v12940_v30, %v12940_v30  ;;  %v3885_v41 = vpop.f32.mrf.mxu1  ;;  %v5131_v49 = vadd.f32 %v5130_v23, %v4740_v12 }
 0x43d   :  { %v3357_v29 = vpop.f32.mrf.mxu0  ;;  %v4343_v15 = vadd.f32 %v4342_v5, %v12940_v30  ;;  %v19268_v30 = vld [vmem:[#allocation82_spill] sm:$0xff] }
 0x43e   :  { %v12955_v24 = vpop.f32.mrf.mxu1  ;;  %v5132_v22 = vadd.f32 %v5131_v49, %v4741_v48  ;;  %v11507_v49 = vld [vmem:[#allocation2 + $0xbc4] ss:$8 sps:$4 sm:$0xff]  }
 0x43f   :  { %v12950_v54 = vpop.f32.mrf.mxu0  ;;  %19264 = vst [vmem:[#allocation322_spill] sm:$0xff] %v12955_v24  ;;  %4086 = vmatprep.mubr.bf16.mxu1 %v11507_v49  ;;  %v11510_v49 = vld [vmem:[#allocation2 + $0xbd4] ss:$8 sps:$4 sm:$0xff]  }
 0x440   :  { %19263 = vst [vmem:[#allocation321_spill] sm:$0xff] %v12950_v54  ;;  %v4742_v56 = vmul.f32 %v12950_v54, %v12950_v54  ;;  %v4344_v1 = vadd.f32 %v4343_v15, %v12950_v54  ;;  %v3890_v4 = vpop.f32.mrf.mxu1  ;;  %v11505_v54 = vld [vmem:[#allocation2 + $0xbc0] ss:$8 sps:$4 sm:$0xff]  }
 0x441   :  { %v3362_v29 = vpop.f32.mrf.mxu0  ;;  %v4745_v4 = vmul.f32 %v19268_v30, %v19268_v30 }
 0x442   :  { %v5133_v0 = vadd.f32 %v5132_v22, %v4742_v56  ;;  %v12963_v5 = vpop.f32.mrf.mxu1  ;;  %v4744_v29 = vmul.f32 %v19267_v60, %v19267_v60  ;;  %4087 = vmatmul.mubr.bf16.gmra.mxu1 %v11505_v54 }
 0x443   :  { %v12958_v19 = vpop.f32.mrf.mxu0  ;;  %19266 = vst [vmem:[#allocation324_spill] sm:$0xff] %v12963_v5  ;;  %4094 = vmatprep.mubr.bf16.mxu1 %v11510_v49  ;;  %v11513_v49 = vld [vmem:[#allocation2 + $0xbe4] ss:$8 sps:$4 sm:$0xff]  }
 0x444   :  { %19265 = vst [vmem:[#allocation323_spill] sm:$0xff] %v12958_v19  ;;  %v4345_v41 = vadd.f32 %v4344_v1, %v12958_v19  ;;  %v4743_v23 = vmul.f32 %v12958_v19, %v12958_v19  ;;  %v3893_v15 = vpop.f32.mrf.mxu1 }
 0x445   :  { %v3365_v12 = vpop.f32.mrf.mxu0 }
 0x446   :  { %v4346_v53 = vadd.f32 %v4345_v41, %v19267_v60  ;;  %v5134_v48 = vadd.f32 %v5133_v0, %v4743_v23  ;;  %v12971_v1 = vpop.f32.mrf.mxu1  ;;  %v19270_v12 = vld [vmem:[#allocation84_spill] sm:$0xff]  ;;  %v19271_v23 = vld [vmem:[#allocation86_spill] sm:$0xff] }
 0x447   :  { %19269 = vst [vmem:[#allocation325_spill] sm:$0xff] %v12971_v1  ;;  %v4746_v19 = vmul.f32 %v19270_v12, %v19270_v12  ;;  %v4747_v15 = vmul.f32 %v19271_v23, %v19271_v23  ;;  %v11508_v1 = vld [vmem:[#allocation2 + $0xbd0] ss:$8 sps:$4 sm:$0xff]  }
 0x448   :  { %v4347_v56 = vadd.f32 %v4346_v53, %v19268_v30  ;;  %v5135_v22 = vadd.f32 %v5134_v48, %v4744_v29  ;;  %v3898_v0 = vpop.f32.mrf.mxu1  ;;  %v19273_v29 = vld [vmem:[#allocation88_spill] sm:$0xff] }
 0x449   :  { %v4748_v53 = vmul.f32 %v19273_v29, %v19273_v29 }
 0x44a   :  { %v4348_v5 = vadd.f32 %v4347_v56, %v19270_v12  ;;  %v5136_v41 = vadd.f32 %v5135_v22, %v4745_v4  ;;  %v12979_v3 = vpop.f32.mrf.mxu1  ;;  %v19274_v56 = vld [vmem:[#allocation90_spill] sm:$0xff]  ;;  %4095 = vmatmul.mubr.bf16.gmra.mxu1 %v11508_v1 }
 0x44b   :  { %19272 = vst [vmem:[#allocation326_spill] sm:$0xff] %v12979_v3  ;;  %v4749_v4 = vmul.f32 %v19274_v56, %v19274_v56  ;;  %4102 = vmatprep.mubr.bf16.mxu1 %v11513_v49  ;;  %v11516_v49 = vld [vmem:[#allocation2 + $0xbf4] ss:$8 sps:$4 sm:$0xff]  }
 0x44c   :  { %v4349_v60 = vadd.f32 %v4348_v5, %v19271_v23  ;;  %v5137_v24 = vadd.f32 %v5136_v41, %v4746_v19  ;;  %v3901_v30 = vpop.f32.mrf.mxu1  ;;  %v19276_v19 = vld [vmem:[#allocation92_spill] sm:$0xff] }
 0x44d   :  { %v4750_v41 = vmul.f32 %v19276_v19, %v19276_v19 }
 0x44e   :  { %v4350_v54 = vadd.f32 %v4349_v60, %v19273_v29  ;;  %v5138_v48 = vadd.f32 %v5137_v24, %v4747_v15  ;;  %v12987_v5 = vpop.f32.mrf.mxu1  ;;  %v19277_v15 = vld [vmem:[#allocation94_spill] sm:$0xff] }
 0x44f   :  { %19275 = vst [vmem:[#allocation327_spill] sm:$0xff] %v12987_v5  ;;  %v4751_v30 = vmul.f32 %v19277_v15, %v19277_v15  ;;  %v11511_v5 = vld [vmem:[#allocation2 + $0xbe0] ss:$8 sps:$4 sm:$0xff]  }
 0x450   :  { %v4351_v22 = vadd.f32 %v4350_v54, %v19274_v56  ;;  %v5139_v0 = vadd.f32 %v5138_v48, %v4748_v53  ;;  %v3906_v24 = vpop.f32.mrf.mxu1  ;;  %v19279_v53 = vld [vmem:[#allocation96_spill] sm:$0xff] }
 0x451   :  { %v4752_v54 = vmul.f32 %v19279_v53, %v19279_v53 }
 0x452   :  { %v4352_v23 = vadd.f32 %v4351_v22, %v19276_v19  ;;  %v5140_v60 = vadd.f32 %v5139_v0, %v4749_v4  ;;  %v12995_v3 = vpop.f32.mrf.mxu1  ;;  %v19280_v22 = vld [vmem:[#allocation98_spill] sm:$0xff]  ;;  %4103 = vmatmul.mubr.bf16.gmra.mxu1 %v11511_v5 }
 0x453   :  { %19278 = vst [vmem:[#allocation328_spill] sm:$0xff] %v12995_v3  ;;  %v4753_v4 = vmul.f32 %v19280_v22, %v19280_v22  ;;  %4110 = vmatprep.mubr.bf16.mxu1 %v11516_v49  ;;  %v11519_v49 = vld [vmem:[#allocation2 + $0xc04] ss:$8 sps:$4 sm:$0xff]  }
 0x454   :  { %v4353_v29 = vadd.f32 %v4352_v23, %v19277_v15  ;;  %v5141_v12 = vadd.f32 %v5140_v60, %v4750_v41  ;;  %v3909_v56 = vpop.f32.mrf.mxu1  ;;  %v19282_v41 = vld [vmem:[#allocation100_spill] sm:$0xff] }
 0x455   :  { %v4754_v60 = vmul.f32 %v19282_v41, %v19282_v41 }
 0x456   :  { %v4354_v1 = vadd.f32 %v4353_v29, %v19279_v53  ;;  %v5142_v48 = vadd.f32 %v5141_v12, %v4751_v30  ;;  %v13003_v23 = vpop.f32.mrf.mxu1  ;;  %v19283_v30 = vld [vmem:[#allocation102_spill] sm:$0xff] }
 0x457   :  { %19281 = vst [vmem:[#allocation329_spill] sm:$0xff] %v13003_v23  ;;  %v4755_v56 = vmul.f32 %v19283_v30, %v19283_v30  ;;  %v11514_v23 = vld [vmem:[#allocation2 + $0xbf0] ss:$8 sps:$4 sm:$0xff]  }
 0x458   :  { %v4355_v0 = vadd.f32 %v4354_v1, %v19280_v22  ;;  %v5143_v24 = vadd.f32 %v5142_v48, %v4752_v54  ;;  %v3914_v12 = vpop.f32.mrf.mxu1  ;;  %v19285_v54 = vld [vmem:[#allocation104_spill] sm:$0xff] }
 0x459   :  { %v4756_v1 = vmul.f32 %v19285_v54, %v19285_v54 }
 0x45a   :  { %v4356_v15 = vadd.f32 %v4355_v0, %v19282_v41  ;;  %v5144_v29 = vadd.f32 %v5143_v24, %v4753_v4  ;;  %v13011_v3 = vpop.f32.mrf.mxu1  ;;  %v19286_v0 = vld [vmem:[#allocation106_spill] sm:$0xff]  ;;  %4111 = vmatmul.mubr.bf16.gmra.mxu1 %v11514_v23 }
 0x45b   :  { %19284 = vst [vmem:[#allocation330_spill] sm:$0xff] %v13011_v3  ;;  %v4757_v4 = vmul.f32 %v19286_v0, %v19286_v0  ;;  %4118 = vmatprep.mubr.bf16.mxu1 %v11519_v49  ;;  %v11522_v49 = vld [vmem:[#allocation2 + $0xc14] ss:$8 sps:$4 sm:$0xff]  }
 0x45c   :  { %v4357_v53 = vadd.f32 %v4356_v15, %v19283_v30  ;;  %v5145_v19 = vadd.f32 %v5144_v29, %v4754_v60  ;;  %v3917_v22 = vpop.f32.mrf.mxu1  ;;  %v19288_v60 = vld [vmem:[#allocation108_spill] sm:$0xff] }
 0x45d   :  { %v4758_v29 = vmul.f32 %v19288_v60, %v19288_v60 }
 0x45e   :  { %v4358_v5 = vadd.f32 %v4357_v53, %v19285_v54  ;;  %v5146_v48 = vadd.f32 %v5145_v19, %v4755_v56  ;;  %v13019_v15 = vpop.f32.mrf.mxu1  ;;  %v19289_v56 = vld [vmem:[#allocation110_spill] sm:$0xff] }
 0x45f   :  { %19287 = vst [vmem:[#allocation331_spill] sm:$0xff] %v13019_v15  ;;  %v4759_v22 = vmul.f32 %v19289_v56, %v19289_v56  ;;  %v11517_v15 = vld [vmem:[#allocation2 + $0xc00] ss:$8 sps:$4 sm:$0xff]  }
 0x460   :  { %v4359_v24 = vadd.f32 %v4358_v5, %v19286_v0  ;;  %v5147_v12 = vadd.f32 %v5146_v48, %v4756_v1  ;;  %v3922_v19 = vpop.f32.mrf.mxu1  ;;  %v19291_v1 = vld [vmem:[#allocation112_spill] sm:$0xff] }
 0x461   :  { %v4760_v5 = vmul.f32 %v19291_v1, %v19291_v1 }
 0x462   :  { %v4360_v30 = vadd.f32 %v4359_v24, %v19288_v60  ;;  %v5148_v53 = vadd.f32 %v5147_v12, %v4757_v4  ;;  %v13027_v3 = vpop.f32.mrf.mxu1  ;;  %v19292_v24 = vld [vmem:[#allocation114_spill] sm:$0xff]  ;;  %4119 = vmatmul.mubr.bf16.gmra.mxu1 %v11517_v15 }
 0x463   :  { %19290 = vst [vmem:[#allocation332_spill] sm:$0xff] %v13027_v3  ;;  %v4761_v4 = vmul.f32 %v19292_v24, %v19292_v24  ;;  %4126 = vmatprep.mubr.bf16.mxu1 %v11522_v49  ;;  %v11525_v49 = vld [vmem:[#allocation2 + $0xc24] ss:$8 sps:$4 sm:$0xff]  }
 0x464   :  { %v4361_v54 = vadd.f32 %v4360_v30, %v19289_v56  ;;  %v5149_v41 = vadd.f32 %v5148_v53, %v4758_v29  ;;  %v3925_v0 = vpop.f32.mrf.mxu1  ;;  %v19294_v29 = vld [vmem:[#allocation116_spill] sm:$0xff] }
 0x465   :  { %v4762_v53 = vmul.f32 %v19294_v29, %v19294_v29 }
 0x466   :  { %v4362_v23 = vadd.f32 %v4361_v54, %v19291_v1  ;;  %v5150_v48 = vadd.f32 %v5149_v41, %v4759_v22  ;;  %v13035_v30 = vpop.f32.mrf.mxu1  ;;  %v19295_v22 = vld [vmem:[#allocation118_spill] sm:$0xff] }
 0x467   :  { %19293 = vst [vmem:[#allocation333_spill] sm:$0xff] %v13035_v30  ;;  %v4763_v0 = vmul.f32 %v19295_v22, %v19295_v22  ;;  %v11520_v30 = vld [vmem:[#allocation2 + $0xc10] ss:$8 sps:$4 sm:$0xff]  }
 0x468   :  { %v4363_v12 = vadd.f32 %v4362_v23, %v19292_v24  ;;  %v5151_v19 = vadd.f32 %v5150_v48, %v4760_v5  ;;  %v3930_v41 = vpop.f32.mrf.mxu1  ;;  %v19297_v5 = vld [vmem:[#allocation120_spill] sm:$0xff] }
 0x469   :  { %v4764_v23 = vmul.f32 %v19297_v5, %v19297_v5 }
 0x46a   :  { %v4364_v56 = vadd.f32 %v4363_v12, %v19294_v29  ;;  %v5152_v54 = vadd.f32 %v5151_v19, %v4761_v4  ;;  %v13043_v3 = vpop.f32.mrf.mxu1  ;;  %v19298_v12 = vld [vmem:[#allocation122_spill] sm:$0xff]  ;;  %4127 = vmatmul.mubr.bf16.gmra.mxu1 %v11520_v30 }
 0x46b   :  { %19296 = vst [vmem:[#allocation334_spill] sm:$0xff] %v13043_v3  ;;  %v4765_v4 = vmul.f32 %v19298_v12, %v19298_v12  ;;  %4134 = vmatprep.mubr.bf16.mxu1 %v11525_v49  ;;  %v11528_v49 = vld [vmem:[#allocation2 + $0xc34] ss:$8 sps:$4 sm:$0xff]  }
 0x46c   :  { %v4365_v1 = vadd.f32 %v4364_v56, %v19295_v22  ;;  %v5153_v60 = vadd.f32 %v5152_v54, %v4762_v53  ;;  %v3933_v24 = vpop.f32.mrf.mxu1  ;;  %v19300_v53 = vld [vmem:[#allocation124_spill] sm:$0xff] }
 0x46d   :  { %v4766_v54 = vmul.f32 %v19300_v53, %v19300_v53 }
 0x46e   :  { %v4366_v15 = vadd.f32 %v4365_v1, %v19297_v5  ;;  %v5154_v48 = vadd.f32 %v5153_v60, %v4763_v0  ;;  %v13051_v56 = vpop.f32.mrf.mxu1  ;;  %v19301_v0 = vld [vmem:[#allocation126_spill] sm:$0xff] }
 0x46f   :  { %19299 = vst [vmem:[#allocation335_spill] sm:$0xff] %v13051_v56  ;;  %v4767_v24 = vmul.f32 %v19301_v0, %v19301_v0  ;;  %v11523_v56 = vld [vmem:[#allocation2 + $0xc20] ss:$8 sps:$4 sm:$0xff]  }
 0x470   :  { %v4367_v19 = vadd.f32 %v4366_v15, %v19298_v12  ;;  %v5155_v41 = vadd.f32 %v5154_v48, %v4764_v23  ;;  %v3938_v60 = vpop.f32.mrf.mxu1  ;;  %v19303_v23 = vld [vmem:[#allocation128_spill] sm:$0xff] }
 0x471   :  { %v4768_v15 = vmul.f32 %v19303_v23, %v19303_v23 }
 0x472   :  { %v4368_v22 = vadd.f32 %v4367_v19, %v19300_v53  ;;  %v5156_v1 = vadd.f32 %v5155_v41, %v4765_v4  ;;  %v13059_v3 = vpop.f32.mrf.mxu1  ;;  %v19304_v19 = vld [vmem:[#allocation130_spill] sm:$0xff]  ;;  %4135 = vmatmul.mubr.bf16.gmra.mxu1 %v11523_v56 }
 0x473   :  { %19302 = vst [vmem:[#allocation336_spill] sm:$0xff] %v13059_v3  ;;  %v4769_v4 = vmul.f32 %v19304_v19, %v19304_v19  ;;  %4142 = vmatprep.mubr.bf16.mxu1 %v11528_v49 }
 0x474   :  { %v4369_v5 = vadd.f32 %v4368_v22, %v19301_v0  ;;  %v5157_v29 = vadd.f32 %v5156_v1, %v4766_v54  ;;  %v3941_v12 = vpop.f32.mrf.mxu1  ;;  %v19306_v54 = vld [vmem:[#allocation132_spill] sm:$0xff] }
 0x475   :  { %v4770_v1 = vmul.f32 %v19306_v54, %v19306_v54 }
 0x476   :  { %v4370_v30 = vadd.f32 %v4369_v5, %v19303_v23  ;;  %v5158_v48 = vadd.f32 %v5157_v29, %v4767_v24  ;;  %v13067_v22 = vpop.f32.mrf.mxu1  ;;  %v19307_v24 = vld [vmem:[#allocation134_spill] sm:$0xff] }
 0x477   :  { %19305 = vst [vmem:[#allocation337_spill] sm:$0xff] %v13067_v22  ;;  %v4771_v12 = vmul.f32 %v19307_v24, %v19307_v24  ;;  %v11526_v22 = vld [vmem:[#allocation2 + $0xc30] ss:$8 sps:$4 sm:$0xff]  }
 0x478   :  { %v4371_v41 = vadd.f32 %v4370_v30, %v19304_v19  ;;  %v5159_v60 = vadd.f32 %v5158_v48, %v4768_v15  ;;  %v3946_v29 = vpop.f32.mrf.mxu1  ;;  %v19309_v15 = vld [vmem:[#allocation136_spill] sm:$0xff] }
 0x479   :  { %v4772_v30 = vmul.f32 %v19309_v15, %v19309_v15 }
 0x47a   :  { %v4372_v0 = vadd.f32 %v4371_v41, %v19306_v54  ;;  %v5160_v5 = vadd.f32 %v5159_v60, %v4769_v4  ;;  %v13075_v3 = vpop.f32.mrf.mxu1  ;;  %v19310_v41 = vld [vmem:[#allocation138_spill] sm:$0xff]  ;;  %4143 = vmatmul.mubr.bf16.gmra.mxu1 %v11526_v22 }
 0x47b   :  { %19308 = vst [vmem:[#allocation338_spill] sm:$0xff] %v13075_v3  ;;  %v4773_v4 = vmul.f32 %v19310_v41, %v19310_v41 }
 0x47c   :  { %v4373_v23 = vadd.f32 %v4372_v0, %v19307_v24  ;;  %v5161_v53 = vadd.f32 %v5160_v5, %v4770_v1  ;;  %v3949_v19 = vpop.f32.mrf.mxu1  ;;  %v19312_v1 = vld [vmem:[#allocation140_spill] sm:$0xff] }
 0x47d   :  { %v4774_v5 = vmul.f32 %v19312_v1, %v19312_v1 }
 0x47e   :  { %v4374_v56 = vadd.f32 %v4373_v23, %v19309_v15  ;;  %v5162_v48 = vadd.f32 %v5161_v53, %v4771_v12  ;;  %v13083_v0 = vpop.f32.mrf.mxu1  ;;  %v19313_v12 = vld [vmem:[#allocation142_spill] sm:$0xff] }
 0x47f   :  { %19311 = vst [vmem:[#allocation339_spill] sm:$0xff] %v13083_v0  ;;  %v4775_v19 = vmul.f32 %v19313_v12, %v19313_v12 }
 0x480   :  { %v4375_v60 = vadd.f32 %v4374_v56, %v19310_v41  ;;  %v5163_v29 = vadd.f32 %v5162_v48, %v4772_v30  ;;  %v3954_v53 = vpop.f32.mrf.mxu1  ;;  %v19315_v30 = vld [vmem:[#allocation144_spill] sm:$0xff]  ;;  %v19316_v41 = vld [vmem:[#allocation146_spill] sm:$0xff] }
 0x481   :  { %v4776_v56 = vmul.f32 %v19315_v30, %v19315_v30 }
 0x482   :  { %v4376_v24 = vadd.f32 %v4375_v60, %v19312_v1  ;;  %v5164_v23 = vadd.f32 %v5163_v29, %v4773_v4  ;;  %v13091_v3 = vpop.f32.mrf.mxu1  ;;  %v4777_v60 = vmul.f32 %v19316_v41, %v19316_v41  ;;  %v19318_v1 = vld [vmem:[#allocation148_spill] sm:$0xff] }
 0x483   :  { %19314 = vst [vmem:[#allocation340_spill] sm:$0xff] %v13091_v3  ;;  %v19319_v3 = vld [vmem:[#allocation150_spill] sm:$0xff] }
 0x484   :  { %v4377_v15 = vadd.f32 %v4376_v24, %v19313_v12  ;;  %v5165_v54 = vadd.f32 %v5164_v23, %v4774_v5  ;;  %v3957_v49 = vpop.f32.mrf.mxu1  ;;  %v4778_v24 = vmul.f32 %v19318_v1, %v19318_v1 }
 0x486   :  { %v4378_v22 = vadd.f32 %v4377_v15, %v19315_v30  ;;  %v5166_v48 = vadd.f32 %v5165_v54, %v4775_v19  ;;  %v13099_v53 = vpop.f32.mrf.mxu1  ;;  %v4779_v15 = vmul.f32 %v19319_v3, %v19319_v3  ;;  %v19321_v30 = vld [vmem:[#allocation152_spill] sm:$0xff] }
 0x487   :  { %19317 = vst [vmem:[#allocation341_spill] sm:$0xff] %v13099_v53  ;;  %v19322_v53 = vld [vmem:[#allocation154_spill] sm:$0xff] }
 0x488   :  { %v4379_v4 = vadd.f32 %v4378_v22, %v19316_v41  ;;  %v5167_v29 = vadd.f32 %v5166_v48, %v4776_v56  ;;  %v3962_v12 = vpop.f32.mrf.mxu1  ;;  %v4780_v56 = vmul.f32 %v19321_v30, %v19321_v30 }
 0x48a   :  { %v4380_v5 = vadd.f32 %v4379_v4, %v19318_v1  ;;  %v5168_v23 = vadd.f32 %v5167_v29, %v4777_v60  ;;  %v13107_v49 = vpop.f32.mrf.mxu1  ;;  %v4781_v4 = vmul.f32 %v19322_v53, %v19322_v53  ;;  %v19324_v1 = vld [vmem:[#allocation156_spill] sm:$0xff] }
 0x48b   :  { %19320 = vst [vmem:[#allocation342_spill] sm:$0xff] %v13107_v49  ;;  %v19325_v49 = vld [vmem:[#allocation158_spill] sm:$0xff] }
 0x48c   :  { %v4381_v54 = vadd.f32 %v4380_v5, %v19319_v3  ;;  %v5169_v19 = vadd.f32 %v5168_v23, %v4778_v24  ;;  %v3965_v41 = vpop.f32.mrf.mxu1  ;;  %v4782_v24 = vmul.f32 %v19324_v1, %v19324_v1 }
 0x48e   :  { %v4382_v22 = vadd.f32 %v4381_v54, %v19321_v30  ;;  %v5170_v48 = vadd.f32 %v5169_v19, %v4779_v15  ;;  %v13115_v29 = vpop.f32.mrf.mxu1  ;;  %v4783_v54 = vmul.f32 %v19325_v49, %v19325_v49  ;;  %v19327_v30 = vld [vmem:[#allocation160_spill] sm:$0xff] }
 0x48f   :  { %19323 = vst [vmem:[#allocation343_spill] sm:$0xff] %v13115_v29  ;;  %v19328_v29 = vld [vmem:[#allocation162_spill] sm:$0xff] }
 0x490   :  { %v4383_v12 = vadd.f32 %v4382_v22, %v19322_v53  ;;  %v5171_v60 = vadd.f32 %v5170_v48, %v4780_v56  ;;  %v3970_v3 = vpop.f32.mrf.mxu1  ;;  %v4784_v56 = vmul.f32 %v19327_v30, %v19327_v30 }
 0x492   :  { %v4384_v5 = vadd.f32 %v4383_v12, %v19324_v1  ;;  %v5172_v23 = vadd.f32 %v5171_v60, %v4781_v4  ;;  %v13123_v19 = vpop.f32.mrf.mxu1  ;;  %v4785_v12 = vmul.f32 %v19328_v29, %v19328_v29  ;;  %v19330_v1 = vld [vmem:[#allocation164_spill] sm:$0xff] }
 0x493   :  { %19326 = vst [vmem:[#allocation344_spill] sm:$0xff] %v13123_v19  ;;  %v19331_v19 = vld [vmem:[#allocation166_spill] sm:$0xff] }
 0x494   :  { %v4385_v41 = vadd.f32 %v4384_v5, %v19325_v49  ;;  %v5173_v15 = vadd.f32 %v5172_v23, %v4782_v24  ;;  %v3973_v53 = vpop.f32.mrf.mxu1  ;;  %v4786_v24 = vmul.f32 %v19330_v1, %v19330_v1 }
 0x496   :  { %v4386_v22 = vadd.f32 %v4385_v41, %v19327_v30  ;;  %v5174_v48 = vadd.f32 %v5173_v15, %v4783_v54  ;;  %v13131_v60 = vpop.f32.mrf.mxu1  ;;  %v4787_v41 = vmul.f32 %v19331_v19, %v19331_v19  ;;  %v19333_v30 = vld [vmem:[#allocation168_spill] sm:$0xff] }
 0x497   :  { %19329 = vst [vmem:[#allocation345_spill] sm:$0xff] %v13131_v60  ;;  %v19334_v60 = vld [vmem:[#allocation170_spill] sm:$0xff] }
 0x498   :  { %v4387_v3 = vadd.f32 %v4386_v22, %v19328_v29  ;;  %v5175_v4 = vadd.f32 %v5174_v48, %v4784_v56  ;;  %v3978_v49 = vpop.f32.mrf.mxu1  ;;  %v4788_v56 = vmul.f32 %v19333_v30, %v19333_v30 }
 0x49a   :  { %v4388_v5 = vadd.f32 %v4387_v3, %v19330_v1  ;;  %v5176_v23 = vadd.f32 %v5175_v4, %v4785_v12  ;;  %v13139_v15 = vpop.f32.mrf.mxu1  ;;  %v4789_v3 = vmul.f32 %v19334_v60, %v19334_v60  ;;  %v19336_v1 = vld [vmem:[#allocation172_spill] sm:$0xff] }
 0x49b   :  { %19332 = vst [vmem:[#allocation346_spill] sm:$0xff] %v13139_v15  ;;  %v19337_v15 = vld [vmem:[#allocation174_spill] sm:$0xff] }
 0x49c   :  { %v4389_v53 = vadd.f32 %v4388_v5, %v19331_v19  ;;  %v5177_v54 = vadd.f32 %v5176_v23, %v4786_v24  ;;  %v3981_v29 = vpop.f32.mrf.mxu1  ;;  %v4790_v24 = vmul.f32 %v19336_v1, %v19336_v1 }
 0x49e   :  { %v4390_v22 = vadd.f32 %v4389_v53, %v19333_v30  ;;  %v5178_v48 = vadd.f32 %v5177_v54, %v4787_v41  ;;  %v13147_v4 = vpop.f32.mrf.mxu1  ;;  %v4791_v53 = vmul.f32 %v19337_v15, %v19337_v15  ;;  %v19339_v30 = vld [vmem:[#allocation176_spill] sm:$0xff] }
 0x49f   :  { %19335 = vst [vmem:[#allocation347_spill] sm:$0xff] %v13147_v4  ;;  %v19340_v4 = vld [vmem:[#allocation178_spill] sm:$0xff] }
 0x4a0   :  { %v4391_v49 = vadd.f32 %v4390_v22, %v19334_v60  ;;  %v5179_v12 = vadd.f32 %v5178_v48, %v4788_v56  ;;  %v3986_v19 = vpop.f32.mrf.mxu1  ;;  %v4792_v56 = vmul.f32 %v19339_v30, %v19339_v30 }
 0x4a2   :  { %v4392_v5 = vadd.f32 %v4391_v49, %v19336_v1  ;;  %v5180_v23 = vadd.f32 %v5179_v12, %v4789_v3  ;;  %v13155_v54 = vpop.f32.mrf.mxu1  ;;  %v4793_v49 = vmul.f32 %v19340_v4, %v19340_v4  ;;  %v19342_v1 = vld [vmem:[#allocation180_spill] sm:$0xff] }
 0x4a3   :  { %19338 = vst [vmem:[#allocation348_spill] sm:$0xff] %v13155_v54  ;;  %v19343_v54 = vld [vmem:[#allocation182_spill] sm:$0xff] }
 0x4a4   :  { %v4393_v29 = vadd.f32 %v4392_v5, %v19337_v15  ;;  %v5181_v41 = vadd.f32 %v5180_v23, %v4790_v24  ;;  %v3989_v60 = vpop.f32.mrf.mxu1  ;;  %v4794_v24 = vmul.f32 %v19342_v1, %v19342_v1 }
 0x4a6   :  { %v4394_v22 = vadd.f32 %v4393_v29, %v19339_v30  ;;  %v5182_v48 = vadd.f32 %v5181_v41, %v4791_v53  ;;  %v13163_v12 = vpop.f32.mrf.mxu1  ;;  %v4795_v29 = vmul.f32 %v19343_v54, %v19343_v54  ;;  %v19345_v30 = vld [vmem:[#allocation184_spill] sm:$0xff] }
 0x4a7   :  { %19341 = vst [vmem:[#allocation349_spill] sm:$0xff] %v13163_v12  ;;  %v19346_v12 = vld [vmem:[#allocation186_spill] sm:$0xff] }
 0x4a8   :  { %v4395_v19 = vadd.f32 %v4394_v22, %v19340_v4  ;;  %v5183_v3 = vadd.f32 %v5182_v48, %v4792_v56  ;;  %v3994_v15 = vpop.f32.mrf.mxu1  ;;  %v4796_v56 = vmul.f32 %v19345_v30, %v19345_v30 }
 0x4aa   :  { %v4396_v5 = vadd.f32 %v4395_v19, %v19342_v1  ;;  %v5184_v23 = vadd.f32 %v5183_v3, %v4793_v49  ;;  %v13171_v41 = vpop.f32.mrf.mxu1  ;;  %v4797_v19 = vmul.f32 %v19346_v12, %v19346_v12  ;;  %v19348_v1 = vld [vmem:[#allocation188_spill] sm:$0xff] }
 0x4ab   :  { %19344 = vst [vmem:[#allocation350_spill] sm:$0xff] %v13171_v41  ;;  %v19349_v41 = vld [vmem:[#allocation190_spill] sm:$0xff] }
 0x4ac   :  { %v4397_v60 = vadd.f32 %v4396_v5, %v19343_v54  ;;  %v5185_v53 = vadd.f32 %v5184_v23, %v4794_v24  ;;  %v3997_v4 = vpop.f32.mrf.mxu1  ;;  %v4798_v24 = vmul.f32 %v19348_v1, %v19348_v1 }
 0x4ae   :  { %v4398_v22 = vadd.f32 %v4397_v60, %v19345_v30  ;;  %v5186_v48 = vadd.f32 %v5185_v53, %v4795_v29  ;;  %v13179_v3 = vpop.f32.mrf.mxu1  ;;  %v4799_v60 = vmul.f32 %v19349_v41, %v19349_v41  ;;  %v19351_v30 = vld [vmem:[#allocation192_spill] sm:$0xff] }
 0x4af   :  { %19347 = vst [vmem:[#allocation351_spill] sm:$0xff] %v13179_v3  ;;  %v19352_v3 = vld [vmem:[#allocation194_spill] sm:$0xff] }
 0x4b0   :  { %v4399_v15 = vadd.f32 %v4398_v22, %v19346_v12  ;;  %v5187_v49 = vadd.f32 %v5186_v48, %v4796_v56  ;;  %v4002_v54 = vpop.f32.mrf.mxu1  ;;  %v4800_v56 = vmul.f32 %v19351_v30, %v19351_v30 }
 0x4b2   :  { %v4400_v5 = vadd.f32 %v4399_v15, %v19348_v1  ;;  %v5188_v23 = vadd.f32 %v5187_v49, %v4797_v19  ;;  %v13187_v53 = vpop.f32.mrf.mxu1  ;;  %v4801_v15 = vmul.f32 %v19352_v3, %v19352_v3  ;;  %v19354_v1 = vld [vmem:[#allocation196_spill] sm:$0xff] }
 0x4b3   :  { %19350 = vst [vmem:[#allocation352_spill] sm:$0xff] %v13187_v53  ;;  %v19355_v53 = vld [vmem:[#allocation198_spill] sm:$0xff] }
 0x4b4   :  { %v4401_v4 = vadd.f32 %v4400_v5, %v19349_v41  ;;  %v5189_v29 = vadd.f32 %v5188_v23, %v4798_v24  ;;  %v4005_v12 = vpop.f32.mrf.mxu1  ;;  %v4802_v24 = vmul.f32 %v19354_v1, %v19354_v1 }
 0x4b6   :  { %v4402_v22 = vadd.f32 %v4401_v4, %v19351_v30  ;;  %v5190_v48 = vadd.f32 %v5189_v29, %v4799_v60  ;;  %v13195_v49 = vpop.f32.mrf.mxu1  ;;  %v4803_v4 = vmul.f32 %v19355_v53, %v19355_v53  ;;  %v19357_v30 = vld [vmem:[#allocation200_spill] sm:$0xff] }
 0x4b7   :  { %19353 = vst [vmem:[#allocation353_spill] sm:$0xff] %v13195_v49  ;;  %v19358_v49 = vld [vmem:[#allocation202_spill] sm:$0xff] }
 0x4b8   :  { %v4403_v54 = vadd.f32 %v4402_v22, %v19352_v3  ;;  %v5191_v19 = vadd.f32 %v5190_v48, %v4800_v56  ;;  %v4010_v41 = vpop.f32.mrf.mxu1  ;;  %v4804_v56 = vmul.f32 %v19357_v30, %v19357_v30 }
 0x4ba   :  { %v4404_v5 = vadd.f32 %v4403_v54, %v19354_v1  ;;  %v5192_v23 = vadd.f32 %v5191_v19, %v4801_v15  ;;  %v13203_v29 = vpop.f32.mrf.mxu1  ;;  %v4805_v54 = vmul.f32 %v19358_v49, %v19358_v49  ;;  %v19360_v1 = vld [vmem:[#allocation204_spill] sm:$0xff] }
 0x4bb   :  { %19356 = vst [vmem:[#allocation354_spill] sm:$0xff] %v13203_v29  ;;  %v19361_v29 = vld [vmem:[#allocation206_spill] sm:$0xff] }
 0x4bc   :  { %v4405_v12 = vadd.f32 %v4404_v5, %v19355_v53  ;;  %v5193_v60 = vadd.f32 %v5192_v23, %v4802_v24  ;;  %v4013_v3 = vpop.f32.mrf.mxu1  ;;  %v4806_v24 = vmul.f32 %v19360_v1, %v19360_v1 }
 0x4be   :  { %v4406_v22 = vadd.f32 %v4405_v12, %v19357_v30  ;;  %v5194_v48 = vadd.f32 %v5193_v60, %v4803_v4  ;;  %v13211_v19 = vpop.f32.mrf.mxu1  ;;  %v4807_v12 = vmul.f32 %v19361_v29, %v19361_v29  ;;  %v19363_v30 = vld [vmem:[#allocation208_spill] sm:$0xff] }
 0x4bf   :  { %19359 = vst [vmem:[#allocation355_spill] sm:$0xff] %v13211_v19  ;;  %v19364_v19 = vld [vmem:[#allocation210_spill] sm:$0xff] }
 0x4c0   :  { %v4407_v41 = vadd.f32 %v4406_v22, %v19358_v49  ;;  %v5195_v15 = vadd.f32 %v5194_v48, %v4804_v56  ;;  %v4018_v53 = vpop.f32.mrf.mxu1  ;;  %v4808_v56 = vmul.f32 %v19363_v30, %v19363_v30 }
 0x4c2   :  { %v4408_v5 = vadd.f32 %v4407_v41, %v19360_v1  ;;  %v5196_v23 = vadd.f32 %v5195_v15, %v4805_v54  ;;  %v13219_v60 = vpop.f32.mrf.mxu1  ;;  %v4809_v41 = vmul.f32 %v19364_v19, %v19364_v19  ;;  %v19366_v1 = vld [vmem:[#allocation212_spill] sm:$0xff] }
 0x4c3   :  { %19362 = vst [vmem:[#allocation356_spill] sm:$0xff] %v13219_v60  ;;  %v19367_v60 = vld [vmem:[#allocation214_spill] sm:$0xff] }
 0x4c4   :  { %v4409_v3 = vadd.f32 %v4408_v5, %v19361_v29  ;;  %v5197_v4 = vadd.f32 %v5196_v23, %v4806_v24  ;;  %v4021_v49 = vpop.f32.mrf.mxu1  ;;  %v4810_v24 = vmul.f32 %v19366_v1, %v19366_v1 }
 0x4c6   :  { %v4410_v22 = vadd.f32 %v4409_v3, %v19363_v30  ;;  %v5198_v48 = vadd.f32 %v5197_v4, %v4807_v12  ;;  %v13227_v15 = vpop.f32.mrf.mxu1  ;;  %v4811_v3 = vmul.f32 %v19367_v60, %v19367_v60  ;;  %v19369_v30 = vld [vmem:[#allocation216_spill] sm:$0xff] }
 0x4c7   :  { %19365 = vst [vmem:[#allocation357_spill] sm:$0xff] %v13227_v15  ;;  %v19370_v15 = vld [vmem:[#allocation218_spill] sm:$0xff] }
 0x4c8   :  { %v4411_v53 = vadd.f32 %v4410_v22, %v19364_v19  ;;  %v5199_v54 = vadd.f32 %v5198_v48, %v4808_v56  ;;  %v4026_v29 = vpop.f32.mrf.mxu1  ;;  %v4812_v56 = vmul.f32 %v19369_v30, %v19369_v30 }
 0x4ca   :  { %v4412_v5 = vadd.f32 %v4411_v53, %v19366_v1  ;;  %v5200_v23 = vadd.f32 %v5199_v54, %v4809_v41  ;;  %v13235_v4 = vpop.f32.mrf.mxu1  ;;  %v4813_v53 = vmul.f32 %v19370_v15, %v19370_v15  ;;  %v19372_v1 = vld [vmem:[#allocation220_spill] sm:$0xff] }
 0x4cb   :  { %19368 = vst [vmem:[#allocation358_spill] sm:$0xff] %v13235_v4  ;;  %v19373_v4 = vld [vmem:[#allocation222_spill] sm:$0xff] }
 0x4cc   :  { %v4413_v49 = vadd.f32 %v4412_v5, %v19367_v60  ;;  %v5201_v12 = vadd.f32 %v5200_v23, %v4810_v24  ;;  %v4029_v19 = vpop.f32.mrf.mxu1  ;;  %v4814_v24 = vmul.f32 %v19372_v1, %v19372_v1 }
 0x4ce   :  { %v4414_v22 = vadd.f32 %v4413_v49, %v19369_v30  ;;  %v5202_v48 = vadd.f32 %v5201_v12, %v4811_v3  ;;  %v13243_v54 = vpop.f32.mrf.mxu1  ;;  %v4815_v49 = vmul.f32 %v19373_v4, %v19373_v4  ;;  %v19375_v30 = vld [vmem:[#allocation224_spill] sm:$0xff] }
 0x4cf   :  { %19371 = vst [vmem:[#allocation359_spill] sm:$0xff] %v13243_v54  ;;  %v19376_v54 = vld [vmem:[#allocation226_spill] sm:$0xff] }
 0x4d0   :  { %v4415_v29 = vadd.f32 %v4414_v22, %v19370_v15  ;;  %v5203_v41 = vadd.f32 %v5202_v48, %v4812_v56  ;;  %v4034_v60 = vpop.f32.mrf.mxu1  ;;  %v4816_v56 = vmul.f32 %v19375_v30, %v19375_v30 }
 0x4d2   :  { %v4416_v5 = vadd.f32 %v4415_v29, %v19372_v1  ;;  %v5204_v23 = vadd.f32 %v5203_v41, %v4813_v53  ;;  %v13251_v12 = vpop.f32.mrf.mxu1  ;;  %v4817_v29 = vmul.f32 %v19376_v54, %v19376_v54  ;;  %v19378_v1 = vld [vmem:[#allocation228_spill] sm:$0xff] }
 0x4d3   :  { %19374 = vst [vmem:[#allocation360_spill] sm:$0xff] %v13251_v12  ;;  %v19379_v12 = vld [vmem:[#allocation230_spill] sm:$0xff] }
 0x4d4   :  { %v4417_v19 = vadd.f32 %v4416_v5, %v19373_v4  ;;  %v5205_v3 = vadd.f32 %v5204_v23, %v4814_v24  ;;  %v4037_v15 = vpop.f32.mrf.mxu1  ;;  %v4818_v24 = vmul.f32 %v19378_v1, %v19378_v1 }
 0x4d6   :  { %v4418_v22 = vadd.f32 %v4417_v19, %v19375_v30  ;;  %v5206_v48 = vadd.f32 %v5205_v3, %v4815_v49  ;;  %v13259_v41 = vpop.f32.mrf.mxu1  ;;  %v4819_v19 = vmul.f32 %v19379_v12, %v19379_v12  ;;  %v19381_v30 = vld [vmem:[#allocation232_spill] sm:$0xff] }
 0x4d7   :  { %19377 = vst [vmem:[#allocation361_spill] sm:$0xff] %v13259_v41  ;;  %v19382_v41 = vld [vmem:[#allocation234_spill] sm:$0xff] }
 0x4d8   :  { %v4419_v60 = vadd.f32 %v4418_v22, %v19376_v54  ;;  %v5207_v53 = vadd.f32 %v5206_v48, %v4816_v56  ;;  %v4042_v4 = vpop.f32.mrf.mxu1  ;;  %v4820_v56 = vmul.f32 %v19381_v30, %v19381_v30 }
 0x4da   :  { %v4420_v5 = vadd.f32 %v4419_v60, %v19378_v1  ;;  %v5208_v23 = vadd.f32 %v5207_v53, %v4817_v29  ;;  %v13267_v3 = vpop.f32.mrf.mxu1  ;;  %v4821_v60 = vmul.f32 %v19382_v41, %v19382_v41  ;;  %v19384_v1 = vld [vmem:[#allocation236_spill] sm:$0xff] }
 0x4db   :  { %19380 = vst [vmem:[#allocation362_spill] sm:$0xff] %v13267_v3  ;;  %v19385_v3 = vld [vmem:[#allocation238_spill] sm:$0xff] }
 0x4dc   :  { %v4421_v15 = vadd.f32 %v4420_v5, %v19379_v12  ;;  %v5209_v49 = vadd.f32 %v5208_v23, %v4818_v24  ;;  %v4045_v54 = vpop.f32.mrf.mxu1  ;;  %v4822_v24 = vmul.f32 %v19384_v1, %v19384_v1 }
 0x4de   :  { %v4422_v22 = vadd.f32 %v4421_v15, %v19381_v30  ;;  %v5210_v48 = vadd.f32 %v5209_v49, %v4819_v19  ;;  %v13275_v53 = vpop.f32.mrf.mxu1  ;;  %v4823_v15 = vmul.f32 %v19385_v3, %v19385_v3  ;;  %v19386_v30 = vld [vmem:[#allocation240_spill] sm:$0xff] }
 0x4df   :  { %19383 = vst [vmem:[#allocation363_spill] sm:$0xff] %v13275_v53  ;;  %v19387_v53 = vld [vmem:[#allocation242_spill] sm:$0xff] }
 0x4e0   :  { %v4423_v4 = vadd.f32 %v4422_v22, %v19382_v41  ;;  %v5211_v29 = vadd.f32 %v5210_v48, %v4820_v56  ;;  %v4050_v12 = vpop.f32.mrf.mxu1  ;;  %v4824_v56 = vmul.f32 %v19386_v30, %v19386_v30 }
 0x4e2   :  { %v4424_v5 = vadd.f32 %v4423_v4, %v19384_v1  ;;  %v5212_v23 = vadd.f32 %v5211_v29, %v4821_v60  ;;  %v13283_v49 = vpop.f32.mrf.mxu1  ;;  %v4825_v4 = vmul.f32 %v19387_v53, %v19387_v53 }
 0x4e4   :  { %v4425_v54 = vadd.f32 %v4424_v5, %v19385_v3  ;;  %v5213_v19 = vadd.f32 %v5212_v23, %v4822_v24  ;;  %v4053_v41 = vpop.f32.mrf.mxu1  ;;  %v4826_v24 = vmul.f32 %v12475_v45, %v12475_v45 }
 0x4e6   :  { %v4426_v22 = vadd.f32 %v4425_v54, %v19386_v30  ;;  %v5214_v48 = vadd.f32 %v5213_v19, %v4823_v15  ;;  %v13291_v29 = vpop.f32.mrf.mxu1  ;;  %v4827_v54 = vmul.f32 %v12485_v59, %v12485_v59 }
 0x4e8   :  { %v4427_v12 = vadd.f32 %v4426_v22, %v19387_v53  ;;  %v5215_v60 = vadd.f32 %v5214_v48, %v4824_v56  ;;  %v4058_v3 = vpop.f32.mrf.mxu1  ;;  %v4828_v56 = vmul.f32 %v12495_v14, %v12495_v14 }
 0x4ea   :  { %v4428_v5 = vadd.f32 %v4427_v12, %v12475_v45  ;;  %v5216_v23 = vadd.f32 %v5215_v60, %v4825_v4  ;;  %v13299_v19 = vpop.f32.mrf.mxu1  ;;  %v4829_v12 = vmul.f32 %v12505_v57, %v12505_v57 }
 0x4ec   :  { %v5217_v15 = vadd.f32 %v5216_v23, %v4826_v24  ;;  %v4429_v41 = vadd.f32 %v4428_v5, %v12485_v59  ;;  %v4061_v53 = vpop.f32.mrf.mxu1  ;;  %v4830_v24 = vmul.f32 %v12515_v25, %v12515_v25 }
 0x4ee   :  { %v4430_v22 = vadd.f32 %v4429_v41, %v12495_v14  ;;  %v5218_v48 = vadd.f32 %v5217_v15, %v4827_v54  ;;  %v13307_v60 = vpop.f32.mrf.mxu1  ;;  %v4831_v41 = vmul.f32 %v12525_v63, %v12525_v63 }
 0x4f0   :  { %v4431_v3 = vadd.f32 %v4430_v22, %v12505_v57  ;;  %v5219_v4 = vadd.f32 %v5218_v48, %v4828_v56  ;;  %v4066_v59 = vpop.f32.mrf.mxu1  ;;  %v4832_v56 = vmul.f32 %v12535_v33, %v12535_v33 }
 0x4f2   :  { %v4432_v5 = vadd.f32 %v4431_v3, %v12515_v25  ;;  %v5220_v23 = vadd.f32 %v5219_v4, %v4829_v12  ;;  %v13315_v15 = vpop.f32.mrf.mxu1  ;;  %v4833_v3 = vmul.f32 %v12545_v31, %v12545_v31 }
 0x4f4   :  { %v4433_v53 = vadd.f32 %v4432_v5, %v12525_v63  ;;  %v5221_v54 = vadd.f32 %v5220_v23, %v4830_v24  ;;  %v4069_v57 = vpop.f32.mrf.mxu1  ;;  %v4834_v24 = vmul.f32 %v12555_v9, %v12555_v9 }
 0x4f6   :  { %v4434_v22 = vadd.f32 %v4433_v53, %v12535_v33  ;;  %v5222_v48 = vadd.f32 %v5221_v54, %v4831_v41  ;;  %v13323_v4 = vpop.f32.mrf.mxu1  ;;  %v4835_v53 = vmul.f32 %v12565_v18, %v12565_v18 }
 0x4f8   :  { %v4435_v59 = vadd.f32 %v4434_v22, %v12545_v31  ;;  %v5223_v12 = vadd.f32 %v5222_v48, %v4832_v56  ;;  %v4074_v63 = vpop.f32.mrf.mxu1  ;;  %v4836_v56 = vmul.f32 %v12575_v51, %v12575_v51 }
 0x4fa   :  { %v4436_v5 = vadd.f32 %v4435_v59, %v12555_v9  ;;  %v5224_v23 = vadd.f32 %v5223_v12, %v4833_v3  ;;  %v13331_v54 = vpop.f32.mrf.mxu1  ;;  %v4837_v59 = vmul.f32 %v12585_v11, %v12585_v11 }
 0x4fc   :  { %v4437_v57 = vadd.f32 %v4436_v5, %v12565_v18  ;;  %v5225_v41 = vadd.f32 %v5224_v23, %v4834_v24  ;;  %v4077_v31 = vpop.f32.mrf.mxu1  ;;  %v4838_v24 = vmul.f32 %v12595_v13, %v12595_v13 }
 0x4fe   :  { %v4438_v22 = vadd.f32 %v4437_v57, %v12575_v51  ;;  %v5226_v48 = vadd.f32 %v5225_v41, %v4835_v53  ;;  %v13339_v12 = vpop.f32.mrf.mxu1  ;;  %v4839_v57 = vmul.f32 %v12605_v27, %v12605_v27 }
 0x500   :  { %v4439_v63 = vadd.f32 %v4438_v22, %v12585_v11  ;;  %v5227_v3 = vadd.f32 %v5226_v48, %v4836_v56  ;;  %v4082_v18 = vpop.f32.mrf.mxu1  ;;  %v4840_v56 = vmul.f32 %v12615_v16, %v12615_v16 }
 0x502   :  { %v4440_v5 = vadd.f32 %v4439_v63, %v12595_v13  ;;  %v5228_v23 = vadd.f32 %v5227_v3, %v4837_v59  ;;  %v13347_v41 = vpop.f32.mrf.mxu1  ;;  %v4841_v63 = vmul.f32 %v12625_v50, %v12625_v50 }
 0x504   :  { %v4441_v31 = vadd.f32 %v4440_v5, %v12605_v27  ;;  %v5229_v53 = vadd.f32 %v5228_v23, %v4838_v24  ;;  %v4085_v11 = vpop.f32.mrf.mxu1  ;;  %v4842_v24 = vmul.f32 %v12635_v40, %v12635_v40 }
 0x505   :  { %v4843_v11 = vmul.f32 %v12645_v6, %v12645_v6 }
 0x506   :  { %v4442_v22 = vadd.f32 %v4441_v31, %v12615_v16  ;;  %v5230_v48 = vadd.f32 %v5229_v53, %v4839_v57  ;;  %v13355_v3 = vpop.f32.mrf.mxu1 }
 0x508   :  { %v4443_v18 = vadd.f32 %v4442_v22, %v12625_v50  ;;  %v5231_v59 = vadd.f32 %v5230_v48, %v4840_v56  ;;  %v4090_v27 = vpop.f32.mrf.mxu1  ;;  %v4844_v22 = vmul.f32 %v12655_v7, %v12655_v7 }
 0x509   :  { %v4845_v27 = vmul.f32 %v12665_v44, %v12665_v44 }
 0x50a   :  { %v4444_v5 = vadd.f32 %v4443_v18, %v12635_v40  ;;  %v5232_v23 = vadd.f32 %v5231_v59, %v4841_v63  ;;  %v13363_v31 = vpop.f32.mrf.mxu1 }
 0x50c   :  { %v4445_v13 = vadd.f32 %v4444_v5, %v12645_v6  ;;  %v5233_v57 = vadd.f32 %v5232_v23, %v4842_v24  ;;  %v4093_v48 = vpop.f32.mrf.mxu1  ;;  %v19388_v5 = vld [vmem:[#allocation275_spill] sm:$0xff] }
 0x50d   :  { %v4846_v23 = vmul.f32 %v19388_v5, %v19388_v5 }
 0x50e   :  { %v5234_v53 = vadd.f32 %v5233_v57, %v4843_v11  ;;  %v4446_v56 = vadd.f32 %v4445_v13, %v12655_v7  ;;  %v13371_v63 = vpop.f32.mrf.mxu1  ;;  %v19389_v57 = vld [vmem:[#allocation277_spill] sm:$0xff] }
 0x510   :  { %v5235_v50 = vadd.f32 %v5234_v53, %v4844_v22  ;;  %v4447_v18 = vadd.f32 %v4446_v56, %v12665_v44  ;;  %v4098_v11 = vpop.f32.mrf.mxu1  ;;  %v4847_v53 = vmul.f32 %v19389_v57, %v19389_v57 }
 0x512   :  { %v5236_v59 = vadd.f32 %v5235_v50, %v4845_v27  ;;  %v4448_v24 = vadd.f32 %v4447_v18, %v19388_v5  ;;  %v13379_v22 = vpop.f32.mrf.mxu1  ;;  %v4848_v50 = vmul.f32 %v12695_v55, %v12695_v55 }
 0x514   :  { %v5237_v13 = vadd.f32 %v5236_v59, %v4846_v23  ;;  %v4449_v6 = vadd.f32 %v4448_v24, %v19389_v57  ;;  %v4101_v27 = vpop.f32.mrf.mxu1  ;;  %v4849_v59 = vmul.f32 %v12705_v8, %v12705_v8 }
 0x516   :  { %v5238_v56 = vadd.f32 %v5237_v13, %v4847_v53  ;;  %v4450_v48 = vadd.f32 %v4449_v6, %v12695_v55  ;;  %v13387_v23 = vpop.f32.mrf.mxu1  ;;  %v4850_v13 = vmul.f32 %v12715_v62, %v12715_v62 }
 0x517   :  { %19390 = vst [vmem:[#allocation236_spill] sm:$0xff] %v13387_v23 }
 0x518   :  { %v5239_v18 = vadd.f32 %v5238_v56, %v4848_v50  ;;  %v4451_v44 = vadd.f32 %v4450_v48, %v12705_v8  ;;  %v4106_v53 = vpop.f32.mrf.mxu1  ;;  %v4851_v56 = vmul.f32 %v12725_v37, %v12725_v37 }
 0x51a   :  { %v5240_v24 = vadd.f32 %v5239_v18, %v4849_v59  ;;  %v4452_v11 = vadd.f32 %v4451_v44, %v12715_v62  ;;  %v13395_v50 = vpop.f32.mrf.mxu1  ;;  %v4852_v18 = vmul.f32 %v12735_v35, %v12735_v35 }
 0x51b   :  { %19391 = vst [vmem:[#allocation240_spill] sm:$0xff] %v13395_v50 }
 0x51c   :  { %v5241_v6 = vadd.f32 %v5240_v24, %v4850_v13  ;;  %v4453_v57 = vadd.f32 %v4452_v11, %v12725_v37  ;;  %v4109_v59 = vpop.f32.mrf.mxu1  ;;  %v4853_v24 = vmul.f32 %v12745_v28, %v12745_v28 }
 0x51e   :  { %v5242_v48 = vadd.f32 %v5241_v6, %v4851_v56  ;;  %v4454_v27 = vadd.f32 %v4453_v57, %v12735_v35  ;;  %v13403_v13 = vpop.f32.mrf.mxu1  ;;  %v4854_v6 = vmul.f32 %v12755_v34, %v12755_v34 }
 0x51f   :  { %19392 = vst [vmem:[#allocation275_spill] sm:$0xff] %v13403_v13 }
 0x520   :  { %v5243_v44 = vadd.f32 %v5242_v48, %v4852_v18  ;;  %v4455_v8 = vadd.f32 %v4454_v27, %v12745_v28  ;;  %v4114_v56 = vpop.f32.mrf.mxu1  ;;  %v4855_v48 = vmul.f32 %v12765_v21, %v12765_v21 }
 0x522   :  { %v5244_v11 = vadd.f32 %v5243_v44, %v4853_v24  ;;  %v4456_v53 = vadd.f32 %v4455_v8, %v12755_v34  ;;  %v13411_v18 = vpop.f32.mrf.mxu1  ;;  %v4856_v44 = vmul.f32 %v12775_v43, %v12775_v43 }
 0x523   :  { %19393 = vst [vmem:[#allocation364_spill] sm:$0xff] %v13411_v18 }
 0x524   :  { %v5245_v57 = vadd.f32 %v5244_v11, %v4854_v6  ;;  %v4457_v37 = vadd.f32 %v4456_v53, %v12765_v21  ;;  %v4117_v24 = vpop.f32.mrf.mxu1  ;;  %v4857_v11 = vmul.f32 %v12785_v20, %v12785_v20 }
 0x526   :  { %v5246_v27 = vadd.f32 %v5245_v57, %v4855_v48  ;;  %v4458_v59 = vadd.f32 %v4457_v37, %v12775_v43  ;;  %v13419_v6 = vpop.f32.mrf.mxu1  ;;  %v4858_v57 = vmul.f32 %v12795_v39, %v12795_v39 }
 0x527   :  { %19394 = vst [vmem:[#allocation365_spill] sm:$0xff] %v13419_v6 }
 0x528   :  { %v5247_v8 = vadd.f32 %v5246_v27, %v4856_v44  ;;  %v4459_v28 = vadd.f32 %v4458_v59, %v12785_v20  ;;  %v4122_v48 = vpop.f32.mrf.mxu1  ;;  %v4859_v27 = vmul.f32 %v12805_v58, %v12805_v58 }
 0x52a   :  { %v5248_v53 = vadd.f32 %v5247_v8, %v4857_v11  ;;  %v4460_v56 = vadd.f32 %v4459_v28, %v12795_v39  ;;  %v13427_v44 = vpop.f32.mrf.mxu1  ;;  %v4860_v8 = vmul.f32 %v12815_v47, %v12815_v47 }
 0x52b   :  { %19395 = vst [vmem:[#allocation366_spill] sm:$0xff] %v13427_v44 }
 0x52c   :  { %v5249_v37 = vadd.f32 %v5248_v53, %v4858_v57  ;;  %v4461_v21 = vadd.f32 %v4460_v56, %v12805_v58  ;;  %v4125_v11 = vpop.f32.mrf.mxu1  ;;  %v4861_v53 = vmul.f32 %v12825_v52, %v12825_v52 }
 0x52e   :  { %v5250_v59 = vadd.f32 %v5249_v37, %v4859_v27  ;;  %v4462_v24 = vadd.f32 %v4461_v21, %v12815_v47  ;;  %v13435_v57 = vpop.f32.mrf.mxu1  ;;  %v4862_v37 = vmul.f32 %v12835_v36, %v12835_v36 }
 0x52f   :  { %19396 = vst [vmem:[#allocation367_spill] sm:$0xff] %v13435_v57 }
 0x530   :  { %v5251_v28 = vadd.f32 %v5250_v59, %v4860_v8  ;;  %v4463_v20 = vadd.f32 %v4462_v24, %v12825_v52  ;;  %v4130_v27 = vpop.f32.mrf.mxu1  ;;  %v4863_v59 = vmul.f32 %v12845_v2, %v12845_v2 }
 0x532   :  { %v5252_v56 = vadd.f32 %v5251_v28, %v4861_v53  ;;  %v4464_v48 = vadd.f32 %v4463_v20, %v12835_v36  ;;  %v13443_v8 = vpop.f32.mrf.mxu1  ;;  %v4864_v28 = vmul.f32 %v12855_v26, %v12855_v26 }
 0x533   :  { %19397 = vst [vmem:[#allocation368_spill] sm:$0xff] %v13443_v8 }
 0x534   :  { %v5253_v21 = vadd.f32 %v5252_v56, %v4862_v37  ;;  %v4465_v58 = vadd.f32 %v4464_v48, %v12845_v2  ;;  %v4133_v53 = vpop.f32.mrf.mxu1  ;;  %v4865_v56 = vmul.f32 %v12865_v10, %v12865_v10 }
 0x536   :  { %v5254_v24 = vadd.f32 %v5253_v21, %v4863_v59  ;;  %v4466_v11 = vadd.f32 %v4465_v58, %v12855_v26  ;;  %v13451_v37 = vpop.f32.mrf.mxu1  ;;  %v4866_v21 = vmul.f32 %v12875_v42, %v12875_v42 }
 0x537   :  { %19398 = vst [vmem:[#allocation369_spill] sm:$0xff] %v13451_v37 }
 0x538   :  { %v5255_v20 = vadd.f32 %v5254_v24, %v4864_v28  ;;  %v4467_v52 = vadd.f32 %v4466_v11, %v12865_v10  ;;  %v4138_v59 = vpop.f32.mrf.mxu1  ;;  %v4867_v24 = vmul.f32 %v12885_v61, %v12885_v61 }
 0x53a   :  { %v5256_v48 = vadd.f32 %v5255_v20, %v4865_v56  ;;  %v4468_v27 = vadd.f32 %v4467_v52, %v12875_v42  ;;  %v13459_v28 = vpop.f32.mrf.mxu1  ;;  %v4868_v20 = vmul.f32 %v12895_v17, %v12895_v17 }
 0x53b   :  { %19399 = vst [vmem:[#allocation370_spill] sm:$0xff] %v13459_v28 }
 0x53c   :  { %v5257_v58 = vadd.f32 %v5256_v48, %v4866_v21  ;;  %v4469_v2 = vadd.f32 %v4468_v27, %v12885_v61  ;;  %v4141_v56 = vpop.f32.mrf.mxu1  ;;  %v4869_v48 = vmul.f32 %v12905_v32, %v12905_v32 }
 0x53d   :  { %v19400_v56 = vld [vmem:[#allocation318_spill] sm:$0xff] }
 0x53e   :  { %v5258_v11 = vadd.f32 %v5257_v58, %v4867_v24  ;;  %v4470_v53 = vadd.f32 %v4469_v2, %v12895_v17  ;;  %v13467_v21 = vpop.f32.mrf.mxu1  ;;  %v4870_v58 = vmul.f32 %v12915_v46, %v12915_v46  ;;  %v19401_v17 = vld [vmem:[#allocation320_spill] sm:$0xff] }
 0x540   :  { %v5259_v52 = vadd.f32 %v5258_v11, %v4868_v20  ;;  %v4471_v10 = vadd.f32 %v4470_v53, %v12905_v32  ;;  %v4146_v24 = vpop.f32.mrf.mxu1  ;;  %v4871_v11 = vmul.f32 %v12925_v38, %v12925_v38 }
 0x542   :  { %v5260_v27 = vadd.f32 %v5259_v52, %v4869_v48  ;;  %v4472_v59 = vadd.f32 %v4471_v10, %v12915_v46  ;;  %v13475_v20 = vpop.f32.mrf.mxu1  ;;  %v4872_v52 = vmul.f32 %v19400_v56, %v19400_v56 }
 0x544   :  { %v5261_v2 = vadd.f32 %v5260_v27, %v4870_v58  ;;  %v4473_v61 = vadd.f32 %v4472_v59, %v12925_v38  ;;  %v4149_v48 = vpop.f32.mrf.mxu1  ;;  %v4873_v27 = vmul.f32 %v19401_v17, %v19401_v17  ;;  %v19402_v59 = vld [vmem:[#allocation322_spill] sm:$0xff] }
 0x545   :  { %v4874_v38 = vmul.f32 %v19402_v59, %v19402_v59  ;;  %v19404_v48 = vld [vmem:[#allocation325_spill] sm:$0xff] }
 0x546   :  { %v5262_v53 = vadd.f32 %v5261_v2, %v4871_v11  ;;  %v4474_v32 = vadd.f32 %v4473_v61, %v19400_v56  ;;  %v19403_v2 = vld [vmem:[#allocation324_spill] sm:$0xff] }
 0x547   :  { %v4875_v61 = vmul.f32 %v19403_v2, %v19403_v2 }
 0x548   :  { %v5263_v10 = vadd.f32 %v5262_v53, %v4872_v52  ;;  %v4475_v42 = vadd.f32 %v4474_v32, %v19401_v17  ;;  %v4876_v32 = vmul.f32 %v19404_v48, %v19404_v48  ;;  %v19405_v17 = vld [vmem:[#allocation326_spill] sm:$0xff] }
 0x54a   :  { %v5264_v58 = vadd.f32 %v5263_v10, %v4873_v27  ;;  %v4476_v24 = vadd.f32 %v4475_v42, %v19402_v59  ;;  %v4877_v42 = vmul.f32 %v19405_v17, %v19405_v17  ;;  %v19406_v59 = vld [vmem:[#allocation327_spill] sm:$0xff] }
 0x54c   :  { %v5265_v46 = vadd.f32 %v5264_v58, %v4874_v38  ;;  %v4477_v11 = vadd.f32 %v4476_v24, %v19403_v2  ;;  %v4878_v58 = vmul.f32 %v19406_v59, %v19406_v59  ;;  %v19407_v2 = vld [vmem:[#allocation328_spill] sm:$0xff] }
 0x54e   :  { %v5266_v56 = vadd.f32 %v5265_v46, %v4875_v61  ;;  %v4478_v53 = vadd.f32 %v4477_v11, %v19404_v48  ;;  %v4879_v11 = vmul.f32 %v19407_v2, %v19407_v2  ;;  %v19408_v48 = vld [vmem:[#allocation329_spill] sm:$0xff] }
 0x550   :  { %v5267_v52 = vadd.f32 %v5266_v56, %v4876_v32  ;;  %v4479_v10 = vadd.f32 %v4478_v53, %v19405_v17  ;;  %v4880_v53 = vmul.f32 %v19408_v48, %v19408_v48  ;;  %v19409_v17 = vld [vmem:[#allocation330_spill] sm:$0xff] }
 0x552   :  { %v5268_v27 = vadd.f32 %v5267_v52, %v4877_v42  ;;  %v4480_v38 = vadd.f32 %v4479_v10, %v19406_v59  ;;  %v4881_v10 = vmul.f32 %v19409_v17, %v19409_v17  ;;  %v19410_v59 = vld [vmem:[#allocation331_spill] sm:$0xff] }
 0x554   :  { %v5269_v24 = vadd.f32 %v5268_v27, %v4878_v58  ;;  %v4481_v46 = vadd.f32 %v4480_v38, %v19407_v2  ;;  %v4882_v38 = vmul.f32 %v19410_v59, %v19410_v59  ;;  %v19411_v2 = vld [vmem:[#allocation332_spill] sm:$0xff] }
 0x556   :  { %v5270_v61 = vadd.f32 %v5269_v24, %v4879_v11  ;;  %v4482_v56 = vadd.f32 %v4481_v46, %v19408_v48  ;;  %v4883_v46 = vmul.f32 %v19411_v2, %v19411_v2  ;;  %v19412_v48 = vld [vmem:[#allocation333_spill] sm:$0xff] }
 0x558   :  { %v5271_v32 = vadd.f32 %v5270_v61, %v4880_v53  ;;  %v4483_v52 = vadd.f32 %v4482_v56, %v19409_v17  ;;  %v4884_v56 = vmul.f32 %v19412_v48, %v19412_v48  ;;  %v19413_v17 = vld [vmem:[#allocation334_spill] sm:$0xff] }
 0x55a   :  { %v5272_v42 = vadd.f32 %v5271_v32, %v4881_v10  ;;  %v4484_v27 = vadd.f32 %v4483_v52, %v19410_v59  ;;  %v4885_v52 = vmul.f32 %v19413_v17, %v19413_v17  ;;  %v19414_v59 = vld [vmem:[#allocation335_spill] sm:$0xff] }
 0x55c   :  { %v5273_v58 = vadd.f32 %v5272_v42, %v4882_v38  ;;  %v4485_v24 = vadd.f32 %v4484_v27, %v19411_v2  ;;  %v4886_v27 = vmul.f32 %v19414_v59, %v19414_v59  ;;  %v19415_v2 = vld [vmem:[#allocation336_spill] sm:$0xff] }
 0x55e   :  { %v5274_v11 = vadd.f32 %v5273_v58, %v4883_v46  ;;  %v4486_v61 = vadd.f32 %v4485_v24, %v19412_v48  ;;  %v4887_v24 = vmul.f32 %v19415_v2, %v19415_v2  ;;  %v19416_v48 = vld [vmem:[#allocation337_spill] sm:$0xff] }
 0x560   :  { %v5275_v53 = vadd.f32 %v5274_v11, %v4884_v56  ;;  %v4487_v32 = vadd.f32 %v4486_v61, %v19413_v17  ;;  %v4888_v61 = vmul.f32 %v19416_v48, %v19416_v48  ;;  %v19417_v17 = vld [vmem:[#allocation338_spill] sm:$0xff] }
 0x562   :  { %v5276_v10 = vadd.f32 %v5275_v53, %v4885_v52  ;;  %v4488_v42 = vadd.f32 %v4487_v32, %v19414_v59  ;;  %v4889_v32 = vmul.f32 %v19417_v17, %v19417_v17 }
 0x564   :  { %v5277_v38 = vadd.f32 %v5276_v10, %v4886_v27  ;;  %v4489_v58 = vadd.f32 %v4488_v42, %v19415_v2  ;;  %v4890_v42 = vmul.f32 %v13083_v0, %v13083_v0  ;;  %v19418_v2 = vld [vmem:[#allocation340_spill] sm:$0xff] }
 0x566   :  { %v5278_v46 = vadd.f32 %v5277_v38, %v4887_v24  ;;  %v4490_v11 = vadd.f32 %v4489_v58, %v19416_v48  ;;  %v4891_v58 = vmul.f32 %v19418_v2, %v19418_v2  ;;  %v19419_v48 = vld [vmem:[#allocation341_spill] sm:$0xff] }
 0x568   :  { %v5279_v56 = vadd.f32 %v5278_v46, %v4888_v61  ;;  %v4491_v53 = vadd.f32 %v4490_v11, %v19417_v17  ;;  %v4892_v11 = vmul.f32 %v19419_v48, %v19419_v48  ;;  %v19420_v17 = vld [vmem:[#allocation342_spill] sm:$0xff] }
 0x56a   :  { %v5280_v52 = vadd.f32 %v5279_v56, %v4889_v32  ;;  %v4492_v10 = vadd.f32 %v4491_v53, %v13083_v0  ;;  %v4893_v53 = vmul.f32 %v19420_v17, %v19420_v17  ;;  %v19421_v0 = vld [vmem:[#allocation343_spill] sm:$0xff] }
 0x56c   :  { %v5281_v27 = vadd.f32 %v5280_v52, %v4890_v42  ;;  %v4493_v38 = vadd.f32 %v4492_v10, %v19418_v2  ;;  %v4894_v10 = vmul.f32 %v19421_v0, %v19421_v0  ;;  %v19422_v2 = vld [vmem:[#allocation344_spill] sm:$0xff] }
 0x56e   :  { %v5282_v24 = vadd.f32 %v5281_v27, %v4891_v58  ;;  %v4494_v46 = vadd.f32 %v4493_v38, %v19419_v48  ;;  %v4895_v38 = vmul.f32 %v19422_v2, %v19422_v2  ;;  %v19423_v48 = vld [vmem:[#allocation345_spill] sm:$0xff] }
 0x570   :  { %v5283_v61 = vadd.f32 %v5282_v24, %v4892_v11  ;;  %v4495_v56 = vadd.f32 %v4494_v46, %v19420_v17  ;;  %v4896_v46 = vmul.f32 %v19423_v48, %v19423_v48  ;;  %v19424_v17 = vld [vmem:[#allocation346_spill] sm:$0xff] }
 0x572   :  { %v5284_v32 = vadd.f32 %v5283_v61, %v4893_v53  ;;  %v4496_v52 = vadd.f32 %v4495_v56, %v19421_v0  ;;  %v4897_v56 = vmul.f32 %v19424_v17, %v19424_v17  ;;  %v19425_v0 = vld [vmem:[#allocation347_spill] sm:$0xff] }
 0x574   :  { %v5285_v42 = vadd.f32 %v5284_v32, %v4894_v10  ;;  %v4497_v27 = vadd.f32 %v4496_v52, %v19422_v2  ;;  %v4898_v52 = vmul.f32 %v19425_v0, %v19425_v0  ;;  %v19426_v2 = vld [vmem:[#allocation348_spill] sm:$0xff] }
 0x576   :  { %v5286_v58 = vadd.f32 %v5285_v42, %v4895_v38  ;;  %v4498_v24 = vadd.f32 %v4497_v27, %v19423_v48  ;;  %v4899_v27 = vmul.f32 %v19426_v2, %v19426_v2  ;;  %v19427_v48 = vld [vmem:[#allocation349_spill] sm:$0xff] }
 0x578   :  { %v5287_v11 = vadd.f32 %v5286_v58, %v4896_v46  ;;  %v4499_v61 = vadd.f32 %v4498_v24, %v19424_v17  ;;  %v4900_v24 = vmul.f32 %v19427_v48, %v19427_v48  ;;  %v19428_v17 = vld [vmem:[#allocation350_spill] sm:$0xff] }
 0x57a   :  { %v5288_v53 = vadd.f32 %v5287_v11, %v4897_v56  ;;  %v4500_v32 = vadd.f32 %v4499_v61, %v19425_v0  ;;  %v4901_v61 = vmul.f32 %v19428_v17, %v19428_v17  ;;  %v19429_v0 = vld [vmem:[#allocation351_spill] sm:$0xff] }
 0x57c   :  { %v5289_v10 = vadd.f32 %v5288_v53, %v4898_v52  ;;  %v4501_v42 = vadd.f32 %v4500_v32, %v19426_v2  ;;  %v4902_v32 = vmul.f32 %v19429_v0, %v19429_v0  ;;  %v19430_v2 = vld [vmem:[#allocation352_spill] sm:$0xff] }
 0x57e   :  { %v5290_v38 = vadd.f32 %v5289_v10, %v4899_v27  ;;  %v4502_v58 = vadd.f32 %v4501_v42, %v19427_v48  ;;  %v4903_v42 = vmul.f32 %v19430_v2, %v19430_v2  ;;  %v19431_v48 = vld [vmem:[#allocation353_spill] sm:$0xff] }
 0x580   :  { %v5291_v46 = vadd.f32 %v5290_v38, %v4900_v24  ;;  %v4503_v11 = vadd.f32 %v4502_v58, %v19428_v17  ;;  %v4904_v58 = vmul.f32 %v19431_v48, %v19431_v48  ;;  %v19432_v17 = vld [vmem:[#allocation354_spill] sm:$0xff] }
 0x582   :  { %v5292_v56 = vadd.f32 %v5291_v46, %v4901_v61  ;;  %v4504_v53 = vadd.f32 %v4503_v11, %v19429_v0  ;;  %v4905_v11 = vmul.f32 %v19432_v17, %v19432_v17  ;;  %v19433_v0 = vld [vmem:[#allocation355_spill] sm:$0xff] }
 0x584   :  { %v5293_v52 = vadd.f32 %v5292_v56, %v4902_v32  ;;  %v4505_v10 = vadd.f32 %v4504_v53, %v19430_v2  ;;  %v4906_v53 = vmul.f32 %v19433_v0, %v19433_v0  ;;  %v19434_v2 = vld [vmem:[#allocation356_spill] sm:$0xff] }
 0x586   :  { %v5294_v27 = vadd.f32 %v5293_v52, %v4903_v42  ;;  %v4506_v38 = vadd.f32 %v4505_v10, %v19431_v48  ;;  %v4907_v10 = vmul.f32 %v19434_v2, %v19434_v2  ;;  %v19435_v48 = vld [vmem:[#allocation357_spill] sm:$0xff] }
 0x588   :  { %v5295_v24 = vadd.f32 %v5294_v27, %v4904_v58  ;;  %v4507_v46 = vadd.f32 %v4506_v38, %v19432_v17  ;;  %v4908_v38 = vmul.f32 %v19435_v48, %v19435_v48  ;;  %v19436_v17 = vld [vmem:[#allocation358_spill] sm:$0xff] }
 0x58a   :  { %v5296_v61 = vadd.f32 %v5295_v24, %v4905_v11  ;;  %v4508_v56 = vadd.f32 %v4507_v46, %v19433_v0  ;;  %v4909_v46 = vmul.f32 %v19436_v17, %v19436_v17  ;;  %v19437_v0 = vld [vmem:[#allocation359_spill] sm:$0xff] }
 0x58c   :  { %v5297_v32 = vadd.f32 %v5296_v61, %v4906_v53  ;;  %v4509_v52 = vadd.f32 %v4508_v56, %v19434_v2  ;;  %v4910_v56 = vmul.f32 %v19437_v0, %v19437_v0  ;;  %v19438_v2 = vld [vmem:[#allocation360_spill] sm:$0xff] }
 0x58e   :  { %v5298_v42 = vadd.f32 %v5297_v32, %v4907_v10  ;;  %v4510_v27 = vadd.f32 %v4509_v52, %v19435_v48  ;;  %v4911_v52 = vmul.f32 %v19438_v2, %v19438_v2  ;;  %v19439_v48 = vld [vmem:[#allocation361_spill] sm:$0xff] }
 0x590   :  { %v5299_v58 = vadd.f32 %v5298_v42, %v4908_v38  ;;  %v4511_v24 = vadd.f32 %v4510_v27, %v19436_v17  ;;  %v4912_v27 = vmul.f32 %v19439_v48, %v19439_v48  ;;  %v19440_v17 = vld [vmem:[#allocation362_spill] sm:$0xff] }
 0x592   :  { %v5300_v11 = vadd.f32 %v5299_v58, %v4909_v46  ;;  %v4512_v61 = vadd.f32 %v4511_v24, %v19437_v0  ;;  %v4913_v24 = vmul.f32 %v19440_v17, %v19440_v17  ;;  %v19441_v0 = vld [vmem:[#allocation363_spill] sm:$0xff] }
 0x594   :  { %v5301_v53 = vadd.f32 %v5300_v11, %v4910_v56  ;;  %v4513_v32 = vadd.f32 %v4512_v61, %v19438_v2  ;;  %v4914_v61 = vmul.f32 %v19441_v0, %v19441_v0 }
 0x596   :  { %v5302_v10 = vadd.f32 %v5301_v53, %v4911_v52  ;;  %v4514_v42 = vadd.f32 %v4513_v32, %v19439_v48  ;;  %v4915_v32 = vmul.f32 %v13283_v49, %v13283_v49 }
 0x598   :  { %v5303_v38 = vadd.f32 %v5302_v10, %v4912_v27  ;;  %v4515_v58 = vadd.f32 %v4514_v42, %v19440_v17  ;;  %v4916_v42 = vmul.f32 %v13291_v29, %v13291_v29 }
 0x59a   :  { %v5304_v46 = vadd.f32 %v5303_v38, %v4913_v24  ;;  %v4516_v11 = vadd.f32 %v4515_v58, %v19441_v0  ;;  %v4917_v58 = vmul.f32 %v13299_v19, %v13299_v19 }
 0x59c   :  { %v5305_v56 = vadd.f32 %v5304_v46, %v4914_v61  ;;  %v4517_v53 = vadd.f32 %v4516_v11, %v13283_v49  ;;  %v4918_v11 = vmul.f32 %v13307_v60, %v13307_v60 }
 0x59e   :  { %v5306_v52 = vadd.f32 %v5305_v56, %v4915_v32  ;;  %v4518_v10 = vadd.f32 %v4517_v53, %v13291_v29  ;;  %v4919_v53 = vmul.f32 %v13315_v15, %v13315_v15 }
 0x5a0   :  { %v5307_v27 = vadd.f32 %v5306_v52, %v4916_v42  ;;  %v4519_v38 = vadd.f32 %v4518_v10, %v13299_v19  ;;  %v4920_v10 = vmul.f32 %v13323_v4, %v13323_v4 }
 0x5a2   :  { %v5308_v24 = vadd.f32 %v5307_v27, %v4917_v58  ;;  %v4520_v46 = vadd.f32 %v4519_v38, %v13307_v60  ;;  %v4921_v38 = vmul.f32 %v13331_v54, %v13331_v54 }
 0x5a4   :  { %v5309_v61 = vadd.f32 %v5308_v24, %v4918_v11  ;;  %v4521_v56 = vadd.f32 %v4520_v46, %v13315_v15  ;;  %v4922_v46 = vmul.f32 %v13339_v12, %v13339_v12 }
 0x5a6   :  { %v5310_v32 = vadd.f32 %v5309_v61, %v4919_v53  ;;  %v4522_v52 = vadd.f32 %v4521_v56, %v13323_v4  ;;  %v4923_v56 = vmul.f32 %v13347_v41, %v13347_v41 }
 0x5a8   :  { %v5311_v42 = vadd.f32 %v5310_v32, %v4920_v10  ;;  %v4523_v27 = vadd.f32 %v4522_v52, %v13331_v54  ;;  %v4924_v52 = vmul.f32 %v13355_v3, %v13355_v3 }
 0x5aa   :  { %v5312_v58 = vadd.f32 %v5311_v42, %v4921_v38  ;;  %v4524_v24 = vadd.f32 %v4523_v27, %v13339_v12  ;;  %v4925_v27 = vmul.f32 %v13363_v31, %v13363_v31 }
 0x5ac   :  { %v5313_v11 = vadd.f32 %v5312_v58, %v4922_v46  ;;  %v4525_v61 = vadd.f32 %v4524_v24, %v13347_v41  ;;  %v4926_v24 = vmul.f32 %v13371_v63, %v13371_v63 }
 0x5ae   :  { %v5314_v53 = vadd.f32 %v5313_v11, %v4923_v56  ;;  %v4526_v32 = vadd.f32 %v4525_v61, %v13355_v3  ;;  %v4927_v61 = vmul.f32 %v13379_v22, %v13379_v22 }
 0x5b0   :  { %v5315_v10 = vadd.f32 %v5314_v53, %v4924_v52  ;;  %v4527_v42 = vadd.f32 %v4526_v32, %v13363_v31  ;;  %v4928_v32 = vmul.f32 %v13387_v23, %v13387_v23 }
 0x5b2   :  { %v5316_v38 = vadd.f32 %v5315_v10, %v4925_v27  ;;  %v4528_v58 = vadd.f32 %v4527_v42, %v13371_v63  ;;  %v4929_v42 = vmul.f32 %v13395_v50, %v13395_v50 }
 0x5b4   :  { %v5317_v46 = vadd.f32 %v5316_v38, %v4926_v24  ;;  %v4529_v11 = vadd.f32 %v4528_v58, %v13379_v22  ;;  %v4930_v58 = vmul.f32 %v13403_v13, %v13403_v13 }
 0x5b6   :  { %v5318_v56 = vadd.f32 %v5317_v46, %v4927_v61  ;;  %v4530_v53 = vadd.f32 %v4529_v11, %v13387_v23  ;;  %v4931_v11 = vmul.f32 %v13411_v18, %v13411_v18  ;;  %v5350_v23 = vlaneseq }
 0x5b8   :  { %v5319_v52 = vadd.f32 %v5318_v56, %v4928_v32  ;;  %v4531_v10 = vadd.f32 %v4530_v53, %v13395_v50  ;;  %v4932_v53 = vmul.f32 %v13419_v6, %v13419_v6 }
 0x5ba   :  { %v5320_v27 = vadd.f32 %v5319_v52, %v4929_v42  ;;  %v4532_v38 = vadd.f32 %v4531_v10, %v13403_v13  ;;  %v4933_v10 = vmul.f32 %v13427_v44, %v13427_v44 }
 0x5bc   :  { %v5321_v24 = vadd.f32 %v5320_v27, %v4930_v58  ;;  %v4533_v46 = vadd.f32 %v4532_v38, %v13411_v18  ;;  %v4934_v38 = vmul.f32 %v13435_v57, %v13435_v57 }
 0x5be   :  { %v5322_v61 = vadd.f32 %v5321_v24, %v4931_v11  ;;  %v4534_v56 = vadd.f32 %v4533_v46, %v13419_v6  ;;  %v4935_v46 = vmul.f32 %v13443_v8, %v13443_v8 }
 0x5c0   :  { %v5323_v32 = vadd.f32 %v5322_v61, %v4932_v53  ;;  %v4535_v52 = vadd.f32 %v4534_v56, %v13427_v44  ;;  %v4936_v56 = vmul.f32 %v13451_v37, %v13451_v37 }
 0x5c2   :  { %v5324_v42 = vadd.f32 %v5323_v32, %v4933_v10  ;;  %v4536_v27 = vadd.f32 %v4535_v52, %v13435_v57  ;;  %v4937_v52 = vmul.f32 %v13459_v28, %v13459_v28 }
 0x5c4   :  { %v5325_v58 = vadd.f32 %v5324_v42, %v4934_v38  ;;  %v4537_v24 = vadd.f32 %v4536_v27, %v13443_v8  ;;  %v4938_v27 = vmul.f32 %v13467_v21, %v13467_v21 }
 0x5c6   :  { %v5326_v11 = vadd.f32 %v5325_v58, %v4935_v46  ;;  %v4538_v61 = vadd.f32 %v4537_v24, %v13451_v37  ;;  %v4939_v24 = vmul.f32 %v13475_v20, %v13475_v20 }
 0x5c8   :  { %v5327_v53 = vadd.f32 %v5326_v11, %v4936_v56  ;;  %v4539_v32 = vadd.f32 %v4538_v61, %v13459_v28 }
 0x5ca   :  { %v5328_v10 = vadd.f32 %v5327_v53, %v4937_v52  ;;  %v4540_v42 = vadd.f32 %v4539_v32, %v13467_v21 }
 0x5cc   :  { %v5329_v38 = vadd.f32 %v5328_v10, %v4938_v27  ;;  %v4541_v58 = vadd.f32 %v4540_v42, %v13475_v20 }
 0x5ce   :  { %v4542_v46 = vrot.slane %v4541_v58, 4  ;;  %v5330_v37 = vadd.f32 %v5329_v38, %v4939_v24  ;;  %v5351_v38 = vshrl.u32 %v5350_v23, 7  ;;  %v19443_v23 = vld [vmem:[#allocation16_spill] sm:$0xff] }
 0x5d0   :  { %v4543_v11 = vadd.f32 %v4542_v46, %v4541_v58  ;;  %v5331_v56 = vrot.slane %v5330_v37, 4  ;;  %v5342_v58 = vld [vmem:[#allocation7] sm:$0x1]  ;;  %v5352_v24 = vsub.s32 0, %v5351_v38 }
 0x5d2   :  { %v4544_v61 = vrot.slane %v4543_v11, 2  ;;  %v5332_v8 = vadd.f32 %v5331_v56, %v5330_v37 }
 0x5d4   :  { %v4545_v57 = vadd.f32 %v4544_v61, %v4543_v11  ;;  %v5333_v28 = vrot.slane %v5332_v8, 2  ;;  %v5346_v11 = vld [vmem:[#allocation8] sm:$0x1] }
 0x5d6   :  { %v4546_v53 = vrot.slane %v4545_v57, 1  ;;  %v5334_v52 = vadd.f32 %v5333_v28, %v5332_v8  ;;  %v19442_v8 = vld [vmem:[#allocation15_spill] sm:$0xff]  ;;  %v19444_v28 = vld [vmem:[#allocation17_spill] sm:$0xff] }
 0x5d8   :  { %v4547_v32 = vadd.f32 %v4546_v53, %v4545_v57  ;;  %v5335_v44 = vrot.slane %v5334_v52, 1  ;;  %v19445_v53 = vld [vmem:[#allocation18_spill] sm:$0xff] }
 0x5da   :  { %v5336_v6 = vadd.f32 %v5335_v44, %v5334_v52  ;;  %v5337_v18 = vmul.f32 0.00031887754, %v4547_v32 }
 0x5dc   :  { %v5338_v10 = vmul.f32 0.00031887754, %v5336_v6  ;;  %v5339_v27 = vmul.f32 %v5337_v18, %v5337_v18 }
 0x5de   :  { %v5340_v42 = vsub.f32 %v5338_v10, %v5339_v27  ;;  %v19447_v10 = vld [vmem:[#allocation20_spill] sm:$0xff] }
 0x5e0   :  { %v5341_v13 = vmax.f32 %v5340_v42, 0.0  ;;  %v19448_v42 = vld [vmem:[#allocation21_spill] sm:$0xff] }
 0x5e2   :  { %v5343_v50 = vadd.f32 1e-05, %v5341_v13 }
 0x5e4   :  { %11529 = vrsqrt.f32 %v5343_v50 }
 0x5f1   :  { %v11530_v46 = vpop.eup %11529 }
 0x5f2   :  { %v5345_v37 = vmul.f32 %v11530_v46, %v5342_v58  ;;  %v19449_v58 = vld [vmem:[#allocation22_spill] sm:$0xff] }
 0x5f4   :  { %v5347_v56 = vmul.f32 %v5345_v37, %v5337_v18  ;;  %v13681_v61 = vrot.slane %v5345_v37, %v5352_v24  ;;  %v19450_v37 = vld [vmem:[#allocation23_spill] sm:$0xff] }
 0x5f6   :  { %v5348_v57 = vsub.f32 %v5346_v11, %v5347_v56  ;;  %v5745_v44 = vmul.f32 %v13681_v61, %v13467_v21  ;;  %v5746_v6 = vmul.f32 %v13681_v61, %v13475_v20  ;;  %v13689_v50 = vmul.f32 %v13681_v61, %v19442_v8  ;;  %v19446_v21 = vld [vmem:[#allocation19_spill] sm:$0xff]  ;;  %v19451_v56 = vld [vmem:[#allocation24_spill] sm:$0xff] }
 0x5f7   :  { %v13693_v13 = vmul.f32 %v13681_v61, %v19443_v23  ;;  %v13697_v18 = vmul.f32 %v13681_v61, %v19444_v28  ;;  %v13701_v52 = vmul.f32 %v13681_v61, %v19445_v53  ;;  %v13705_v32 = vmul.f32 %v13681_v61, %v19446_v21  ;;  %v19455_v23 = vld [vmem:[#allocation26_spill] sm:$0xff] }
 0x5f8   :  { %v13707_v20 = vrot.slane %v5348_v57, %v5352_v24  ;;  %v13711_v27 = vmul.f32 %v13681_v61, %v19447_v10  ;;  %v13715_v38 = vmul.f32 %v13681_v61, %v19448_v42  ;;  %v13719_v46 = vmul.f32 %v13681_v61, %v19449_v58  ;;  %v19453_v57 = vld [vmem:[#allocation25_spill] sm:$0xff]  ;;  %v19457_v10 = vld [vmem:[#allocation27_spill] sm:$0xff]  ;;  %v19459_v58 = vld [vmem:[#allocation28_spill] sm:$0xff] }
 0x5f9   :  { %v13723_v11 = vmul.f32 %v13681_v61, %v19450_v37  ;;  %v13727_v24 = vmul.f32 %v13681_v61, %v19451_v56  ;;  %v13731_v8 = vmul.f32 %v13681_v61, %v19453_v57  ;;  %v13735_v28 = vmul.f32 %v13681_v61, %v19455_v23  ;;  %v19461_v56 = vld [vmem:[#allocation29_spill] sm:$0xff] }
 0x5fa   :  { %v6143_v53 = vadd.f32 %v13707_v20, %v5745_v44  ;;  %v6144_v21 = vadd.f32 %v13707_v20, %v5746_v6  ;;  %v13741_v42 = vmul.f32 %v13681_v61, %v19457_v10  ;;  %v13745_v37 = vmul.f32 %v13681_v61, %v19459_v58  ;;  %v19467_v6 = vld [vmem:[#allocation32_spill] sm:$0xff]  ;;  %v19469_v58 = vld [vmem:[#allocation33_spill] sm:$0xff] }
 0x5fb   :  { %19452 = vst [vmem:[#allocation335_spill] sm:$0xff] %v13727_v24  ;;  %19454 = vst [vmem:[#allocation360_spill] sm:$0xff] %v13731_v8  ;;  %v13749_v57 = vmul.f32 %v13681_v61, %v19461_v56  ;;  %v19463_v8 = vld [vmem:[#allocation30_spill] sm:$0xff]  ;;  %v13761_v10 = vmul.f32 %v13681_v61, %v19467_v6  ;;  %v19477_v6 = vld [vmem:[#allocation37_spill] sm:$0xff] }
 0x5fc   :  { %19456 = vst [vmem:[#allocation361_spill] sm:$0xff] %v13735_v28  ;;  %19458 = vst [vmem:[#allocation362_spill] sm:$0xff] %v13741_v42  ;;  %v13753_v23 = vmul.f32 %v13681_v61, %v19463_v8  ;;  %v19465_v28 = vld [vmem:[#allocation31_spill] sm:$0xff]  ;;  %v6535_v42 = vmax.f32 %v6143_v53, 0.0  ;;  %v6536_v24 = vmax.f32 %v6144_v21, 0.0  ;;  %v19471_v56 = vld [vmem:[#allocation34_spill] sm:$0xff]  ;;  %v13781_v53 = vmul.f32 %v13681_v61, %v19477_v6 }
 0x5fd   :  { %19460 = vst [vmem:[#allocation363_spill] sm:$0xff] %v13745_v37  ;;  %19462 = vst [vmem:[#allocation15_spill] sm:$0xff] %v13749_v57  ;;  %v13757_v44 = vmul.f32 %v13681_v61, %v19465_v28  ;;  %v13765_v37 = vmul.f32 %v13681_v61, %v19469_v58  ;;  %v13769_v57 = vmul.f32 %v13681_v61, %v19471_v56  ;;  %v19473_v8 = vld [vmem:[#allocation35_spill] sm:$0xff]  ;;  %v19475_v28 = vld [vmem:[#allocation36_spill] sm:$0xff] }
 0x5fe   :  { %19464 = vst [vmem:[#allocation16_spill] sm:$0xff] %v13753_v23  ;;  %19468 = vst [vmem:[#allocation18_spill] sm:$0xff] %v13761_v10  ;;  %v13773_v23 = vmul.f32 %v13681_v61, %v19473_v8  ;;  %v19479_v21 = vld [vmem:[#allocation38_spill] sm:$0xff]  ;;  %v19480_v10 = vld [vmem:[#allocation39_spill] sm:$0xff] }
 0x5ff   :  { %19466 = vst [vmem:[#allocation17_spill] sm:$0xff] %v13757_v44  ;;  %19470 = vst [vmem:[#allocation19_spill] sm:$0xff] %v13765_v37  ;;  %v13777_v44 = vmul.f32 %v13681_v61, %v19475_v28  ;;  %v13785_v58 = vmul.f32 %v13681_v61, %v19479_v21  ;;  %v10686_v37 = vpack.c.bf16 %v6536_v24, %v6535_v42  ;;  %v19489_v24 = vld [vmem:[#allocation44_spill] sm:$0xff] }
 0x600   :  { %19472 = vst [vmem:[#allocation20_spill] sm:$0xff] %v13769_v57  ;;  %19474 = vst [vmem:[#allocation21_spill] sm:$0xff] %v13773_v23  ;;  %v13789_v56 = vmul.f32 %v13681_v61, %v19480_v10  ;;  %v19481_v57 = vld [vmem:[#allocation40_spill] sm:$0xff]  ;;  %v19483_v23 = vld [vmem:[#allocation41_spill] sm:$0xff]  ;;  %v13809_v42 = vmul.f32 %v13681_v61, %v19489_v24 }
 0x601   :  { %19476 = vst [vmem:[#allocation22_spill] sm:$0xff] %v13777_v44  ;;  %19478 = vst [vmem:[#allocation23_spill] sm:$0xff] %v13781_v53  ;;  %v13793_v8 = vmul.f32 %v13681_v61, %v19481_v57  ;;  %v13797_v28 = vmul.f32 %v13681_v61, %v19483_v23  ;;  %v19485_v44 = vld [vmem:[#allocation42_spill] sm:$0xff]  ;;  %v19487_v53 = vld [vmem:[#allocation43_spill] sm:$0xff] }
 0x602   :  { %v13801_v6 = vmul.f32 %v13681_v61, %v19485_v44  ;;  %v13805_v21 = vmul.f32 %v13681_v61, %v19487_v53  ;;  %19490 = vst [vmem:[#allocation28_spill] sm:$0xff] %v13809_v42  ;;  %v19491_v10 = vld [vmem:[#allocation45_spill] sm:$0xff]  ;;  %10882 = vst [vmem:[#allocation10 + $0x618] sm:$0xff] %v10686_v37   ;;  %v19500_v42 = vld [vmem:[#allocation50_spill] sm:$0xff] }
 0x603   :  { %19482 = vst [vmem:[#allocation24_spill] sm:$0xff] %v13793_v8  ;;  %19484 = vst [vmem:[#allocation25_spill] sm:$0xff] %v13797_v28  ;;  %v13813_v57 = vmul.f32 %v13681_v61, %v19491_v10  ;;  %v19492_v8 = vld [vmem:[#allocation46_spill] sm:$0xff]  ;;  %v19494_v28 = vld [vmem:[#allocation47_spill] sm:$0xff]  ;;  %v13833_v10 = vmul.f32 %v13681_v61, %v19500_v42 }
 0x604   :  { %19486 = vst [vmem:[#allocation26_spill] sm:$0xff] %v13801_v6  ;;  %19488 = vst [vmem:[#allocation27_spill] sm:$0xff] %v13805_v21  ;;  %v13817_v23 = vmul.f32 %v13681_v61, %v19492_v8  ;;  %v13821_v44 = vmul.f32 %v13681_v61, %v19494_v28  ;;  %v19496_v6 = vld [vmem:[#allocation48_spill] sm:$0xff]  ;;  %v19498_v21 = vld [vmem:[#allocation49_spill] sm:$0xff] }
 0x605   :  { %v13825_v53 = vmul.f32 %v13681_v61, %v19496_v6  ;;  %v13829_v24 = vmul.f32 %v13681_v61, %v19498_v21  ;;  %19501 = vst [vmem:[#allocation33_spill] sm:$0xff] %v13833_v10  ;;  %v19502_v37 = vld [vmem:[#allocation51_spill] sm:$0xff]  ;;  %v19512_v10 = vld [vmem:[#allocation56_spill] sm:$0xff] }
 0x606   :  { %19493 = vst [vmem:[#allocation29_spill] sm:$0xff] %v13817_v23  ;;  %19495 = vst [vmem:[#allocation30_spill] sm:$0xff] %v13821_v44  ;;  %v13837_v8 = vmul.f32 %v13681_v61, %v19502_v37  ;;  %v19504_v23 = vld [vmem:[#allocation52_spill] sm:$0xff]  ;;  %v19506_v44 = vld [vmem:[#allocation53_spill] sm:$0xff]  ;;  %v13857_v37 = vmul.f32 %v13681_v61, %v19512_v10 }
 0x607   :  { %19497 = vst [vmem:[#allocation31_spill] sm:$0xff] %v13825_v53  ;;  %19499 = vst [vmem:[#allocation32_spill] sm:$0xff] %v13829_v24  ;;  %v13841_v28 = vmul.f32 %v13681_v61, %v19504_v23  ;;  %v13845_v6 = vmul.f32 %v13681_v61, %v19506_v44  ;;  %v19508_v53 = vld [vmem:[#allocation54_spill] sm:$0xff]  ;;  %v19510_v24 = vld [vmem:[#allocation55_spill] sm:$0xff] }
 0x608   :  { %19503 = vst [vmem:[#allocation34_spill] sm:$0xff] %v13837_v8  ;;  %v13849_v21 = vmul.f32 %v13681_v61, %v19508_v53  ;;  %v13853_v42 = vmul.f32 %v13681_v61, %v19510_v24  ;;  %19513 = vst [vmem:[#allocation39_spill] sm:$0xff] %v13857_v37  ;;  %v19514_v8 = vld [vmem:[#allocation57_spill] sm:$0xff]  ;;  %v19524_v37 = vld [vmem:[#allocation62_spill] sm:$0xff] }
 0x609   :  { %19505 = vst [vmem:[#allocation35_spill] sm:$0xff] %v13841_v28  ;;  %19507 = vst [vmem:[#allocation36_spill] sm:$0xff] %v13845_v6  ;;  %v13861_v23 = vmul.f32 %v13681_v61, %v19514_v8  ;;  %v19516_v28 = vld [vmem:[#allocation58_spill] sm:$0xff]  ;;  %v19518_v6 = vld [vmem:[#allocation59_spill] sm:$0xff]  ;;  %v13881_v8 = vmul.f32 %v13681_v61, %v19524_v37 }
 0x60a   :  { %19509 = vst [vmem:[#allocation37_spill] sm:$0xff] %v13849_v21  ;;  %19511 = vst [vmem:[#allocation38_spill] sm:$0xff] %v13853_v42  ;;  %v13865_v44 = vmul.f32 %v13681_v61, %v19516_v28  ;;  %v13869_v53 = vmul.f32 %v13681_v61, %v19518_v6  ;;  %v19520_v21 = vld [vmem:[#allocation60_spill] sm:$0xff]  ;;  %v19522_v42 = vld [vmem:[#allocation61_spill] sm:$0xff] }
 0x60b   :  { %19515 = vst [vmem:[#allocation40_spill] sm:$0xff] %v13861_v23  ;;  %v13873_v24 = vmul.f32 %v13681_v61, %v19520_v21  ;;  %v13877_v10 = vmul.f32 %v13681_v61, %v19522_v42  ;;  %19525 = vst [vmem:[#allocation45_spill] sm:$0xff] %v13881_v8  ;;  %v19526_v23 = vld [vmem:[#allocation63_spill] sm:$0xff]  ;;  %v19536_v8 = vld [vmem:[#allocation68_spill] sm:$0xff] }
 0x60c   :  { %19517 = vst [vmem:[#allocation41_spill] sm:$0xff] %v13865_v44  ;;  %19519 = vst [vmem:[#allocation42_spill] sm:$0xff] %v13869_v53  ;;  %v13885_v28 = vmul.f32 %v13681_v61, %v19526_v23  ;;  %v19528_v44 = vld [vmem:[#allocation64_spill] sm:$0xff]  ;;  %v19530_v53 = vld [vmem:[#allocation65_spill] sm:$0xff]  ;;  %v13905_v23 = vmul.f32 %v13681_v61, %v19536_v8 }
 0x60d   :  { %19521 = vst [vmem:[#allocation43_spill] sm:$0xff] %v13873_v24  ;;  %19523 = vst [vmem:[#allocation44_spill] sm:$0xff] %v13877_v10  ;;  %v13889_v6 = vmul.f32 %v13681_v61, %v19528_v44  ;;  %v13893_v21 = vmul.f32 %v13681_v61, %v19530_v53  ;;  %v19532_v24 = vld [vmem:[#allocation66_spill] sm:$0xff]  ;;  %v19534_v10 = vld [vmem:[#allocation67_spill] sm:$0xff] }
 0x60e   :  { %19527 = vst [vmem:[#allocation46_spill] sm:$0xff] %v13885_v28  ;;  %v13897_v42 = vmul.f32 %v13681_v61, %v19532_v24  ;;  %v13901_v37 = vmul.f32 %v13681_v61, %v19534_v10  ;;  %19537 = vst [vmem:[#allocation51_spill] sm:$0xff] %v13905_v23  ;;  %v19538_v28 = vld [vmem:[#allocation69_spill] sm:$0xff]  ;;  %v19548_v23 = vld [vmem:[#allocation74_spill] sm:$0xff] }
 0x60f   :  { %19529 = vst [vmem:[#allocation47_spill] sm:$0xff] %v13889_v6  ;;  %19531 = vst [vmem:[#allocation48_spill] sm:$0xff] %v13893_v21  ;;  %v13909_v44 = vmul.f32 %v13681_v61, %v19538_v28  ;;  %v19540_v6 = vld [vmem:[#allocation70_spill] sm:$0xff]  ;;  %v19542_v21 = vld [vmem:[#allocation71_spill] sm:$0xff]  ;;  %v13929_v28 = vmul.f32 %v13681_v61, %v19548_v23 }
 0x610   :  { %19533 = vst [vmem:[#allocation49_spill] sm:$0xff] %v13897_v42  ;;  %19535 = vst [vmem:[#allocation50_spill] sm:$0xff] %v13901_v37  ;;  %v13913_v53 = vmul.f32 %v13681_v61, %v19540_v6  ;;  %v13917_v24 = vmul.f32 %v13681_v61, %v19542_v21  ;;  %v19544_v42 = vld [vmem:[#allocation72_spill] sm:$0xff]  ;;  %v19546_v37 = vld [vmem:[#allocation73_spill] sm:$0xff] }
 0x611   :  { %19539 = vst [vmem:[#allocation52_spill] sm:$0xff] %v13909_v44  ;;  %v13921_v10 = vmul.f32 %v13681_v61, %v19544_v42  ;;  %v13925_v8 = vmul.f32 %v13681_v61, %v19546_v37  ;;  %19549 = vst [vmem:[#allocation57_spill] sm:$0xff] %v13929_v28  ;;  %v19550_v44 = vld [vmem:[#allocation75_spill] sm:$0xff]  ;;  %v19560_v28 = vld [vmem:[#allocation81_spill] sm:$0xff] }
 0x612   :  { %19541 = vst [vmem:[#allocation53_spill] sm:$0xff] %v13913_v53  ;;  %19543 = vst [vmem:[#allocation54_spill] sm:$0xff] %v13917_v24  ;;  %v13933_v6 = vmul.f32 %v13681_v61, %v19550_v44  ;;  %v19552_v53 = vld [vmem:[#allocation76_spill] sm:$0xff]  ;;  %v19554_v24 = vld [vmem:[#allocation77_spill] sm:$0xff]  ;;  %v13953_v44 = vmul.f32 %v13681_v61, %v19560_v28 }
 0x613   :  { %19545 = vst [vmem:[#allocation55_spill] sm:$0xff] %v13921_v10  ;;  %19547 = vst [vmem:[#allocation56_spill] sm:$0xff] %v13925_v8  ;;  %v13937_v21 = vmul.f32 %v13681_v61, %v19552_v53  ;;  %v13941_v42 = vmul.f32 %v13681_v61, %v19554_v24  ;;  %v19556_v10 = vld [vmem:[#allocation78_spill] sm:$0xff]  ;;  %v19558_v8 = vld [vmem:[#allocation79_spill] sm:$0xff] }
 0x614   :  { %19551 = vst [vmem:[#allocation58_spill] sm:$0xff] %v13933_v6  ;;  %v13945_v37 = vmul.f32 %v13681_v61, %v19556_v10  ;;  %v13949_v23 = vmul.f32 %v13681_v61, %v19558_v8  ;;  %19561 = vst [vmem:[#allocation63_spill] sm:$0xff] %v13953_v44  ;;  %v19562_v6 = vld [vmem:[#allocation83_spill] sm:$0xff]  ;;  %v19572_v44 = vld [vmem:[#allocation93_spill] sm:$0xff] }
 0x615   :  { %19553 = vst [vmem:[#allocation59_spill] sm:$0xff] %v13937_v21  ;;  %19555 = vst [vmem:[#allocation60_spill] sm:$0xff] %v13941_v42  ;;  %v13957_v53 = vmul.f32 %v13681_v61, %v19562_v6  ;;  %v19564_v21 = vld [vmem:[#allocation85_spill] sm:$0xff]  ;;  %v19566_v42 = vld [vmem:[#allocation87_spill] sm:$0xff]  ;;  %v13977_v6 = vmul.f32 %v13681_v61, %v19572_v44 }
 0x616   :  { %19557 = vst [vmem:[#allocation61_spill] sm:$0xff] %v13945_v37  ;;  %19559 = vst [vmem:[#allocation62_spill] sm:$0xff] %v13949_v23  ;;  %v13961_v24 = vmul.f32 %v13681_v61, %v19564_v21  ;;  %v13965_v10 = vmul.f32 %v13681_v61, %v19566_v42  ;;  %v19568_v37 = vld [vmem:[#allocation89_spill] sm:$0xff]  ;;  %v19570_v23 = vld [vmem:[#allocation91_spill] sm:$0xff] }
 0x617   :  { %19563 = vst [vmem:[#allocation64_spill] sm:$0xff] %v13957_v53  ;;  %v13969_v8 = vmul.f32 %v13681_v61, %v19568_v37  ;;  %v13973_v28 = vmul.f32 %v13681_v61, %v19570_v23  ;;  %19573 = vst [vmem:[#allocation69_spill] sm:$0xff] %v13977_v6  ;;  %v19574_v53 = vld [vmem:[#allocation95_spill] sm:$0xff]  ;;  %v19584_v6 = vld [vmem:[#allocation105_spill] sm:$0xff] }
 0x618   :  { %19565 = vst [vmem:[#allocation65_spill] sm:$0xff] %v13961_v24  ;;  %19567 = vst [vmem:[#allocation66_spill] sm:$0xff] %v13965_v10  ;;  %v13981_v21 = vmul.f32 %v13681_v61, %v19574_v53  ;;  %v19576_v24 = vld [vmem:[#allocation97_spill] sm:$0xff]  ;;  %v19578_v10 = vld [vmem:[#allocation99_spill] sm:$0xff]  ;;  %v14001_v53 = vmul.f32 %v13681_v61, %v19584_v6 }
 0x619   :  { %19569 = vst [vmem:[#allocation67_spill] sm:$0xff] %v13969_v8  ;;  %19571 = vst [vmem:[#allocation68_spill] sm:$0xff] %v13973_v28  ;;  %v13985_v42 = vmul.f32 %v13681_v61, %v19576_v24  ;;  %v13989_v37 = vmul.f32 %v13681_v61, %v19578_v10  ;;  %v19580_v8 = vld [vmem:[#allocation101_spill] sm:$0xff]  ;;  %v19582_v28 = vld [vmem:[#allocation103_spill] sm:$0xff] }
 0x61a   :  { %19575 = vst [vmem:[#allocation70_spill] sm:$0xff] %v13981_v21  ;;  %v13993_v23 = vmul.f32 %v13681_v61, %v19580_v8  ;;  %v13997_v44 = vmul.f32 %v13681_v61, %v19582_v28  ;;  %19585 = vst [vmem:[#allocation75_spill] sm:$0xff] %v14001_v53  ;;  %v19586_v21 = vld [vmem:[#allocation107_spill] sm:$0xff]  ;;  %v19596_v53 = vld [vmem:[#allocation117_spill] sm:$0xff] }
 0x61b   :  { %19577 = vst [vmem:[#allocation71_spill] sm:$0xff] %v13985_v42  ;;  %19579 = vst [vmem:[#allocation72_spill] sm:$0xff] %v13989_v37  ;;  %v14005_v24 = vmul.f32 %v13681_v61, %v19586_v21  ;;  %v19588_v42 = vld [vmem:[#allocation109_spill] sm:$0xff]  ;;  %v19590_v37 = vld [vmem:[#allocation111_spill] sm:$0xff]  ;;  %v14025_v21 = vmul.f32 %v13681_v61, %v19596_v53 }
 0x61c   :  { %19581 = vst [vmem:[#allocation73_spill] sm:$0xff] %v13993_v23  ;;  %19583 = vst [vmem:[#allocation74_spill] sm:$0xff] %v13997_v44  ;;  %v14009_v10 = vmul.f32 %v13681_v61, %v19588_v42  ;;  %v14013_v8 = vmul.f32 %v13681_v61, %v19590_v37  ;;  %v19592_v23 = vld [vmem:[#allocation113_spill] sm:$0xff]  ;;  %v19594_v44 = vld [vmem:[#allocation115_spill] sm:$0xff] }
 0x61d   :  { %19587 = vst [vmem:[#allocation76_spill] sm:$0xff] %v14005_v24  ;;  %v14017_v28 = vmul.f32 %v13681_v61, %v19592_v23  ;;  %v14021_v6 = vmul.f32 %v13681_v61, %v19594_v44  ;;  %19597 = vst [vmem:[#allocation83_spill] sm:$0xff] %v14025_v21  ;;  %v19598_v24 = vld [vmem:[#allocation119_spill] sm:$0xff]  ;;  %v19608_v21 = vld [vmem:[#allocation129_spill] sm:$0xff] }
 0x61e   :  { %19589 = vst [vmem:[#allocation77_spill] sm:$0xff] %v14009_v10  ;;  %19591 = vst [vmem:[#allocation78_spill] sm:$0xff] %v14013_v8  ;;  %v14029_v42 = vmul.f32 %v13681_v61, %v19598_v24  ;;  %v19600_v10 = vld [vmem:[#allocation121_spill] sm:$0xff]  ;;  %v19602_v8 = vld [vmem:[#allocation123_spill] sm:$0xff]  ;;  %v14049_v24 = vmul.f32 %v13681_v61, %v19608_v21 }
 0x61f   :  { %19593 = vst [vmem:[#allocation79_spill] sm:$0xff] %v14017_v28  ;;  %19595 = vst [vmem:[#allocation81_spill] sm:$0xff] %v14021_v6  ;;  %v14033_v37 = vmul.f32 %v13681_v61, %v19600_v10  ;;  %v14037_v23 = vmul.f32 %v13681_v61, %v19602_v8  ;;  %v19604_v28 = vld [vmem:[#allocation125_spill] sm:$0xff]  ;;  %v19606_v6 = vld [vmem:[#allocation127_spill] sm:$0xff] }
 0x620   :  { %19599 = vst [vmem:[#allocation85_spill] sm:$0xff] %v14029_v42  ;;  %v14041_v44 = vmul.f32 %v13681_v61, %v19604_v28  ;;  %v14045_v53 = vmul.f32 %v13681_v61, %v19606_v6  ;;  %19609 = vst [vmem:[#allocation95_spill] sm:$0xff] %v14049_v24  ;;  %v19610_v42 = vld [vmem:[#allocation131_spill] sm:$0xff]  ;;  %v19620_v24 = vld [vmem:[#allocation141_spill] sm:$0xff] }
 0x621   :  { %19601 = vst [vmem:[#allocation87_spill] sm:$0xff] %v14033_v37  ;;  %19603 = vst [vmem:[#allocation89_spill] sm:$0xff] %v14037_v23  ;;  %v14053_v10 = vmul.f32 %v13681_v61, %v19610_v42  ;;  %v19612_v37 = vld [vmem:[#allocation133_spill] sm:$0xff]  ;;  %v19614_v23 = vld [vmem:[#allocation135_spill] sm:$0xff]  ;;  %v14073_v42 = vmul.f32 %v13681_v61, %v19620_v24 }
 0x622   :  { %19605 = vst [vmem:[#allocation91_spill] sm:$0xff] %v14041_v44  ;;  %19607 = vst [vmem:[#allocation93_spill] sm:$0xff] %v14045_v53  ;;  %v14057_v8 = vmul.f32 %v13681_v61, %v19612_v37  ;;  %v14061_v28 = vmul.f32 %v13681_v61, %v19614_v23  ;;  %v19616_v44 = vld [vmem:[#allocation137_spill] sm:$0xff]  ;;  %v19618_v53 = vld [vmem:[#allocation139_spill] sm:$0xff] }
 0x623   :  { %19611 = vst [vmem:[#allocation97_spill] sm:$0xff] %v14053_v10  ;;  %v14065_v6 = vmul.f32 %v13681_v61, %v19616_v44  ;;  %v14069_v21 = vmul.f32 %v13681_v61, %v19618_v53  ;;  %19621 = vst [vmem:[#allocation107_spill] sm:$0xff] %v14073_v42  ;;  %v19622_v10 = vld [vmem:[#allocation143_spill] sm:$0xff]  ;;  %v19632_v42 = vld [vmem:[#allocation153_spill] sm:$0xff] }
 0x624   :  { %19613 = vst [vmem:[#allocation99_spill] sm:$0xff] %v14057_v8  ;;  %19615 = vst [vmem:[#allocation101_spill] sm:$0xff] %v14061_v28  ;;  %v14077_v37 = vmul.f32 %v13681_v61, %v19622_v10  ;;  %v19624_v8 = vld [vmem:[#allocation145_spill] sm:$0xff]  ;;  %v19626_v28 = vld [vmem:[#allocation147_spill] sm:$0xff]  ;;  %v14097_v10 = vmul.f32 %v13681_v61, %v19632_v42 }
 0x625   :  { %19617 = vst [vmem:[#allocation103_spill] sm:$0xff] %v14065_v6  ;;  %19619 = vst [vmem:[#allocation105_spill] sm:$0xff] %v14069_v21  ;;  %v14081_v23 = vmul.f32 %v13681_v61, %v19624_v8  ;;  %v14085_v44 = vmul.f32 %v13681_v61, %v19626_v28  ;;  %v19628_v6 = vld [vmem:[#allocation149_spill] sm:$0xff]  ;;  %v19630_v21 = vld [vmem:[#allocation151_spill] sm:$0xff] }
 0x626   :  { %19623 = vst [vmem:[#allocation109_spill] sm:$0xff] %v14077_v37  ;;  %v14089_v53 = vmul.f32 %v13681_v61, %v19628_v6  ;;  %v14093_v24 = vmul.f32 %v13681_v61, %v19630_v21  ;;  %19633 = vst [vmem:[#allocation119_spill] sm:$0xff] %v14097_v10  ;;  %v19634_v37 = vld [vmem:[#allocation155_spill] sm:$0xff]  ;;  %v19644_v10 = vld [vmem:[#allocation165_spill] sm:$0xff] }
 0x627   :  { %19625 = vst [vmem:[#allocation111_spill] sm:$0xff] %v14081_v23  ;;  %19627 = vst [vmem:[#allocation113_spill] sm:$0xff] %v14085_v44  ;;  %v14101_v8 = vmul.f32 %v13681_v61, %v19634_v37  ;;  %v19636_v23 = vld [vmem:[#allocation157_spill] sm:$0xff]  ;;  %v19638_v44 = vld [vmem:[#allocation159_spill] sm:$0xff]  ;;  %v14121_v37 = vmul.f32 %v13681_v61, %v19644_v10 }
 0x628   :  { %19629 = vst [vmem:[#allocation115_spill] sm:$0xff] %v14089_v53  ;;  %19631 = vst [vmem:[#allocation117_spill] sm:$0xff] %v14093_v24  ;;  %v14105_v28 = vmul.f32 %v13681_v61, %v19636_v23  ;;  %v14109_v6 = vmul.f32 %v13681_v61, %v19638_v44  ;;  %v19640_v53 = vld [vmem:[#allocation161_spill] sm:$0xff]  ;;  %v19642_v24 = vld [vmem:[#allocation163_spill] sm:$0xff] }
 0x629   :  { %19635 = vst [vmem:[#allocation121_spill] sm:$0xff] %v14101_v8  ;;  %v14113_v21 = vmul.f32 %v13681_v61, %v19640_v53  ;;  %v14117_v42 = vmul.f32 %v13681_v61, %v19642_v24  ;;  %19645 = vst [vmem:[#allocation131_spill] sm:$0xff] %v14121_v37  ;;  %v19646_v8 = vld [vmem:[#allocation167_spill] sm:$0xff]  ;;  %v19656_v37 = vld [vmem:[#allocation177_spill] sm:$0xff] }
 0x62a   :  { %19637 = vst [vmem:[#allocation123_spill] sm:$0xff] %v14105_v28  ;;  %19639 = vst [vmem:[#allocation125_spill] sm:$0xff] %v14109_v6  ;;  %v14125_v23 = vmul.f32 %v13681_v61, %v19646_v8  ;;  %v19648_v28 = vld [vmem:[#allocation169_spill] sm:$0xff]  ;;  %v19650_v6 = vld [vmem:[#allocation171_spill] sm:$0xff]  ;;  %v14145_v8 = vmul.f32 %v13681_v61, %v19656_v37 }
 0x62b   :  { %19641 = vst [vmem:[#allocation127_spill] sm:$0xff] %v14113_v21  ;;  %19643 = vst [vmem:[#allocation129_spill] sm:$0xff] %v14117_v42  ;;  %v14129_v44 = vmul.f32 %v13681_v61, %v19648_v28  ;;  %v14133_v53 = vmul.f32 %v13681_v61, %v19650_v6  ;;  %v19652_v21 = vld [vmem:[#allocation173_spill] sm:$0xff]  ;;  %v19654_v42 = vld [vmem:[#allocation175_spill] sm:$0xff] }
 0x62c   :  { %19647 = vst [vmem:[#allocation133_spill] sm:$0xff] %v14125_v23  ;;  %v14137_v24 = vmul.f32 %v13681_v61, %v19652_v21  ;;  %v14141_v10 = vmul.f32 %v13681_v61, %v19654_v42  ;;  %19657 = vst [vmem:[#allocation143_spill] sm:$0xff] %v14145_v8  ;;  %v19658_v23 = vld [vmem:[#allocation179_spill] sm:$0xff]  ;;  %v19668_v8 = vld [vmem:[#allocation189_spill] sm:$0xff] }
 0x62d   :  { %19649 = vst [vmem:[#allocation135_spill] sm:$0xff] %v14129_v44  ;;  %19651 = vst [vmem:[#allocation137_spill] sm:$0xff] %v14133_v53  ;;  %v14149_v28 = vmul.f32 %v13681_v61, %v19658_v23  ;;  %v19660_v44 = vld [vmem:[#allocation181_spill] sm:$0xff]  ;;  %v19662_v53 = vld [vmem:[#allocation183_spill] sm:$0xff]  ;;  %v14169_v23 = vmul.f32 %v13681_v61, %v19668_v8 }
 0x62e   :  { %19653 = vst [vmem:[#allocation139_spill] sm:$0xff] %v14137_v24  ;;  %19655 = vst [vmem:[#allocation141_spill] sm:$0xff] %v14141_v10  ;;  %v14153_v6 = vmul.f32 %v13681_v61, %v19660_v44  ;;  %v14157_v21 = vmul.f32 %v13681_v61, %v19662_v53  ;;  %v19664_v24 = vld [vmem:[#allocation185_spill] sm:$0xff]  ;;  %v19666_v10 = vld [vmem:[#allocation187_spill] sm:$0xff] }
 0x62f   :  { %19659 = vst [vmem:[#allocation145_spill] sm:$0xff] %v14149_v28  ;;  %v14161_v42 = vmul.f32 %v13681_v61, %v19664_v24  ;;  %v14165_v37 = vmul.f32 %v13681_v61, %v19666_v10  ;;  %19669 = vst [vmem:[#allocation155_spill] sm:$0xff] %v14169_v23  ;;  %v19670_v28 = vld [vmem:[#allocation191_spill] sm:$0xff]  ;;  %v19680_v23 = vld [vmem:[#allocation201_spill] sm:$0xff] }
 0x630   :  { %19661 = vst [vmem:[#allocation147_spill] sm:$0xff] %v14153_v6  ;;  %19663 = vst [vmem:[#allocation149_spill] sm:$0xff] %v14157_v21  ;;  %v14173_v44 = vmul.f32 %v13681_v61, %v19670_v28  ;;  %v19672_v6 = vld [vmem:[#allocation193_spill] sm:$0xff]  ;;  %v19674_v21 = vld [vmem:[#allocation195_spill] sm:$0xff]  ;;  %v14193_v28 = vmul.f32 %v13681_v61, %v19680_v23 }
 0x631   :  { %19665 = vst [vmem:[#allocation151_spill] sm:$0xff] %v14161_v42  ;;  %19667 = vst [vmem:[#allocation153_spill] sm:$0xff] %v14165_v37  ;;  %v14177_v53 = vmul.f32 %v13681_v61, %v19672_v6  ;;  %v14181_v24 = vmul.f32 %v13681_v61, %v19674_v21  ;;  %v19676_v42 = vld [vmem:[#allocation197_spill] sm:$0xff]  ;;  %v19678_v37 = vld [vmem:[#allocation199_spill] sm:$0xff] }
 0x632   :  { %19671 = vst [vmem:[#allocation157_spill] sm:$0xff] %v14173_v44  ;;  %v14185_v10 = vmul.f32 %v13681_v61, %v19676_v42  ;;  %v14189_v8 = vmul.f32 %v13681_v61, %v19678_v37  ;;  %19681 = vst [vmem:[#allocation167_spill] sm:$0xff] %v14193_v28  ;;  %v19682_v44 = vld [vmem:[#allocation203_spill] sm:$0xff]  ;;  %v19692_v28 = vld [vmem:[#allocation213_spill] sm:$0xff] }
 0x633   :  { %19673 = vst [vmem:[#allocation159_spill] sm:$0xff] %v14177_v53  ;;  %19675 = vst [vmem:[#allocation161_spill] sm:$0xff] %v14181_v24  ;;  %v14197_v6 = vmul.f32 %v13681_v61, %v19682_v44  ;;  %v19684_v53 = vld [vmem:[#allocation205_spill] sm:$0xff]  ;;  %v19686_v24 = vld [vmem:[#allocation207_spill] sm:$0xff]  ;;  %v14217_v44 = vmul.f32 %v13681_v61, %v19692_v28 }
 0x634   :  { %19677 = vst [vmem:[#allocation163_spill] sm:$0xff] %v14185_v10  ;;  %19679 = vst [vmem:[#allocation165_spill] sm:$0xff] %v14189_v8  ;;  %v14201_v21 = vmul.f32 %v13681_v61, %v19684_v53  ;;  %v14205_v42 = vmul.f32 %v13681_v61, %v19686_v24  ;;  %v19688_v10 = vld [vmem:[#allocation209_spill] sm:$0xff]  ;;  %v19690_v8 = vld [vmem:[#allocation211_spill] sm:$0xff] }
 0x635   :  { %19683 = vst [vmem:[#allocation169_spill] sm:$0xff] %v14197_v6  ;;  %v14209_v37 = vmul.f32 %v13681_v61, %v19688_v10  ;;  %v14213_v23 = vmul.f32 %v13681_v61, %v19690_v8  ;;  %19693 = vst [vmem:[#allocation179_spill] sm:$0xff] %v14217_v44  ;;  %v19694_v6 = vld [vmem:[#allocation215_spill] sm:$0xff]  ;;  %v19704_v44 = vld [vmem:[#allocation225_spill] sm:$0xff] }
 0x636   :  { %19685 = vst [vmem:[#allocation171_spill] sm:$0xff] %v14201_v21  ;;  %19687 = vst [vmem:[#allocation173_spill] sm:$0xff] %v14205_v42  ;;  %v14221_v53 = vmul.f32 %v13681_v61, %v19694_v6  ;;  %v19696_v21 = vld [vmem:[#allocation217_spill] sm:$0xff]  ;;  %v19698_v42 = vld [vmem:[#allocation219_spill] sm:$0xff]  ;;  %v14241_v6 = vmul.f32 %v13681_v61, %v19704_v44 }
 0x637   :  { %19689 = vst [vmem:[#allocation175_spill] sm:$0xff] %v14209_v37  ;;  %19691 = vst [vmem:[#allocation177_spill] sm:$0xff] %v14213_v23  ;;  %v14225_v24 = vmul.f32 %v13681_v61, %v19696_v21  ;;  %v14229_v10 = vmul.f32 %v13681_v61, %v19698_v42  ;;  %v19700_v37 = vld [vmem:[#allocation221_spill] sm:$0xff]  ;;  %v19702_v23 = vld [vmem:[#allocation223_spill] sm:$0xff] }
 0x638   :  { %19695 = vst [vmem:[#allocation181_spill] sm:$0xff] %v14221_v53  ;;  %v14233_v8 = vmul.f32 %v13681_v61, %v19700_v37  ;;  %v14237_v28 = vmul.f32 %v13681_v61, %v19702_v23  ;;  %19705 = vst [vmem:[#allocation191_spill] sm:$0xff] %v14241_v6  ;;  %v19706_v53 = vld [vmem:[#allocation227_spill] sm:$0xff]  ;;  %v19716_v6 = vld [vmem:[#allocation237_spill] sm:$0xff] }
 0x639   :  { %19697 = vst [vmem:[#allocation183_spill] sm:$0xff] %v14225_v24  ;;  %19699 = vst [vmem:[#allocation185_spill] sm:$0xff] %v14229_v10  ;;  %v14245_v21 = vmul.f32 %v13681_v61, %v19706_v53  ;;  %v19708_v24 = vld [vmem:[#allocation229_spill] sm:$0xff]  ;;  %v19710_v10 = vld [vmem:[#allocation231_spill] sm:$0xff]  ;;  %v14265_v53 = vmul.f32 %v13681_v61, %v19716_v6 }
 0x63a   :  { %19701 = vst [vmem:[#allocation187_spill] sm:$0xff] %v14233_v8  ;;  %19703 = vst [vmem:[#allocation189_spill] sm:$0xff] %v14237_v28  ;;  %v14249_v42 = vmul.f32 %v13681_v61, %v19708_v24  ;;  %v14253_v37 = vmul.f32 %v13681_v61, %v19710_v10  ;;  %v19712_v8 = vld [vmem:[#allocation233_spill] sm:$0xff]  ;;  %v19714_v28 = vld [vmem:[#allocation235_spill] sm:$0xff] }
 0x63b   :  { %19707 = vst [vmem:[#allocation193_spill] sm:$0xff] %v14245_v21  ;;  %v14257_v23 = vmul.f32 %v13681_v61, %v19712_v8  ;;  %v14261_v44 = vmul.f32 %v13681_v61, %v19714_v28  ;;  %19717 = vst [vmem:[#allocation203_spill] sm:$0xff] %v14265_v53  ;;  %v19718_v21 = vld [vmem:[#allocation239_spill] sm:$0xff] }
 0x63c   :  { %19709 = vst [vmem:[#allocation195_spill] sm:$0xff] %v14249_v42  ;;  %19711 = vst [vmem:[#allocation197_spill] sm:$0xff] %v14253_v37  ;;  %v14269_v24 = vmul.f32 %v13681_v61, %v19718_v21  ;;  %v19720_v42 = vld [vmem:[#allocation241_spill] sm:$0xff]  ;;  %v19722_v37 = vld [vmem:[#allocation243_spill] sm:$0xff] }
 0x63d   :  { %19713 = vst [vmem:[#allocation199_spill] sm:$0xff] %v14257_v23  ;;  %19715 = vst [vmem:[#allocation201_spill] sm:$0xff] %v14261_v44  ;;  %v14273_v10 = vmul.f32 %v13681_v61, %v19720_v42  ;;  %v14277_v8 = vmul.f32 %v13681_v61, %v19722_v37  ;;  %v19724_v23 = vld [vmem:[#allocation244_spill] sm:$0xff]  ;;  %v19726_v44 = vld [vmem:[#allocation246_spill] sm:$0xff] }
 0x63e   :  { %19719 = vst [vmem:[#allocation205_spill] sm:$0xff] %v14269_v24  ;;  %v14281_v28 = vmul.f32 %v13681_v61, %v19724_v23  ;;  %v14285_v6 = vmul.f32 %v13681_v61, %v19726_v44  ;;  %v19728_v53 = vld [vmem:[#allocation247_spill] sm:$0xff]  ;;  %v19730_v24 = vld [vmem:[#allocation249_spill] sm:$0xff] }
 0x63f   :  { %19721 = vst [vmem:[#allocation207_spill] sm:$0xff] %v14273_v10  ;;  %19723 = vst [vmem:[#allocation209_spill] sm:$0xff] %v14277_v8  ;;  %v14289_v21 = vmul.f32 %v13681_v61, %v19728_v53  ;;  %v14293_v42 = vmul.f32 %v13681_v61, %v19730_v24  ;;  %v19732_v10 = vld [vmem:[#allocation250_spill] sm:$0xff]  ;;  %v19734_v8 = vld [vmem:[#allocation252_spill] sm:$0xff] }
 0x640   :  { %19725 = vst [vmem:[#allocation211_spill] sm:$0xff] %v14281_v28  ;;  %19727 = vst [vmem:[#allocation213_spill] sm:$0xff] %v14285_v6  ;;  %v14297_v37 = vmul.f32 %v13681_v61, %v19732_v10  ;;  %v14301_v23 = vmul.f32 %v13681_v61, %v19734_v8  ;;  %v19736_v28 = vld [vmem:[#allocation253_spill] sm:$0xff]  ;;  %v19738_v6 = vld [vmem:[#allocation255_spill] sm:$0xff] }
 0x641   :  { %19729 = vst [vmem:[#allocation215_spill] sm:$0xff] %v14289_v21  ;;  %19731 = vst [vmem:[#allocation217_spill] sm:$0xff] %v14293_v42  ;;  %v14305_v44 = vmul.f32 %v13681_v61, %v19736_v28  ;;  %v14309_v53 = vmul.f32 %v13681_v61, %v19738_v6  ;;  %v19740_v21 = vld [vmem:[#allocation256_spill] sm:$0xff]  ;;  %v19742_v42 = vld [vmem:[#allocation258_spill] sm:$0xff] }
 0x642   :  { %19733 = vst [vmem:[#allocation219_spill] sm:$0xff] %v14297_v37  ;;  %19735 = vst [vmem:[#allocation221_spill] sm:$0xff] %v14301_v23  ;;  %v14313_v24 = vmul.f32 %v13681_v61, %v19740_v21  ;;  %v14317_v10 = vmul.f32 %v13681_v61, %v19742_v42  ;;  %v19744_v37 = vld [vmem:[#allocation259_spill] sm:$0xff]  ;;  %v19746_v23 = vld [vmem:[#allocation261_spill] sm:$0xff] }
 0x643   :  { %19737 = vst [vmem:[#allocation223_spill] sm:$0xff] %v14305_v44  ;;  %19739 = vst [vmem:[#allocation225_spill] sm:$0xff] %v14309_v53  ;;  %v14321_v8 = vmul.f32 %v13681_v61, %v19744_v37  ;;  %v14325_v28 = vmul.f32 %v13681_v61, %v19746_v23  ;;  %v19748_v44 = vld [vmem:[#allocation263_spill] sm:$0xff]  ;;  %v19750_v53 = vld [vmem:[#allocation265_spill] sm:$0xff] }
 0x644   :  { %19741 = vst [vmem:[#allocation227_spill] sm:$0xff] %v14313_v24  ;;  %19743 = vst [vmem:[#allocation229_spill] sm:$0xff] %v14317_v10  ;;  %v14329_v6 = vmul.f32 %v13681_v61, %v19748_v44  ;;  %v14333_v21 = vmul.f32 %v13681_v61, %v19750_v53  ;;  %v19752_v24 = vld [vmem:[#allocation266_spill] sm:$0xff]  ;;  %v19754_v10 = vld [vmem:[#allocation268_spill] sm:$0xff] }
 0x645   :  { %19745 = vst [vmem:[#allocation231_spill] sm:$0xff] %v14321_v8  ;;  %19747 = vst [vmem:[#allocation233_spill] sm:$0xff] %v14325_v28  ;;  %v14337_v42 = vmul.f32 %v13681_v61, %v19752_v24  ;;  %v14341_v37 = vmul.f32 %v13681_v61, %v19754_v10  ;;  %v19756_v8 = vld [vmem:[#allocation269_spill] sm:$0xff]  ;;  %v19758_v28 = vld [vmem:[#allocation271_spill] sm:$0xff] }
 0x646   :  { %19749 = vst [vmem:[#allocation235_spill] sm:$0xff] %v14329_v6  ;;  %19751 = vst [vmem:[#allocation237_spill] sm:$0xff] %v14333_v21  ;;  %v14345_v23 = vmul.f32 %v13681_v61, %v19756_v8  ;;  %v14349_v44 = vmul.f32 %v13681_v61, %v19758_v28  ;;  %v19760_v6 = vld [vmem:[#allocation272_spill] sm:$0xff]  ;;  %v19762_v21 = vld [vmem:[#allocation274_spill] sm:$0xff] }
 0x647   :  { %19753 = vst [vmem:[#allocation239_spill] sm:$0xff] %v14337_v42  ;;  %19755 = vst [vmem:[#allocation241_spill] sm:$0xff] %v14341_v37  ;;  %v14353_v53 = vmul.f32 %v13681_v61, %v19760_v6  ;;  %v14357_v24 = vmul.f32 %v13681_v61, %v19762_v21  ;;  %v19764_v42 = vld [vmem:[#allocation276_spill] sm:$0xff]  ;;  %v19766_v37 = vld [vmem:[#allocation278_spill] sm:$0xff] }
 0x648   :  { %19757 = vst [vmem:[#allocation243_spill] sm:$0xff] %v14345_v23  ;;  %19759 = vst [vmem:[#allocation244_spill] sm:$0xff] %v14349_v44  ;;  %v14361_v10 = vmul.f32 %v13681_v61, %v19764_v42  ;;  %v14365_v8 = vmul.f32 %v13681_v61, %v19766_v37  ;;  %v19768_v23 = vld [vmem:[#allocation279_spill] sm:$0xff]  ;;  %v19770_v44 = vld [vmem:[#allocation281_spill] sm:$0xff] }
 0x649   :  { %19761 = vst [vmem:[#allocation246_spill] sm:$0xff] %v14353_v53  ;;  %19763 = vst [vmem:[#allocation247_spill] sm:$0xff] %v14357_v24  ;;  %v14369_v28 = vmul.f32 %v13681_v61, %v19768_v23  ;;  %v14373_v6 = vmul.f32 %v13681_v61, %v19770_v44  ;;  %v19772_v53 = vld [vmem:[#allocation282_spill] sm:$0xff]  ;;  %v19774_v24 = vld [vmem:[#allocation284_spill] sm:$0xff] }
 0x64a   :  { %19765 = vst [vmem:[#allocation249_spill] sm:$0xff] %v14361_v10  ;;  %19767 = vst [vmem:[#allocation250_spill] sm:$0xff] %v14365_v8  ;;  %v14377_v21 = vmul.f32 %v13681_v61, %v19772_v53  ;;  %v14381_v42 = vmul.f32 %v13681_v61, %v19774_v24  ;;  %v19776_v10 = vld [vmem:[#allocation285_spill] sm:$0xff]  ;;  %v19778_v8 = vld [vmem:[#allocation287_spill] sm:$0xff] }
 0x64b   :  { %19769 = vst [vmem:[#allocation252_spill] sm:$0xff] %v14369_v28  ;;  %19771 = vst [vmem:[#allocation253_spill] sm:$0xff] %v14373_v6  ;;  %v14385_v37 = vmul.f32 %v13681_v61, %v19776_v10  ;;  %v14389_v23 = vmul.f32 %v13681_v61, %v19778_v8  ;;  %v19780_v28 = vld [vmem:[#allocation288_spill] sm:$0xff]  ;;  %v19782_v6 = vld [vmem:[#allocation290_spill] sm:$0xff] }
 0x64c   :  { %19773 = vst [vmem:[#allocation255_spill] sm:$0xff] %v14377_v21  ;;  %19775 = vst [vmem:[#allocation256_spill] sm:$0xff] %v14381_v42  ;;  %v14393_v44 = vmul.f32 %v13681_v61, %v19780_v28  ;;  %v14397_v53 = vmul.f32 %v13681_v61, %v19782_v6  ;;  %v19784_v21 = vld [vmem:[#allocation291_spill] sm:$0xff]  ;;  %v19786_v42 = vld [vmem:[#allocation293_spill] sm:$0xff] }
 0x64d   :  { %19777 = vst [vmem:[#allocation258_spill] sm:$0xff] %v14385_v37  ;;  %19779 = vst [vmem:[#allocation259_spill] sm:$0xff] %v14389_v23  ;;  %v14401_v24 = vmul.f32 %v13681_v61, %v19784_v21  ;;  %v14405_v10 = vmul.f32 %v13681_v61, %v19786_v42  ;;  %v19788_v37 = vld [vmem:[#allocation294_spill] sm:$0xff]  ;;  %v19790_v23 = vld [vmem:[#allocation296_spill] sm:$0xff] }
 0x64e   :  { %19781 = vst [vmem:[#allocation261_spill] sm:$0xff] %v14393_v44  ;;  %19783 = vst [vmem:[#allocation263_spill] sm:$0xff] %v14397_v53  ;;  %v14409_v8 = vmul.f32 %v13681_v61, %v19788_v37  ;;  %v14413_v28 = vmul.f32 %v13681_v61, %v19790_v23  ;;  %v19792_v44 = vld [vmem:[#allocation297_spill] sm:$0xff]  ;;  %v19794_v53 = vld [vmem:[#allocation299_spill] sm:$0xff] }
 0x64f   :  { %19785 = vst [vmem:[#allocation265_spill] sm:$0xff] %v14401_v24  ;;  %19787 = vst [vmem:[#allocation266_spill] sm:$0xff] %v14405_v10  ;;  %v14417_v6 = vmul.f32 %v13681_v61, %v19792_v44  ;;  %v14421_v21 = vmul.f32 %v13681_v61, %v19794_v53  ;;  %v19796_v24 = vld [vmem:[#allocation300_spill] sm:$0xff]  ;;  %v19798_v10 = vld [vmem:[#allocation302_spill] sm:$0xff] }
 0x650   :  { %19789 = vst [vmem:[#allocation268_spill] sm:$0xff] %v14409_v8  ;;  %19791 = vst [vmem:[#allocation269_spill] sm:$0xff] %v14413_v28  ;;  %v14425_v42 = vmul.f32 %v13681_v61, %v19796_v24  ;;  %v14429_v37 = vmul.f32 %v13681_v61, %v19798_v10  ;;  %v19800_v8 = vld [vmem:[#allocation303_spill] sm:$0xff]  ;;  %v19802_v28 = vld [vmem:[#allocation305_spill] sm:$0xff] }
 0x651   :  { %19793 = vst [vmem:[#allocation271_spill] sm:$0xff] %v14417_v6  ;;  %19795 = vst [vmem:[#allocation272_spill] sm:$0xff] %v14421_v21  ;;  %v14433_v23 = vmul.f32 %v13681_v61, %v19800_v8  ;;  %v14437_v44 = vmul.f32 %v13681_v61, %v19802_v28  ;;  %v19804_v6 = vld [vmem:[#allocation307_spill] sm:$0xff]  ;;  %v19806_v21 = vld [vmem:[#allocation309_spill] sm:$0xff] }
 0x652   :  { %19797 = vst [vmem:[#allocation274_spill] sm:$0xff] %v14425_v42  ;;  %19799 = vst [vmem:[#allocation276_spill] sm:$0xff] %v14429_v37  ;;  %v14441_v53 = vmul.f32 %v13681_v61, %v19804_v6  ;;  %v14445_v24 = vmul.f32 %v13681_v61, %v19806_v21  ;;  %v19808_v42 = vld [vmem:[#allocation311_spill] sm:$0xff]  ;;  %v19810_v37 = vld [vmem:[#allocation313_spill] sm:$0xff] }
 0x653   :  { %19801 = vst [vmem:[#allocation278_spill] sm:$0xff] %v14433_v23  ;;  %19803 = vst [vmem:[#allocation279_spill] sm:$0xff] %v14437_v44  ;;  %v14449_v10 = vmul.f32 %v13681_v61, %v19808_v42  ;;  %v14453_v8 = vmul.f32 %v13681_v61, %v19810_v37  ;;  %v19812_v23 = vld [vmem:[#allocation315_spill] sm:$0xff]  ;;  %v19814_v44 = vld [vmem:[#allocation317_spill] sm:$0xff] }
 0x654   :  { %19805 = vst [vmem:[#allocation281_spill] sm:$0xff] %v14441_v53  ;;  %19807 = vst [vmem:[#allocation282_spill] sm:$0xff] %v14445_v24  ;;  %v14457_v28 = vmul.f32 %v13681_v61, %v19812_v23  ;;  %v14461_v6 = vmul.f32 %v13681_v61, %v19814_v44  ;;  %v19816_v53 = vld [vmem:[#allocation319_spill] sm:$0xff]  ;;  %v19818_v24 = vld [vmem:[#allocation321_spill] sm:$0xff] }
 0x655   :  { %19809 = vst [vmem:[#allocation284_spill] sm:$0xff] %v14449_v10  ;;  %19811 = vst [vmem:[#allocation285_spill] sm:$0xff] %v14453_v8  ;;  %v14465_v21 = vmul.f32 %v13681_v61, %v19816_v53  ;;  %v14469_v42 = vmul.f32 %v13681_v61, %v19818_v24  ;;  %v19820_v10 = vld [vmem:[#allocation323_spill] sm:$0xff]  ;;  %v19822_v8 = vld [vmem:[#allocation80_spill] sm:$0xff] }
 0x656   :  { %19813 = vst [vmem:[#allocation287_spill] sm:$0xff] %v14457_v28  ;;  %19815 = vst [vmem:[#allocation288_spill] sm:$0xff] %v14461_v6  ;;  %v14473_v37 = vmul.f32 %v13681_v61, %v19820_v10  ;;  %v14477_v23 = vmul.f32 %v13681_v61, %v19822_v8  ;;  %v19824_v28 = vld [vmem:[#allocation82_spill] sm:$0xff]  ;;  %v19826_v6 = vld [vmem:[#allocation84_spill] sm:$0xff] }
 0x657   :  { %19817 = vst [vmem:[#allocation290_spill] sm:$0xff] %v14465_v21  ;;  %19819 = vst [vmem:[#allocation291_spill] sm:$0xff] %v14469_v42  ;;  %v14481_v44 = vmul.f32 %v13681_v61, %v19824_v28  ;;  %v14485_v53 = vmul.f32 %v13681_v61, %v19826_v6  ;;  %v19828_v21 = vld [vmem:[#allocation86_spill] sm:$0xff]  ;;  %v19830_v42 = vld [vmem:[#allocation88_spill] sm:$0xff] }
 0x658   :  { %19821 = vst [vmem:[#allocation293_spill] sm:$0xff] %v14473_v37  ;;  %19823 = vst [vmem:[#allocation294_spill] sm:$0xff] %v14477_v23  ;;  %v14489_v24 = vmul.f32 %v13681_v61, %v19828_v21  ;;  %v14493_v10 = vmul.f32 %v13681_v61, %v19830_v42  ;;  %v19832_v37 = vld [vmem:[#allocation90_spill] sm:$0xff]  ;;  %v19834_v23 = vld [vmem:[#allocation92_spill] sm:$0xff] }
 0x659   :  { %19825 = vst [vmem:[#allocation296_spill] sm:$0xff] %v14481_v44  ;;  %19827 = vst [vmem:[#allocation297_spill] sm:$0xff] %v14485_v53  ;;  %v14497_v8 = vmul.f32 %v13681_v61, %v19832_v37  ;;  %v14501_v28 = vmul.f32 %v13681_v61, %v19834_v23  ;;  %v19836_v44 = vld [vmem:[#allocation94_spill] sm:$0xff]  ;;  %v19838_v53 = vld [vmem:[#allocation96_spill] sm:$0xff] }
 0x65a   :  { %19829 = vst [vmem:[#allocation299_spill] sm:$0xff] %v14489_v24  ;;  %19831 = vst [vmem:[#allocation300_spill] sm:$0xff] %v14493_v10  ;;  %v14505_v6 = vmul.f32 %v13681_v61, %v19836_v44  ;;  %v14509_v21 = vmul.f32 %v13681_v61, %v19838_v53  ;;  %v19840_v24 = vld [vmem:[#allocation98_spill] sm:$0xff]  ;;  %v19842_v10 = vld [vmem:[#allocation100_spill] sm:$0xff] }
 0x65b   :  { %19833 = vst [vmem:[#allocation302_spill] sm:$0xff] %v14497_v8  ;;  %19835 = vst [vmem:[#allocation303_spill] sm:$0xff] %v14501_v28  ;;  %v14513_v42 = vmul.f32 %v13681_v61, %v19840_v24  ;;  %v14517_v37 = vmul.f32 %v13681_v61, %v19842_v10  ;;  %v19844_v8 = vld [vmem:[#allocation102_spill] sm:$0xff]  ;;  %v19846_v28 = vld [vmem:[#allocation104_spill] sm:$0xff] }
 0x65c   :  { %19837 = vst [vmem:[#allocation305_spill] sm:$0xff] %v14505_v6  ;;  %19839 = vst [vmem:[#allocation307_spill] sm:$0xff] %v14509_v21  ;;  %v14521_v23 = vmul.f32 %v13681_v61, %v19844_v8  ;;  %v14525_v44 = vmul.f32 %v13681_v61, %v19846_v28  ;;  %v19848_v6 = vld [vmem:[#allocation106_spill] sm:$0xff]  ;;  %v19850_v21 = vld [vmem:[#allocation108_spill] sm:$0xff] }
 0x65d   :  { %19841 = vst [vmem:[#allocation309_spill] sm:$0xff] %v14513_v42  ;;  %19843 = vst [vmem:[#allocation311_spill] sm:$0xff] %v14517_v37  ;;  %v14529_v53 = vmul.f32 %v13681_v61, %v19848_v6  ;;  %v14533_v24 = vmul.f32 %v13681_v61, %v19850_v21  ;;  %v19852_v42 = vld [vmem:[#allocation110_spill] sm:$0xff]  ;;  %v19854_v37 = vld [vmem:[#allocation112_spill] sm:$0xff] }
 0x65e   :  { %19845 = vst [vmem:[#allocation313_spill] sm:$0xff] %v14521_v23  ;;  %19847 = vst [vmem:[#allocation315_spill] sm:$0xff] %v14525_v44  ;;  %v14537_v10 = vmul.f32 %v13681_v61, %v19852_v42  ;;  %v14541_v8 = vmul.f32 %v13681_v61, %v19854_v37  ;;  %v19856_v23 = vld [vmem:[#allocation114_spill] sm:$0xff]  ;;  %v19858_v44 = vld [vmem:[#allocation116_spill] sm:$0xff] }
 0x65f   :  { %19849 = vst [vmem:[#allocation317_spill] sm:$0xff] %v14529_v53  ;;  %19851 = vst [vmem:[#allocation319_spill] sm:$0xff] %v14533_v24  ;;  %v14545_v28 = vmul.f32 %v13681_v61, %v19856_v23  ;;  %v14549_v6 = vmul.f32 %v13681_v61, %v19858_v44  ;;  %v19860_v53 = vld [vmem:[#allocation118_spill] sm:$0xff]  ;;  %v19862_v24 = vld [vmem:[#allocation120_spill] sm:$0xff] }
 0x660   :  { %19853 = vst [vmem:[#allocation321_spill] sm:$0xff] %v14537_v10  ;;  %19855 = vst [vmem:[#allocation323_spill] sm:$0xff] %v14541_v8  ;;  %v14553_v21 = vmul.f32 %v13681_v61, %v19860_v53  ;;  %v14557_v42 = vmul.f32 %v13681_v61, %v19862_v24  ;;  %v19864_v10 = vld [vmem:[#allocation122_spill] sm:$0xff]  ;;  %v19866_v8 = vld [vmem:[#allocation124_spill] sm:$0xff] }
 0x661   :  { %19857 = vst [vmem:[#allocation80_spill] sm:$0xff] %v14545_v28  ;;  %19859 = vst [vmem:[#allocation82_spill] sm:$0xff] %v14549_v6  ;;  %v14561_v37 = vmul.f32 %v13681_v61, %v19864_v10  ;;  %v14565_v23 = vmul.f32 %v13681_v61, %v19866_v8  ;;  %v19868_v28 = vld [vmem:[#allocation126_spill] sm:$0xff]  ;;  %v19870_v6 = vld [vmem:[#allocation128_spill] sm:$0xff] }
 0x662   :  { %19861 = vst [vmem:[#allocation84_spill] sm:$0xff] %v14553_v21  ;;  %19863 = vst [vmem:[#allocation86_spill] sm:$0xff] %v14557_v42  ;;  %v14569_v44 = vmul.f32 %v13681_v61, %v19868_v28  ;;  %v14573_v53 = vmul.f32 %v13681_v61, %v19870_v6  ;;  %v19872_v21 = vld [vmem:[#allocation130_spill] sm:$0xff]  ;;  %v19874_v42 = vld [vmem:[#allocation132_spill] sm:$0xff] }
 0x663   :  { %19865 = vst [vmem:[#allocation88_spill] sm:$0xff] %v14561_v37  ;;  %19867 = vst [vmem:[#allocation90_spill] sm:$0xff] %v14565_v23  ;;  %v14577_v24 = vmul.f32 %v13681_v61, %v19872_v21  ;;  %v14581_v10 = vmul.f32 %v13681_v61, %v19874_v42  ;;  %v19876_v37 = vld [vmem:[#allocation134_spill] sm:$0xff]  ;;  %v19878_v23 = vld [vmem:[#allocation136_spill] sm:$0xff] }
 0x664   :  { %19869 = vst [vmem:[#allocation92_spill] sm:$0xff] %v14569_v44  ;;  %19871 = vst [vmem:[#allocation94_spill] sm:$0xff] %v14573_v53  ;;  %v14585_v8 = vmul.f32 %v13681_v61, %v19876_v37  ;;  %v14589_v28 = vmul.f32 %v13681_v61, %v19878_v23  ;;  %v19880_v44 = vld [vmem:[#allocation138_spill] sm:$0xff]  ;;  %v19882_v53 = vld [vmem:[#allocation140_spill] sm:$0xff] }
 0x665   :  { %19873 = vst [vmem:[#allocation96_spill] sm:$0xff] %v14577_v24  ;;  %19875 = vst [vmem:[#allocation98_spill] sm:$0xff] %v14581_v10  ;;  %v14593_v6 = vmul.f32 %v13681_v61, %v19880_v44  ;;  %v14597_v21 = vmul.f32 %v13681_v61, %v19882_v53  ;;  %v19884_v24 = vld [vmem:[#allocation142_spill] sm:$0xff]  ;;  %v19886_v10 = vld [vmem:[#allocation144_spill] sm:$0xff] }
 0x666   :  { %19877 = vst [vmem:[#allocation100_spill] sm:$0xff] %v14585_v8  ;;  %19879 = vst [vmem:[#allocation102_spill] sm:$0xff] %v14589_v28  ;;  %v14601_v42 = vmul.f32 %v13681_v61, %v19884_v24  ;;  %v14605_v37 = vmul.f32 %v13681_v61, %v19886_v10  ;;  %v19888_v8 = vld [vmem:[#allocation146_spill] sm:$0xff]  ;;  %v19890_v28 = vld [vmem:[#allocation148_spill] sm:$0xff] }
 0x667   :  { %19881 = vst [vmem:[#allocation104_spill] sm:$0xff] %v14593_v6  ;;  %19883 = vst [vmem:[#allocation106_spill] sm:$0xff] %v14597_v21  ;;  %v14609_v23 = vmul.f32 %v13681_v61, %v19888_v8  ;;  %v14613_v44 = vmul.f32 %v13681_v61, %v19890_v28  ;;  %v19892_v6 = vld [vmem:[#allocation150_spill] sm:$0xff]  ;;  %v19894_v21 = vld [vmem:[#allocation152_spill] sm:$0xff] }
 0x668   :  { %19885 = vst [vmem:[#allocation108_spill] sm:$0xff] %v14601_v42  ;;  %19887 = vst [vmem:[#allocation110_spill] sm:$0xff] %v14605_v37  ;;  %v14617_v53 = vmul.f32 %v13681_v61, %v19892_v6  ;;  %v14621_v24 = vmul.f32 %v13681_v61, %v19894_v21  ;;  %v19896_v42 = vld [vmem:[#allocation154_spill] sm:$0xff]  ;;  %v19898_v37 = vld [vmem:[#allocation156_spill] sm:$0xff] }
 0x669   :  { %19889 = vst [vmem:[#allocation112_spill] sm:$0xff] %v14609_v23  ;;  %19891 = vst [vmem:[#allocation114_spill] sm:$0xff] %v14613_v44  ;;  %v14625_v10 = vmul.f32 %v13681_v61, %v19896_v42  ;;  %v14629_v8 = vmul.f32 %v13681_v61, %v19898_v37  ;;  %v19900_v23 = vld [vmem:[#allocation158_spill] sm:$0xff]  ;;  %v19902_v44 = vld [vmem:[#allocation160_spill] sm:$0xff] }
 0x66a   :  { %19893 = vst [vmem:[#allocation116_spill] sm:$0xff] %v14617_v53  ;;  %19895 = vst [vmem:[#allocation118_spill] sm:$0xff] %v14621_v24  ;;  %v14633_v28 = vmul.f32 %v13681_v61, %v19900_v23  ;;  %v14637_v6 = vmul.f32 %v13681_v61, %v19902_v44  ;;  %v19904_v53 = vld [vmem:[#allocation162_spill] sm:$0xff]  ;;  %v19906_v24 = vld [vmem:[#allocation164_spill] sm:$0xff] }
 0x66b   :  { %19897 = vst [vmem:[#allocation120_spill] sm:$0xff] %v14625_v10  ;;  %19899 = vst [vmem:[#allocation122_spill] sm:$0xff] %v14629_v8  ;;  %v14641_v21 = vmul.f32 %v13681_v61, %v19904_v53  ;;  %v14645_v42 = vmul.f32 %v13681_v61, %v19906_v24  ;;  %v19908_v10 = vld [vmem:[#allocation166_spill] sm:$0xff]  ;;  %v19910_v8 = vld [vmem:[#allocation168_spill] sm:$0xff] }
 0x66c   :  { %19901 = vst [vmem:[#allocation124_spill] sm:$0xff] %v14633_v28  ;;  %19903 = vst [vmem:[#allocation126_spill] sm:$0xff] %v14637_v6  ;;  %v14649_v37 = vmul.f32 %v13681_v61, %v19908_v10  ;;  %v14653_v23 = vmul.f32 %v13681_v61, %v19910_v8  ;;  %v19912_v28 = vld [vmem:[#allocation170_spill] sm:$0xff]  ;;  %v19914_v6 = vld [vmem:[#allocation172_spill] sm:$0xff] }
 0x66d   :  { %19905 = vst [vmem:[#allocation128_spill] sm:$0xff] %v14641_v21  ;;  %19907 = vst [vmem:[#allocation130_spill] sm:$0xff] %v14645_v42  ;;  %v14657_v44 = vmul.f32 %v13681_v61, %v19912_v28  ;;  %v14661_v53 = vmul.f32 %v13681_v61, %v19914_v6  ;;  %v19916_v21 = vld [vmem:[#allocation174_spill] sm:$0xff]  ;;  %v19918_v42 = vld [vmem:[#allocation176_spill] sm:$0xff] }
 0x66e   :  { %19909 = vst [vmem:[#allocation132_spill] sm:$0xff] %v14649_v37  ;;  %19911 = vst [vmem:[#allocation134_spill] sm:$0xff] %v14653_v23  ;;  %v14665_v24 = vmul.f32 %v13681_v61, %v19916_v21  ;;  %v14669_v10 = vmul.f32 %v13681_v61, %v19918_v42  ;;  %v19920_v37 = vld [vmem:[#allocation178_spill] sm:$0xff]  ;;  %v19922_v23 = vld [vmem:[#allocation180_spill] sm:$0xff] }
 0x66f   :  { %19913 = vst [vmem:[#allocation136_spill] sm:$0xff] %v14657_v44  ;;  %19915 = vst [vmem:[#allocation138_spill] sm:$0xff] %v14661_v53  ;;  %v14673_v8 = vmul.f32 %v13681_v61, %v19920_v37  ;;  %v14677_v28 = vmul.f32 %v13681_v61, %v19922_v23  ;;  %v19924_v44 = vld [vmem:[#allocation182_spill] sm:$0xff]  ;;  %v19926_v53 = vld [vmem:[#allocation184_spill] sm:$0xff] }
 0x670   :  { %19917 = vst [vmem:[#allocation140_spill] sm:$0xff] %v14665_v24  ;;  %19919 = vst [vmem:[#allocation142_spill] sm:$0xff] %v14669_v10  ;;  %v14681_v6 = vmul.f32 %v13681_v61, %v19924_v44  ;;  %v14685_v21 = vmul.f32 %v13681_v61, %v19926_v53  ;;  %v19928_v24 = vld [vmem:[#allocation186_spill] sm:$0xff]  ;;  %v19930_v10 = vld [vmem:[#allocation188_spill] sm:$0xff] }
 0x671   :  { %19921 = vst [vmem:[#allocation144_spill] sm:$0xff] %v14673_v8  ;;  %19923 = vst [vmem:[#allocation146_spill] sm:$0xff] %v14677_v28  ;;  %v14689_v42 = vmul.f32 %v13681_v61, %v19928_v24  ;;  %v14693_v37 = vmul.f32 %v13681_v61, %v19930_v10  ;;  %v19932_v8 = vld [vmem:[#allocation190_spill] sm:$0xff]  ;;  %v19934_v28 = vld [vmem:[#allocation192_spill] sm:$0xff] }
 0x672   :  { %19925 = vst [vmem:[#allocation148_spill] sm:$0xff] %v14681_v6  ;;  %19927 = vst [vmem:[#allocation150_spill] sm:$0xff] %v14685_v21  ;;  %v14697_v23 = vmul.f32 %v13681_v61, %v19932_v8  ;;  %v14701_v44 = vmul.f32 %v13681_v61, %v19934_v28  ;;  %v19936_v6 = vld [vmem:[#allocation194_spill] sm:$0xff]  ;;  %v19938_v21 = vld [vmem:[#allocation196_spill] sm:$0xff] }
 0x673   :  { %19929 = vst [vmem:[#allocation152_spill] sm:$0xff] %v14689_v42  ;;  %19931 = vst [vmem:[#allocation154_spill] sm:$0xff] %v14693_v37  ;;  %v14705_v53 = vmul.f32 %v13681_v61, %v19936_v6  ;;  %v14709_v24 = vmul.f32 %v13681_v61, %v19938_v21  ;;  %v19940_v42 = vld [vmem:[#allocation198_spill] sm:$0xff]  ;;  %v19942_v37 = vld [vmem:[#allocation200_spill] sm:$0xff] }
 0x674   :  { %19933 = vst [vmem:[#allocation156_spill] sm:$0xff] %v14697_v23  ;;  %19935 = vst [vmem:[#allocation158_spill] sm:$0xff] %v14701_v44  ;;  %v14713_v10 = vmul.f32 %v13681_v61, %v19940_v42  ;;  %v14717_v8 = vmul.f32 %v13681_v61, %v19942_v37  ;;  %v19944_v23 = vld [vmem:[#allocation202_spill] sm:$0xff]  ;;  %v19946_v44 = vld [vmem:[#allocation204_spill] sm:$0xff] }
 0x675   :  { %19937 = vst [vmem:[#allocation160_spill] sm:$0xff] %v14705_v53  ;;  %19939 = vst [vmem:[#allocation162_spill] sm:$0xff] %v14709_v24  ;;  %v14721_v28 = vmul.f32 %v13681_v61, %v19944_v23  ;;  %v14725_v6 = vmul.f32 %v13681_v61, %v19946_v44  ;;  %v19948_v53 = vld [vmem:[#allocation206_spill] sm:$0xff]  ;;  %v19950_v24 = vld [vmem:[#allocation208_spill] sm:$0xff] }
 0x676   :  { %19941 = vst [vmem:[#allocation164_spill] sm:$0xff] %v14713_v10  ;;  %19943 = vst [vmem:[#allocation166_spill] sm:$0xff] %v14717_v8  ;;  %v14729_v21 = vmul.f32 %v13681_v61, %v19948_v53  ;;  %v14733_v42 = vmul.f32 %v13681_v61, %v19950_v24  ;;  %v19952_v10 = vld [vmem:[#allocation210_spill] sm:$0xff]  ;;  %v19954_v8 = vld [vmem:[#allocation212_spill] sm:$0xff] }
 0x677   :  { %19945 = vst [vmem:[#allocation168_spill] sm:$0xff] %v14721_v28  ;;  %19947 = vst [vmem:[#allocation170_spill] sm:$0xff] %v14725_v6  ;;  %v14737_v37 = vmul.f32 %v13681_v61, %v19952_v10  ;;  %v14741_v23 = vmul.f32 %v13681_v61, %v19954_v8  ;;  %v19956_v28 = vld [vmem:[#allocation214_spill] sm:$0xff]  ;;  %v19958_v6 = vld [vmem:[#allocation216_spill] sm:$0xff] }
 0x678   :  { %19949 = vst [vmem:[#allocation172_spill] sm:$0xff] %v14729_v21  ;;  %19951 = vst [vmem:[#allocation174_spill] sm:$0xff] %v14733_v42  ;;  %v14745_v44 = vmul.f32 %v13681_v61, %v19956_v28  ;;  %v14749_v53 = vmul.f32 %v13681_v61, %v19958_v6  ;;  %v19960_v21 = vld [vmem:[#allocation218_spill] sm:$0xff]  ;;  %v19962_v42 = vld [vmem:[#allocation220_spill] sm:$0xff] }
 0x679   :  { %19953 = vst [vmem:[#allocation176_spill] sm:$0xff] %v14737_v37  ;;  %19955 = vst [vmem:[#allocation178_spill] sm:$0xff] %v14741_v23  ;;  %v14753_v24 = vmul.f32 %v13681_v61, %v19960_v21  ;;  %v14757_v10 = vmul.f32 %v13681_v61, %v19962_v42  ;;  %v19964_v37 = vld [vmem:[#allocation222_spill] sm:$0xff]  ;;  %v19966_v23 = vld [vmem:[#allocation224_spill] sm:$0xff] }
 0x67a   :  { %19957 = vst [vmem:[#allocation180_spill] sm:$0xff] %v14745_v44  ;;  %19959 = vst [vmem:[#allocation182_spill] sm:$0xff] %v14749_v53  ;;  %v14761_v8 = vmul.f32 %v13681_v61, %v19964_v37  ;;  %v14765_v28 = vmul.f32 %v13681_v61, %v19966_v23  ;;  %v19967_v44 = vld [vmem:[#allocation226_spill] sm:$0xff]  ;;  %v19969_v53 = vld [vmem:[#allocation228_spill] sm:$0xff] }
 0x67b   :  { %19961 = vst [vmem:[#allocation184_spill] sm:$0xff] %v14753_v24  ;;  %19963 = vst [vmem:[#allocation186_spill] sm:$0xff] %v14757_v10  ;;  %v14769_v6 = vmul.f32 %v13681_v61, %v19967_v44  ;;  %v14773_v21 = vmul.f32 %v13681_v61, %v19969_v53  ;;  %v19970_v24 = vld [vmem:[#allocation230_spill] sm:$0xff]  ;;  %v19972_v10 = vld [vmem:[#allocation232_spill] sm:$0xff]  ;;  %v14789_v44 = vmul.f32 %v13681_v61, %v19384_v1 }
 0x67c   :  { %19965 = vst [vmem:[#allocation188_spill] sm:$0xff] %v14761_v8  ;;  %v14777_v42 = vmul.f32 %v13681_v61, %v19970_v24  ;;  %v14781_v37 = vmul.f32 %v13681_v61, %v19972_v10  ;;  %v19973_v8 = vld [vmem:[#allocation234_spill] sm:$0xff]  ;;  %v14797_v24 = vmul.f32 %v13681_v61, %v19386_v30 }
 0x67d   :  { %19968 = vst [vmem:[#allocation190_spill] sm:$0xff] %v14769_v6  ;;  %v14785_v23 = vmul.f32 %v13681_v61, %v19973_v8  ;;  %v19975_v6 = vld [vmem:[#allocation238_spill] sm:$0xff]  ;;  %v14805_v8 = vmul.f32 %v13681_v61, %v12475_v45 }
 0x67e   :  { %19971 = vst [vmem:[#allocation192_spill] sm:$0xff] %v14777_v42  ;;  %v14793_v53 = vmul.f32 %v13681_v61, %v19975_v6  ;;  %v19977_v42 = vld [vmem:[#allocation242_spill] sm:$0xff]  ;;  %v14813_v6 = vmul.f32 %v13681_v61, %v12495_v14 }
 0x67f   :  { %19974 = vst [vmem:[#allocation194_spill] sm:$0xff] %v14785_v23  ;;  %v14801_v10 = vmul.f32 %v13681_v61, %v19977_v42  ;;  %v19979_v23 = vld [vmem:[#allocation245_spill] sm:$0xff]  ;;  %v14821_v42 = vmul.f32 %v13681_v61, %v12515_v25 }
 0x680   :  { %19976 = vst [vmem:[#allocation196_spill] sm:$0xff] %v14793_v53  ;;  %v14809_v1 = vmul.f32 %v13681_v61, %v19979_v23  ;;  %v19981_v53 = vld [vmem:[#allocation248_spill] sm:$0xff]  ;;  %v14829_v23 = vmul.f32 %v13681_v61, %v12535_v33 }
 0x681   :  { %19978 = vst [vmem:[#allocation198_spill] sm:$0xff] %v14801_v10  ;;  %v14817_v30 = vmul.f32 %v13681_v61, %v19981_v53  ;;  %v19983_v10 = vld [vmem:[#allocation251_spill] sm:$0xff]  ;;  %v14837_v53 = vmul.f32 %v13681_v61, %v12555_v9 }
 0x682   :  { %19980 = vst [vmem:[#allocation200_spill] sm:$0xff] %v14809_v1  ;;  %v14825_v45 = vmul.f32 %v13681_v61, %v19983_v10  ;;  %19985 = vst [vmem:[#allocation206_spill] sm:$0xff] %v14829_v23  ;;  %v19986_v1 = vld [vmem:[#allocation254_spill] sm:$0xff]  ;;  %v14845_v10 = vmul.f32 %v13681_v61, %v12575_v51 }
 0x683   :  { %19982 = vst [vmem:[#allocation202_spill] sm:$0xff] %v14817_v30  ;;  %v14833_v14 = vmul.f32 %v13681_v61, %v19986_v1  ;;  %v19988_v30 = vld [vmem:[#allocation257_spill] sm:$0xff]  ;;  %v19992_v23 = vld [vmem:[#allocation262_spill] sm:$0xff] }
 0x684   :  { %19984 = vst [vmem:[#allocation204_spill] sm:$0xff] %v14825_v45  ;;  %v14841_v25 = vmul.f32 %v13681_v61, %v19988_v30  ;;  %v19990_v45 = vld [vmem:[#allocation260_spill] sm:$0xff]  ;;  %v14853_v1 = vmul.f32 %v13681_v61, %v19992_v23  ;;  %v14861_v30 = vmul.f32 %v13681_v61, %v12615_v16 }
 0x685   :  { %19987 = vst [vmem:[#allocation208_spill] sm:$0xff] %v14833_v14  ;;  %v14849_v33 = vmul.f32 %v13681_v61, %v19990_v45  ;;  %v19993_v14 = vld [vmem:[#allocation264_spill] sm:$0xff]  ;;  %v14869_v45 = vmul.f32 %v13681_v61, %v12635_v40 }
 0x686   :  { %19989 = vst [vmem:[#allocation210_spill] sm:$0xff] %v14841_v25  ;;  %v14857_v9 = vmul.f32 %v13681_v61, %v19993_v14  ;;  %v19995_v25 = vld [vmem:[#allocation267_spill] sm:$0xff]  ;;  %v14877_v14 = vmul.f32 %v13681_v61, %v12655_v7 }
 0x687   :  { %19991 = vst [vmem:[#allocation212_spill] sm:$0xff] %v14849_v33  ;;  %v14865_v51 = vmul.f32 %v13681_v61, %v19995_v25  ;;  %v19997_v33 = vld [vmem:[#allocation270_spill] sm:$0xff]  ;;  %v14885_v25 = vmul.f32 %v13681_v61, %v19388_v5 }
 0x688   :  { %19994 = vst [vmem:[#allocation214_spill] sm:$0xff] %v14857_v9  ;;  %v14873_v23 = vmul.f32 %v13681_v61, %v19997_v33  ;;  %v19999_v9 = vld [vmem:[#allocation273_spill] sm:$0xff]  ;;  %v14893_v33 = vmul.f32 %v13681_v61, %v12695_v55 }
 0x689   :  { %19996 = vst [vmem:[#allocation216_spill] sm:$0xff] %v14865_v51  ;;  %v14881_v16 = vmul.f32 %v13681_v61, %v19999_v9  ;;  %v20001_v51 = vld [vmem:[#allocation277_spill] sm:$0xff]  ;;  %v14901_v9 = vmul.f32 %v13681_v61, %v12715_v62 }
 0x68a   :  { %19998 = vst [vmem:[#allocation218_spill] sm:$0xff] %v14873_v23  ;;  %v14889_v40 = vmul.f32 %v13681_v61, %v20001_v51  ;;  %v20003_v23 = vld [vmem:[#allocation280_spill] sm:$0xff]  ;;  %v14909_v51 = vmul.f32 %v13681_v61, %v12735_v35 }
 0x68b   :  { %20000 = vst [vmem:[#allocation220_spill] sm:$0xff] %v14881_v16  ;;  %v14897_v7 = vmul.f32 %v13681_v61, %v20003_v23  ;;  %v20005_v16 = vld [vmem:[#allocation283_spill] sm:$0xff]  ;;  %v14917_v23 = vmul.f32 %v13681_v61, %v12755_v34 }
 0x68c   :  { %20002 = vst [vmem:[#allocation222_spill] sm:$0xff] %v14889_v40  ;;  %v14905_v5 = vmul.f32 %v13681_v61, %v20005_v16  ;;  %v20007_v40 = vld [vmem:[#allocation286_spill] sm:$0xff]  ;;  %v14925_v16 = vmul.f32 %v13681_v61, %v12775_v43 }
 0x68d   :  { %20004 = vst [vmem:[#allocation224_spill] sm:$0xff] %v14897_v7  ;;  %v14913_v55 = vmul.f32 %v13681_v61, %v20007_v40  ;;  %v20009_v7 = vld [vmem:[#allocation289_spill] sm:$0xff]  ;;  %v14933_v40 = vmul.f32 %v13681_v61, %v12795_v39 }
 0x68e   :  { %20006 = vst [vmem:[#allocation226_spill] sm:$0xff] %v14905_v5  ;;  %v14921_v62 = vmul.f32 %v13681_v61, %v20009_v7  ;;  %v20011_v5 = vld [vmem:[#allocation292_spill] sm:$0xff]  ;;  %v14941_v7 = vmul.f32 %v13681_v61, %v12815_v47 }
 0x68f   :  { %20008 = vst [vmem:[#allocation228_spill] sm:$0xff] %v14913_v55  ;;  %v14929_v35 = vmul.f32 %v13681_v61, %v20011_v5  ;;  %v20013_v55 = vld [vmem:[#allocation295_spill] sm:$0xff]  ;;  %v14949_v5 = vmul.f32 %v13681_v61, %v12835_v36 }
 0x690   :  { %20010 = vst [vmem:[#allocation230_spill] sm:$0xff] %v14921_v62  ;;  %v14937_v34 = vmul.f32 %v13681_v61, %v20013_v55  ;;  %20015 = vst [vmem:[#allocation238_spill] sm:$0xff] %v14941_v7  ;;  %v20016_v62 = vld [vmem:[#allocation298_spill] sm:$0xff]  ;;  %v14957_v55 = vmul.f32 %v13681_v61, %v12855_v26 }
 0x691   :  { %20012 = vst [vmem:[#allocation232_spill] sm:$0xff] %v14929_v35  ;;  %v14945_v43 = vmul.f32 %v13681_v61, %v20016_v62  ;;  %20018 = vst [vmem:[#allocation245_spill] sm:$0xff] %v14949_v5  ;;  %v20019_v35 = vld [vmem:[#allocation301_spill] sm:$0xff]  ;;  %v20024_v7 = vld [vmem:[#allocation306_spill] sm:$0xff] }
 0x692   :  { %20014 = vst [vmem:[#allocation234_spill] sm:$0xff] %v14937_v34  ;;  %v14953_v39 = vmul.f32 %v13681_v61, %v20019_v35  ;;  %20021 = vst [vmem:[#allocation251_spill] sm:$0xff] %v14957_v55  ;;  %v20022_v34 = vld [vmem:[#allocation304_spill] sm:$0xff]  ;;  %v14965_v62 = vmul.f32 %v13681_v61, %v20024_v7  ;;  %v20028_v5 = vld [vmem:[#allocation310_spill] sm:$0xff] }
 0x693   :  { %20017 = vst [vmem:[#allocation242_spill] sm:$0xff] %v14945_v43  ;;  %v14961_v47 = vmul.f32 %v13681_v61, %v20022_v34  ;;  %v20026_v43 = vld [vmem:[#allocation308_spill] sm:$0xff]  ;;  %v14973_v35 = vmul.f32 %v13681_v61, %v20028_v5  ;;  %v20032_v55 = vld [vmem:[#allocation314_spill] sm:$0xff] }
 0x694   :  { %20020 = vst [vmem:[#allocation248_spill] sm:$0xff] %v14953_v39  ;;  %20025 = vst [vmem:[#allocation257_spill] sm:$0xff] %v14965_v62  ;;  %v14969_v36 = vmul.f32 %v13681_v61, %v20026_v43  ;;  %v20030_v39 = vld [vmem:[#allocation312_spill] sm:$0xff]  ;;  %v14981_v34 = vmul.f32 %v13681_v61, %v20032_v55  ;;  %v20036_v62 = vld [vmem:[#allocation318_spill] sm:$0xff] }
 0x695   :  { %20023 = vst [vmem:[#allocation254_spill] sm:$0xff] %v14961_v47  ;;  %20029 = vst [vmem:[#allocation262_spill] sm:$0xff] %v14973_v35  ;;  %v14977_v26 = vmul.f32 %v13681_v61, %v20030_v39  ;;  %v20034_v47 = vld [vmem:[#allocation316_spill] sm:$0xff]  ;;  %v14989_v43 = vmul.f32 %v13681_v61, %v20036_v62  ;;  %v20040_v35 = vld [vmem:[#allocation322_spill] sm:$0xff] }
 0x696   :  { %20027 = vst [vmem:[#allocation260_spill] sm:$0xff] %v14969_v36  ;;  %20033 = vst [vmem:[#allocation267_spill] sm:$0xff] %v14981_v34  ;;  %v14985_v7 = vmul.f32 %v13681_v61, %v20034_v47  ;;  %v20038_v36 = vld [vmem:[#allocation320_spill] sm:$0xff]  ;;  %v14997_v39 = vmul.f32 %v13681_v61, %v20040_v35  ;;  %v20044_v34 = vld [vmem:[#allocation325_spill] sm:$0xff] }
 0x697   :  { %20031 = vst [vmem:[#allocation264_spill] sm:$0xff] %v14977_v26  ;;  %20037 = vst [vmem:[#allocation273_spill] sm:$0xff] %v14989_v43  ;;  %v14993_v5 = vmul.f32 %v13681_v61, %v20038_v36  ;;  %v20042_v26 = vld [vmem:[#allocation324_spill] sm:$0xff]  ;;  %v15005_v47 = vmul.f32 %v13681_v61, %v20044_v34  ;;  %v20048_v43 = vld [vmem:[#allocation327_spill] sm:$0xff] }
 0x698   :  { %20035 = vst [vmem:[#allocation270_spill] sm:$0xff] %v14985_v7  ;;  %20041 = vst [vmem:[#allocation280_spill] sm:$0xff] %v14997_v39  ;;  %v15001_v55 = vmul.f32 %v13681_v61, %v20042_v26  ;;  %v20046_v7 = vld [vmem:[#allocation326_spill] sm:$0xff]  ;;  %v15013_v36 = vmul.f32 %v13681_v61, %v20048_v43  ;;  %v20052_v39 = vld [vmem:[#allocation329_spill] sm:$0xff] }
 0x699   :  { %20039 = vst [vmem:[#allocation277_spill] sm:$0xff] %v14993_v5  ;;  %20045 = vst [vmem:[#allocation286_spill] sm:$0xff] %v15005_v47  ;;  %v15009_v62 = vmul.f32 %v13681_v61, %v20046_v7  ;;  %v20050_v5 = vld [vmem:[#allocation328_spill] sm:$0xff]  ;;  %v15021_v26 = vmul.f32 %v13681_v61, %v20052_v39  ;;  %v20055_v47 = vld [vmem:[#allocation331_spill] sm:$0xff] }
 0x69a   :  { %20043 = vst [vmem:[#allocation283_spill] sm:$0xff] %v15001_v55  ;;  %20049 = vst [vmem:[#allocation292_spill] sm:$0xff] %v15013_v36  ;;  %v15017_v35 = vmul.f32 %v13681_v61, %v20050_v5  ;;  %v20053_v55 = vld [vmem:[#allocation330_spill] sm:$0xff]  ;;  %v15029_v7 = vmul.f32 %v13681_v61, %v20055_v47  ;;  %v20059_v36 = vld [vmem:[#allocation333_spill] sm:$0xff] }
 0x69b   :  { %20047 = vst [vmem:[#allocation289_spill] sm:$0xff] %v15009_v62  ;;  %v15025_v34 = vmul.f32 %v13681_v61, %v20053_v55  ;;  %v20057_v62 = vld [vmem:[#allocation332_spill] sm:$0xff]  ;;  %v15037_v5 = vmul.f32 %v13681_v61, %v20059_v36  ;;  %v15045_v55 = vmul.f32 %v13681_v61, %v19414_v59 }
 0x69c   :  { %20051 = vst [vmem:[#allocation295_spill] sm:$0xff] %v15017_v35  ;;  %20056 = vst [vmem:[#allocation301_spill] sm:$0xff] %v15029_v7  ;;  %v15033_v43 = vmul.f32 %v13681_v61, %v20057_v62  ;;  %v20061_v35 = vld [vmem:[#allocation334_spill] sm:$0xff]  ;;  %v20066_v7 = vld [vmem:[#allocation337_spill] sm:$0xff] }
 0x69d   :  { %20054 = vst [vmem:[#allocation298_spill] sm:$0xff] %v15025_v34  ;;  %20060 = vst [vmem:[#allocation306_spill] sm:$0xff] %v15037_v5  ;;  %v15041_v39 = vmul.f32 %v13681_v61, %v20061_v35  ;;  %v20064_v34 = vld [vmem:[#allocation336_spill] sm:$0xff]  ;;  %v15053_v62 = vmul.f32 %v13681_v61, %v20066_v7  ;;  %v20070_v5 = vld [vmem:[#allocation339_spill] sm:$0xff] }
 0x69e   :  { %20058 = vst [vmem:[#allocation304_spill] sm:$0xff] %v15033_v43  ;;  %20063 = vst [vmem:[#allocation310_spill] sm:$0xff] %v15045_v55  ;;  %v15049_v47 = vmul.f32 %v13681_v61, %v20064_v34  ;;  %v20068_v43 = vld [vmem:[#allocation338_spill] sm:$0xff]  ;;  %v15061_v35 = vmul.f32 %v13681_v61, %v20070_v5  ;;  %v20074_v55 = vld [vmem:[#allocation341_spill] sm:$0xff] }
 0x69f   :  { %20062 = vst [vmem:[#allocation308_spill] sm:$0xff] %v15041_v39  ;;  %20067 = vst [vmem:[#allocation314_spill] sm:$0xff] %v15053_v62  ;;  %v15057_v36 = vmul.f32 %v13681_v61, %v20068_v43  ;;  %v20072_v39 = vld [vmem:[#allocation340_spill] sm:$0xff]  ;;  %v15069_v34 = vmul.f32 %v13681_v61, %v20074_v55  ;;  %v20078_v62 = vld [vmem:[#allocation343_spill] sm:$0xff] }
 0x6a0   :  { %20065 = vst [vmem:[#allocation312_spill] sm:$0xff] %v15049_v47  ;;  %20071 = vst [vmem:[#allocation318_spill] sm:$0xff] %v15061_v35  ;;  %v15065_v59 = vmul.f32 %v13681_v61, %v20072_v39  ;;  %v20076_v47 = vld [vmem:[#allocation342_spill] sm:$0xff]  ;;  %v15077_v43 = vmul.f32 %v13681_v61, %v20078_v62  ;;  %v20082_v35 = vld [vmem:[#allocation345_spill] sm:$0xff] }
 0x6a1   :  { %20069 = vst [vmem:[#allocation316_spill] sm:$0xff] %v15057_v36  ;;  %20075 = vst [vmem:[#allocation322_spill] sm:$0xff] %v15069_v34  ;;  %v15073_v7 = vmul.f32 %v13681_v61, %v20076_v47  ;;  %v20080_v36 = vld [vmem:[#allocation344_spill] sm:$0xff]  ;;  %v15085_v39 = vmul.f32 %v13681_v61, %v20082_v35  ;;  %v20086_v34 = vld [vmem:[#allocation347_spill] sm:$0xff] }
 0x6a2   :  { %20073 = vst [vmem:[#allocation320_spill] sm:$0xff] %v15065_v59  ;;  %20079 = vst [vmem:[#allocation325_spill] sm:$0xff] %v15077_v43  ;;  %v15081_v5 = vmul.f32 %v13681_v61, %v20080_v36  ;;  %v20084_v59 = vld [vmem:[#allocation346_spill] sm:$0xff]  ;;  %v15093_v47 = vmul.f32 %v13681_v61, %v20086_v34  ;;  %v20090_v43 = vld [vmem:[#allocation349_spill] sm:$0xff] }
 0x6a3   :  { %20077 = vst [vmem:[#allocation324_spill] sm:$0xff] %v15073_v7  ;;  %20083 = vst [vmem:[#allocation327_spill] sm:$0xff] %v15085_v39  ;;  %v15089_v55 = vmul.f32 %v13681_v61, %v20084_v59  ;;  %v20088_v7 = vld [vmem:[#allocation348_spill] sm:$0xff]  ;;  %v15101_v36 = vmul.f32 %v13681_v61, %v20090_v43  ;;  %v20094_v39 = vld [vmem:[#allocation351_spill] sm:$0xff] }
 0x6a4   :  { %20081 = vst [vmem:[#allocation326_spill] sm:$0xff] %v15081_v5  ;;  %20087 = vst [vmem:[#allocation329_spill] sm:$0xff] %v15093_v47  ;;  %v15097_v62 = vmul.f32 %v13681_v61, %v20088_v7  ;;  %v20092_v5 = vld [vmem:[#allocation350_spill] sm:$0xff]  ;;  %v15109_v59 = vmul.f32 %v13681_v61, %v20094_v39  ;;  %v20098_v47 = vld [vmem:[#allocation353_spill] sm:$0xff] }
 0x6a5   :  { %20085 = vst [vmem:[#allocation328_spill] sm:$0xff] %v15089_v55  ;;  %20091 = vst [vmem:[#allocation331_spill] sm:$0xff] %v15101_v36  ;;  %v15105_v35 = vmul.f32 %v13681_v61, %v20092_v5  ;;  %v20096_v55 = vld [vmem:[#allocation352_spill] sm:$0xff]  ;;  %v15117_v7 = vmul.f32 %v13681_v61, %v20098_v47  ;;  %v20101_v36 = vld [vmem:[#allocation355_spill] sm:$0xff] }
 0x6a6   :  { %20089 = vst [vmem:[#allocation330_spill] sm:$0xff] %v15097_v62  ;;  %20095 = vst [vmem:[#allocation333_spill] sm:$0xff] %v15109_v59  ;;  %v15113_v34 = vmul.f32 %v13681_v61, %v20096_v55  ;;  %v20100_v62 = vld [vmem:[#allocation354_spill] sm:$0xff]  ;;  %v15125_v5 = vmul.f32 %v13681_v61, %v20101_v36  ;;  %v20103_v59 = vld [vmem:[#allocation357_spill] sm:$0xff]  ;;  %v15145_v36 = vmul.f32 %v13681_v61, %v19438_v2 }
 0x6a7   :  { %20093 = vst [vmem:[#allocation332_spill] sm:$0xff] %v15105_v35  ;;  %20099 = vst [vmem:[#allocation336_spill] sm:$0xff] %v15117_v7  ;;  %v15121_v43 = vmul.f32 %v13681_v61, %v20100_v62  ;;  %v20102_v35 = vld [vmem:[#allocation356_spill] sm:$0xff]  ;;  %v15133_v55 = vmul.f32 %v13681_v61, %v20103_v59  ;;  %v20105_v7 = vld [vmem:[#allocation359_spill] sm:$0xff]  ;;  %v15153_v59 = vmul.f32 %v13681_v61, %v19440_v17 }
 0x6a8   :  { %20097 = vst [vmem:[#allocation334_spill] sm:$0xff] %v15113_v34  ;;  %v15129_v39 = vmul.f32 %v13681_v61, %v20102_v35  ;;  %v20104_v34 = vld [vmem:[#allocation358_spill] sm:$0xff]  ;;  %v15141_v62 = vmul.f32 %v13681_v61, %v20105_v7  ;;  %v15149_v35 = vmul.f32 %v13681_v61, %v19439_v48  ;;  %v15161_v7 = vmul.f32 %v13681_v61, %v13283_v49 }
 0x6a9   :  { %v15137_v47 = vmul.f32 %v13681_v61, %v20104_v34  ;;  %v15157_v34 = vmul.f32 %v13681_v61, %v19441_v0  ;;  %v15165_v2 = vmul.f32 %v13681_v61, %v13291_v29  ;;  %v15169_v48 = vmul.f32 %v13681_v61, %v13299_v19 }
 0x6aa   :  { %v15173_v17 = vmul.f32 %v13681_v61, %v13307_v60  ;;  %v15177_v0 = vmul.f32 %v13681_v61, %v13315_v15  ;;  %v15181_v49 = vmul.f32 %v13681_v61, %v13323_v4  ;;  %v15185_v29 = vmul.f32 %v13681_v61, %v13331_v54 }
 0x6ab   :  { %v15189_v19 = vmul.f32 %v13681_v61, %v13339_v12  ;;  %v15193_v60 = vmul.f32 %v13681_v61, %v13347_v41  ;;  %v15197_v15 = vmul.f32 %v13681_v61, %v13355_v3  ;;  %v15201_v4 = vmul.f32 %v13681_v61, %v13363_v31 }
 0x6ac   :  { %v15205_v54 = vmul.f32 %v13681_v61, %v13371_v63  ;;  %v15209_v12 = vmul.f32 %v13681_v61, %v13379_v22 }
 0x6ad   :  { %20106 = vst [vmem:[#allocation337_spill] sm:$0xff] %v15189_v19  ;;  %20107 = vst [vmem:[#allocation338_spill] sm:$0xff] %v15193_v60  ;;  %v20112_v19 = vld [vmem:[#allocation236_spill] sm:$0xff] }
 0x6ae   :  { %20108 = vst [vmem:[#allocation339_spill] sm:$0xff] %v15197_v15  ;;  %20109 = vst [vmem:[#allocation340_spill] sm:$0xff] %v15201_v4  ;;  %v15213_v41 = vmul.f32 %v13681_v61, %v20112_v19  ;;  %v20114_v60 = vld [vmem:[#allocation240_spill] sm:$0xff]  ;;  %v20116_v15 = vld [vmem:[#allocation275_spill] sm:$0xff] }
 0x6af   :  { %20110 = vst [vmem:[#allocation341_spill] sm:$0xff] %v15205_v54  ;;  %20111 = vst [vmem:[#allocation342_spill] sm:$0xff] %v15209_v12  ;;  %v15217_v3 = vmul.f32 %v13681_v61, %v20114_v60  ;;  %v15221_v31 = vmul.f32 %v13681_v61, %v20116_v15  ;;  %v20118_v4 = vld [vmem:[#allocation364_spill] sm:$0xff]  ;;  %v20120_v54 = vld [vmem:[#allocation365_spill] sm:$0xff] }
 0x6b0   :  { %20113 = vst [vmem:[#allocation343_spill] sm:$0xff] %v15213_v41  ;;  %v15225_v63 = vmul.f32 %v13681_v61, %v20118_v4  ;;  %v15229_v22 = vmul.f32 %v13681_v61, %v20120_v54  ;;  %v20121_v12 = vld [vmem:[#allocation366_spill] sm:$0xff]  ;;  %v20122_v41 = vld [vmem:[#allocation367_spill] sm:$0xff] }
 0x6b1   :  { %20115 = vst [vmem:[#allocation344_spill] sm:$0xff] %v15217_v3  ;;  %20117 = vst [vmem:[#allocation345_spill] sm:$0xff] %v15221_v31  ;;  %v15233_v19 = vmul.f32 %v13681_v61, %v20121_v12  ;;  %v15237_v60 = vmul.f32 %v13681_v61, %v20122_v41  ;;  %v20123_v3 = vld [vmem:[#allocation368_spill] sm:$0xff]  ;;  %v20124_v31 = vld [vmem:[#allocation369_spill] sm:$0xff]  ;;  %v15253_v12 = vadd.f32 %v13707_v20, %v13689_v50 }
 0x6b2   :  { %20119 = vst [vmem:[#allocation346_spill] sm:$0xff] %v15225_v63  ;;  %v15241_v15 = vmul.f32 %v13681_v61, %v20123_v3  ;;  %v15245_v4 = vmul.f32 %v13681_v61, %v20124_v31  ;;  %v20125_v63 = vld [vmem:[#allocation370_spill] sm:$0xff]  ;;  %v15257_v41 = vadd.f32 %v13707_v20, %v13693_v13  ;;  %v15261_v3 = vadd.f32 %v13707_v20, %v13697_v18 }
 0x6b3   :  { %v15249_v54 = vmul.f32 %v13681_v61, %v20125_v63  ;;  %20126 = vst [vmem:[#allocation347_spill] sm:$0xff] %v15253_v12  ;;  %v15265_v31 = vadd.f32 %v13707_v20, %v13701_v52  ;;  %v15269_v61 = vadd.f32 %v13707_v20, %v13705_v32  ;;  %v15273_v50 = vadd.f32 %v13707_v20, %v13711_v27  ;;  %v20135_v63 = vld [vmem:[#allocation335_spill] sm:$0xff] }
 0x6b4   :  { %20127 = vst [vmem:[#allocation348_spill] sm:$0xff] %v15257_v41  ;;  %20128 = vst [vmem:[#allocation349_spill] sm:$0xff] %v15261_v3  ;;  %v15277_v13 = vadd.f32 %v13707_v20, %v13715_v38  ;;  %v15281_v18 = vadd.f32 %v13707_v20, %v13719_v46  ;;  %v15285_v52 = vadd.f32 %v13707_v20, %v13723_v11 }
 0x6b5   :  { %20129 = vst [vmem:[#allocation350_spill] sm:$0xff] %v15265_v31  ;;  %20130 = vst [vmem:[#allocation351_spill] sm:$0xff] %v15269_v61  ;;  %v15289_v32 = vadd.f32 %v13707_v20, %v20135_v63  ;;  %v20137_v61 = vld [vmem:[#allocation360_spill] sm:$0xff] }
 0x6b6   :  { %20131 = vst [vmem:[#allocation352_spill] sm:$0xff] %v15273_v50  ;;  %20132 = vst [vmem:[#allocation353_spill] sm:$0xff] %v15277_v13  ;;  %v15293_v27 = vadd.f32 %v13707_v20, %v20137_v61  ;;  %v20139_v50 = vld [vmem:[#allocation361_spill] sm:$0xff]  ;;  %v20141_v13 = vld [vmem:[#allocation362_spill] sm:$0xff] }
 0x6b7   :  { %20133 = vst [vmem:[#allocation354_spill] sm:$0xff] %v15281_v18  ;;  %20134 = vst [vmem:[#allocation355_spill] sm:$0xff] %v15285_v52  ;;  %v15297_v38 = vadd.f32 %v13707_v20, %v20139_v50  ;;  %v15301_v46 = vadd.f32 %v13707_v20, %v20141_v13  ;;  %v20143_v18 = vld [vmem:[#allocation363_spill] sm:$0xff] }
 0x6b8   :  { %20136 = vst [vmem:[#allocation356_spill] sm:$0xff] %v15289_v32  ;;  %20138 = vst [vmem:[#allocation357_spill] sm:$0xff] %v15293_v27  ;;  %v15305_v11 = vadd.f32 %v13707_v20, %v20143_v18  ;;  %v20145_v52 = vld [vmem:[#allocation15_spill] sm:$0xff]  ;;  %v20147_v32 = vld [vmem:[#allocation16_spill] sm:$0xff] }
 0x6b9   :  { %20140 = vst [vmem:[#allocation358_spill] sm:$0xff] %v15297_v38  ;;  %20142 = vst [vmem:[#allocation359_spill] sm:$0xff] %v15301_v46  ;;  %v15309_v63 = vadd.f32 %v13707_v20, %v20145_v52  ;;  %v15313_v61 = vadd.f32 %v13707_v20, %v20147_v32  ;;  %v20149_v27 = vld [vmem:[#allocation17_spill] sm:$0xff]  ;;  %v20151_v38 = vld [vmem:[#allocation18_spill] sm:$0xff] }
 0x6ba   :  { %20144 = vst [vmem:[#allocation236_spill] sm:$0xff] %v15305_v11  ;;  %v15317_v50 = vadd.f32 %v13707_v20, %v20149_v27  ;;  %v15321_v13 = vadd.f32 %v13707_v20, %v20151_v38  ;;  %v20153_v46 = vld [vmem:[#allocation19_spill] sm:$0xff]  ;;  %v20155_v11 = vld [vmem:[#allocation20_spill] sm:$0xff] }
 0x6bb   :  { %20146 = vst [vmem:[#allocation240_spill] sm:$0xff] %v15309_v63  ;;  %20148 = vst [vmem:[#allocation275_spill] sm:$0xff] %v15313_v61  ;;  %v15325_v18 = vadd.f32 %v13707_v20, %v20153_v46  ;;  %v15329_v52 = vadd.f32 %v13707_v20, %v20155_v11  ;;  %v20157_v63 = vld [vmem:[#allocation21_spill] sm:$0xff]  ;;  %v20159_v61 = vld [vmem:[#allocation22_spill] sm:$0xff]  ;;  %v15345_v46 = vadd.f32 %v13707_v20, %v13785_v58 }
 0x6bc   :  { %20150 = vst [vmem:[#allocation364_spill] sm:$0xff] %v15317_v50  ;;  %20152 = vst [vmem:[#allocation365_spill] sm:$0xff] %v15321_v13  ;;  %v15333_v32 = vadd.f32 %v13707_v20, %v20157_v63  ;;  %v15337_v27 = vadd.f32 %v13707_v20, %v20159_v61  ;;  %v20161_v50 = vld [vmem:[#allocation23_spill] sm:$0xff]  ;;  %v15349_v11 = vadd.f32 %v13707_v20, %v13789_v56 }
 0x6bd   :  { %20154 = vst [vmem:[#allocation366_spill] sm:$0xff] %v15325_v18  ;;  %20156 = vst [vmem:[#allocation367_spill] sm:$0xff] %v15329_v52  ;;  %v15341_v38 = vadd.f32 %v13707_v20, %v20161_v50  ;;  %v20165_v52 = vld [vmem:[#allocation24_spill] sm:$0xff] }
 0x6be   :  { %20158 = vst [vmem:[#allocation368_spill] sm:$0xff] %v15333_v32  ;;  %20160 = vst [vmem:[#allocation369_spill] sm:$0xff] %v15337_v27  ;;  %v15353_v63 = vadd.f32 %v13707_v20, %v20165_v52  ;;  %v20167_v32 = vld [vmem:[#allocation25_spill] sm:$0xff]  ;;  %v20169_v27 = vld [vmem:[#allocation26_spill] sm:$0xff]  ;;  %v15373_v52 = vadd.f32 %v13707_v20, %v13813_v57 }
 0x6bf   :  { %20162 = vst [vmem:[#allocation370_spill] sm:$0xff] %v15341_v38  ;;  %20163 = vst [vmem:[#allocation335_spill] sm:$0xff] %v15345_v46  ;;  %v15357_v61 = vadd.f32 %v13707_v20, %v20167_v32  ;;  %v15361_v50 = vadd.f32 %v13707_v20, %v20169_v27  ;;  %v20171_v38 = vld [vmem:[#allocation27_spill] sm:$0xff]  ;;  %v20173_v46 = vld [vmem:[#allocation28_spill] sm:$0xff] }
 0x6c0   :  { %20164 = vst [vmem:[#allocation360_spill] sm:$0xff] %v15349_v11  ;;  %20166 = vst [vmem:[#allocation361_spill] sm:$0xff] %v15353_v63  ;;  %v15365_v58 = vadd.f32 %v13707_v20, %v20171_v38  ;;  %v15369_v56 = vadd.f32 %v13707_v20, %v20173_v46  ;;  %v20176_v63 = vld [vmem:[#allocation29_spill] sm:$0xff] }
 0x6c1   :  { %20168 = vst [vmem:[#allocation362_spill] sm:$0xff] %v15357_v61  ;;  %20170 = vst [vmem:[#allocation363_spill] sm:$0xff] %v15361_v50  ;;  %v15377_v32 = vadd.f32 %v13707_v20, %v20176_v63  ;;  %v20178_v61 = vld [vmem:[#allocation30_spill] sm:$0xff]  ;;  %v20180_v50 = vld [vmem:[#allocation31_spill] sm:$0xff] }
 0x6c2   :  { %20172 = vst [vmem:[#allocation15_spill] sm:$0xff] %v15365_v58  ;;  %20174 = vst [vmem:[#allocation16_spill] sm:$0xff] %v15369_v56  ;;  %v15381_v27 = vadd.f32 %v13707_v20, %v20178_v61  ;;  %v15385_v38 = vadd.f32 %v13707_v20, %v20180_v50  ;;  %v20182_v58 = vld [vmem:[#allocation32_spill] sm:$0xff]  ;;  %v20184_v56 = vld [vmem:[#allocation33_spill] sm:$0xff] }
 0x6c3   :  { %20175 = vst [vmem:[#allocation17_spill] sm:$0xff] %v15373_v52  ;;  %20177 = vst [vmem:[#allocation18_spill] sm:$0xff] %v15377_v32  ;;  %v15389_v46 = vadd.f32 %v13707_v20, %v20182_v58  ;;  %v15393_v57 = vadd.f32 %v13707_v20, %v20184_v56  ;;  %v20186_v52 = vld [vmem:[#allocation34_spill] sm:$0xff]  ;;  %v20188_v32 = vld [vmem:[#allocation35_spill] sm:$0xff] }
 0x6c4   :  { %20179 = vst [vmem:[#allocation19_spill] sm:$0xff] %v15381_v27  ;;  %20181 = vst [vmem:[#allocation20_spill] sm:$0xff] %v15385_v38  ;;  %v15397_v63 = vadd.f32 %v13707_v20, %v20186_v52  ;;  %v15401_v61 = vadd.f32 %v13707_v20, %v20188_v32  ;;  %v20190_v27 = vld [vmem:[#allocation36_spill] sm:$0xff]  ;;  %v20192_v38 = vld [vmem:[#allocation37_spill] sm:$0xff] }
 0x6c5   :  { %20183 = vst [vmem:[#allocation21_spill] sm:$0xff] %v15389_v46  ;;  %20185 = vst [vmem:[#allocation22_spill] sm:$0xff] %v15393_v57  ;;  %v15405_v50 = vadd.f32 %v13707_v20, %v20190_v27  ;;  %v15409_v58 = vadd.f32 %v13707_v20, %v20192_v38  ;;  %v20194_v46 = vld [vmem:[#allocation38_spill] sm:$0xff]  ;;  %v20196_v57 = vld [vmem:[#allocation39_spill] sm:$0xff] }
 0x6c6   :  { %20187 = vst [vmem:[#allocation23_spill] sm:$0xff] %v15397_v63  ;;  %20189 = vst [vmem:[#allocation24_spill] sm:$0xff] %v15401_v61  ;;  %v15413_v56 = vadd.f32 %v13707_v20, %v20194_v46  ;;  %v15417_v52 = vadd.f32 %v13707_v20, %v20196_v57  ;;  %v20198_v63 = vld [vmem:[#allocation40_spill] sm:$0xff]  ;;  %v20200_v61 = vld [vmem:[#allocation41_spill] sm:$0xff] }
 0x6c7   :  { %20191 = vst [vmem:[#allocation25_spill] sm:$0xff] %v15405_v50  ;;  %20193 = vst [vmem:[#allocation26_spill] sm:$0xff] %v15409_v58  ;;  %v15421_v32 = vadd.f32 %v13707_v20, %v20198_v63  ;;  %v15425_v27 = vadd.f32 %v13707_v20, %v20200_v61  ;;  %v20202_v50 = vld [vmem:[#allocation42_spill] sm:$0xff]  ;;  %v20204_v58 = vld [vmem:[#allocation43_spill] sm:$0xff] }
 0x6c8   :  { %20195 = vst [vmem:[#allocation27_spill] sm:$0xff] %v15413_v56  ;;  %20197 = vst [vmem:[#allocation28_spill] sm:$0xff] %v15417_v52  ;;  %v15429_v38 = vadd.f32 %v13707_v20, %v20202_v50  ;;  %v15433_v46 = vadd.f32 %v13707_v20, %v20204_v58  ;;  %v20206_v56 = vld [vmem:[#allocation44_spill] sm:$0xff]  ;;  %v20208_v52 = vld [vmem:[#allocation45_spill] sm:$0xff] }
 0x6c9   :  { %20199 = vst [vmem:[#allocation29_spill] sm:$0xff] %v15421_v32  ;;  %20201 = vst [vmem:[#allocation30_spill] sm:$0xff] %v15425_v27  ;;  %v15437_v57 = vadd.f32 %v13707_v20, %v20206_v56  ;;  %v15441_v63 = vadd.f32 %v13707_v20, %v20208_v52  ;;  %v20210_v32 = vld [vmem:[#allocation46_spill] sm:$0xff]  ;;  %v20212_v27 = vld [vmem:[#allocation47_spill] sm:$0xff] }
 0x6ca   :  { %20203 = vst [vmem:[#allocation31_spill] sm:$0xff] %v15429_v38  ;;  %20205 = vst [vmem:[#allocation32_spill] sm:$0xff] %v15433_v46  ;;  %v15445_v61 = vadd.f32 %v13707_v20, %v20210_v32  ;;  %v15449_v50 = vadd.f32 %v13707_v20, %v20212_v27  ;;  %v20214_v38 = vld [vmem:[#allocation48_spill] sm:$0xff]  ;;  %v20216_v46 = vld [vmem:[#allocation49_spill] sm:$0xff] }
 0x6cb   :  { %20207 = vst [vmem:[#allocation33_spill] sm:$0xff] %v15437_v57  ;;  %20209 = vst [vmem:[#allocation34_spill] sm:$0xff] %v15441_v63  ;;  %v15453_v58 = vadd.f32 %v13707_v20, %v20214_v38  ;;  %v15457_v56 = vadd.f32 %v13707_v20, %v20216_v46  ;;  %v20218_v57 = vld [vmem:[#allocation50_spill] sm:$0xff]  ;;  %v20220_v63 = vld [vmem:[#allocation51_spill] sm:$0xff] }
 0x6cc   :  { %20211 = vst [vmem:[#allocation35_spill] sm:$0xff] %v15445_v61  ;;  %20213 = vst [vmem:[#allocation36_spill] sm:$0xff] %v15449_v50  ;;  %v15461_v52 = vadd.f32 %v13707_v20, %v20218_v57  ;;  %v15465_v32 = vadd.f32 %v13707_v20, %v20220_v63  ;;  %v20222_v61 = vld [vmem:[#allocation52_spill] sm:$0xff]  ;;  %v20224_v50 = vld [vmem:[#allocation53_spill] sm:$0xff] }
 0x6cd   :  { %20215 = vst [vmem:[#allocation37_spill] sm:$0xff] %v15453_v58  ;;  %20217 = vst [vmem:[#allocation38_spill] sm:$0xff] %v15457_v56  ;;  %v15469_v27 = vadd.f32 %v13707_v20, %v20222_v61  ;;  %v15473_v38 = vadd.f32 %v13707_v20, %v20224_v50  ;;  %v20226_v58 = vld [vmem:[#allocation54_spill] sm:$0xff]  ;;  %v20228_v56 = vld [vmem:[#allocation55_spill] sm:$0xff] }
 0x6ce   :  { %20219 = vst [vmem:[#allocation39_spill] sm:$0xff] %v15461_v52  ;;  %20221 = vst [vmem:[#allocation40_spill] sm:$0xff] %v15465_v32  ;;  %v15477_v46 = vadd.f32 %v13707_v20, %v20226_v58  ;;  %v15481_v57 = vadd.f32 %v13707_v20, %v20228_v56  ;;  %v20230_v52 = vld [vmem:[#allocation56_spill] sm:$0xff]  ;;  %v20232_v32 = vld [vmem:[#allocation57_spill] sm:$0xff] }
 0x6cf   :  { %20223 = vst [vmem:[#allocation41_spill] sm:$0xff] %v15469_v27  ;;  %20225 = vst [vmem:[#allocation42_spill] sm:$0xff] %v15473_v38  ;;  %v15485_v63 = vadd.f32 %v13707_v20, %v20230_v52  ;;  %v15489_v61 = vadd.f32 %v13707_v20, %v20232_v32  ;;  %v20234_v27 = vld [vmem:[#allocation58_spill] sm:$0xff]  ;;  %v20236_v38 = vld [vmem:[#allocation59_spill] sm:$0xff] }
 0x6d0   :  { %20227 = vst [vmem:[#allocation43_spill] sm:$0xff] %v15477_v46  ;;  %20229 = vst [vmem:[#allocation44_spill] sm:$0xff] %v15481_v57  ;;  %v15493_v50 = vadd.f32 %v13707_v20, %v20234_v27  ;;  %v15497_v58 = vadd.f32 %v13707_v20, %v20236_v38  ;;  %v20238_v46 = vld [vmem:[#allocation60_spill] sm:$0xff]  ;;  %v20240_v57 = vld [vmem:[#allocation61_spill] sm:$0xff] }
 0x6d1   :  { %20231 = vst [vmem:[#allocation45_spill] sm:$0xff] %v15485_v63  ;;  %20233 = vst [vmem:[#allocation46_spill] sm:$0xff] %v15489_v61  ;;  %v15501_v56 = vadd.f32 %v13707_v20, %v20238_v46  ;;  %v15505_v52 = vadd.f32 %v13707_v20, %v20240_v57  ;;  %v20242_v63 = vld [vmem:[#allocation62_spill] sm:$0xff]  ;;  %v20244_v61 = vld [vmem:[#allocation63_spill] sm:$0xff] }
 0x6d2   :  { %20235 = vst [vmem:[#allocation47_spill] sm:$0xff] %v15493_v50  ;;  %20237 = vst [vmem:[#allocation48_spill] sm:$0xff] %v15497_v58  ;;  %v15509_v32 = vadd.f32 %v13707_v20, %v20242_v63  ;;  %v15513_v27 = vadd.f32 %v13707_v20, %v20244_v61  ;;  %v20246_v50 = vld [vmem:[#allocation64_spill] sm:$0xff]  ;;  %v20248_v58 = vld [vmem:[#allocation65_spill] sm:$0xff] }
 0x6d3   :  { %20239 = vst [vmem:[#allocation49_spill] sm:$0xff] %v15501_v56  ;;  %20241 = vst [vmem:[#allocation50_spill] sm:$0xff] %v15505_v52  ;;  %v15517_v38 = vadd.f32 %v13707_v20, %v20246_v50  ;;  %v15521_v46 = vadd.f32 %v13707_v20, %v20248_v58  ;;  %v20250_v56 = vld [vmem:[#allocation66_spill] sm:$0xff]  ;;  %v20252_v52 = vld [vmem:[#allocation67_spill] sm:$0xff] }
 0x6d4   :  { %20243 = vst [vmem:[#allocation51_spill] sm:$0xff] %v15509_v32  ;;  %20245 = vst [vmem:[#allocation52_spill] sm:$0xff] %v15513_v27  ;;  %v15525_v57 = vadd.f32 %v13707_v20, %v20250_v56  ;;  %v15529_v63 = vadd.f32 %v13707_v20, %v20252_v52  ;;  %v20254_v32 = vld [vmem:[#allocation68_spill] sm:$0xff]  ;;  %v20256_v27 = vld [vmem:[#allocation69_spill] sm:$0xff] }
 0x6d5   :  { %20247 = vst [vmem:[#allocation53_spill] sm:$0xff] %v15517_v38  ;;  %20249 = vst [vmem:[#allocation54_spill] sm:$0xff] %v15521_v46  ;;  %v15533_v61 = vadd.f32 %v13707_v20, %v20254_v32  ;;  %v15537_v50 = vadd.f32 %v13707_v20, %v20256_v27  ;;  %v20258_v38 = vld [vmem:[#allocation70_spill] sm:$0xff]  ;;  %v20260_v46 = vld [vmem:[#allocation71_spill] sm:$0xff] }
 0x6d6   :  { %20251 = vst [vmem:[#allocation55_spill] sm:$0xff] %v15525_v57  ;;  %20253 = vst [vmem:[#allocation56_spill] sm:$0xff] %v15529_v63  ;;  %v15541_v58 = vadd.f32 %v13707_v20, %v20258_v38  ;;  %v15545_v56 = vadd.f32 %v13707_v20, %v20260_v46  ;;  %v20262_v57 = vld [vmem:[#allocation72_spill] sm:$0xff]  ;;  %v20264_v63 = vld [vmem:[#allocation73_spill] sm:$0xff] }
 0x6d7   :  { %20255 = vst [vmem:[#allocation57_spill] sm:$0xff] %v15533_v61  ;;  %20257 = vst [vmem:[#allocation58_spill] sm:$0xff] %v15537_v50  ;;  %v15549_v52 = vadd.f32 %v13707_v20, %v20262_v57  ;;  %v15553_v32 = vadd.f32 %v13707_v20, %v20264_v63  ;;  %v20266_v61 = vld [vmem:[#allocation74_spill] sm:$0xff]  ;;  %v20268_v50 = vld [vmem:[#allocation75_spill] sm:$0xff] }
 0x6d8   :  { %20259 = vst [vmem:[#allocation59_spill] sm:$0xff] %v15541_v58  ;;  %20261 = vst [vmem:[#allocation60_spill] sm:$0xff] %v15545_v56  ;;  %v15557_v27 = vadd.f32 %v13707_v20, %v20266_v61  ;;  %v15561_v38 = vadd.f32 %v13707_v20, %v20268_v50  ;;  %v20270_v58 = vld [vmem:[#allocation76_spill] sm:$0xff]  ;;  %v20272_v56 = vld [vmem:[#allocation77_spill] sm:$0xff] }
 0x6d9   :  { %20263 = vst [vmem:[#allocation61_spill] sm:$0xff] %v15549_v52  ;;  %20265 = vst [vmem:[#allocation62_spill] sm:$0xff] %v15553_v32  ;;  %v15565_v46 = vadd.f32 %v13707_v20, %v20270_v58  ;;  %v15569_v57 = vadd.f32 %v13707_v20, %v20272_v56  ;;  %v20274_v52 = vld [vmem:[#allocation78_spill] sm:$0xff]  ;;  %v20276_v32 = vld [vmem:[#allocation79_spill] sm:$0xff] }
 0x6da   :  { %20267 = vst [vmem:[#allocation63_spill] sm:$0xff] %v15557_v27  ;;  %20269 = vst [vmem:[#allocation64_spill] sm:$0xff] %v15561_v38  ;;  %v15573_v63 = vadd.f32 %v13707_v20, %v20274_v52  ;;  %v15577_v61 = vadd.f32 %v13707_v20, %v20276_v32  ;;  %v20278_v27 = vld [vmem:[#allocation81_spill] sm:$0xff]  ;;  %v20280_v38 = vld [vmem:[#allocation83_spill] sm:$0xff] }
 0x6db   :  { %20271 = vst [vmem:[#allocation65_spill] sm:$0xff] %v15565_v46  ;;  %20273 = vst [vmem:[#allocation66_spill] sm:$0xff] %v15569_v57  ;;  %v15581_v50 = vadd.f32 %v13707_v20, %v20278_v27  ;;  %v15585_v58 = vadd.f32 %v13707_v20, %v20280_v38  ;;  %v20282_v46 = vld [vmem:[#allocation85_spill] sm:$0xff]  ;;  %v20284_v57 = vld [vmem:[#allocation87_spill] sm:$0xff] }
 0x6dc   :  { %20275 = vst [vmem:[#allocation67_spill] sm:$0xff] %v15573_v63  ;;  %20277 = vst [vmem:[#allocation68_spill] sm:$0xff] %v15577_v61  ;;  %v15589_v56 = vadd.f32 %v13707_v20, %v20282_v46  ;;  %v15593_v52 = vadd.f32 %v13707_v20, %v20284_v57  ;;  %v20286_v63 = vld [vmem:[#allocation89_spill] sm:$0xff]  ;;  %v20288_v61 = vld [vmem:[#allocation91_spill] sm:$0xff] }
 0x6dd   :  { %20279 = vst [vmem:[#allocation69_spill] sm:$0xff] %v15581_v50  ;;  %20281 = vst [vmem:[#allocation70_spill] sm:$0xff] %v15585_v58  ;;  %v15597_v32 = vadd.f32 %v13707_v20, %v20286_v63  ;;  %v15601_v27 = vadd.f32 %v13707_v20, %v20288_v61  ;;  %v20290_v50 = vld [vmem:[#allocation93_spill] sm:$0xff]  ;;  %v20292_v58 = vld [vmem:[#allocation95_spill] sm:$0xff] }
 0x6de   :  { %20283 = vst [vmem:[#allocation71_spill] sm:$0xff] %v15589_v56  ;;  %20285 = vst [vmem:[#allocation72_spill] sm:$0xff] %v15593_v52  ;;  %v15605_v38 = vadd.f32 %v13707_v20, %v20290_v50  ;;  %v15609_v46 = vadd.f32 %v13707_v20, %v20292_v58  ;;  %v20294_v56 = vld [vmem:[#allocation97_spill] sm:$0xff]  ;;  %v20296_v52 = vld [vmem:[#allocation99_spill] sm:$0xff] }
 0x6df   :  { %20287 = vst [vmem:[#allocation73_spill] sm:$0xff] %v15597_v32  ;;  %20289 = vst [vmem:[#allocation74_spill] sm:$0xff] %v15601_v27  ;;  %v15613_v57 = vadd.f32 %v13707_v20, %v20294_v56  ;;  %v15617_v63 = vadd.f32 %v13707_v20, %v20296_v52  ;;  %v20298_v32 = vld [vmem:[#allocation101_spill] sm:$0xff]  ;;  %v20300_v27 = vld [vmem:[#allocation103_spill] sm:$0xff] }
 0x6e0   :  { %20291 = vst [vmem:[#allocation75_spill] sm:$0xff] %v15605_v38  ;;  %20293 = vst [vmem:[#allocation76_spill] sm:$0xff] %v15609_v46  ;;  %v15621_v61 = vadd.f32 %v13707_v20, %v20298_v32  ;;  %v15625_v50 = vadd.f32 %v13707_v20, %v20300_v27  ;;  %v20302_v38 = vld [vmem:[#allocation105_spill] sm:$0xff]  ;;  %v20304_v46 = vld [vmem:[#allocation107_spill] sm:$0xff] }
 0x6e1   :  { %20295 = vst [vmem:[#allocation77_spill] sm:$0xff] %v15613_v57  ;;  %20297 = vst [vmem:[#allocation78_spill] sm:$0xff] %v15617_v63  ;;  %v15629_v58 = vadd.f32 %v13707_v20, %v20302_v38  ;;  %v15633_v56 = vadd.f32 %v13707_v20, %v20304_v46  ;;  %v20306_v57 = vld [vmem:[#allocation109_spill] sm:$0xff]  ;;  %v20308_v63 = vld [vmem:[#allocation111_spill] sm:$0xff] }
 0x6e2   :  { %20299 = vst [vmem:[#allocation79_spill] sm:$0xff] %v15621_v61  ;;  %20301 = vst [vmem:[#allocation81_spill] sm:$0xff] %v15625_v50  ;;  %v15637_v52 = vadd.f32 %v13707_v20, %v20306_v57  ;;  %v15641_v32 = vadd.f32 %v13707_v20, %v20308_v63  ;;  %v20310_v61 = vld [vmem:[#allocation113_spill] sm:$0xff]  ;;  %v20312_v50 = vld [vmem:[#allocation115_spill] sm:$0xff] }
 0x6e3   :  { %20303 = vst [vmem:[#allocation83_spill] sm:$0xff] %v15629_v58  ;;  %20305 = vst [vmem:[#allocation85_spill] sm:$0xff] %v15633_v56  ;;  %v15645_v27 = vadd.f32 %v13707_v20, %v20310_v61  ;;  %v15649_v38 = vadd.f32 %v13707_v20, %v20312_v50  ;;  %v20314_v58 = vld [vmem:[#allocation117_spill] sm:$0xff]  ;;  %v20316_v56 = vld [vmem:[#allocation119_spill] sm:$0xff] }
 0x6e4   :  { %20307 = vst [vmem:[#allocation87_spill] sm:$0xff] %v15637_v52  ;;  %20309 = vst [vmem:[#allocation89_spill] sm:$0xff] %v15641_v32  ;;  %v15653_v46 = vadd.f32 %v13707_v20, %v20314_v58  ;;  %v15657_v57 = vadd.f32 %v13707_v20, %v20316_v56  ;;  %v20318_v52 = vld [vmem:[#allocation121_spill] sm:$0xff]  ;;  %v20320_v32 = vld [vmem:[#allocation123_spill] sm:$0xff] }
 0x6e5   :  { %20311 = vst [vmem:[#allocation91_spill] sm:$0xff] %v15645_v27  ;;  %20313 = vst [vmem:[#allocation93_spill] sm:$0xff] %v15649_v38  ;;  %v15661_v63 = vadd.f32 %v13707_v20, %v20318_v52  ;;  %v15665_v61 = vadd.f32 %v13707_v20, %v20320_v32  ;;  %v20322_v27 = vld [vmem:[#allocation125_spill] sm:$0xff]  ;;  %v20324_v38 = vld [vmem:[#allocation127_spill] sm:$0xff] }
 0x6e6   :  { %20315 = vst [vmem:[#allocation95_spill] sm:$0xff] %v15653_v46  ;;  %20317 = vst [vmem:[#allocation97_spill] sm:$0xff] %v15657_v57  ;;  %v15669_v50 = vadd.f32 %v13707_v20, %v20322_v27  ;;  %v15673_v58 = vadd.f32 %v13707_v20, %v20324_v38  ;;  %v20326_v46 = vld [vmem:[#allocation129_spill] sm:$0xff]  ;;  %v20328_v57 = vld [vmem:[#allocation131_spill] sm:$0xff] }
 0x6e7   :  { %20319 = vst [vmem:[#allocation99_spill] sm:$0xff] %v15661_v63  ;;  %20321 = vst [vmem:[#allocation101_spill] sm:$0xff] %v15665_v61  ;;  %v15677_v56 = vadd.f32 %v13707_v20, %v20326_v46  ;;  %v15681_v52 = vadd.f32 %v13707_v20, %v20328_v57  ;;  %v20330_v63 = vld [vmem:[#allocation133_spill] sm:$0xff]  ;;  %v20332_v61 = vld [vmem:[#allocation135_spill] sm:$0xff] }
 0x6e8   :  { %20323 = vst [vmem:[#allocation103_spill] sm:$0xff] %v15669_v50  ;;  %20325 = vst [vmem:[#allocation105_spill] sm:$0xff] %v15673_v58  ;;  %v15685_v32 = vadd.f32 %v13707_v20, %v20330_v63  ;;  %v15689_v27 = vadd.f32 %v13707_v20, %v20332_v61  ;;  %v20334_v50 = vld [vmem:[#allocation137_spill] sm:$0xff]  ;;  %v20336_v58 = vld [vmem:[#allocation139_spill] sm:$0xff] }
 0x6e9   :  { %20327 = vst [vmem:[#allocation107_spill] sm:$0xff] %v15677_v56  ;;  %20329 = vst [vmem:[#allocation109_spill] sm:$0xff] %v15681_v52  ;;  %v15693_v38 = vadd.f32 %v13707_v20, %v20334_v50  ;;  %v15697_v46 = vadd.f32 %v13707_v20, %v20336_v58  ;;  %v20338_v56 = vld [vmem:[#allocation141_spill] sm:$0xff]  ;;  %v20340_v52 = vld [vmem:[#allocation143_spill] sm:$0xff] }
 0x6ea   :  { %20331 = vst [vmem:[#allocation111_spill] sm:$0xff] %v15685_v32  ;;  %20333 = vst [vmem:[#allocation113_spill] sm:$0xff] %v15689_v27  ;;  %v15701_v57 = vadd.f32 %v13707_v20, %v20338_v56  ;;  %v15705_v63 = vadd.f32 %v13707_v20, %v20340_v52  ;;  %v20342_v32 = vld [vmem:[#allocation145_spill] sm:$0xff]  ;;  %v20344_v27 = vld [vmem:[#allocation147_spill] sm:$0xff] }
 0x6eb   :  { %20335 = vst [vmem:[#allocation115_spill] sm:$0xff] %v15693_v38  ;;  %20337 = vst [vmem:[#allocation117_spill] sm:$0xff] %v15697_v46  ;;  %v15709_v61 = vadd.f32 %v13707_v20, %v20342_v32  ;;  %v15713_v50 = vadd.f32 %v13707_v20, %v20344_v27  ;;  %v20346_v38 = vld [vmem:[#allocation149_spill] sm:$0xff]  ;;  %v20348_v46 = vld [vmem:[#allocation151_spill] sm:$0xff] }
 0x6ec   :  { %20339 = vst [vmem:[#allocation119_spill] sm:$0xff] %v15701_v57  ;;  %20341 = vst [vmem:[#allocation121_spill] sm:$0xff] %v15705_v63  ;;  %v15717_v58 = vadd.f32 %v13707_v20, %v20346_v38  ;;  %v15721_v56 = vadd.f32 %v13707_v20, %v20348_v46  ;;  %v20350_v57 = vld [vmem:[#allocation153_spill] sm:$0xff]  ;;  %v20352_v63 = vld [vmem:[#allocation155_spill] sm:$0xff] }
 0x6ed   :  { %20343 = vst [vmem:[#allocation123_spill] sm:$0xff] %v15709_v61  ;;  %20345 = vst [vmem:[#allocation125_spill] sm:$0xff] %v15713_v50  ;;  %v15725_v52 = vadd.f32 %v13707_v20, %v20350_v57  ;;  %v15729_v32 = vadd.f32 %v13707_v20, %v20352_v63  ;;  %v20354_v61 = vld [vmem:[#allocation157_spill] sm:$0xff]  ;;  %v20356_v50 = vld [vmem:[#allocation159_spill] sm:$0xff] }
 0x6ee   :  { %20347 = vst [vmem:[#allocation127_spill] sm:$0xff] %v15717_v58  ;;  %20349 = vst [vmem:[#allocation129_spill] sm:$0xff] %v15721_v56  ;;  %v15733_v27 = vadd.f32 %v13707_v20, %v20354_v61  ;;  %v15737_v38 = vadd.f32 %v13707_v20, %v20356_v50  ;;  %v20358_v58 = vld [vmem:[#allocation161_spill] sm:$0xff]  ;;  %v20360_v56 = vld [vmem:[#allocation163_spill] sm:$0xff] }
 0x6ef   :  { %20351 = vst [vmem:[#allocation131_spill] sm:$0xff] %v15725_v52  ;;  %20353 = vst [vmem:[#allocation133_spill] sm:$0xff] %v15729_v32  ;;  %v15741_v46 = vadd.f32 %v13707_v20, %v20358_v58  ;;  %v15745_v57 = vadd.f32 %v13707_v20, %v20360_v56  ;;  %v20362_v52 = vld [vmem:[#allocation165_spill] sm:$0xff]  ;;  %v20364_v32 = vld [vmem:[#allocation167_spill] sm:$0xff] }
 0x6f0   :  { %20355 = vst [vmem:[#allocation135_spill] sm:$0xff] %v15733_v27  ;;  %20357 = vst [vmem:[#allocation137_spill] sm:$0xff] %v15737_v38  ;;  %v15749_v63 = vadd.f32 %v13707_v20, %v20362_v52  ;;  %v15753_v61 = vadd.f32 %v13707_v20, %v20364_v32  ;;  %v20366_v27 = vld [vmem:[#allocation169_spill] sm:$0xff]  ;;  %v20368_v38 = vld [vmem:[#allocation171_spill] sm:$0xff] }
 0x6f1   :  { %20359 = vst [vmem:[#allocation139_spill] sm:$0xff] %v15741_v46  ;;  %20361 = vst [vmem:[#allocation141_spill] sm:$0xff] %v15745_v57  ;;  %v15757_v50 = vadd.f32 %v13707_v20, %v20366_v27  ;;  %v15761_v58 = vadd.f32 %v13707_v20, %v20368_v38  ;;  %v20370_v46 = vld [vmem:[#allocation173_spill] sm:$0xff]  ;;  %v20372_v57 = vld [vmem:[#allocation175_spill] sm:$0xff] }
 0x6f2   :  { %20363 = vst [vmem:[#allocation143_spill] sm:$0xff] %v15749_v63  ;;  %20365 = vst [vmem:[#allocation145_spill] sm:$0xff] %v15753_v61  ;;  %v15765_v56 = vadd.f32 %v13707_v20, %v20370_v46  ;;  %v15769_v52 = vadd.f32 %v13707_v20, %v20372_v57  ;;  %v20374_v63 = vld [vmem:[#allocation177_spill] sm:$0xff]  ;;  %v20376_v61 = vld [vmem:[#allocation179_spill] sm:$0xff] }
 0x6f3   :  { %20367 = vst [vmem:[#allocation147_spill] sm:$0xff] %v15757_v50  ;;  %20369 = vst [vmem:[#allocation149_spill] sm:$0xff] %v15761_v58  ;;  %v15773_v32 = vadd.f32 %v13707_v20, %v20374_v63  ;;  %v15777_v27 = vadd.f32 %v13707_v20, %v20376_v61  ;;  %v20378_v50 = vld [vmem:[#allocation181_spill] sm:$0xff]  ;;  %v20380_v58 = vld [vmem:[#allocation183_spill] sm:$0xff] }
 0x6f4   :  { %20371 = vst [vmem:[#allocation151_spill] sm:$0xff] %v15765_v56  ;;  %20373 = vst [vmem:[#allocation153_spill] sm:$0xff] %v15769_v52  ;;  %v15781_v38 = vadd.f32 %v13707_v20, %v20378_v50  ;;  %v15785_v46 = vadd.f32 %v13707_v20, %v20380_v58  ;;  %v20382_v56 = vld [vmem:[#allocation185_spill] sm:$0xff]  ;;  %v20384_v52 = vld [vmem:[#allocation187_spill] sm:$0xff] }
 0x6f5   :  { %20375 = vst [vmem:[#allocation155_spill] sm:$0xff] %v15773_v32  ;;  %20377 = vst [vmem:[#allocation157_spill] sm:$0xff] %v15777_v27  ;;  %v15789_v57 = vadd.f32 %v13707_v20, %v20382_v56  ;;  %v15793_v63 = vadd.f32 %v13707_v20, %v20384_v52  ;;  %v20386_v32 = vld [vmem:[#allocation189_spill] sm:$0xff]  ;;  %v20388_v27 = vld [vmem:[#allocation191_spill] sm:$0xff] }
 0x6f6   :  { %20379 = vst [vmem:[#allocation159_spill] sm:$0xff] %v15781_v38  ;;  %20381 = vst [vmem:[#allocation161_spill] sm:$0xff] %v15785_v46  ;;  %v15797_v61 = vadd.f32 %v13707_v20, %v20386_v32  ;;  %v15801_v50 = vadd.f32 %v13707_v20, %v20388_v27  ;;  %v20390_v38 = vld [vmem:[#allocation193_spill] sm:$0xff]  ;;  %v20392_v46 = vld [vmem:[#allocation195_spill] sm:$0xff] }
 0x6f7   :  { %20383 = vst [vmem:[#allocation163_spill] sm:$0xff] %v15789_v57  ;;  %20385 = vst [vmem:[#allocation165_spill] sm:$0xff] %v15793_v63  ;;  %v15805_v58 = vadd.f32 %v13707_v20, %v20390_v38  ;;  %v15809_v56 = vadd.f32 %v13707_v20, %v20392_v46  ;;  %v20394_v57 = vld [vmem:[#allocation197_spill] sm:$0xff]  ;;  %v20396_v63 = vld [vmem:[#allocation199_spill] sm:$0xff] }
 0x6f8   :  { %20387 = vst [vmem:[#allocation167_spill] sm:$0xff] %v15797_v61  ;;  %20389 = vst [vmem:[#allocation169_spill] sm:$0xff] %v15801_v50  ;;  %v15813_v52 = vadd.f32 %v13707_v20, %v20394_v57  ;;  %v15817_v32 = vadd.f32 %v13707_v20, %v20396_v63  ;;  %v20398_v61 = vld [vmem:[#allocation201_spill] sm:$0xff]  ;;  %v20400_v50 = vld [vmem:[#allocation203_spill] sm:$0xff] }
 0x6f9   :  { %20391 = vst [vmem:[#allocation171_spill] sm:$0xff] %v15805_v58  ;;  %20393 = vst [vmem:[#allocation173_spill] sm:$0xff] %v15809_v56  ;;  %v15821_v27 = vadd.f32 %v13707_v20, %v20398_v61  ;;  %v15825_v38 = vadd.f32 %v13707_v20, %v20400_v50  ;;  %v20402_v58 = vld [vmem:[#allocation205_spill] sm:$0xff]  ;;  %v20404_v56 = vld [vmem:[#allocation207_spill] sm:$0xff] }
 0x6fa   :  { %20395 = vst [vmem:[#allocation175_spill] sm:$0xff] %v15813_v52  ;;  %20397 = vst [vmem:[#allocation177_spill] sm:$0xff] %v15817_v32  ;;  %v15829_v46 = vadd.f32 %v13707_v20, %v20402_v58  ;;  %v15833_v57 = vadd.f32 %v13707_v20, %v20404_v56  ;;  %v20406_v52 = vld [vmem:[#allocation209_spill] sm:$0xff]  ;;  %v20408_v32 = vld [vmem:[#allocation211_spill] sm:$0xff] }
 0x6fb   :  { %20399 = vst [vmem:[#allocation179_spill] sm:$0xff] %v15821_v27  ;;  %20401 = vst [vmem:[#allocation181_spill] sm:$0xff] %v15825_v38  ;;  %v15837_v63 = vadd.f32 %v13707_v20, %v20406_v52  ;;  %v15841_v61 = vadd.f32 %v13707_v20, %v20408_v32  ;;  %v20410_v27 = vld [vmem:[#allocation213_spill] sm:$0xff]  ;;  %v20412_v38 = vld [vmem:[#allocation215_spill] sm:$0xff] }
 0x6fc   :  { %20403 = vst [vmem:[#allocation183_spill] sm:$0xff] %v15829_v46  ;;  %20405 = vst [vmem:[#allocation185_spill] sm:$0xff] %v15833_v57  ;;  %v15845_v50 = vadd.f32 %v13707_v20, %v20410_v27  ;;  %v15849_v58 = vadd.f32 %v13707_v20, %v20412_v38  ;;  %v20414_v46 = vld [vmem:[#allocation217_spill] sm:$0xff]  ;;  %v20416_v57 = vld [vmem:[#allocation219_spill] sm:$0xff] }
 0x6fd   :  { %20407 = vst [vmem:[#allocation187_spill] sm:$0xff] %v15837_v63  ;;  %20409 = vst [vmem:[#allocation189_spill] sm:$0xff] %v15841_v61  ;;  %v15853_v56 = vadd.f32 %v13707_v20, %v20414_v46  ;;  %v15857_v52 = vadd.f32 %v13707_v20, %v20416_v57  ;;  %v20418_v63 = vld [vmem:[#allocation221_spill] sm:$0xff]  ;;  %v20420_v61 = vld [vmem:[#allocation223_spill] sm:$0xff] }
 0x6fe   :  { %20411 = vst [vmem:[#allocation191_spill] sm:$0xff] %v15845_v50  ;;  %20413 = vst [vmem:[#allocation193_spill] sm:$0xff] %v15849_v58  ;;  %v15861_v32 = vadd.f32 %v13707_v20, %v20418_v63  ;;  %v15865_v27 = vadd.f32 %v13707_v20, %v20420_v61  ;;  %v20422_v50 = vld [vmem:[#allocation225_spill] sm:$0xff]  ;;  %v20424_v58 = vld [vmem:[#allocation227_spill] sm:$0xff] }
 0x6ff   :  { %20415 = vst [vmem:[#allocation195_spill] sm:$0xff] %v15853_v56  ;;  %20417 = vst [vmem:[#allocation197_spill] sm:$0xff] %v15857_v52  ;;  %v15869_v38 = vadd.f32 %v13707_v20, %v20422_v50  ;;  %v15873_v46 = vadd.f32 %v13707_v20, %v20424_v58  ;;  %v20426_v56 = vld [vmem:[#allocation229_spill] sm:$0xff]  ;;  %v20428_v52 = vld [vmem:[#allocation231_spill] sm:$0xff] }
 0x700   :  { %20419 = vst [vmem:[#allocation199_spill] sm:$0xff] %v15861_v32  ;;  %20421 = vst [vmem:[#allocation201_spill] sm:$0xff] %v15865_v27  ;;  %v15877_v57 = vadd.f32 %v13707_v20, %v20426_v56  ;;  %v15881_v63 = vadd.f32 %v13707_v20, %v20428_v52  ;;  %v20430_v32 = vld [vmem:[#allocation233_spill] sm:$0xff]  ;;  %v20432_v27 = vld [vmem:[#allocation235_spill] sm:$0xff] }
 0x701   :  { %20423 = vst [vmem:[#allocation203_spill] sm:$0xff] %v15869_v38  ;;  %20425 = vst [vmem:[#allocation205_spill] sm:$0xff] %v15873_v46  ;;  %v15885_v61 = vadd.f32 %v13707_v20, %v20430_v32  ;;  %v15889_v50 = vadd.f32 %v13707_v20, %v20432_v27  ;;  %v20434_v38 = vld [vmem:[#allocation237_spill] sm:$0xff]  ;;  %v20436_v46 = vld [vmem:[#allocation239_spill] sm:$0xff] }
 0x702   :  { %20427 = vst [vmem:[#allocation207_spill] sm:$0xff] %v15877_v57  ;;  %20429 = vst [vmem:[#allocation209_spill] sm:$0xff] %v15881_v63  ;;  %v15893_v58 = vadd.f32 %v13707_v20, %v20434_v38  ;;  %v15897_v56 = vadd.f32 %v13707_v20, %v20436_v46  ;;  %v20438_v57 = vld [vmem:[#allocation241_spill] sm:$0xff]  ;;  %v20440_v63 = vld [vmem:[#allocation243_spill] sm:$0xff] }
 0x703   :  { %20431 = vst [vmem:[#allocation211_spill] sm:$0xff] %v15885_v61  ;;  %20433 = vst [vmem:[#allocation213_spill] sm:$0xff] %v15889_v50  ;;  %v15901_v52 = vadd.f32 %v13707_v20, %v20438_v57  ;;  %v15905_v32 = vadd.f32 %v13707_v20, %v20440_v63  ;;  %v20442_v61 = vld [vmem:[#allocation244_spill] sm:$0xff]  ;;  %v20444_v50 = vld [vmem:[#allocation246_spill] sm:$0xff] }
 0x704   :  { %20435 = vst [vmem:[#allocation215_spill] sm:$0xff] %v15893_v58  ;;  %20437 = vst [vmem:[#allocation217_spill] sm:$0xff] %v15897_v56  ;;  %v15909_v27 = vadd.f32 %v13707_v20, %v20442_v61  ;;  %v15913_v38 = vadd.f32 %v13707_v20, %v20444_v50  ;;  %v20446_v58 = vld [vmem:[#allocation247_spill] sm:$0xff]  ;;  %v20448_v56 = vld [vmem:[#allocation249_spill] sm:$0xff] }
 0x705   :  { %20439 = vst [vmem:[#allocation219_spill] sm:$0xff] %v15901_v52  ;;  %20441 = vst [vmem:[#allocation221_spill] sm:$0xff] %v15905_v32  ;;  %v15917_v46 = vadd.f32 %v13707_v20, %v20446_v58  ;;  %v15921_v57 = vadd.f32 %v13707_v20, %v20448_v56  ;;  %v20450_v52 = vld [vmem:[#allocation250_spill] sm:$0xff]  ;;  %v20452_v32 = vld [vmem:[#allocation252_spill] sm:$0xff] }
 0x706   :  { %20443 = vst [vmem:[#allocation223_spill] sm:$0xff] %v15909_v27  ;;  %20445 = vst [vmem:[#allocation225_spill] sm:$0xff] %v15913_v38  ;;  %v15925_v63 = vadd.f32 %v13707_v20, %v20450_v52  ;;  %v15929_v61 = vadd.f32 %v13707_v20, %v20452_v32  ;;  %v20454_v27 = vld [vmem:[#allocation253_spill] sm:$0xff]  ;;  %v20456_v38 = vld [vmem:[#allocation255_spill] sm:$0xff] }
 0x707   :  { %20447 = vst [vmem:[#allocation227_spill] sm:$0xff] %v15917_v46  ;;  %20449 = vst [vmem:[#allocation229_spill] sm:$0xff] %v15921_v57  ;;  %v15933_v50 = vadd.f32 %v13707_v20, %v20454_v27  ;;  %v15937_v58 = vadd.f32 %v13707_v20, %v20456_v38  ;;  %v20458_v46 = vld [vmem:[#allocation256_spill] sm:$0xff]  ;;  %v20460_v57 = vld [vmem:[#allocation258_spill] sm:$0xff] }
 0x708   :  { %20451 = vst [vmem:[#allocation231_spill] sm:$0xff] %v15925_v63  ;;  %20453 = vst [vmem:[#allocation233_spill] sm:$0xff] %v15929_v61  ;;  %v15941_v56 = vadd.f32 %v13707_v20, %v20458_v46  ;;  %v15945_v52 = vadd.f32 %v13707_v20, %v20460_v57  ;;  %v20462_v63 = vld [vmem:[#allocation259_spill] sm:$0xff]  ;;  %v20464_v61 = vld [vmem:[#allocation261_spill] sm:$0xff] }
 0x709   :  { %20455 = vst [vmem:[#allocation235_spill] sm:$0xff] %v15933_v50  ;;  %20457 = vst [vmem:[#allocation237_spill] sm:$0xff] %v15937_v58  ;;  %v15949_v32 = vadd.f32 %v13707_v20, %v20462_v63  ;;  %v15953_v27 = vadd.f32 %v13707_v20, %v20464_v61  ;;  %v20466_v50 = vld [vmem:[#allocation263_spill] sm:$0xff]  ;;  %v20468_v58 = vld [vmem:[#allocation265_spill] sm:$0xff] }
 0x70a   :  { %20459 = vst [vmem:[#allocation239_spill] sm:$0xff] %v15941_v56  ;;  %20461 = vst [vmem:[#allocation241_spill] sm:$0xff] %v15945_v52  ;;  %v15957_v38 = vadd.f32 %v13707_v20, %v20466_v50  ;;  %v15961_v46 = vadd.f32 %v13707_v20, %v20468_v58  ;;  %v20470_v56 = vld [vmem:[#allocation266_spill] sm:$0xff]  ;;  %v20472_v52 = vld [vmem:[#allocation268_spill] sm:$0xff] }
 0x70b   :  { %20463 = vst [vmem:[#allocation243_spill] sm:$0xff] %v15949_v32  ;;  %20465 = vst [vmem:[#allocation244_spill] sm:$0xff] %v15953_v27  ;;  %v15965_v57 = vadd.f32 %v13707_v20, %v20470_v56  ;;  %v15969_v63 = vadd.f32 %v13707_v20, %v20472_v52  ;;  %v20474_v32 = vld [vmem:[#allocation269_spill] sm:$0xff]  ;;  %v20476_v27 = vld [vmem:[#allocation271_spill] sm:$0xff] }
 0x70c   :  { %20467 = vst [vmem:[#allocation246_spill] sm:$0xff] %v15957_v38  ;;  %20469 = vst [vmem:[#allocation247_spill] sm:$0xff] %v15961_v46  ;;  %v15973_v61 = vadd.f32 %v13707_v20, %v20474_v32  ;;  %v15977_v50 = vadd.f32 %v13707_v20, %v20476_v27  ;;  %v20478_v38 = vld [vmem:[#allocation272_spill] sm:$0xff]  ;;  %v20480_v46 = vld [vmem:[#allocation274_spill] sm:$0xff] }
 0x70d   :  { %20471 = vst [vmem:[#allocation249_spill] sm:$0xff] %v15965_v57  ;;  %20473 = vst [vmem:[#allocation250_spill] sm:$0xff] %v15969_v63  ;;  %v15981_v58 = vadd.f32 %v13707_v20, %v20478_v38  ;;  %v15985_v56 = vadd.f32 %v13707_v20, %v20480_v46  ;;  %v20482_v57 = vld [vmem:[#allocation276_spill] sm:$0xff]  ;;  %v20484_v63 = vld [vmem:[#allocation278_spill] sm:$0xff] }
 0x70e   :  { %20475 = vst [vmem:[#allocation252_spill] sm:$0xff] %v15973_v61  ;;  %20477 = vst [vmem:[#allocation253_spill] sm:$0xff] %v15977_v50  ;;  %v15989_v52 = vadd.f32 %v13707_v20, %v20482_v57  ;;  %v15993_v32 = vadd.f32 %v13707_v20, %v20484_v63  ;;  %v20486_v61 = vld [vmem:[#allocation279_spill] sm:$0xff]  ;;  %v20488_v50 = vld [vmem:[#allocation281_spill] sm:$0xff] }
 0x70f   :  { %20479 = vst [vmem:[#allocation255_spill] sm:$0xff] %v15981_v58  ;;  %20481 = vst [vmem:[#allocation256_spill] sm:$0xff] %v15985_v56  ;;  %v15997_v27 = vadd.f32 %v13707_v20, %v20486_v61  ;;  %v16001_v38 = vadd.f32 %v13707_v20, %v20488_v50  ;;  %v20490_v58 = vld [vmem:[#allocation282_spill] sm:$0xff]  ;;  %v20492_v56 = vld [vmem:[#allocation284_spill] sm:$0xff] }
 0x710   :  { %20483 = vst [vmem:[#allocation258_spill] sm:$0xff] %v15989_v52  ;;  %20485 = vst [vmem:[#allocation259_spill] sm:$0xff] %v15993_v32  ;;  %v16005_v46 = vadd.f32 %v13707_v20, %v20490_v58  ;;  %v16009_v57 = vadd.f32 %v13707_v20, %v20492_v56  ;;  %v20494_v52 = vld [vmem:[#allocation285_spill] sm:$0xff]  ;;  %v20496_v32 = vld [vmem:[#allocation287_spill] sm:$0xff] }
 0x711   :  { %20487 = vst [vmem:[#allocation261_spill] sm:$0xff] %v15997_v27  ;;  %20489 = vst [vmem:[#allocation263_spill] sm:$0xff] %v16001_v38  ;;  %v16013_v63 = vadd.f32 %v13707_v20, %v20494_v52  ;;  %v16017_v61 = vadd.f32 %v13707_v20, %v20496_v32  ;;  %v20498_v27 = vld [vmem:[#allocation288_spill] sm:$0xff]  ;;  %v20500_v38 = vld [vmem:[#allocation290_spill] sm:$0xff] }
 0x712   :  { %20491 = vst [vmem:[#allocation265_spill] sm:$0xff] %v16005_v46  ;;  %20493 = vst [vmem:[#allocation266_spill] sm:$0xff] %v16009_v57  ;;  %v16021_v50 = vadd.f32 %v13707_v20, %v20498_v27  ;;  %v16025_v58 = vadd.f32 %v13707_v20, %v20500_v38  ;;  %v20502_v46 = vld [vmem:[#allocation291_spill] sm:$0xff]  ;;  %v20504_v57 = vld [vmem:[#allocation293_spill] sm:$0xff] }
 0x713   :  { %20495 = vst [vmem:[#allocation268_spill] sm:$0xff] %v16013_v63  ;;  %20497 = vst [vmem:[#allocation269_spill] sm:$0xff] %v16017_v61  ;;  %v16029_v56 = vadd.f32 %v13707_v20, %v20502_v46  ;;  %v16033_v52 = vadd.f32 %v13707_v20, %v20504_v57  ;;  %v20506_v63 = vld [vmem:[#allocation294_spill] sm:$0xff]  ;;  %v20508_v61 = vld [vmem:[#allocation296_spill] sm:$0xff] }
 0x714   :  { %20499 = vst [vmem:[#allocation271_spill] sm:$0xff] %v16021_v50  ;;  %20501 = vst [vmem:[#allocation272_spill] sm:$0xff] %v16025_v58  ;;  %v16037_v32 = vadd.f32 %v13707_v20, %v20506_v63  ;;  %v16041_v27 = vadd.f32 %v13707_v20, %v20508_v61  ;;  %v20510_v50 = vld [vmem:[#allocation297_spill] sm:$0xff]  ;;  %v20512_v58 = vld [vmem:[#allocation299_spill] sm:$0xff] }
 0x715   :  { %20503 = vst [vmem:[#allocation274_spill] sm:$0xff] %v16029_v56  ;;  %20505 = vst [vmem:[#allocation276_spill] sm:$0xff] %v16033_v52  ;;  %v16045_v38 = vadd.f32 %v13707_v20, %v20510_v50  ;;  %v16049_v46 = vadd.f32 %v13707_v20, %v20512_v58  ;;  %v20514_v56 = vld [vmem:[#allocation300_spill] sm:$0xff]  ;;  %v20516_v52 = vld [vmem:[#allocation302_spill] sm:$0xff] }
 0x716   :  { %20507 = vst [vmem:[#allocation278_spill] sm:$0xff] %v16037_v32  ;;  %20509 = vst [vmem:[#allocation279_spill] sm:$0xff] %v16041_v27  ;;  %v16053_v57 = vadd.f32 %v13707_v20, %v20514_v56  ;;  %v16057_v63 = vadd.f32 %v13707_v20, %v20516_v52  ;;  %v20518_v32 = vld [vmem:[#allocation303_spill] sm:$0xff]  ;;  %v20520_v27 = vld [vmem:[#allocation305_spill] sm:$0xff] }
 0x717   :  { %20511 = vst [vmem:[#allocation281_spill] sm:$0xff] %v16045_v38  ;;  %20513 = vst [vmem:[#allocation282_spill] sm:$0xff] %v16049_v46  ;;  %v16061_v61 = vadd.f32 %v13707_v20, %v20518_v32  ;;  %v16065_v50 = vadd.f32 %v13707_v20, %v20520_v27  ;;  %v20522_v38 = vld [vmem:[#allocation307_spill] sm:$0xff]  ;;  %v20524_v46 = vld [vmem:[#allocation309_spill] sm:$0xff] }
 0x718   :  { %20515 = vst [vmem:[#allocation284_spill] sm:$0xff] %v16053_v57  ;;  %20517 = vst [vmem:[#allocation285_spill] sm:$0xff] %v16057_v63  ;;  %v16069_v58 = vadd.f32 %v13707_v20, %v20522_v38  ;;  %v16073_v56 = vadd.f32 %v13707_v20, %v20524_v46  ;;  %v20526_v57 = vld [vmem:[#allocation311_spill] sm:$0xff]  ;;  %v20528_v63 = vld [vmem:[#allocation313_spill] sm:$0xff] }
 0x719   :  { %20519 = vst [vmem:[#allocation287_spill] sm:$0xff] %v16061_v61  ;;  %20521 = vst [vmem:[#allocation288_spill] sm:$0xff] %v16065_v50  ;;  %v16077_v52 = vadd.f32 %v13707_v20, %v20526_v57  ;;  %v16081_v32 = vadd.f32 %v13707_v20, %v20528_v63  ;;  %v20530_v61 = vld [vmem:[#allocation315_spill] sm:$0xff]  ;;  %v20532_v50 = vld [vmem:[#allocation317_spill] sm:$0xff] }
 0x71a   :  { %20523 = vst [vmem:[#allocation290_spill] sm:$0xff] %v16069_v58  ;;  %20525 = vst [vmem:[#allocation291_spill] sm:$0xff] %v16073_v56  ;;  %v16085_v27 = vadd.f32 %v13707_v20, %v20530_v61  ;;  %v16089_v38 = vadd.f32 %v13707_v20, %v20532_v50  ;;  %v20534_v58 = vld [vmem:[#allocation319_spill] sm:$0xff]  ;;  %v20536_v56 = vld [vmem:[#allocation321_spill] sm:$0xff] }
 0x71b   :  { %20527 = vst [vmem:[#allocation293_spill] sm:$0xff] %v16077_v52  ;;  %20529 = vst [vmem:[#allocation294_spill] sm:$0xff] %v16081_v32  ;;  %v16093_v46 = vadd.f32 %v13707_v20, %v20534_v58  ;;  %v16097_v57 = vadd.f32 %v13707_v20, %v20536_v56  ;;  %v20538_v52 = vld [vmem:[#allocation323_spill] sm:$0xff]  ;;  %v20540_v32 = vld [vmem:[#allocation80_spill] sm:$0xff] }
 0x71c   :  { %20531 = vst [vmem:[#allocation296_spill] sm:$0xff] %v16085_v27  ;;  %20533 = vst [vmem:[#allocation297_spill] sm:$0xff] %v16089_v38  ;;  %v16101_v63 = vadd.f32 %v13707_v20, %v20538_v52  ;;  %v16105_v61 = vadd.f32 %v13707_v20, %v20540_v32  ;;  %v20542_v27 = vld [vmem:[#allocation82_spill] sm:$0xff]  ;;  %v20544_v38 = vld [vmem:[#allocation84_spill] sm:$0xff] }
 0x71d   :  { %20535 = vst [vmem:[#allocation299_spill] sm:$0xff] %v16093_v46  ;;  %20537 = vst [vmem:[#allocation300_spill] sm:$0xff] %v16097_v57  ;;  %v16109_v50 = vadd.f32 %v13707_v20, %v20542_v27  ;;  %v16113_v58 = vadd.f32 %v13707_v20, %v20544_v38  ;;  %v20546_v46 = vld [vmem:[#allocation86_spill] sm:$0xff]  ;;  %v20548_v57 = vld [vmem:[#allocation88_spill] sm:$0xff] }
 0x71e   :  { %20539 = vst [vmem:[#allocation302_spill] sm:$0xff] %v16101_v63  ;;  %20541 = vst [vmem:[#allocation303_spill] sm:$0xff] %v16105_v61  ;;  %v16117_v56 = vadd.f32 %v13707_v20, %v20546_v46  ;;  %v16121_v52 = vadd.f32 %v13707_v20, %v20548_v57  ;;  %v20550_v63 = vld [vmem:[#allocation90_spill] sm:$0xff]  ;;  %v20552_v61 = vld [vmem:[#allocation92_spill] sm:$0xff] }
 0x71f   :  { %20543 = vst [vmem:[#allocation305_spill] sm:$0xff] %v16109_v50  ;;  %20545 = vst [vmem:[#allocation307_spill] sm:$0xff] %v16113_v58  ;;  %v16125_v32 = vadd.f32 %v13707_v20, %v20550_v63  ;;  %v16129_v27 = vadd.f32 %v13707_v20, %v20552_v61  ;;  %v20554_v50 = vld [vmem:[#allocation94_spill] sm:$0xff]  ;;  %v20556_v58 = vld [vmem:[#allocation96_spill] sm:$0xff] }
 0x720   :  { %20547 = vst [vmem:[#allocation309_spill] sm:$0xff] %v16117_v56  ;;  %20549 = vst [vmem:[#allocation311_spill] sm:$0xff] %v16121_v52  ;;  %v16133_v38 = vadd.f32 %v13707_v20, %v20554_v50  ;;  %v16137_v46 = vadd.f32 %v13707_v20, %v20556_v58  ;;  %v20558_v56 = vld [vmem:[#allocation98_spill] sm:$0xff]  ;;  %v20560_v52 = vld [vmem:[#allocation100_spill] sm:$0xff] }
 0x721   :  { %20551 = vst [vmem:[#allocation313_spill] sm:$0xff] %v16125_v32  ;;  %20553 = vst [vmem:[#allocation315_spill] sm:$0xff] %v16129_v27  ;;  %v16141_v57 = vadd.f32 %v13707_v20, %v20558_v56  ;;  %v16145_v63 = vadd.f32 %v13707_v20, %v20560_v52  ;;  %v20562_v32 = vld [vmem:[#allocation102_spill] sm:$0xff]  ;;  %v20564_v27 = vld [vmem:[#allocation104_spill] sm:$0xff] }
 0x722   :  { %20555 = vst [vmem:[#allocation317_spill] sm:$0xff] %v16133_v38  ;;  %20557 = vst [vmem:[#allocation319_spill] sm:$0xff] %v16137_v46  ;;  %v16149_v61 = vadd.f32 %v13707_v20, %v20562_v32  ;;  %v16153_v50 = vadd.f32 %v13707_v20, %v20564_v27  ;;  %v20566_v38 = vld [vmem:[#allocation106_spill] sm:$0xff]  ;;  %v20568_v46 = vld [vmem:[#allocation108_spill] sm:$0xff] }
 0x723   :  { %20559 = vst [vmem:[#allocation321_spill] sm:$0xff] %v16141_v57  ;;  %20561 = vst [vmem:[#allocation323_spill] sm:$0xff] %v16145_v63  ;;  %v16157_v58 = vadd.f32 %v13707_v20, %v20566_v38  ;;  %v16161_v56 = vadd.f32 %v13707_v20, %v20568_v46  ;;  %v20570_v57 = vld [vmem:[#allocation110_spill] sm:$0xff]  ;;  %v20572_v63 = vld [vmem:[#allocation112_spill] sm:$0xff] }
 0x724   :  { %20563 = vst [vmem:[#allocation80_spill] sm:$0xff] %v16149_v61  ;;  %20565 = vst [vmem:[#allocation82_spill] sm:$0xff] %v16153_v50  ;;  %v16165_v52 = vadd.f32 %v13707_v20, %v20570_v57  ;;  %v16169_v32 = vadd.f32 %v13707_v20, %v20572_v63  ;;  %v20574_v61 = vld [vmem:[#allocation114_spill] sm:$0xff]  ;;  %v20576_v50 = vld [vmem:[#allocation116_spill] sm:$0xff] }
 0x725   :  { %20567 = vst [vmem:[#allocation84_spill] sm:$0xff] %v16157_v58  ;;  %20569 = vst [vmem:[#allocation86_spill] sm:$0xff] %v16161_v56  ;;  %v16173_v27 = vadd.f32 %v13707_v20, %v20574_v61  ;;  %v16177_v38 = vadd.f32 %v13707_v20, %v20576_v50  ;;  %v20578_v58 = vld [vmem:[#allocation118_spill] sm:$0xff]  ;;  %v20580_v56 = vld [vmem:[#allocation120_spill] sm:$0xff] }
 0x726   :  { %20571 = vst [vmem:[#allocation88_spill] sm:$0xff] %v16165_v52  ;;  %20573 = vst [vmem:[#allocation90_spill] sm:$0xff] %v16169_v32  ;;  %v16181_v46 = vadd.f32 %v13707_v20, %v20578_v58  ;;  %v16185_v57 = vadd.f32 %v13707_v20, %v20580_v56  ;;  %v20582_v52 = vld [vmem:[#allocation122_spill] sm:$0xff]  ;;  %v20584_v32 = vld [vmem:[#allocation124_spill] sm:$0xff] }
 0x727   :  { %20575 = vst [vmem:[#allocation92_spill] sm:$0xff] %v16173_v27  ;;  %20577 = vst [vmem:[#allocation94_spill] sm:$0xff] %v16177_v38  ;;  %v16189_v63 = vadd.f32 %v13707_v20, %v20582_v52  ;;  %v16193_v61 = vadd.f32 %v13707_v20, %v20584_v32  ;;  %v20586_v27 = vld [vmem:[#allocation126_spill] sm:$0xff]  ;;  %v20588_v38 = vld [vmem:[#allocation128_spill] sm:$0xff] }
 0x728   :  { %20579 = vst [vmem:[#allocation96_spill] sm:$0xff] %v16181_v46  ;;  %20581 = vst [vmem:[#allocation98_spill] sm:$0xff] %v16185_v57  ;;  %v16197_v50 = vadd.f32 %v13707_v20, %v20586_v27  ;;  %v16201_v58 = vadd.f32 %v13707_v20, %v20588_v38  ;;  %v20590_v46 = vld [vmem:[#allocation130_spill] sm:$0xff]  ;;  %v20592_v57 = vld [vmem:[#allocation132_spill] sm:$0xff] }
 0x729   :  { %20583 = vst [vmem:[#allocation100_spill] sm:$0xff] %v16189_v63  ;;  %20585 = vst [vmem:[#allocation102_spill] sm:$0xff] %v16193_v61  ;;  %v16205_v56 = vadd.f32 %v13707_v20, %v20590_v46  ;;  %v16209_v52 = vadd.f32 %v13707_v20, %v20592_v57  ;;  %v20594_v63 = vld [vmem:[#allocation134_spill] sm:$0xff]  ;;  %v20596_v61 = vld [vmem:[#allocation136_spill] sm:$0xff] }
 0x72a   :  { %20587 = vst [vmem:[#allocation104_spill] sm:$0xff] %v16197_v50  ;;  %20589 = vst [vmem:[#allocation106_spill] sm:$0xff] %v16201_v58  ;;  %v16213_v32 = vadd.f32 %v13707_v20, %v20594_v63  ;;  %v16217_v27 = vadd.f32 %v13707_v20, %v20596_v61  ;;  %v20598_v50 = vld [vmem:[#allocation138_spill] sm:$0xff]  ;;  %v20600_v58 = vld [vmem:[#allocation140_spill] sm:$0xff] }
 0x72b   :  { %20591 = vst [vmem:[#allocation108_spill] sm:$0xff] %v16205_v56  ;;  %20593 = vst [vmem:[#allocation110_spill] sm:$0xff] %v16209_v52  ;;  %v16221_v38 = vadd.f32 %v13707_v20, %v20598_v50  ;;  %v16225_v46 = vadd.f32 %v13707_v20, %v20600_v58  ;;  %v20602_v56 = vld [vmem:[#allocation142_spill] sm:$0xff]  ;;  %v20604_v52 = vld [vmem:[#allocation144_spill] sm:$0xff] }
 0x72c   :  { %20595 = vst [vmem:[#allocation112_spill] sm:$0xff] %v16213_v32  ;;  %20597 = vst [vmem:[#allocation114_spill] sm:$0xff] %v16217_v27  ;;  %v16229_v57 = vadd.f32 %v13707_v20, %v20602_v56  ;;  %v16233_v63 = vadd.f32 %v13707_v20, %v20604_v52  ;;  %v20606_v32 = vld [vmem:[#allocation146_spill] sm:$0xff]  ;;  %v20608_v27 = vld [vmem:[#allocation148_spill] sm:$0xff] }
 0x72d   :  { %20599 = vst [vmem:[#allocation116_spill] sm:$0xff] %v16221_v38  ;;  %20601 = vst [vmem:[#allocation118_spill] sm:$0xff] %v16225_v46  ;;  %v16237_v61 = vadd.f32 %v13707_v20, %v20606_v32  ;;  %v16241_v50 = vadd.f32 %v13707_v20, %v20608_v27  ;;  %v20610_v38 = vld [vmem:[#allocation150_spill] sm:$0xff]  ;;  %v20612_v46 = vld [vmem:[#allocation152_spill] sm:$0xff] }
 0x72e   :  { %20603 = vst [vmem:[#allocation120_spill] sm:$0xff] %v16229_v57  ;;  %20605 = vst [vmem:[#allocation122_spill] sm:$0xff] %v16233_v63  ;;  %v16245_v58 = vadd.f32 %v13707_v20, %v20610_v38  ;;  %v16249_v56 = vadd.f32 %v13707_v20, %v20612_v46  ;;  %v20614_v57 = vld [vmem:[#allocation154_spill] sm:$0xff]  ;;  %v20616_v63 = vld [vmem:[#allocation156_spill] sm:$0xff] }
 0x72f   :  { %20607 = vst [vmem:[#allocation124_spill] sm:$0xff] %v16237_v61  ;;  %20609 = vst [vmem:[#allocation126_spill] sm:$0xff] %v16241_v50  ;;  %v16253_v52 = vadd.f32 %v13707_v20, %v20614_v57  ;;  %v16257_v32 = vadd.f32 %v13707_v20, %v20616_v63  ;;  %v20618_v61 = vld [vmem:[#allocation158_spill] sm:$0xff]  ;;  %v20620_v50 = vld [vmem:[#allocation160_spill] sm:$0xff] }
 0x730   :  { %20611 = vst [vmem:[#allocation128_spill] sm:$0xff] %v16245_v58  ;;  %20613 = vst [vmem:[#allocation130_spill] sm:$0xff] %v16249_v56  ;;  %v16261_v27 = vadd.f32 %v13707_v20, %v20618_v61  ;;  %v16265_v38 = vadd.f32 %v13707_v20, %v20620_v50  ;;  %v20622_v58 = vld [vmem:[#allocation162_spill] sm:$0xff]  ;;  %v20624_v56 = vld [vmem:[#allocation164_spill] sm:$0xff] }
 0x731   :  { %20615 = vst [vmem:[#allocation132_spill] sm:$0xff] %v16253_v52  ;;  %20617 = vst [vmem:[#allocation134_spill] sm:$0xff] %v16257_v32  ;;  %v16269_v46 = vadd.f32 %v13707_v20, %v20622_v58  ;;  %v16273_v57 = vadd.f32 %v13707_v20, %v20624_v56  ;;  %v20626_v52 = vld [vmem:[#allocation166_spill] sm:$0xff]  ;;  %v20628_v32 = vld [vmem:[#allocation168_spill] sm:$0xff] }
 0x732   :  { %20619 = vst [vmem:[#allocation136_spill] sm:$0xff] %v16261_v27  ;;  %20621 = vst [vmem:[#allocation138_spill] sm:$0xff] %v16265_v38  ;;  %v16277_v63 = vadd.f32 %v13707_v20, %v20626_v52  ;;  %v16281_v61 = vadd.f32 %v13707_v20, %v20628_v32  ;;  %v20630_v27 = vld [vmem:[#allocation170_spill] sm:$0xff]  ;;  %v20632_v38 = vld [vmem:[#allocation172_spill] sm:$0xff] }
 0x733   :  { %20623 = vst [vmem:[#allocation140_spill] sm:$0xff] %v16269_v46  ;;  %20625 = vst [vmem:[#allocation142_spill] sm:$0xff] %v16273_v57  ;;  %v16285_v50 = vadd.f32 %v13707_v20, %v20630_v27  ;;  %v16289_v58 = vadd.f32 %v13707_v20, %v20632_v38  ;;  %v20634_v46 = vld [vmem:[#allocation174_spill] sm:$0xff]  ;;  %v20636_v57 = vld [vmem:[#allocation176_spill] sm:$0xff] }
 0x734   :  { %20627 = vst [vmem:[#allocation144_spill] sm:$0xff] %v16277_v63  ;;  %20629 = vst [vmem:[#allocation146_spill] sm:$0xff] %v16281_v61  ;;  %v16293_v56 = vadd.f32 %v13707_v20, %v20634_v46  ;;  %v16297_v52 = vadd.f32 %v13707_v20, %v20636_v57  ;;  %v20638_v63 = vld [vmem:[#allocation178_spill] sm:$0xff]  ;;  %v20640_v61 = vld [vmem:[#allocation180_spill] sm:$0xff] }
 0x735   :  { %20631 = vst [vmem:[#allocation148_spill] sm:$0xff] %v16285_v50  ;;  %20633 = vst [vmem:[#allocation150_spill] sm:$0xff] %v16289_v58  ;;  %v16301_v32 = vadd.f32 %v13707_v20, %v20638_v63  ;;  %v16305_v27 = vadd.f32 %v13707_v20, %v20640_v61  ;;  %v20642_v50 = vld [vmem:[#allocation182_spill] sm:$0xff]  ;;  %v20644_v58 = vld [vmem:[#allocation184_spill] sm:$0xff]  ;;  %v16325_v61 = vadd.f32 %v13707_v20, %v14765_v28 }
 0x736   :  { %20635 = vst [vmem:[#allocation152_spill] sm:$0xff] %v16293_v56  ;;  %20637 = vst [vmem:[#allocation154_spill] sm:$0xff] %v16297_v52  ;;  %v16309_v38 = vadd.f32 %v13707_v20, %v20642_v50  ;;  %v16313_v46 = vadd.f32 %v13707_v20, %v20644_v58  ;;  %v20646_v56 = vld [vmem:[#allocation186_spill] sm:$0xff]  ;;  %v20648_v52 = vld [vmem:[#allocation188_spill] sm:$0xff]  ;;  %v16333_v58 = vadd.f32 %v13707_v20, %v14773_v21 }
 0x737   :  { %20639 = vst [vmem:[#allocation156_spill] sm:$0xff] %v16301_v32  ;;  %20641 = vst [vmem:[#allocation158_spill] sm:$0xff] %v16305_v27  ;;  %v16317_v57 = vadd.f32 %v13707_v20, %v20646_v56  ;;  %v16321_v63 = vadd.f32 %v13707_v20, %v20648_v52  ;;  %v20651_v27 = vld [vmem:[#allocation190_spill] sm:$0xff]  ;;  %v16341_v52 = vadd.f32 %v13707_v20, %v14781_v37  ;;  %v20852_v3 = vld [vmem:[#allocation236_spill] sm:$0xff] }
 0x738   :  { %20643 = vst [vmem:[#allocation160_spill] sm:$0xff] %v16309_v38  ;;  %20645 = vst [vmem:[#allocation162_spill] sm:$0xff] %v16313_v46  ;;  %v16329_v50 = vadd.f32 %v13707_v20, %v20651_v27  ;;  %v20654_v46 = vld [vmem:[#allocation192_spill] sm:$0xff]  ;;  %v16349_v27 = vadd.f32 %v13707_v20, %v14789_v44 }
 0x739   :  { %20647 = vst [vmem:[#allocation164_spill] sm:$0xff] %v16317_v57  ;;  %20649 = vst [vmem:[#allocation166_spill] sm:$0xff] %v16321_v63  ;;  %v16337_v56 = vadd.f32 %v13707_v20, %v20654_v46  ;;  %v20657_v63 = vld [vmem:[#allocation194_spill] sm:$0xff]  ;;  %v16357_v46 = vadd.f32 %v13707_v20, %v14797_v24 }
 0x73a   :  { %20650 = vst [vmem:[#allocation168_spill] sm:$0xff] %v16325_v61  ;;  %20652 = vst [vmem:[#allocation170_spill] sm:$0xff] %v16329_v50  ;;  %v16345_v28 = vadd.f32 %v13707_v20, %v20657_v63  ;;  %v20660_v50 = vld [vmem:[#allocation196_spill] sm:$0xff]  ;;  %v16365_v63 = vadd.f32 %v13707_v20, %v14805_v8  ;;  %v21089_v12 = vld [vmem:[#allocation138_spill] sm:$0xff] }
 0x73b   :  { %20653 = vst [vmem:[#allocation172_spill] sm:$0xff] %v16333_v58  ;;  %20655 = vst [vmem:[#allocation174_spill] sm:$0xff] %v16337_v56  ;;  %v16353_v21 = vadd.f32 %v13707_v20, %v20660_v50  ;;  %v20663_v56 = vld [vmem:[#allocation198_spill] sm:$0xff]  ;;  %v16373_v50 = vadd.f32 %v13707_v20, %v14813_v6 }
 0x73c   :  { %20656 = vst [vmem:[#allocation176_spill] sm:$0xff] %v16341_v52  ;;  %20658 = vst [vmem:[#allocation178_spill] sm:$0xff] %v16345_v28  ;;  %v16361_v37 = vadd.f32 %v13707_v20, %v20663_v56  ;;  %v20666_v28 = vld [vmem:[#allocation200_spill] sm:$0xff]  ;;  %v16381_v56 = vadd.f32 %v13707_v20, %v14821_v42  ;;  %v21091_v11 = vld [vmem:[#allocation142_spill] sm:$0xff] }
 0x73d   :  { %20659 = vst [vmem:[#allocation180_spill] sm:$0xff] %v16349_v27  ;;  %20661 = vst [vmem:[#allocation182_spill] sm:$0xff] %v16353_v21  ;;  %v16369_v44 = vadd.f32 %v13707_v20, %v20666_v28  ;;  %v20669_v21 = vld [vmem:[#allocation202_spill] sm:$0xff] }
 0x73e   :  { %20662 = vst [vmem:[#allocation184_spill] sm:$0xff] %v16357_v46  ;;  %20664 = vst [vmem:[#allocation186_spill] sm:$0xff] %v16361_v37  ;;  %v16377_v24 = vadd.f32 %v13707_v20, %v20669_v21  ;;  %v20672_v37 = vld [vmem:[#allocation204_spill] sm:$0xff]  ;;  %v16397_v21 = vadd.f32 %v13707_v20, %v14837_v53  ;;  %v21095_v13 = vld [vmem:[#allocation150_spill] sm:$0xff] }
 0x73f   :  { %20665 = vst [vmem:[#allocation188_spill] sm:$0xff] %v16365_v63  ;;  %20667 = vst [vmem:[#allocation190_spill] sm:$0xff] %v16369_v44  ;;  %v16385_v8 = vadd.f32 %v13707_v20, %v20672_v37  ;;  %v20674_v63 = vld [vmem:[#allocation206_spill] sm:$0xff]  ;;  %v20676_v44 = vld [vmem:[#allocation208_spill] sm:$0xff]  ;;  %v16405_v37 = vadd.f32 %v13707_v20, %v14845_v10 }
 0x740   :  { %20668 = vst [vmem:[#allocation192_spill] sm:$0xff] %v16373_v50  ;;  %20670 = vst [vmem:[#allocation194_spill] sm:$0xff] %v16377_v24  ;;  %v16389_v28 = vadd.f32 %v13707_v20, %v20674_v63  ;;  %v16393_v6 = vadd.f32 %v13707_v20, %v20676_v44  ;;  %v20679_v24 = vld [vmem:[#allocation210_spill] sm:$0xff]  ;;  %v16413_v44 = vadd.f32 %v13707_v20, %v14853_v1 }
 0x741   :  { %20671 = vst [vmem:[#allocation196_spill] sm:$0xff] %v16381_v56  ;;  %20673 = vst [vmem:[#allocation198_spill] sm:$0xff] %v16385_v8  ;;  %v16401_v42 = vadd.f32 %v13707_v20, %v20679_v24  ;;  %v20682_v8 = vld [vmem:[#allocation212_spill] sm:$0xff]  ;;  %v16421_v24 = vadd.f32 %v13707_v20, %v14861_v30  ;;  %v21099_v41 = vld [vmem:[#allocation162_spill] sm:$0xff] }
 0x742   :  { %20675 = vst [vmem:[#allocation200_spill] sm:$0xff] %v16389_v28  ;;  %20677 = vst [vmem:[#allocation202_spill] sm:$0xff] %v16393_v6  ;;  %v16409_v63 = vadd.f32 %v13707_v20, %v20682_v8  ;;  %v20685_v6 = vld [vmem:[#allocation214_spill] sm:$0xff]  ;;  %v16429_v8 = vadd.f32 %v13707_v20, %v14869_v45 }
 0x743   :  { %20678 = vst [vmem:[#allocation204_spill] sm:$0xff] %v16397_v21  ;;  %20680 = vst [vmem:[#allocation206_spill] sm:$0xff] %v16401_v42  ;;  %v16417_v53 = vadd.f32 %v13707_v20, %v20685_v6  ;;  %v20688_v42 = vld [vmem:[#allocation216_spill] sm:$0xff]  ;;  %v16437_v6 = vadd.f32 %v13707_v20, %v14877_v14  ;;  %v21102_v18 = vld [vmem:[#allocation174_spill] sm:$0xff] }
 0x744   :  { %20681 = vst [vmem:[#allocation208_spill] sm:$0xff] %v16405_v37  ;;  %20683 = vst [vmem:[#allocation210_spill] sm:$0xff] %v16409_v63  ;;  %v16425_v10 = vadd.f32 %v13707_v20, %v20688_v42  ;;  %v20691_v63 = vld [vmem:[#allocation218_spill] sm:$0xff]  ;;  %v16445_v42 = vadd.f32 %v13707_v20, %v14885_v25 }
 0x745   :  { %20684 = vst [vmem:[#allocation212_spill] sm:$0xff] %v16413_v44  ;;  %20686 = vst [vmem:[#allocation214_spill] sm:$0xff] %v16417_v53  ;;  %v16433_v1 = vadd.f32 %v13707_v20, %v20691_v63  ;;  %v20694_v53 = vld [vmem:[#allocation220_spill] sm:$0xff]  ;;  %v16453_v63 = vadd.f32 %v13707_v20, %v14893_v33  ;;  %v21103_v32 = vld [vmem:[#allocation178_spill] sm:$0xff] }
 0x746   :  { %20687 = vst [vmem:[#allocation371_spill] sm:$0xff] %v16421_v24  ;;  %20689 = vst [vmem:[#allocation216_spill] sm:$0xff] %v16425_v10  ;;  %v16441_v30 = vadd.f32 %v13707_v20, %v20694_v53  ;;  %v20697_v10 = vld [vmem:[#allocation222_spill] sm:$0xff]  ;;  %v16461_v53 = vadd.f32 %v13707_v20, %v14901_v9 }
 0x747   :  { %20690 = vst [vmem:[#allocation372_spill] sm:$0xff] %v16429_v8  ;;  %20692 = vst [vmem:[#allocation218_spill] sm:$0xff] %v16433_v1  ;;  %v16449_v45 = vadd.f32 %v13707_v20, %v20697_v10  ;;  %v20700_v1 = vld [vmem:[#allocation224_spill] sm:$0xff]  ;;  %v16469_v10 = vadd.f32 %v13707_v20, %v14909_v51  ;;  %v21104_v38 = vld [vmem:[#allocation182_spill] sm:$0xff] }
 0x748   :  { %20693 = vst [vmem:[#allocation373_spill] sm:$0xff] %v16437_v6  ;;  %20695 = vst [vmem:[#allocation220_spill] sm:$0xff] %v16441_v30  ;;  %v16457_v14 = vadd.f32 %v13707_v20, %v20700_v1  ;;  %v20703_v30 = vld [vmem:[#allocation226_spill] sm:$0xff]  ;;  %v16477_v1 = vadd.f32 %v13707_v20, %v14917_v23 }
 0x749   :  { %20696 = vst [vmem:[#allocation374_spill] sm:$0xff] %v16445_v42  ;;  %20698 = vst [vmem:[#allocation222_spill] sm:$0xff] %v16449_v45  ;;  %v16465_v25 = vadd.f32 %v13707_v20, %v20703_v30  ;;  %v20706_v45 = vld [vmem:[#allocation228_spill] sm:$0xff]  ;;  %v16485_v30 = vadd.f32 %v13707_v20, %v14925_v16  ;;  %v21105_v57 = vld [vmem:[#allocation186_spill] sm:$0xff] }
 0x74a   :  { %20699 = vst [vmem:[#allocation375_spill] sm:$0xff] %v16453_v63  ;;  %20701 = vst [vmem:[#allocation224_spill] sm:$0xff] %v16457_v14  ;;  %v16473_v33 = vadd.f32 %v13707_v20, %v20706_v45  ;;  %v20709_v14 = vld [vmem:[#allocation230_spill] sm:$0xff]  ;;  %v16493_v45 = vadd.f32 %v13707_v20, %v14933_v40 }
 0x74b   :  { %20702 = vst [vmem:[#allocation376_spill] sm:$0xff] %v16461_v53  ;;  %20704 = vst [vmem:[#allocation226_spill] sm:$0xff] %v16465_v25  ;;  %v16481_v9 = vadd.f32 %v13707_v20, %v20709_v14  ;;  %v20712_v25 = vld [vmem:[#allocation232_spill] sm:$0xff]  ;;  %v21107_v61 = vld [vmem:[#allocation190_spill] sm:$0xff] }
 0x74c   :  { %20705 = vst [vmem:[#allocation377_spill] sm:$0xff] %v16469_v10  ;;  %20707 = vst [vmem:[#allocation228_spill] sm:$0xff] %v16473_v33  ;;  %v16489_v51 = vadd.f32 %v13707_v20, %v20712_v25  ;;  %v20715_v33 = vld [vmem:[#allocation234_spill] sm:$0xff] }
 0x74d   :  { %20708 = vst [vmem:[#allocation378_spill] sm:$0xff] %v16477_v1  ;;  %20710 = vst [vmem:[#allocation230_spill] sm:$0xff] %v16481_v9  ;;  %v16497_v23 = vadd.f32 %v13707_v20, %v20715_v33  ;;  %v20717_v1 = vld [vmem:[#allocation238_spill] sm:$0xff]  ;;  %v21114_v56 = vld [vmem:[#allocation216_spill] sm:$0xff] }
 0x74e   :  { %20711 = vst [vmem:[#allocation379_spill] sm:$0xff] %v16485_v30  ;;  %20713 = vst [vmem:[#allocation232_spill] sm:$0xff] %v16489_v51  ;;  %v16501_v14 = vadd.f32 %v13707_v20, %v20717_v1  ;;  %v20719_v9 = vld [vmem:[#allocation242_spill] sm:$0xff]  ;;  %v20721_v30 = vld [vmem:[#allocation245_spill] sm:$0xff] }
 0x74f   :  { %20714 = vst [vmem:[#allocation380_spill] sm:$0xff] %v16493_v45  ;;  %20716 = vst [vmem:[#allocation234_spill] sm:$0xff] %v16497_v23  ;;  %v16505_v16 = vadd.f32 %v13707_v20, %v20719_v9  ;;  %v16509_v25 = vadd.f32 %v13707_v20, %v20721_v30  ;;  %v20723_v51 = vld [vmem:[#allocation248_spill] sm:$0xff]  ;;  %v20725_v45 = vld [vmem:[#allocation251_spill] sm:$0xff] }
 0x750   :  { %20718 = vst [vmem:[#allocation238_spill] sm:$0xff] %v16501_v14  ;;  %v16513_v40 = vadd.f32 %v13707_v20, %v20723_v51  ;;  %v16517_v33 = vadd.f32 %v13707_v20, %v20725_v45  ;;  %v20727_v23 = vld [vmem:[#allocation254_spill] sm:$0xff]  ;;  %v20729_v14 = vld [vmem:[#allocation257_spill] sm:$0xff] }
 0x751   :  { %20720 = vst [vmem:[#allocation242_spill] sm:$0xff] %v16505_v16  ;;  %20722 = vst [vmem:[#allocation245_spill] sm:$0xff] %v16509_v25  ;;  %v16521_v1 = vadd.f32 %v13707_v20, %v20727_v23  ;;  %v16525_v9 = vadd.f32 %v13707_v20, %v20729_v14  ;;  %v20731_v16 = vld [vmem:[#allocation260_spill] sm:$0xff]  ;;  %v20733_v25 = vld [vmem:[#allocation262_spill] sm:$0xff] }
 0x752   :  { %20724 = vst [vmem:[#allocation248_spill] sm:$0xff] %v16513_v40  ;;  %20726 = vst [vmem:[#allocation251_spill] sm:$0xff] %v16517_v33  ;;  %v16529_v30 = vadd.f32 %v13707_v20, %v20731_v16  ;;  %v16533_v51 = vadd.f32 %v13707_v20, %v20733_v25  ;;  %v20735_v40 = vld [vmem:[#allocation264_spill] sm:$0xff]  ;;  %v20737_v33 = vld [vmem:[#allocation267_spill] sm:$0xff] }
 0x753   :  { %20728 = vst [vmem:[#allocation254_spill] sm:$0xff] %v16521_v1  ;;  %20730 = vst [vmem:[#allocation257_spill] sm:$0xff] %v16525_v9  ;;  %v16537_v45 = vadd.f32 %v13707_v20, %v20735_v40  ;;  %v16541_v23 = vadd.f32 %v13707_v20, %v20737_v33  ;;  %v20739_v1 = vld [vmem:[#allocation270_spill] sm:$0xff]  ;;  %v20741_v9 = vld [vmem:[#allocation273_spill] sm:$0xff] }
 0x754   :  { %20732 = vst [vmem:[#allocation260_spill] sm:$0xff] %v16529_v30  ;;  %20734 = vst [vmem:[#allocation262_spill] sm:$0xff] %v16533_v51  ;;  %v16545_v14 = vadd.f32 %v13707_v20, %v20739_v1  ;;  %v16549_v16 = vadd.f32 %v13707_v20, %v20741_v9  ;;  %v20743_v30 = vld [vmem:[#allocation277_spill] sm:$0xff]  ;;  %v20745_v51 = vld [vmem:[#allocation280_spill] sm:$0xff] }
 0x755   :  { %20736 = vst [vmem:[#allocation264_spill] sm:$0xff] %v16537_v45  ;;  %20738 = vst [vmem:[#allocation267_spill] sm:$0xff] %v16541_v23  ;;  %v16553_v25 = vadd.f32 %v13707_v20, %v20743_v30  ;;  %v16557_v40 = vadd.f32 %v13707_v20, %v20745_v51  ;;  %v20747_v45 = vld [vmem:[#allocation283_spill] sm:$0xff]  ;;  %v20749_v23 = vld [vmem:[#allocation286_spill] sm:$0xff] }
 0x756   :  { %20740 = vst [vmem:[#allocation270_spill] sm:$0xff] %v16545_v14  ;;  %20742 = vst [vmem:[#allocation273_spill] sm:$0xff] %v16549_v16  ;;  %v16561_v33 = vadd.f32 %v13707_v20, %v20747_v45  ;;  %v16565_v1 = vadd.f32 %v13707_v20, %v20749_v23  ;;  %v20751_v14 = vld [vmem:[#allocation289_spill] sm:$0xff]  ;;  %v20753_v16 = vld [vmem:[#allocation292_spill] sm:$0xff]  ;;  %v16581_v45 = vadd.f32 %v13707_v20, %v15021_v26 }
 0x757   :  { %20744 = vst [vmem:[#allocation277_spill] sm:$0xff] %v16553_v25  ;;  %20746 = vst [vmem:[#allocation280_spill] sm:$0xff] %v16557_v40  ;;  %v16569_v9 = vadd.f32 %v13707_v20, %v20751_v14  ;;  %v16573_v30 = vadd.f32 %v13707_v20, %v20753_v16  ;;  %v20755_v25 = vld [vmem:[#allocation295_spill] sm:$0xff]  ;;  %v21108_v58 = vld [vmem:[#allocation194_spill] sm:$0xff] }
 0x758   :  { %20748 = vst [vmem:[#allocation283_spill] sm:$0xff] %v16561_v33  ;;  %20750 = vst [vmem:[#allocation286_spill] sm:$0xff] %v16565_v1  ;;  %v16577_v51 = vadd.f32 %v13707_v20, %v20755_v25  ;;  %v20758_v33 = vld [vmem:[#allocation298_spill] sm:$0xff]  ;;  %v20760_v1 = vld [vmem:[#allocation301_spill] sm:$0xff] }
 0x759   :  { %20752 = vst [vmem:[#allocation289_spill] sm:$0xff] %v16569_v9  ;;  %20754 = vst [vmem:[#allocation292_spill] sm:$0xff] %v16573_v30  ;;  %v16585_v23 = vadd.f32 %v13707_v20, %v20758_v33  ;;  %v16589_v14 = vadd.f32 %v13707_v20, %v20760_v1  ;;  %v20762_v9 = vld [vmem:[#allocation304_spill] sm:$0xff]  ;;  %v20764_v30 = vld [vmem:[#allocation306_spill] sm:$0xff] }
 0x75a   :  { %20756 = vst [vmem:[#allocation295_spill] sm:$0xff] %v16577_v51  ;;  %20757 = vst [vmem:[#allocation381_spill] sm:$0xff] %v16581_v45  ;;  %v16593_v16 = vadd.f32 %v13707_v20, %v20762_v9  ;;  %v16597_v25 = vadd.f32 %v13707_v20, %v20764_v30  ;;  %v20766_v51 = vld [vmem:[#allocation308_spill] sm:$0xff]  ;;  %v20768_v45 = vld [vmem:[#allocation310_spill] sm:$0xff] }
 0x75b   :  { %20759 = vst [vmem:[#allocation298_spill] sm:$0xff] %v16585_v23  ;;  %20761 = vst [vmem:[#allocation301_spill] sm:$0xff] %v16589_v14  ;;  %v16601_v26 = vadd.f32 %v13707_v20, %v20766_v51  ;;  %v16605_v33 = vadd.f32 %v13707_v20, %v20768_v45  ;;  %v20770_v23 = vld [vmem:[#allocation312_spill] sm:$0xff]  ;;  %v20772_v14 = vld [vmem:[#allocation314_spill] sm:$0xff] }
 0x75c   :  { %20763 = vst [vmem:[#allocation304_spill] sm:$0xff] %v16593_v16  ;;  %20765 = vst [vmem:[#allocation306_spill] sm:$0xff] %v16597_v25  ;;  %v16609_v1 = vadd.f32 %v13707_v20, %v20770_v23  ;;  %v16613_v9 = vadd.f32 %v13707_v20, %v20772_v14  ;;  %v20774_v16 = vld [vmem:[#allocation316_spill] sm:$0xff]  ;;  %v20776_v25 = vld [vmem:[#allocation318_spill] sm:$0xff] }
 0x75d   :  { %20767 = vst [vmem:[#allocation308_spill] sm:$0xff] %v16601_v26  ;;  %20769 = vst [vmem:[#allocation310_spill] sm:$0xff] %v16605_v33  ;;  %v16617_v30 = vadd.f32 %v13707_v20, %v20774_v16  ;;  %v16621_v51 = vadd.f32 %v13707_v20, %v20776_v25  ;;  %v20778_v26 = vld [vmem:[#allocation320_spill] sm:$0xff]  ;;  %v20780_v33 = vld [vmem:[#allocation322_spill] sm:$0xff] }
 0x75e   :  { %20771 = vst [vmem:[#allocation312_spill] sm:$0xff] %v16609_v1  ;;  %20773 = vst [vmem:[#allocation314_spill] sm:$0xff] %v16613_v9  ;;  %v16625_v45 = vadd.f32 %v13707_v20, %v20778_v26  ;;  %v16629_v23 = vadd.f32 %v13707_v20, %v20780_v33  ;;  %v20782_v1 = vld [vmem:[#allocation324_spill] sm:$0xff]  ;;  %v20784_v9 = vld [vmem:[#allocation325_spill] sm:$0xff] }
 0x75f   :  { %20775 = vst [vmem:[#allocation316_spill] sm:$0xff] %v16617_v30  ;;  %20777 = vst [vmem:[#allocation318_spill] sm:$0xff] %v16621_v51  ;;  %v16633_v14 = vadd.f32 %v13707_v20, %v20782_v1  ;;  %v16637_v16 = vadd.f32 %v13707_v20, %v20784_v9  ;;  %v20786_v30 = vld [vmem:[#allocation326_spill] sm:$0xff]  ;;  %v20788_v51 = vld [vmem:[#allocation327_spill] sm:$0xff] }
 0x760   :  { %20779 = vst [vmem:[#allocation320_spill] sm:$0xff] %v16625_v45  ;;  %20781 = vst [vmem:[#allocation322_spill] sm:$0xff] %v16629_v23  ;;  %v16641_v25 = vadd.f32 %v13707_v20, %v20786_v30  ;;  %v16645_v26 = vadd.f32 %v13707_v20, %v20788_v51  ;;  %v20790_v45 = vld [vmem:[#allocation328_spill] sm:$0xff]  ;;  %v20792_v23 = vld [vmem:[#allocation329_spill] sm:$0xff] }
 0x761   :  { %20783 = vst [vmem:[#allocation324_spill] sm:$0xff] %v16633_v14  ;;  %20785 = vst [vmem:[#allocation325_spill] sm:$0xff] %v16637_v16  ;;  %v16649_v33 = vadd.f32 %v13707_v20, %v20790_v45  ;;  %v16653_v1 = vadd.f32 %v13707_v20, %v20792_v23  ;;  %v20794_v14 = vld [vmem:[#allocation330_spill] sm:$0xff]  ;;  %v20795_v16 = vld [vmem:[#allocation331_spill] sm:$0xff] }
 0x762   :  { %20787 = vst [vmem:[#allocation326_spill] sm:$0xff] %v16641_v25  ;;  %20789 = vst [vmem:[#allocation327_spill] sm:$0xff] %v16645_v26  ;;  %v16657_v9 = vadd.f32 %v13707_v20, %v20794_v14  ;;  %v16661_v30 = vadd.f32 %v13707_v20, %v20795_v16  ;;  %v20796_v25 = vld [vmem:[#allocation332_spill] sm:$0xff]  ;;  %v20797_v26 = vld [vmem:[#allocation333_spill] sm:$0xff]  ;;  %v16681_v16 = vadd.f32 %v13707_v20, %v15121_v43 }
 0x763   :  { %20791 = vst [vmem:[#allocation328_spill] sm:$0xff] %v16649_v33  ;;  %20793 = vst [vmem:[#allocation329_spill] sm:$0xff] %v16653_v1  ;;  %v16665_v51 = vadd.f32 %v13707_v20, %v20796_v25  ;;  %v16669_v45 = vadd.f32 %v13707_v20, %v20797_v26  ;;  %v20798_v33 = vld [vmem:[#allocation334_spill] sm:$0xff]  ;;  %v20799_v1 = vld [vmem:[#allocation336_spill] sm:$0xff]  ;;  %v16685_v25 = vadd.f32 %v13707_v20, %v15125_v5 }
 0x764   :  { %v16673_v23 = vadd.f32 %v13707_v20, %v20798_v33  ;;  %v16677_v14 = vadd.f32 %v13707_v20, %v20799_v1  ;;  %20800 = vst [vmem:[#allocation330_spill] sm:$0xff] %v16681_v16  ;;  %v16689_v26 = vadd.f32 %v13707_v20, %v15129_v39  ;;  %v16693_v33 = vadd.f32 %v13707_v20, %v15133_v55  ;;  %v21109_v52 = vld [vmem:[#allocation198_spill] sm:$0xff]  ;;  %v21130_v10 = vld [vmem:[#allocation248_spill] sm:$0xff]  ;;  %v21186_v16 = vld [vmem:[#allocation347_spill] sm:$0xff] }
 0x765   :  { %20801 = vst [vmem:[#allocation331_spill] sm:$0xff] %v16685_v25  ;;  %v16697_v1 = vadd.f32 %v13707_v20, %v15137_v47  ;;  %v16701_v43 = vadd.f32 %v13707_v20, %v15141_v62  ;;  %v16705_v5 = vadd.f32 %v13707_v20, %v15145_v36  ;;  %v16709_v39 = vadd.f32 %v13707_v20, %v15149_v35  ;;  %v21110_v27 = vld [vmem:[#allocation202_spill] sm:$0xff]  ;;  %v21188_v25 = vld [vmem:[#allocation348_spill] sm:$0xff] }
 0x766   :  { %20802 = vst [vmem:[#allocation332_spill] sm:$0xff] %v16689_v26  ;;  %20803 = vst [vmem:[#allocation333_spill] sm:$0xff] %v16693_v33  ;;  %v16713_v55 = vadd.f32 %v13707_v20, %v15153_v59  ;;  %v16717_v47 = vadd.f32 %v13707_v20, %v15157_v34  ;;  %v16721_v62 = vadd.f32 %v13707_v20, %v15161_v7  ;;  %v21111_v46 = vld [vmem:[#allocation206_spill] sm:$0xff]  ;;  %v21155_v21 = vld [vmem:[#allocation316_spill] sm:$0xff] }
 0x767   :  { %20804 = vst [vmem:[#allocation334_spill] sm:$0xff] %v16697_v1  ;;  %20805 = vst [vmem:[#allocation336_spill] sm:$0xff] %v16701_v43  ;;  %v16725_v36 = vadd.f32 %v13707_v20, %v15165_v2  ;;  %v16729_v35 = vadd.f32 %v13707_v20, %v15169_v48  ;;  %v16733_v59 = vadd.f32 %v13707_v20, %v15173_v17  ;;  %v21112_v31 = vld [vmem:[#allocation210_spill] sm:$0xff]  ;;  %v21157_v37 = vld [vmem:[#allocation320_spill] sm:$0xff] }
 0x768   :  { %20806 = vst [vmem:[#allocation382_spill] sm:$0xff] %v16705_v5  ;;  %20807 = vst [vmem:[#allocation383_spill] sm:$0xff] %v16709_v39  ;;  %v16737_v34 = vadd.f32 %v13707_v20, %v15177_v0  ;;  %v16741_v7 = vadd.f32 %v13707_v20, %v15181_v49  ;;  %v16745_v2 = vadd.f32 %v13707_v20, %v15185_v29  ;;  %v21113_v50 = vld [vmem:[#allocation214_spill] sm:$0xff]  ;;  %v21159_v44 = vld [vmem:[#allocation324_spill] sm:$0xff] }
 0x769   :  { %20808 = vst [vmem:[#allocation384_spill] sm:$0xff] %v16713_v55  ;;  %20809 = vst [vmem:[#allocation385_spill] sm:$0xff] %v16717_v47  ;;  %v21154_v6 = vld [vmem:[#allocation314_spill] sm:$0xff]  ;;  %v21160_v53 = vld [vmem:[#allocation325_spill] sm:$0xff] }
 0x76a   :  { %20810 = vst [vmem:[#allocation386_spill] sm:$0xff] %v16721_v62  ;;  %20811 = vst [vmem:[#allocation387_spill] sm:$0xff] %v16725_v36  ;;  %v20817_v36 = vld [vmem:[#allocation337_spill] sm:$0xff]  ;;  %v21156_v42 = vld [vmem:[#allocation318_spill] sm:$0xff] }
 0x76b   :  { %20812 = vst [vmem:[#allocation388_spill] sm:$0xff] %v16729_v35  ;;  %20813 = vst [vmem:[#allocation389_spill] sm:$0xff] %v16733_v59  ;;  %v16749_v48 = vadd.f32 %v13707_v20, %v20817_v36  ;;  %v20819_v35 = vld [vmem:[#allocation338_spill] sm:$0xff]  ;;  %v20821_v59 = vld [vmem:[#allocation339_spill] sm:$0xff] }
 0x76c   :  { %20814 = vst [vmem:[#allocation390_spill] sm:$0xff] %v16737_v34  ;;  %20815 = vst [vmem:[#allocation391_spill] sm:$0xff] %v16741_v7  ;;  %v16753_v17 = vadd.f32 %v13707_v20, %v20819_v35  ;;  %v16757_v0 = vadd.f32 %v13707_v20, %v20821_v59  ;;  %v20823_v34 = vld [vmem:[#allocation340_spill] sm:$0xff]  ;;  %v20825_v7 = vld [vmem:[#allocation341_spill] sm:$0xff] }
 0x76d   :  { %20816 = vst [vmem:[#allocation392_spill] sm:$0xff] %v16745_v2  ;;  %20818 = vst [vmem:[#allocation337_spill] sm:$0xff] %v16749_v48  ;;  %v16761_v49 = vadd.f32 %v13707_v20, %v20823_v34  ;;  %v16765_v29 = vadd.f32 %v13707_v20, %v20825_v7  ;;  %v20827_v2 = vld [vmem:[#allocation342_spill] sm:$0xff]  ;;  %v20829_v48 = vld [vmem:[#allocation343_spill] sm:$0xff] }
 0x76e   :  { %20820 = vst [vmem:[#allocation338_spill] sm:$0xff] %v16753_v17  ;;  %20822 = vst [vmem:[#allocation339_spill] sm:$0xff] %v16757_v0  ;;  %v16769_v36 = vadd.f32 %v13707_v20, %v20827_v2  ;;  %v16773_v35 = vadd.f32 %v13707_v20, %v20829_v48  ;;  %v20831_v17 = vld [vmem:[#allocation344_spill] sm:$0xff]  ;;  %v20833_v0 = vld [vmem:[#allocation345_spill] sm:$0xff]  ;;  %v16789_v2 = vadd.f32 %v13707_v20, %v15229_v22 }
 0x76f   :  { %20824 = vst [vmem:[#allocation340_spill] sm:$0xff] %v16761_v49  ;;  %20826 = vst [vmem:[#allocation341_spill] sm:$0xff] %v16765_v29  ;;  %v16777_v59 = vadd.f32 %v13707_v20, %v20831_v17  ;;  %v16781_v34 = vadd.f32 %v13707_v20, %v20833_v0  ;;  %v20835_v49 = vld [vmem:[#allocation346_spill] sm:$0xff]  ;;  %v16793_v48 = vadd.f32 %v13707_v20, %v15233_v19  ;;  %v21162_v40 = vld [vmem:[#allocation327_spill] sm:$0xff]  ;;  %v21189_v19 = vmax.f32 %v21188_v25, 0.0 }
 0x770   :  { %20828 = vst [vmem:[#allocation342_spill] sm:$0xff] %v16769_v36  ;;  %20830 = vst [vmem:[#allocation343_spill] sm:$0xff] %v16773_v35  ;;  %v16785_v7 = vadd.f32 %v13707_v20, %v20835_v49  ;;  %v16797_v17 = vadd.f32 %v13707_v20, %v15237_v60  ;;  %v16801_v0 = vadd.f32 %v13707_v20, %v15241_v15  ;;  %v21097_v35 = vld [vmem:[#allocation154_spill] sm:$0xff]  ;;  %v21163_v8 = vld [vmem:[#allocation328_spill] sm:$0xff] }
 0x771   :  { %20832 = vst [vmem:[#allocation344_spill] sm:$0xff] %v16777_v59  ;;  %20834 = vst [vmem:[#allocation345_spill] sm:$0xff] %v16781_v34  ;;  %v16805_v49 = vadd.f32 %v13707_v20, %v15245_v4  ;;  %v16809_v22 = vadd.f32 %v13707_v20, %v15249_v54  ;;  %v20845_v34 = vld [vmem:[#allocation353_spill] sm:$0xff]  ;;  %v20846_v4 = vld [vmem:[#allocation354_spill] sm:$0xff] }
 0x772   :  { %20836 = vst [vmem:[#allocation346_spill] sm:$0xff] %v16785_v7  ;;  %20837 = vst [vmem:[#allocation393_spill] sm:$0xff] %v16789_v2  ;;  %v21087_v20 = vld [vmem:[#allocation134_spill] sm:$0xff]  ;;  %v21164_v28 = vld [vmem:[#allocation329_spill] sm:$0xff]  ;;  %v21187_v2 = vmax.f32 %v21186_v16, 0.0  ;;  %v21199_v36 = vmax.f32 %v20846_v4, 0.0 }
 0x773   :  { %20838 = vst [vmem:[#allocation394_spill] sm:$0xff] %v16793_v48  ;;  %20839 = vst [vmem:[#allocation395_spill] sm:$0xff] %v16797_v17  ;;  %v21093_v17 = vld [vmem:[#allocation146_spill] sm:$0xff]  ;;  %v21190_v48 = vld [vmem:[#allocation349_spill] sm:$0xff] }
 0x774   :  { %20840 = vst [vmem:[#allocation396_spill] sm:$0xff] %v16801_v0  ;;  %20841 = vst [vmem:[#allocation397_spill] sm:$0xff] %v16805_v49  ;;  %v21101_v15 = vld [vmem:[#allocation170_spill] sm:$0xff]  ;;  %v9711_v26 = vpack.c.bf16 %v21189_v19, %v21187_v2  ;;  %v21191_v33 = vmax.f32 %v21190_v48, 0.0  ;;  %v21194_v43 = vld [vmem:[#allocation351_spill] sm:$0xff]  ;;  %v21198_v49 = vmax.f32 %v20845_v34, 0.0 }
 0x775   :  { %20842 = vst [vmem:[#allocation398_spill] sm:$0xff] %v16809_v22  ;;  %v21098_v22 = vld [vmem:[#allocation158_spill] sm:$0xff]  ;;  %v21195_v0 = vmax.f32 %v21194_v43, 0.0  ;;  %v21196_v5 = vld [vmem:[#allocation352_spill] sm:$0xff]  ;;  %v21200_v29 = vld [vmem:[#allocation355_spill] sm:$0xff] }
 0x776   :  { %v21158_v63 = vld [vmem:[#allocation322_spill] sm:$0xff]  ;;  %v21197_v59 = vmax.f32 %v21196_v5, 0.0  ;;  %v9726_v54 = vpack.c.bf16 %v21199_v36, %v21198_v49  ;;  %v21201_v16 = vmax.f32 %v21200_v29, 0.0  ;;  %v21202_v47 = vld [vmem:[#allocation356_spill] sm:$0xff]  ;;  %9712 = vst [vmem:[#allocation10] sm:$0xff] %v9711_v26   ;;  %v21204_v48 = vld [vmem:[#allocation357_spill] sm:$0xff] }
 0x777   :  { %v21161_v24 = vld [vmem:[#allocation326_spill] sm:$0xff]  ;;  %v21203_v25 = vmax.f32 %v21202_v47, 0.0  ;;  %v21205_v19 = vmax.f32 %v21204_v48, 0.0  ;;  %v21208_v43 = vld [vmem:[#allocation359_spill] sm:$0xff]  ;;  %v21210_v5 = vmax.f32 %v20852_v3, 0.0  ;;  %v21211_v34 = vld [vmem:[#allocation240_spill] sm:$0xff] }
 0x778   :  { %v21192_v60 = vld [vmem:[#allocation350_spill] sm:$0xff]  ;;  %v9721_v39 = vpack.c.bf16 %v21197_v59, %v21195_v0  ;;  %v21209_v55 = vmax.f32 %v21208_v43, 0.0  ;;  %v21212_v0 = vmax.f32 %v21211_v34, 0.0  ;;  %v21213_v4 = vld [vmem:[#allocation275_spill] sm:$0xff]  ;;  %v21215_v29 = vld [vmem:[#allocation364_spill] sm:$0xff]  ;;  %10690 = vst [vmem:[#allocation10 + $0x18] sm:$0xff] %v9726_v54  }
 0x779   :  { %v21193_v1 = vmax.f32 %v21192_v60, 0.0  ;;  %v9731_v2 = vpack.c.bf16 %v21203_v25, %v21201_v16  ;;  %v21206_v60 = vld [vmem:[#allocation358_spill] sm:$0xff]  ;;  %v21214_v36 = vmax.f32 %v21213_v4, 0.0  ;;  %v21216_v62 = vmax.f32 %v21215_v29, 0.0  ;;  %v21217_v47 = vld [vmem:[#allocation365_spill] sm:$0xff] }
 0x77a   :  { %v9741_v59 = vpack.c.bf16 %v21210_v5, %v21209_v55  ;;  %v21218_v16 = vmax.f32 %v21217_v47, 0.0  ;;  %10689 = vst [vmem:[#allocation10 + $0x10] sm:$0xff] %v9721_v39   ;;  %v21219_v25 = vld [vmem:[#allocation366_spill] sm:$0xff]  ;;  %v21223_v55 = vld [vmem:[#allocation368_spill] sm:$0xff]  ;;  %v21225_v43 = vld [vmem:[#allocation369_spill] sm:$0xff] }
 0x77b   :  { %v9716_v7 = vpack.c.bf16 %v21193_v1, %v21191_v33  ;;  %v21207_v33 = vmax.f32 %v21206_v60, 0.0  ;;  %v9746_v49 = vpack.c.bf16 %v21214_v36, %v21212_v0  ;;  %10691 = vst [vmem:[#allocation10 + $0x20] sm:$0xff] %v9731_v2   ;;  %v21220_v48 = vmax.f32 %v21219_v25, 0.0  ;;  %v21227_v0 = vld [vmem:[#allocation370_spill] sm:$0xff]  ;;  %v21229_v36 = vld [vmem:[#allocation335_spill] sm:$0xff]  ;;  %v21233_v39 = vld [vmem:[#allocation361_spill] sm:$0xff] }
 0x77c   :  { %v9751_v26 = vpack.c.bf16 %v21218_v16, %v21216_v62  ;;  %v21226_v5 = vmax.f32 %v21225_v43, 0.0  ;;  %v21228_v4 = vmax.f32 %v21227_v0, 0.0  ;;  %v21230_v29 = vmax.f32 %v21229_v36, 0.0  ;;  %v21231_v62 = vld [vmem:[#allocation360_spill] sm:$0xff]  ;;  %10693 = vst [vmem:[#allocation10 + $0x30] sm:$0xff] %v9741_v59   ;;  %v21235_v16 = vld [vmem:[#allocation362_spill] sm:$0xff] }
 0x77d   :  { %v9736_v1 = vpack.c.bf16 %v21207_v33, %v21205_v19  ;;  %10688 = vst [vmem:[#allocation10 + $0x8] sm:$0xff] %v9716_v7   ;;  %v21221_v19 = vld [vmem:[#allocation367_spill] sm:$0xff]  ;;  %v21224_v33 = vmax.f32 %v21223_v55, 0.0  ;;  %v21232_v7 = vmax.f32 %v21231_v62, 0.0  ;;  %v21234_v54 = vmax.f32 %v21233_v39, 0.0  ;;  %10694 = vst [vmem:[#allocation10 + $0x38] sm:$0xff] %v9746_v49  }
 0x77e   :  { %v21222_v60 = vmax.f32 %v21221_v19, 0.0  ;;  %v9766_v47 = vpack.c.bf16 %v21230_v29, %v21228_v4  ;;  %10695 = vst [vmem:[#allocation10 + $0x40] sm:$0xff] %v9751_v26   ;;  %v21236_v25 = vmax.f32 %v21235_v16, 0.0  ;;  %v21239_v55 = vld [vmem:[#allocation15_spill] sm:$0xff]  ;;  %v21241_v43 = vld [vmem:[#allocation16_spill] sm:$0xff]  ;;  %v21243_v4 = vld [vmem:[#allocation17_spill] sm:$0xff] }
 0x77f   :  { %v9761_v34 = vpack.c.bf16 %v21226_v5, %v21224_v33  ;;  %v9771_v2 = vpack.c.bf16 %v21234_v54, %v21232_v7  ;;  %10692 = vst [vmem:[#allocation10 + $0x28] sm:$0xff] %v9736_v1   ;;  %v21240_v33 = vmax.f32 %v21239_v55, 0.0  ;;  %v21242_v5 = vmax.f32 %v21241_v43, 0.0  ;;  %v21245_v29 = vld [vmem:[#allocation18_spill] sm:$0xff]  ;;  %v21247_v7 = vld [vmem:[#allocation19_spill] sm:$0xff]  ;;  %v21249_v59 = vld [vmem:[#allocation20_spill] sm:$0xff] }
 0x780   :  { %v9756_v3 = vpack.c.bf16 %v21222_v60, %v21220_v48  ;;  %v21237_v48 = vld [vmem:[#allocation363_spill] sm:$0xff]  ;;  %v21244_v36 = vmax.f32 %v21243_v4, 0.0  ;;  %v21246_v62 = vmax.f32 %v21245_v29, 0.0  ;;  %v21248_v1 = vmax.f32 %v21247_v7, 0.0  ;;  %10698 = vst [vmem:[#allocation10 + $0x58] sm:$0xff] %v9766_v47   ;;  %v21251_v54 = vld [vmem:[#allocation21_spill] sm:$0xff] }
 0x781   :  { %v21238_v19 = vmax.f32 %v21237_v48, 0.0  ;;  %v9781_v0 = vpack.c.bf16 %v21242_v5, %v21240_v33  ;;  %v21250_v49 = vmax.f32 %v21249_v59, 0.0  ;;  %10697 = vst [vmem:[#allocation10 + $0x50] sm:$0xff] %v9761_v34   ;;  %10699 = vst [vmem:[#allocation10 + $0x60] sm:$0xff] %v9771_v2   ;;  %v21252_v16 = vmax.f32 %v21251_v54, 0.0  ;;  %v21255_v55 = vld [vmem:[#allocation23_spill] sm:$0xff] }
 0x782   :  { %v9786_v39 = vpack.c.bf16 %v21246_v62, %v21244_v36  ;;  %10696 = vst [vmem:[#allocation10 + $0x48] sm:$0xff] %v9756_v3   ;;  %v21256_v33 = vmax.f32 %v21255_v55, 0.0  ;;  %v21257_v43 = vld [vmem:[#allocation24_spill] sm:$0xff]  ;;  %v21259_v36 = vld [vmem:[#allocation25_spill] sm:$0xff]  ;;  %v21261_v62 = vld [vmem:[#allocation26_spill] sm:$0xff] }
 0x783   :  { %v9776_v60 = vpack.c.bf16 %v21238_v19, %v21236_v25  ;;  %v9791_v26 = vpack.c.bf16 %v21250_v49, %v21248_v1  ;;  %v21253_v25 = vld [vmem:[#allocation22_spill] sm:$0xff]  ;;  %v21258_v5 = vmax.f32 %v21257_v43, 0.0  ;;  %v21260_v29 = vmax.f32 %v21259_v36, 0.0  ;;  %v21263_v1 = vld [vmem:[#allocation27_spill] sm:$0xff]  ;;  %v21265_v34 = vld [vmem:[#allocation28_spill] sm:$0xff]  ;;  %10701 = vst [vmem:[#allocation10 + $0x70] sm:$0xff] %v9781_v0  }
 0x784   :  { %v21254_v48 = vmax.f32 %v21253_v25, 0.0  ;;  %v21262_v7 = vmax.f32 %v21261_v62, 0.0  ;;  %v21264_v3 = vmax.f32 %v21263_v1, 0.0  ;;  %v21266_v47 = vmax.f32 %v21265_v34, 0.0  ;;  %10702 = vst [vmem:[#allocation10 + $0x78] sm:$0xff] %v9786_v39   ;;  %v21267_v49 = vld [vmem:[#allocation29_spill] sm:$0xff] }
 0x785   :  { %v9801_v4 = vpack.c.bf16 %v21258_v5, %v21256_v33  ;;  %10700 = vst [vmem:[#allocation10 + $0x68] sm:$0xff] %v9776_v60   ;;  %10703 = vst [vmem:[#allocation10 + $0x80] sm:$0xff] %v9791_v26   ;;  %v21268_v54 = vmax.f32 %v21267_v49, 0.0  ;;  %v21271_v55 = vld [vmem:[#allocation31_spill] sm:$0xff]  ;;  %v21273_v43 = vld [vmem:[#allocation32_spill] sm:$0xff] }
 0x786   :  { %v9796_v19 = vpack.c.bf16 %v21254_v48, %v21252_v16  ;;  %v9806_v59 = vpack.c.bf16 %v21262_v7, %v21260_v29  ;;  %v9811_v2 = vpack.c.bf16 %v21266_v47, %v21264_v3  ;;  %v21269_v16 = vld [vmem:[#allocation30_spill] sm:$0xff]  ;;  %v21272_v33 = vmax.f32 %v21271_v55, 0.0  ;;  %v21275_v29 = vld [vmem:[#allocation33_spill] sm:$0xff]  ;;  %v21279_v3 = vld [vmem:[#allocation35_spill] sm:$0xff] }
 0x787   :  { %v21270_v25 = vmax.f32 %v21269_v16, 0.0  ;;  %v21274_v5 = vmax.f32 %v21273_v43, 0.0  ;;  %v21276_v62 = vmax.f32 %v21275_v29, 0.0  ;;  %v21277_v7 = vld [vmem:[#allocation34_spill] sm:$0xff]  ;;  %v21280_v60 = vmax.f32 %v21279_v3, 0.0  ;;  %v21281_v0 = vld [vmem:[#allocation36_spill] sm:$0xff] }
 0x788   :  { %v21278_v1 = vmax.f32 %v21277_v7, 0.0  ;;  %v21282_v39 = vmax.f32 %v21281_v0, 0.0  ;;  %10704 = vst [vmem:[#allocation10 + $0x88] sm:$0xff] %v9796_v19   ;;  %10705 = vst [vmem:[#allocation10 + $0x90] sm:$0xff] %v9801_v4   ;;  %v21283_v47 = vld [vmem:[#allocation37_spill] sm:$0xff]  ;;  %v21287_v55 = vld [vmem:[#allocation39_spill] sm:$0xff] }
 0x789   :  { %v9816_v48 = vpack.c.bf16 %v21270_v25, %v21268_v54  ;;  %v9821_v36 = vpack.c.bf16 %v21274_v5, %v21272_v33  ;;  %10706 = vst [vmem:[#allocation10 + $0x98] sm:$0xff] %v9806_v59   ;;  %10707 = vst [vmem:[#allocation10 + $0xa0] sm:$0xff] %v9811_v2   ;;  %v21284_v49 = vmax.f32 %v21283_v47, 0.0  ;;  %v21285_v54 = vld [vmem:[#allocation38_spill] sm:$0xff]  ;;  %v21288_v33 = vmax.f32 %v21287_v55, 0.0  ;;  %v21289_v43 = vld [vmem:[#allocation40_spill] sm:$0xff] }
 0x78a   :  { %v9826_v34 = vpack.c.bf16 %v21278_v1, %v21276_v62  ;;  %v9831_v26 = vpack.c.bf16 %v21282_v39, %v21280_v60  ;;  %v21286_v16 = vmax.f32 %v21285_v54, 0.0  ;;  %v21290_v5 = vmax.f32 %v21289_v43, 0.0  ;;  %v21291_v62 = vld [vmem:[#allocation41_spill] sm:$0xff]  ;;  %v21293_v1 = vld [vmem:[#allocation42_spill] sm:$0xff]  ;;  %v21295_v60 = vld [vmem:[#allocation43_spill] sm:$0xff] }
 0x78b   :  { %v21292_v7 = vmax.f32 %v21291_v62, 0.0  ;;  %v21294_v3 = vmax.f32 %v21293_v1, 0.0  ;;  %v21296_v19 = vmax.f32 %v21295_v60, 0.0  ;;  %v21297_v4 = vld [vmem:[#allocation44_spill] sm:$0xff]  ;;  %10708 = vst [vmem:[#allocation10 + $0xa8] sm:$0xff] %v9816_v48   ;;  %10709 = vst [vmem:[#allocation10 + $0xb0] sm:$0xff] %v9821_v36  }
 0x78c   :  { %v9836_v25 = vpack.c.bf16 %v21286_v16, %v21284_v49  ;;  %v9841_v29 = vpack.c.bf16 %v21290_v5, %v21288_v33  ;;  %v21298_v59 = vmax.f32 %v21297_v4, 0.0  ;;  %10710 = vst [vmem:[#allocation10 + $0xb8] sm:$0xff] %v9826_v34   ;;  %10711 = vst [vmem:[#allocation10 + $0xc0] sm:$0xff] %v9831_v26   ;;  %v21299_v39 = vld [vmem:[#allocation45_spill] sm:$0xff]  ;;  %v21301_v49 = vld [vmem:[#allocation46_spill] sm:$0xff] }
 0x78d   :  { %v9846_v0 = vpack.c.bf16 %v21294_v3, %v21292_v7  ;;  %v21300_v47 = vmax.f32 %v21299_v39, 0.0  ;;  %v21302_v54 = vmax.f32 %v21301_v49, 0.0  ;;  %v21303_v55 = vld [vmem:[#allocation47_spill] sm:$0xff]  ;;  %v21305_v43 = vld [vmem:[#allocation48_spill] sm:$0xff]  ;;  %v21307_v7 = vld [vmem:[#allocation49_spill] sm:$0xff] }
 0x78e   :  { %v9851_v2 = vpack.c.bf16 %v21298_v59, %v21296_v19  ;;  %v21304_v33 = vmax.f32 %v21303_v55, 0.0  ;;  %v21306_v5 = vmax.f32 %v21305_v43, 0.0  ;;  %v21308_v1 = vmax.f32 %v21307_v7, 0.0  ;;  %v21309_v3 = vld [vmem:[#allocation50_spill] sm:$0xff]  ;;  %v21311_v19 = vld [vmem:[#allocation51_spill] sm:$0xff]  ;;  %v21313_v36 = vld [vmem:[#allocation52_spill] sm:$0xff] }
 0x78f   :  { %v9856_v16 = vpack.c.bf16 %v21302_v54, %v21300_v47  ;;  %v21310_v60 = vmax.f32 %v21309_v3, 0.0  ;;  %v21312_v48 = vmax.f32 %v21311_v19, 0.0  ;;  %v21314_v34 = vmax.f32 %v21313_v36, 0.0  ;;  %10712 = vst [vmem:[#allocation10 + $0xc8] sm:$0xff] %v9836_v25   ;;  %10713 = vst [vmem:[#allocation10 + $0xd0] sm:$0xff] %v9841_v29   ;;  %v21315_v59 = vld [vmem:[#allocation53_spill] sm:$0xff] }
 0x790   :  { %v9861_v62 = vpack.c.bf16 %v21306_v5, %v21304_v33  ;;  %10714 = vst [vmem:[#allocation10 + $0xd8] sm:$0xff] %v9846_v0   ;;  %10715 = vst [vmem:[#allocation10 + $0xe0] sm:$0xff] %v9851_v2   ;;  %v21316_v39 = vmax.f32 %v21315_v59, 0.0  ;;  %v21317_v47 = vld [vmem:[#allocation54_spill] sm:$0xff]  ;;  %v21319_v55 = vld [vmem:[#allocation55_spill] sm:$0xff] }
 0x791   :  { %v9866_v4 = vpack.c.bf16 %v21310_v60, %v21308_v1  ;;  %v9871_v26 = vpack.c.bf16 %v21314_v34, %v21312_v48  ;;  %v21318_v49 = vmax.f32 %v21317_v47, 0.0  ;;  %v21320_v33 = vmax.f32 %v21319_v55, 0.0  ;;  %v21321_v43 = vld [vmem:[#allocation56_spill] sm:$0xff]  ;;  %v21323_v1 = vld [vmem:[#allocation57_spill] sm:$0xff]  ;;  %v21325_v60 = vld [vmem:[#allocation58_spill] sm:$0xff]  ;;  %10716 = vst [vmem:[#allocation10 + $0xe8] sm:$0xff] %v9856_v16  }
 0x792   :  { %v21322_v5 = vmax.f32 %v21321_v43, 0.0  ;;  %v21324_v3 = vmax.f32 %v21323_v1, 0.0  ;;  %v21326_v19 = vmax.f32 %v21325_v60, 0.0  ;;  %v21327_v48 = vld [vmem:[#allocation59_spill] sm:$0xff]  ;;  %v21329_v29 = vld [vmem:[#allocation60_spill] sm:$0xff]  ;;  %10717 = vst [vmem:[#allocation10 + $0xf0] sm:$0xff] %v9861_v62  }
 0x793   :  { %v9876_v54 = vpack.c.bf16 %v21318_v49, %v21316_v39  ;;  %v21328_v25 = vmax.f32 %v21327_v48, 0.0  ;;  %v21330_v0 = vmax.f32 %v21329_v29, 0.0  ;;  %10718 = vst [vmem:[#allocation10 + $0xf8] sm:$0xff] %v9866_v4   ;;  %10719 = vst [vmem:[#allocation10 + $0x100] sm:$0xff] %v9871_v26   ;;  %v21331_v34 = vld [vmem:[#allocation61_spill] sm:$0xff]  ;;  %v21333_v39 = vld [vmem:[#allocation62_spill] sm:$0xff] }
 0x794   :  { %v9881_v7 = vpack.c.bf16 %v21322_v5, %v21320_v33  ;;  %v9886_v36 = vpack.c.bf16 %v21326_v19, %v21324_v3  ;;  %v21332_v59 = vmax.f32 %v21331_v34, 0.0  ;;  %v21334_v47 = vmax.f32 %v21333_v39, 0.0  ;;  %v21335_v55 = vld [vmem:[#allocation63_spill] sm:$0xff]  ;;  %v21337_v43 = vld [vmem:[#allocation64_spill] sm:$0xff]  ;;  %v21339_v3 = vld [vmem:[#allocation65_spill] sm:$0xff] }
 0x795   :  { %v9891_v2 = vpack.c.bf16 %v21330_v0, %v21328_v25  ;;  %v21336_v33 = vmax.f32 %v21335_v55, 0.0  ;;  %v21338_v5 = vmax.f32 %v21337_v43, 0.0  ;;  %v21340_v60 = vmax.f32 %v21339_v3, 0.0  ;;  %v21341_v19 = vld [vmem:[#allocation66_spill] sm:$0xff]  ;;  %v21343_v25 = vld [vmem:[#allocation67_spill] sm:$0xff]  ;;  %v21345_v62 = vld [vmem:[#allocation68_spill] sm:$0xff] }
 0x796   :  { %v9896_v49 = vpack.c.bf16 %v21334_v47, %v21332_v59  ;;  %v21342_v48 = vmax.f32 %v21341_v19, 0.0  ;;  %v21344_v16 = vmax.f32 %v21343_v25, 0.0  ;;  %v21346_v4 = vmax.f32 %v21345_v62, 0.0  ;;  %10720 = vst [vmem:[#allocation10 + $0x108] sm:$0xff] %v9876_v54   ;;  %10721 = vst [vmem:[#allocation10 + $0x110] sm:$0xff] %v9881_v7   ;;  %v21347_v0 = vld [vmem:[#allocation69_spill] sm:$0xff] }
 0x797   :  { %v9901_v1 = vpack.c.bf16 %v21338_v5, %v21336_v33  ;;  %10722 = vst [vmem:[#allocation10 + $0x118] sm:$0xff] %v9886_v36   ;;  %10723 = vst [vmem:[#allocation10 + $0x120] sm:$0xff] %v9891_v2   ;;  %v21348_v34 = vmax.f32 %v21347_v0, 0.0  ;;  %v21349_v59 = vld [vmem:[#allocation70_spill] sm:$0xff]  ;;  %v21351_v55 = vld [vmem:[#allocation71_spill] sm:$0xff] }
 0x798   :  { %v9906_v29 = vpack.c.bf16 %v21342_v48, %v21340_v60  ;;  %v9911_v26 = vpack.c.bf16 %v21346_v4, %v21344_v16  ;;  %v21350_v39 = vmax.f32 %v21349_v59, 0.0  ;;  %v21352_v33 = vmax.f32 %v21351_v55, 0.0  ;;  %v21353_v43 = vld [vmem:[#allocation72_spill] sm:$0xff]  ;;  %v21355_v60 = vld [vmem:[#allocation73_spill] sm:$0xff]  ;;  %v21357_v48 = vld [vmem:[#allocation74_spill] sm:$0xff]  ;;  %10724 = vst [vmem:[#allocation10 + $0x128] sm:$0xff] %v9896_v49  }
 0x799   :  { %v21354_v5 = vmax.f32 %v21353_v43, 0.0  ;;  %v21356_v19 = vmax.f32 %v21355_v60, 0.0  ;;  %v21358_v25 = vmax.f32 %v21357_v48, 0.0  ;;  %v21359_v16 = vld [vmem:[#allocation75_spill] sm:$0xff]  ;;  %v21361_v7 = vld [vmem:[#allocation76_spill] sm:$0xff]  ;;  %10725 = vst [vmem:[#allocation10 + $0x130] sm:$0xff] %v9901_v1  }
 0x79a   :  { %v9916_v47 = vpack.c.bf16 %v21350_v39, %v21348_v34  ;;  %v21360_v54 = vmax.f32 %v21359_v16, 0.0  ;;  %v21362_v36 = vmax.f32 %v21361_v7, 0.0  ;;  %10726 = vst [vmem:[#allocation10 + $0x138] sm:$0xff] %v9906_v29   ;;  %10727 = vst [vmem:[#allocation10 + $0x140] sm:$0xff] %v9911_v26   ;;  %v21363_v4 = vld [vmem:[#allocation77_spill] sm:$0xff]  ;;  %v21365_v34 = vld [vmem:[#allocation78_spill] sm:$0xff] }
 0x79b   :  { %v9921_v3 = vpack.c.bf16 %v21354_v5, %v21352_v33  ;;  %v9926_v62 = vpack.c.bf16 %v21358_v25, %v21356_v19  ;;  %v21364_v0 = vmax.f32 %v21363_v4, 0.0  ;;  %v21366_v59 = vmax.f32 %v21365_v34, 0.0  ;;  %v21367_v55 = vld [vmem:[#allocation79_spill] sm:$0xff]  ;;  %v21369_v43 = vld [vmem:[#allocation81_spill] sm:$0xff] }
 0x79c   :  { %v9931_v2 = vpack.c.bf16 %v21362_v36, %v21360_v54  ;;  %v21368_v33 = vmax.f32 %v21367_v55, 0.0  ;;  %v21370_v5 = vmax.f32 %v21369_v43, 0.0  ;;  %v21371_v19 = vld [vmem:[#allocation83_spill] sm:$0xff]  ;;  %v21373_v25 = vld [vmem:[#allocation85_spill] sm:$0xff]  ;;  %10728 = vst [vmem:[#allocation10 + $0x148] sm:$0xff] %v9916_v47  }
 0x79d   :  { %v9936_v39 = vpack.c.bf16 %v21366_v59, %v21364_v0  ;;  %v21372_v48 = vmax.f32 %v21371_v19, 0.0  ;;  %v21374_v16 = vmax.f32 %v21373_v25, 0.0  ;;  %v21375_v54 = vld [vmem:[#allocation87_spill] sm:$0xff]  ;;  %v21377_v1 = vld [vmem:[#allocation89_spill] sm:$0xff]  ;;  %10729 = vst [vmem:[#allocation10 + $0x150] sm:$0xff] %v9921_v3   ;;  %10730 = vst [vmem:[#allocation10 + $0x158] sm:$0xff] %v9926_v62  }
 0x79e   :  { %v9941_v60 = vpack.c.bf16 %v21370_v5, %v21368_v33  ;;  %v21376_v49 = vmax.f32 %v21375_v54, 0.0  ;;  %v21378_v29 = vmax.f32 %v21377_v1, 0.0  ;;  %10731 = vst [vmem:[#allocation10 + $0x160] sm:$0xff] %v9931_v2   ;;  %v21379_v36 = vld [vmem:[#allocation91_spill] sm:$0xff]  ;;  %v21381_v0 = vld [vmem:[#allocation93_spill] sm:$0xff] }
 0x79f   :  { %v9946_v7 = vpack.c.bf16 %v21374_v16, %v21372_v48  ;;  %v21380_v4 = vmax.f32 %v21379_v36, 0.0  ;;  %v21382_v34 = vmax.f32 %v21381_v0, 0.0  ;;  %v21383_v55 = vld [vmem:[#allocation95_spill] sm:$0xff]  ;;  %v21385_v43 = vld [vmem:[#allocation97_spill] sm:$0xff]  ;;  %10732 = vst [vmem:[#allocation10 + $0x168] sm:$0xff] %v9936_v39  }
 0x7a0   :  { %v9951_v26 = vpack.c.bf16 %v21378_v29, %v21376_v49  ;;  %v21384_v33 = vmax.f32 %v21383_v55, 0.0  ;;  %v21386_v5 = vmax.f32 %v21385_v43, 0.0  ;;  %v21387_v48 = vld [vmem:[#allocation99_spill] sm:$0xff]  ;;  %v21389_v16 = vld [vmem:[#allocation101_spill] sm:$0xff]  ;;  %10733 = vst [vmem:[#allocation10 + $0x170] sm:$0xff] %v9941_v60  }
 0x7a1   :  { %v9956_v59 = vpack.c.bf16 %v21382_v34, %v21380_v4  ;;  %v21388_v25 = vmax.f32 %v21387_v48, 0.0  ;;  %v21390_v54 = vmax.f32 %v21389_v16, 0.0  ;;  %v21391_v49 = vld [vmem:[#allocation103_spill] sm:$0xff]  ;;  %v21393_v3 = vld [vmem:[#allocation105_spill] sm:$0xff]  ;;  %10734 = vst [vmem:[#allocation10 + $0x178] sm:$0xff] %v9946_v7  }
 0x7a2   :  { %v9961_v19 = vpack.c.bf16 %v21386_v5, %v21384_v33  ;;  %v21392_v47 = vmax.f32 %v21391_v49, 0.0  ;;  %v21394_v62 = vmax.f32 %v21393_v3, 0.0  ;;  %10735 = vst [vmem:[#allocation10 + $0x180] sm:$0xff] %v9951_v26   ;;  %v21395_v29 = vld [vmem:[#allocation107_spill] sm:$0xff]  ;;  %v21397_v4 = vld [vmem:[#allocation109_spill] sm:$0xff] }
 0x7a3   :  { %v9966_v1 = vpack.c.bf16 %v21390_v54, %v21388_v25  ;;  %v21396_v36 = vmax.f32 %v21395_v29, 0.0  ;;  %v21398_v0 = vmax.f32 %v21397_v4, 0.0  ;;  %v21399_v55 = vld [vmem:[#allocation111_spill] sm:$0xff]  ;;  %v21401_v43 = vld [vmem:[#allocation113_spill] sm:$0xff]  ;;  %10736 = vst [vmem:[#allocation10 + $0x188] sm:$0xff] %v9956_v59  }
 0x7a4   :  { %v9971_v2 = vpack.c.bf16 %v21394_v62, %v21392_v47  ;;  %v21400_v33 = vmax.f32 %v21399_v55, 0.0  ;;  %v21402_v5 = vmax.f32 %v21401_v43, 0.0  ;;  %v21403_v25 = vld [vmem:[#allocation115_spill] sm:$0xff]  ;;  %v21405_v54 = vld [vmem:[#allocation117_spill] sm:$0xff]  ;;  %10737 = vst [vmem:[#allocation10 + $0x190] sm:$0xff] %v9961_v19  }
 0x7a5   :  { %v9976_v34 = vpack.c.bf16 %v21398_v0, %v21396_v36  ;;  %v21404_v16 = vmax.f32 %v21403_v25, 0.0  ;;  %v21406_v49 = vmax.f32 %v21405_v54, 0.0  ;;  %v21407_v47 = vld [vmem:[#allocation119_spill] sm:$0xff]  ;;  %v21409_v60 = vld [vmem:[#allocation121_spill] sm:$0xff]  ;;  %10738 = vst [vmem:[#allocation10 + $0x198] sm:$0xff] %v9966_v1  }
 0x7a6   :  { %v9981_v48 = vpack.c.bf16 %v21402_v5, %v21400_v33  ;;  %v21408_v39 = vmax.f32 %v21407_v47, 0.0  ;;  %v21410_v7 = vmax.f32 %v21409_v60, 0.0  ;;  %10739 = vst [vmem:[#allocation10 + $0x1a0] sm:$0xff] %v9971_v2   ;;  %v21411_v62 = vld [vmem:[#allocation123_spill] sm:$0xff]  ;;  %v21413_v36 = vld [vmem:[#allocation125_spill] sm:$0xff] }
 0x7a7   :  { %v9986_v3 = vpack.c.bf16 %v21406_v49, %v21404_v16  ;;  %v21412_v29 = vmax.f32 %v21411_v62, 0.0  ;;  %v21414_v4 = vmax.f32 %v21413_v36, 0.0  ;;  %v21415_v55 = vld [vmem:[#allocation127_spill] sm:$0xff]  ;;  %v21417_v43 = vld [vmem:[#allocation129_spill] sm:$0xff]  ;;  %10740 = vst [vmem:[#allocation10 + $0x1a8] sm:$0xff] %v9976_v34  }
 0x7a8   :  { %v9991_v26 = vpack.c.bf16 %v21410_v7, %v21408_v39  ;;  %v21416_v33 = vmax.f32 %v21415_v55, 0.0  ;;  %v21418_v5 = vmax.f32 %v21417_v43, 0.0  ;;  %v21419_v16 = vld [vmem:[#allocation131_spill] sm:$0xff]  ;;  %v21421_v49 = vld [vmem:[#allocation133_spill] sm:$0xff]  ;;  %10741 = vst [vmem:[#allocation10 + $0x1b0] sm:$0xff] %v9981_v48  }
 0x7a9   :  { %v9996_v0 = vpack.c.bf16 %v21414_v4, %v21412_v29  ;;  %v21420_v54 = vmax.f32 %v21419_v16, 0.0  ;;  %v21422_v47 = vmax.f32 %v21421_v49, 0.0  ;;  %v21423_v39 = vld [vmem:[#allocation135_spill] sm:$0xff]  ;;  %v21425_v19 = vld [vmem:[#allocation137_spill] sm:$0xff]  ;;  %10742 = vst [vmem:[#allocation10 + $0x1b8] sm:$0xff] %v9986_v3  }
 0x7aa   :  { %v10001_v25 = vpack.c.bf16 %v21418_v5, %v21416_v33  ;;  %v21424_v59 = vmax.f32 %v21423_v39, 0.0  ;;  %v21426_v1 = vmax.f32 %v21425_v19, 0.0  ;;  %10743 = vst [vmem:[#allocation10 + $0x1c0] sm:$0xff] %v9991_v26   ;;  %v21427_v7 = vld [vmem:[#allocation139_spill] sm:$0xff]  ;;  %v21429_v29 = vld [vmem:[#allocation141_spill] sm:$0xff] }
 0x7ab   :  { %v10006_v60 = vpack.c.bf16 %v21422_v47, %v21420_v54  ;;  %v21428_v62 = vmax.f32 %v21427_v7, 0.0  ;;  %v21430_v36 = vmax.f32 %v21429_v29, 0.0  ;;  %v21431_v55 = vld [vmem:[#allocation143_spill] sm:$0xff]  ;;  %v21433_v43 = vld [vmem:[#allocation145_spill] sm:$0xff]  ;;  %10744 = vst [vmem:[#allocation10 + $0x1c8] sm:$0xff] %v9996_v0  }
 0x7ac   :  { %v10011_v2 = vpack.c.bf16 %v21426_v1, %v21424_v59  ;;  %v21432_v33 = vmax.f32 %v21431_v55, 0.0  ;;  %v21434_v5 = vmax.f32 %v21433_v43, 0.0  ;;  %v21435_v54 = vld [vmem:[#allocation147_spill] sm:$0xff]  ;;  %v21437_v47 = vld [vmem:[#allocation149_spill] sm:$0xff]  ;;  %10745 = vst [vmem:[#allocation10 + $0x1d0] sm:$0xff] %v10001_v25  }
 0x7ad   :  { %v10016_v4 = vpack.c.bf16 %v21430_v36, %v21428_v62  ;;  %v21436_v49 = vmax.f32 %v21435_v54, 0.0  ;;  %v21438_v39 = vmax.f32 %v21437_v47, 0.0  ;;  %v21439_v59 = vld [vmem:[#allocation151_spill] sm:$0xff]  ;;  %v21441_v48 = vld [vmem:[#allocation153_spill] sm:$0xff]  ;;  %10746 = vst [vmem:[#allocation10 + $0x1d8] sm:$0xff] %v10006_v60  }
 0x7ae   :  { %v10021_v16 = vpack.c.bf16 %v21434_v5, %v21432_v33  ;;  %v21440_v34 = vmax.f32 %v21439_v59, 0.0  ;;  %v21442_v3 = vmax.f32 %v21441_v48, 0.0  ;;  %10747 = vst [vmem:[#allocation10 + $0x1e0] sm:$0xff] %v10011_v2   ;;  %v21443_v1 = vld [vmem:[#allocation155_spill] sm:$0xff]  ;;  %v21445_v62 = vld [vmem:[#allocation157_spill] sm:$0xff] }
 0x7af   :  { %v10026_v19 = vpack.c.bf16 %v21438_v39, %v21436_v49  ;;  %v21444_v7 = vmax.f32 %v21443_v1, 0.0  ;;  %v21446_v29 = vmax.f32 %v21445_v62, 0.0  ;;  %v21447_v55 = vld [vmem:[#allocation159_spill] sm:$0xff]  ;;  %v21449_v43 = vld [vmem:[#allocation161_spill] sm:$0xff]  ;;  %10748 = vst [vmem:[#allocation10 + $0x1e8] sm:$0xff] %v10016_v4  }
 0x7b0   :  { %v10031_v26 = vpack.c.bf16 %v21442_v3, %v21440_v34  ;;  %v21448_v33 = vmax.f32 %v21447_v55, 0.0  ;;  %v21450_v5 = vmax.f32 %v21449_v43, 0.0  ;;  %v21451_v49 = vld [vmem:[#allocation163_spill] sm:$0xff]  ;;  %v21453_v39 = vld [vmem:[#allocation165_spill] sm:$0xff]  ;;  %10749 = vst [vmem:[#allocation10 + $0x1f0] sm:$0xff] %v10021_v16  }
 0x7b1   :  { %v10036_v36 = vpack.c.bf16 %v21446_v29, %v21444_v7  ;;  %v21452_v47 = vmax.f32 %v21451_v49, 0.0  ;;  %v21454_v59 = vmax.f32 %v21453_v39, 0.0  ;;  %v21455_v34 = vld [vmem:[#allocation167_spill] sm:$0xff]  ;;  %v21457_v25 = vld [vmem:[#allocation169_spill] sm:$0xff]  ;;  %10750 = vst [vmem:[#allocation10 + $0x1f8] sm:$0xff] %v10026_v19  }
 0x7b2   :  { %v10041_v54 = vpack.c.bf16 %v21450_v5, %v21448_v33  ;;  %v21456_v0 = vmax.f32 %v21455_v34, 0.0  ;;  %v21458_v60 = vmax.f32 %v21457_v25, 0.0  ;;  %10751 = vst [vmem:[#allocation10 + $0x200] sm:$0xff] %v10031_v26   ;;  %v21459_v3 = vld [vmem:[#allocation171_spill] sm:$0xff]  ;;  %v21461_v7 = vld [vmem:[#allocation173_spill] sm:$0xff] }
 0x7b3   :  { %v10046_v48 = vpack.c.bf16 %v21454_v59, %v21452_v47  ;;  %v21460_v1 = vmax.f32 %v21459_v3, 0.0  ;;  %v21462_v62 = vmax.f32 %v21461_v7, 0.0  ;;  %v21463_v55 = vld [vmem:[#allocation175_spill] sm:$0xff]  ;;  %v21465_v43 = vld [vmem:[#allocation177_spill] sm:$0xff]  ;;  %10752 = vst [vmem:[#allocation10 + $0x208] sm:$0xff] %v10036_v36  }
 0x7b4   :  { %v10051_v2 = vpack.c.bf16 %v21458_v60, %v21456_v0  ;;  %v21464_v33 = vmax.f32 %v21463_v55, 0.0  ;;  %v21466_v5 = vmax.f32 %v21465_v43, 0.0  ;;  %v21467_v47 = vld [vmem:[#allocation179_spill] sm:$0xff]  ;;  %v21469_v59 = vld [vmem:[#allocation181_spill] sm:$0xff]  ;;  %10753 = vst [vmem:[#allocation10 + $0x210] sm:$0xff] %v10041_v54  }
 0x7b5   :  { %v10056_v29 = vpack.c.bf16 %v21462_v62, %v21460_v1  ;;  %v21468_v39 = vmax.f32 %v21467_v47, 0.0  ;;  %v21470_v34 = vmax.f32 %v21469_v59, 0.0  ;;  %v21471_v0 = vld [vmem:[#allocation183_spill] sm:$0xff]  ;;  %v21473_v16 = vld [vmem:[#allocation185_spill] sm:$0xff]  ;;  %10754 = vst [vmem:[#allocation10 + $0x218] sm:$0xff] %v10046_v48  }
 0x7b6   :  { %v10061_v49 = vpack.c.bf16 %v21466_v5, %v21464_v33  ;;  %v21472_v4 = vmax.f32 %v21471_v0, 0.0  ;;  %v21474_v19 = vmax.f32 %v21473_v16, 0.0  ;;  %10755 = vst [vmem:[#allocation10 + $0x220] sm:$0xff] %v10051_v2   ;;  %v21475_v60 = vld [vmem:[#allocation187_spill] sm:$0xff]  ;;  %v21477_v1 = vld [vmem:[#allocation189_spill] sm:$0xff] }
 0x7b7   :  { %v10066_v25 = vpack.c.bf16 %v21470_v34, %v21468_v39  ;;  %v21476_v3 = vmax.f32 %v21475_v60, 0.0  ;;  %v21478_v7 = vmax.f32 %v21477_v1, 0.0  ;;  %v21479_v55 = vld [vmem:[#allocation191_spill] sm:$0xff]  ;;  %v21481_v43 = vld [vmem:[#allocation193_spill] sm:$0xff]  ;;  %10756 = vst [vmem:[#allocation10 + $0x228] sm:$0xff] %v10056_v29  }
 0x7b8   :  { %v10071_v26 = vpack.c.bf16 %v21474_v19, %v21472_v4  ;;  %v21480_v33 = vmax.f32 %v21479_v55, 0.0  ;;  %v21482_v5 = vmax.f32 %v21481_v43, 0.0  ;;  %v21483_v39 = vld [vmem:[#allocation195_spill] sm:$0xff]  ;;  %v21485_v34 = vld [vmem:[#allocation197_spill] sm:$0xff]  ;;  %10757 = vst [vmem:[#allocation10 + $0x230] sm:$0xff] %v10061_v49  }
 0x7b9   :  { %v10076_v62 = vpack.c.bf16 %v21478_v7, %v21476_v3  ;;  %v21484_v59 = vmax.f32 %v21483_v39, 0.0  ;;  %v21486_v0 = vmax.f32 %v21485_v34, 0.0  ;;  %v21487_v4 = vld [vmem:[#allocation199_spill] sm:$0xff]  ;;  %v21489_v54 = vld [vmem:[#allocation201_spill] sm:$0xff]  ;;  %10758 = vst [vmem:[#allocation10 + $0x238] sm:$0xff] %v10066_v25  }
 0x7ba   :  { %v10081_v47 = vpack.c.bf16 %v21482_v5, %v21480_v33  ;;  %v21488_v36 = vmax.f32 %v21487_v4, 0.0  ;;  %v21490_v48 = vmax.f32 %v21489_v54, 0.0  ;;  %10759 = vst [vmem:[#allocation10 + $0x240] sm:$0xff] %v10071_v26   ;;  %v21491_v19 = vld [vmem:[#allocation203_spill] sm:$0xff]  ;;  %v21493_v3 = vld [vmem:[#allocation205_spill] sm:$0xff] }
 0x7bb   :  { %v10086_v16 = vpack.c.bf16 %v21486_v0, %v21484_v59  ;;  %v21492_v60 = vmax.f32 %v21491_v19, 0.0  ;;  %v21494_v1 = vmax.f32 %v21493_v3, 0.0  ;;  %v21495_v55 = vld [vmem:[#allocation207_spill] sm:$0xff]  ;;  %v21497_v43 = vld [vmem:[#allocation209_spill] sm:$0xff]  ;;  %10760 = vst [vmem:[#allocation10 + $0x248] sm:$0xff] %v10076_v62  }
 0x7bc   :  { %v10091_v2 = vpack.c.bf16 %v21490_v48, %v21488_v36  ;;  %v21496_v33 = vmax.f32 %v21495_v55, 0.0  ;;  %v21498_v5 = vmax.f32 %v21497_v43, 0.0  ;;  %v21499_v59 = vld [vmem:[#allocation211_spill] sm:$0xff]  ;;  %v21501_v0 = vld [vmem:[#allocation213_spill] sm:$0xff]  ;;  %10761 = vst [vmem:[#allocation10 + $0x250] sm:$0xff] %v10081_v47  }
 0x7bd   :  { %v10096_v7 = vpack.c.bf16 %v21494_v1, %v21492_v60  ;;  %v21500_v34 = vmax.f32 %v21499_v59, 0.0  ;;  %v21502_v4 = vmax.f32 %v21501_v0, 0.0  ;;  %v21503_v36 = vld [vmem:[#allocation215_spill] sm:$0xff]  ;;  %v21505_v49 = vld [vmem:[#allocation217_spill] sm:$0xff]  ;;  %10762 = vst [vmem:[#allocation10 + $0x258] sm:$0xff] %v10086_v16  }
 0x7be   :  { %v10101_v39 = vpack.c.bf16 %v21498_v5, %v21496_v33  ;;  %v21504_v29 = vmax.f32 %v21503_v36, 0.0  ;;  %v21506_v25 = vmax.f32 %v21505_v49, 0.0  ;;  %10763 = vst [vmem:[#allocation10 + $0x260] sm:$0xff] %v10091_v2   ;;  %v21507_v48 = vld [vmem:[#allocation219_spill] sm:$0xff]  ;;  %v21509_v60 = vld [vmem:[#allocation221_spill] sm:$0xff] }
 0x7bf   :  { %v10106_v54 = vpack.c.bf16 %v21502_v4, %v21500_v34  ;;  %v21508_v19 = vmax.f32 %v21507_v48, 0.0  ;;  %v21510_v3 = vmax.f32 %v21509_v60, 0.0  ;;  %v21511_v55 = vld [vmem:[#allocation223_spill] sm:$0xff]  ;;  %v21513_v43 = vld [vmem:[#allocation225_spill] sm:$0xff]  ;;  %10764 = vst [vmem:[#allocation10 + $0x268] sm:$0xff] %v10096_v7  }
 0x7c0   :  { %v10111_v26 = vpack.c.bf16 %v21506_v25, %v21504_v29  ;;  %v21512_v33 = vmax.f32 %v21511_v55, 0.0  ;;  %v21514_v5 = vmax.f32 %v21513_v43, 0.0  ;;  %v21515_v34 = vld [vmem:[#allocation227_spill] sm:$0xff]  ;;  %v21517_v4 = vld [vmem:[#allocation229_spill] sm:$0xff]  ;;  %10765 = vst [vmem:[#allocation10 + $0x270] sm:$0xff] %v10101_v39  }
 0x7c1   :  { %v10116_v1 = vpack.c.bf16 %v21510_v3, %v21508_v19  ;;  %v21516_v0 = vmax.f32 %v21515_v34, 0.0  ;;  %v21518_v36 = vmax.f32 %v21517_v4, 0.0  ;;  %v21519_v29 = vld [vmem:[#allocation231_spill] sm:$0xff]  ;;  %v21521_v47 = vld [vmem:[#allocation233_spill] sm:$0xff]  ;;  %10766 = vst [vmem:[#allocation10 + $0x278] sm:$0xff] %v10106_v54  }
 0x7c2   :  { %v10121_v59 = vpack.c.bf16 %v21514_v5, %v21512_v33  ;;  %v21520_v62 = vmax.f32 %v21519_v29, 0.0  ;;  %v21522_v16 = vmax.f32 %v21521_v47, 0.0  ;;  %10767 = vst [vmem:[#allocation10 + $0x280] sm:$0xff] %v10111_v26   ;;  %v21523_v25 = vld [vmem:[#allocation235_spill] sm:$0xff]  ;;  %v21525_v19 = vld [vmem:[#allocation237_spill] sm:$0xff] }
 0x7c3   :  { %v10126_v49 = vpack.c.bf16 %v21518_v36, %v21516_v0  ;;  %v21524_v48 = vmax.f32 %v21523_v25, 0.0  ;;  %v21526_v60 = vmax.f32 %v21525_v19, 0.0  ;;  %v21527_v55 = vld [vmem:[#allocation239_spill] sm:$0xff]  ;;  %v21529_v43 = vld [vmem:[#allocation241_spill] sm:$0xff]  ;;  %v21533_v36 = vld [vmem:[#allocation244_spill] sm:$0xff]  ;;  %10768 = vst [vmem:[#allocation10 + $0x288] sm:$0xff] %v10116_v1  }
 0x7c4   :  { %v10131_v2 = vpack.c.bf16 %v21522_v16, %v21520_v62  ;;  %v21528_v33 = vmax.f32 %v21527_v55, 0.0  ;;  %v21530_v5 = vmax.f32 %v21529_v43, 0.0  ;;  %v21531_v0 = vld [vmem:[#allocation243_spill] sm:$0xff]  ;;  %v21534_v29 = vmax.f32 %v21533_v36, 0.0  ;;  %v21535_v62 = vld [vmem:[#allocation246_spill] sm:$0xff]  ;;  %10769 = vst [vmem:[#allocation10 + $0x290] sm:$0xff] %v10121_v59  }
 0x7c5   :  { %v10136_v3 = vpack.c.bf16 %v21526_v60, %v21524_v48  ;;  %v21532_v4 = vmax.f32 %v21531_v0, 0.0  ;;  %v21536_v7 = vmax.f32 %v21535_v62, 0.0  ;;  %v21537_v39 = vld [vmem:[#allocation247_spill] sm:$0xff]  ;;  %10770 = vst [vmem:[#allocation10 + $0x298] sm:$0xff] %v10126_v49   ;;  %v21539_v16 = vld [vmem:[#allocation249_spill] sm:$0xff]  ;;  %v21541_v48 = vld [vmem:[#allocation250_spill] sm:$0xff] }
 0x7c6   :  { %v10141_v34 = vpack.c.bf16 %v21530_v5, %v21528_v33  ;;  %v21538_v54 = vmax.f32 %v21537_v39, 0.0  ;;  %10771 = vst [vmem:[#allocation10 + $0x2a0] sm:$0xff] %v10131_v2   ;;  %v21540_v25 = vmax.f32 %v21539_v16, 0.0  ;;  %v21542_v19 = vmax.f32 %v21541_v48, 0.0  ;;  %v21543_v55 = vld [vmem:[#allocation252_spill] sm:$0xff]  ;;  %v21545_v43 = vld [vmem:[#allocation253_spill] sm:$0xff] }
 0x7c7   :  { %v10146_v47 = vpack.c.bf16 %v21534_v29, %v21532_v4  ;;  %v21544_v33 = vmax.f32 %v21543_v55, 0.0  ;;  %v21546_v5 = vmax.f32 %v21545_v43, 0.0  ;;  %v21547_v4 = vld [vmem:[#allocation255_spill] sm:$0xff]  ;;  %v21549_v29 = vld [vmem:[#allocation256_spill] sm:$0xff]  ;;  %10772 = vst [vmem:[#allocation10 + $0x2a8] sm:$0xff] %v10136_v3   ;;  %v21559_v55 = vld [vmem:[#allocation265_spill] sm:$0xff] }
 0x7c8   :  { %v10151_v26 = vpack.c.bf16 %v21538_v54, %v21536_v7  ;;  %v10156_v60 = vpack.c.bf16 %v21542_v19, %v21540_v25  ;;  %v21548_v36 = vmax.f32 %v21547_v4, 0.0  ;;  %v21550_v62 = vmax.f32 %v21549_v29, 0.0  ;;  %v21551_v7 = vld [vmem:[#allocation258_spill] sm:$0xff]  ;;  %v21553_v59 = vld [vmem:[#allocation259_spill] sm:$0xff]  ;;  %10773 = vst [vmem:[#allocation10 + $0x2b0] sm:$0xff] %v10141_v34   ;;  %v21555_v54 = vld [vmem:[#allocation261_spill] sm:$0xff] }
 0x7c9   :  { %v10161_v0 = vpack.c.bf16 %v21546_v5, %v21544_v33  ;;  %v21552_v1 = vmax.f32 %v21551_v7, 0.0  ;;  %v21554_v49 = vmax.f32 %v21553_v59, 0.0  ;;  %10774 = vst [vmem:[#allocation10 + $0x2b8] sm:$0xff] %v10146_v47   ;;  %v21556_v16 = vmax.f32 %v21555_v54, 0.0  ;;  %v21557_v25 = vld [vmem:[#allocation263_spill] sm:$0xff]  ;;  %v21561_v43 = vld [vmem:[#allocation266_spill] sm:$0xff] }
 0x7ca   :  { %v10166_v39 = vpack.c.bf16 %v21550_v62, %v21548_v36  ;;  %10775 = vst [vmem:[#allocation10 + $0x2c0] sm:$0xff] %v10151_v26   ;;  %v21558_v48 = vmax.f32 %v21557_v25, 0.0  ;;  %v21560_v33 = vmax.f32 %v21559_v55, 0.0  ;;  %v21562_v5 = vmax.f32 %v21561_v43, 0.0  ;;  %v21563_v36 = vld [vmem:[#allocation268_spill] sm:$0xff]  ;;  %v21565_v62 = vld [vmem:[#allocation269_spill] sm:$0xff] }
 0x7cb   :  { %v10171_v2 = vpack.c.bf16 %v21554_v49, %v21552_v1  ;;  %v21564_v29 = vmax.f32 %v21563_v36, 0.0  ;;  %v21566_v7 = vmax.f32 %v21565_v62, 0.0  ;;  %v21567_v1 = vld [vmem:[#allocation271_spill] sm:$0xff]  ;;  %v21569_v34 = vld [vmem:[#allocation272_spill] sm:$0xff]  ;;  %10776 = vst [vmem:[#allocation10 + $0x2c8] sm:$0xff] %v10156_v60   ;;  %10777 = vst [vmem:[#allocation10 + $0x2d0] sm:$0xff] %v10161_v0  }
 0x7cc   :  { %v10176_v19 = vpack.c.bf16 %v21558_v48, %v21556_v16  ;;  %v10181_v4 = vpack.c.bf16 %v21562_v5, %v21560_v33  ;;  %v21568_v3 = vmax.f32 %v21567_v1, 0.0  ;;  %v21570_v47 = vmax.f32 %v21569_v34, 0.0  ;;  %10778 = vst [vmem:[#allocation10 + $0x2d8] sm:$0xff] %v10166_v39   ;;  %v21571_v49 = vld [vmem:[#allocation274_spill] sm:$0xff]  ;;  %v21573_v16 = vld [vmem:[#allocation276_spill] sm:$0xff]  ;;  %v21577_v43 = vld [vmem:[#allocation279_spill] sm:$0xff] }
 0x7cd   :  { %v10186_v59 = vpack.c.bf16 %v21566_v7, %v21564_v29  ;;  %10779 = vst [vmem:[#allocation10 + $0x2e0] sm:$0xff] %v10171_v2   ;;  %v21572_v54 = vmax.f32 %v21571_v49, 0.0  ;;  %v21574_v25 = vmax.f32 %v21573_v16, 0.0  ;;  %v21575_v55 = vld [vmem:[#allocation278_spill] sm:$0xff]  ;;  %v21578_v5 = vmax.f32 %v21577_v43, 0.0  ;;  %v21579_v29 = vld [vmem:[#allocation281_spill] sm:$0xff] }
 0x7ce   :  { %v10191_v26 = vpack.c.bf16 %v21570_v47, %v21568_v3  ;;  %v21576_v33 = vmax.f32 %v21575_v55, 0.0  ;;  %v21580_v62 = vmax.f32 %v21579_v29, 0.0  ;;  %v21581_v7 = vld [vmem:[#allocation282_spill] sm:$0xff]  ;;  %v21583_v3 = vld [vmem:[#allocation284_spill] sm:$0xff]  ;;  %v21585_v0 = vld [vmem:[#allocation285_spill] sm:$0xff]  ;;  %10780 = vst [vmem:[#allocation10 + $0x2e8] sm:$0xff] %v10176_v19  }
 0x7cf   :  { %v10196_v48 = vpack.c.bf16 %v21574_v25, %v21572_v54  ;;  %v21582_v1 = vmax.f32 %v21581_v7, 0.0  ;;  %v21584_v60 = vmax.f32 %v21583_v3, 0.0  ;;  %v21586_v39 = vmax.f32 %v21585_v0, 0.0  ;;  %10781 = vst [vmem:[#allocation10 + $0x2f0] sm:$0xff] %v10181_v4   ;;  %10782 = vst [vmem:[#allocation10 + $0x2f8] sm:$0xff] %v10186_v59   ;;  %v21587_v47 = vld [vmem:[#allocation287_spill] sm:$0xff] }
 0x7d0   :  { %v10201_v36 = vpack.c.bf16 %v21578_v5, %v21576_v33  ;;  %10783 = vst [vmem:[#allocation10 + $0x300] sm:$0xff] %v10191_v26   ;;  %v21588_v49 = vmax.f32 %v21587_v47, 0.0  ;;  %v21589_v54 = vld [vmem:[#allocation288_spill] sm:$0xff]  ;;  %v21591_v55 = vld [vmem:[#allocation290_spill] sm:$0xff]  ;;  %v21593_v43 = vld [vmem:[#allocation291_spill] sm:$0xff] }
 0x7d1   :  { %v10206_v34 = vpack.c.bf16 %v21582_v1, %v21580_v62  ;;  %v10211_v2 = vpack.c.bf16 %v21586_v39, %v21584_v60  ;;  %v21590_v16 = vmax.f32 %v21589_v54, 0.0  ;;  %v21592_v33 = vmax.f32 %v21591_v55, 0.0  ;;  %v21595_v62 = vld [vmem:[#allocation293_spill] sm:$0xff]  ;;  %v21597_v1 = vld [vmem:[#allocation294_spill] sm:$0xff]  ;;  %v21599_v60 = vld [vmem:[#allocation296_spill] sm:$0xff]  ;;  %10784 = vst [vmem:[#allocation10 + $0x308] sm:$0xff] %v10196_v48  }
 0x7d2   :  { %v21594_v5 = vmax.f32 %v21593_v43, 0.0  ;;  %v21596_v7 = vmax.f32 %v21595_v62, 0.0  ;;  %v21598_v3 = vmax.f32 %v21597_v1, 0.0  ;;  %v21600_v19 = vmax.f32 %v21599_v60, 0.0  ;;  %v21601_v4 = vld [vmem:[#allocation297_spill] sm:$0xff]  ;;  %10785 = vst [vmem:[#allocation10 + $0x310] sm:$0xff] %v10201_v36  }
 0x7d3   :  { %v10216_v25 = vpack.c.bf16 %v21590_v16, %v21588_v49  ;;  %v21602_v59 = vmax.f32 %v21601_v4, 0.0  ;;  %10786 = vst [vmem:[#allocation10 + $0x318] sm:$0xff] %v10206_v34   ;;  %10787 = vst [vmem:[#allocation10 + $0x320] sm:$0xff] %v10211_v2   ;;  %v21603_v39 = vld [vmem:[#allocation299_spill] sm:$0xff]  ;;  %v21605_v49 = vld [vmem:[#allocation300_spill] sm:$0xff] }
 0x7d4   :  { %v10221_v29 = vpack.c.bf16 %v21594_v5, %v21592_v33  ;;  %v10226_v0 = vpack.c.bf16 %v21598_v3, %v21596_v7  ;;  %v21604_v47 = vmax.f32 %v21603_v39, 0.0  ;;  %v21606_v54 = vmax.f32 %v21605_v49, 0.0  ;;  %v21607_v55 = vld [vmem:[#allocation302_spill] sm:$0xff]  ;;  %v21609_v43 = vld [vmem:[#allocation303_spill] sm:$0xff]  ;;  %v21611_v7 = vld [vmem:[#allocation305_spill] sm:$0xff] }
 0x7d5   :  { %v10231_v26 = vpack.c.bf16 %v21602_v59, %v21600_v19  ;;  %v21608_v33 = vmax.f32 %v21607_v55, 0.0  ;;  %v21610_v5 = vmax.f32 %v21609_v43, 0.0  ;;  %v21612_v1 = vmax.f32 %v21611_v7, 0.0  ;;  %v21613_v3 = vld [vmem:[#allocation307_spill] sm:$0xff]  ;;  %v21615_v19 = vld [vmem:[#allocation309_spill] sm:$0xff]  ;;  %10788 = vst [vmem:[#allocation10 + $0x328] sm:$0xff] %v10216_v25  }
 0x7d6   :  { %v10236_v16 = vpack.c.bf16 %v21606_v54, %v21604_v47  ;;  %v21614_v60 = vmax.f32 %v21613_v3, 0.0  ;;  %v21616_v48 = vmax.f32 %v21615_v19, 0.0  ;;  %v21617_v36 = vld [vmem:[#allocation311_spill] sm:$0xff]  ;;  %10789 = vst [vmem:[#allocation10 + $0x330] sm:$0xff] %v10221_v29   ;;  %10790 = vst [vmem:[#allocation10 + $0x338] sm:$0xff] %v10226_v0   ;;  %v21619_v59 = vld [vmem:[#allocation313_spill] sm:$0xff] }
 0x7d7   :  { %v10241_v62 = vpack.c.bf16 %v21610_v5, %v21608_v33  ;;  %v21618_v34 = vmax.f32 %v21617_v36, 0.0  ;;  %10791 = vst [vmem:[#allocation10 + $0x340] sm:$0xff] %v10231_v26   ;;  %v21620_v39 = vmax.f32 %v21619_v59, 0.0  ;;  %v21621_v47 = vld [vmem:[#allocation315_spill] sm:$0xff]  ;;  %v21623_v55 = vld [vmem:[#allocation317_spill] sm:$0xff]  ;;  %v21633_v29 = vld [vmem:[#allocation82_spill] sm:$0xff] }
 0x7d8   :  { %v10246_v4 = vpack.c.bf16 %v21614_v60, %v21612_v1  ;;  %v21622_v49 = vmax.f32 %v21621_v47, 0.0  ;;  %v21624_v33 = vmax.f32 %v21623_v55, 0.0  ;;  %v21625_v43 = vld [vmem:[#allocation319_spill] sm:$0xff]  ;;  %v21627_v1 = vld [vmem:[#allocation321_spill] sm:$0xff]  ;;  %v21634_v0 = vmax.f32 %v21633_v29, 0.0  ;;  %10792 = vst [vmem:[#allocation10 + $0x348] sm:$0xff] %v10236_v16  }
 0x7d9   :  { %v10251_v2 = vpack.c.bf16 %v21618_v34, %v21616_v48  ;;  %v21626_v5 = vmax.f32 %v21625_v43, 0.0  ;;  %v21628_v3 = vmax.f32 %v21627_v1, 0.0  ;;  %v21629_v60 = vld [vmem:[#allocation323_spill] sm:$0xff]  ;;  %v21631_v48 = vld [vmem:[#allocation80_spill] sm:$0xff]  ;;  %10793 = vst [vmem:[#allocation10 + $0x350] sm:$0xff] %v10241_v62   ;;  %v21641_v43 = vld [vmem:[#allocation90_spill] sm:$0xff] }
 0x7da   :  { %v10256_v54 = vpack.c.bf16 %v21622_v49, %v21620_v39  ;;  %v21630_v19 = vmax.f32 %v21629_v60, 0.0  ;;  %v21632_v25 = vmax.f32 %v21631_v48, 0.0  ;;  %10794 = vst [vmem:[#allocation10 + $0x358] sm:$0xff] %v10246_v4   ;;  %v21635_v34 = vld [vmem:[#allocation84_spill] sm:$0xff]  ;;  %v21637_v39 = vld [vmem:[#allocation86_spill] sm:$0xff] }
 0x7db   :  { %v10261_v7 = vpack.c.bf16 %v21626_v5, %v21624_v33  ;;  %10795 = vst [vmem:[#allocation10 + $0x360] sm:$0xff] %v10251_v2   ;;  %v21636_v59 = vmax.f32 %v21635_v34, 0.0  ;;  %v21638_v47 = vmax.f32 %v21637_v39, 0.0  ;;  %v21639_v55 = vld [vmem:[#allocation88_spill] sm:$0xff]  ;;  %v21642_v5 = vmax.f32 %v21641_v43, 0.0  ;;  %v21649_v62 = vld [vmem:[#allocation98_spill] sm:$0xff] }
 0x7dc   :  { %v10266_v36 = vpack.c.bf16 %v21630_v19, %v21628_v3  ;;  %v10271_v26 = vpack.c.bf16 %v21634_v0, %v21632_v25  ;;  %v21640_v33 = vmax.f32 %v21639_v55, 0.0  ;;  %v21643_v3 = vld [vmem:[#allocation92_spill] sm:$0xff]  ;;  %v21645_v19 = vld [vmem:[#allocation94_spill] sm:$0xff]  ;;  %v21650_v4 = vmax.f32 %v21649_v62, 0.0  ;;  %10796 = vst [vmem:[#allocation10 + $0x368] sm:$0xff] %v10256_v54  }
 0x7dd   :  { %v10276_v49 = vpack.c.bf16 %v21638_v47, %v21636_v59  ;;  %v21644_v60 = vmax.f32 %v21643_v3, 0.0  ;;  %v21646_v48 = vmax.f32 %v21645_v19, 0.0  ;;  %v21647_v25 = vld [vmem:[#allocation96_spill] sm:$0xff]  ;;  %10797 = vst [vmem:[#allocation10 + $0x370] sm:$0xff] %v10261_v7   ;;  %v21653_v59 = vld [vmem:[#allocation102_spill] sm:$0xff] }
 0x7de   :  { %v10281_v1 = vpack.c.bf16 %v21642_v5, %v21640_v33  ;;  %v21648_v16 = vmax.f32 %v21647_v25, 0.0  ;;  %10798 = vst [vmem:[#allocation10 + $0x378] sm:$0xff] %v10266_v36   ;;  %10799 = vst [vmem:[#allocation10 + $0x380] sm:$0xff] %v10271_v26   ;;  %v21651_v0 = vld [vmem:[#allocation100_spill] sm:$0xff]  ;;  %v21654_v39 = vmax.f32 %v21653_v59, 0.0  ;;  %v21657_v43 = vld [vmem:[#allocation106_spill] sm:$0xff] }
 0x7df   :  { %v10286_v29 = vpack.c.bf16 %v21646_v48, %v21644_v60  ;;  %v21652_v34 = vmax.f32 %v21651_v0, 0.0  ;;  %v21655_v55 = vld [vmem:[#allocation104_spill] sm:$0xff]  ;;  %v21658_v5 = vmax.f32 %v21657_v43, 0.0  ;;  %v21661_v48 = vld [vmem:[#allocation110_spill] sm:$0xff]  ;;  %10800 = vst [vmem:[#allocation10 + $0x388] sm:$0xff] %v10276_v49  }
 0x7e0   :  { %v10291_v2 = vpack.c.bf16 %v21650_v4, %v21648_v16  ;;  %v21656_v33 = vmax.f32 %v21655_v55, 0.0  ;;  %v21659_v60 = vld [vmem:[#allocation108_spill] sm:$0xff]  ;;  %v21662_v25 = vmax.f32 %v21661_v48, 0.0  ;;  %v21665_v7 = vld [vmem:[#allocation114_spill] sm:$0xff]  ;;  %10801 = vst [vmem:[#allocation10 + $0x390] sm:$0xff] %v10281_v1  }
 0x7e1   :  { %v10296_v47 = vpack.c.bf16 %v21654_v39, %v21652_v34  ;;  %v21660_v19 = vmax.f32 %v21659_v60, 0.0  ;;  %v21663_v16 = vld [vmem:[#allocation112_spill] sm:$0xff]  ;;  %v21666_v36 = vmax.f32 %v21665_v7, 0.0  ;;  %10802 = vst [vmem:[#allocation10 + $0x398] sm:$0xff] %v10286_v29   ;;  %v21669_v34 = vld [vmem:[#allocation118_spill] sm:$0xff] }
 0x7e2   :  { %v10301_v3 = vpack.c.bf16 %v21658_v5, %v21656_v33  ;;  %v21664_v54 = vmax.f32 %v21663_v16, 0.0  ;;  %10803 = vst [vmem:[#allocation10 + $0x3a0] sm:$0xff] %v10291_v2   ;;  %v21667_v4 = vld [vmem:[#allocation116_spill] sm:$0xff]  ;;  %v21670_v59 = vmax.f32 %v21669_v34, 0.0  ;;  %v21673_v43 = vld [vmem:[#allocation122_spill] sm:$0xff] }
 0x7e3   :  { %v10306_v62 = vpack.c.bf16 %v21662_v25, %v21660_v19  ;;  %v21668_v0 = vmax.f32 %v21667_v4, 0.0  ;;  %v21671_v55 = vld [vmem:[#allocation120_spill] sm:$0xff]  ;;  %v21674_v5 = vmax.f32 %v21673_v43, 0.0  ;;  %v21677_v25 = vld [vmem:[#allocation126_spill] sm:$0xff]  ;;  %10804 = vst [vmem:[#allocation10 + $0x3a8] sm:$0xff] %v10296_v47  }
 0x7e4   :  { %v10311_v26 = vpack.c.bf16 %v21666_v36, %v21664_v54  ;;  %v21672_v33 = vmax.f32 %v21671_v55, 0.0  ;;  %v21675_v19 = vld [vmem:[#allocation124_spill] sm:$0xff]  ;;  %v21678_v16 = vmax.f32 %v21677_v25, 0.0  ;;  %v21681_v1 = vld [vmem:[#allocation130_spill] sm:$0xff]  ;;  %10805 = vst [vmem:[#allocation10 + $0x3b0] sm:$0xff] %v10301_v3   ;;  %v21694_v3 = vmax.f32 %v21093_v17, 0.0 }
 0x7e5   :  { %v10316_v39 = vpack.c.bf16 %v21670_v59, %v21668_v0  ;;  %v21676_v48 = vmax.f32 %v21675_v19, 0.0  ;;  %v21679_v54 = vld [vmem:[#allocation128_spill] sm:$0xff]  ;;  %v21682_v29 = vmax.f32 %v21681_v1, 0.0  ;;  %10806 = vst [vmem:[#allocation10 + $0x3b8] sm:$0xff] %v10306_v62   ;;  %v21685_v0 = vmax.f32 %v21087_v20, 0.0 }
 0x7e6   :  { %v10321_v60 = vpack.c.bf16 %v21674_v5, %v21672_v33  ;;  %v21680_v49 = vmax.f32 %v21679_v54, 0.0  ;;  %10807 = vst [vmem:[#allocation10 + $0x3c0] sm:$0xff] %v10311_v26   ;;  %v21683_v36 = vld [vmem:[#allocation132_spill] sm:$0xff]  ;;  %v21688_v33 = vmax.f32 %v21089_v12, 0.0  ;;  %v21697_v54 = vmax.f32 %v21095_v13, 0.0 }
 0x7e7   :  { %v10326_v7 = vpack.c.bf16 %v21678_v16, %v21676_v48  ;;  %v21684_v4 = vmax.f32 %v21683_v36, 0.0  ;;  %v21686_v59 = vld [vmem:[#allocation136_spill] sm:$0xff]  ;;  %v21691_v48 = vmax.f32 %v21091_v11, 0.0  ;;  %10808 = vst [vmem:[#allocation10 + $0x3c8] sm:$0xff] %v10316_v39  }
 0x7e8   :  { %v10331_v2 = vpack.c.bf16 %v21682_v29, %v21680_v49  ;;  %v21687_v55 = vmax.f32 %v21686_v59, 0.0  ;;  %v21689_v5 = vld [vmem:[#allocation140_spill] sm:$0xff]  ;;  %10809 = vst [vmem:[#allocation10 + $0x3d0] sm:$0xff] %v10321_v60   ;;  %v21700_v29 = vmax.f32 %v21097_v35, 0.0  ;;  %v21706_v60 = vmax.f32 %v21099_v41, 0.0 }
 0x7e9   :  { %v10336_v34 = vpack.c.bf16 %v21685_v0, %v21684_v4  ;;  %v21690_v19 = vmax.f32 %v21689_v5, 0.0  ;;  %v21692_v16 = vld [vmem:[#allocation144_spill] sm:$0xff]  ;;  %10810 = vst [vmem:[#allocation10 + $0x3d8] sm:$0xff] %v10326_v7   ;;  %v21703_v0 = vmax.f32 %v21098_v22, 0.0 }
 0x7ea   :  { %v10341_v43 = vpack.c.bf16 %v21688_v33, %v21687_v55  ;;  %v21693_v47 = vmax.f32 %v21692_v16, 0.0  ;;  %10811 = vst [vmem:[#allocation10 + $0x3e0] sm:$0xff] %v10331_v2   ;;  %v21695_v20 = vld [vmem:[#allocation148_spill] sm:$0xff]  ;;  %v21709_v55 = vld [vmem:[#allocation166_spill] sm:$0xff] }
 0x7eb   :  { %v10346_v25 = vpack.c.bf16 %v21691_v48, %v21690_v19  ;;  %v21696_v26 = vmax.f32 %v21695_v20, 0.0  ;;  %v21698_v49 = vld [vmem:[#allocation152_spill] sm:$0xff]  ;;  %10812 = vst [vmem:[#allocation10 + $0x3e8] sm:$0xff] %v10336_v34   ;;  %v21710_v33 = vmax.f32 %v21709_v55, 0.0  ;;  %v21713_v48 = vmax.f32 %v21101_v15, 0.0 }
 0x7ec   :  { %v10351_v62 = vpack.c.bf16 %v21694_v3, %v21693_v47  ;;  %v21699_v1 = vmax.f32 %v21698_v49, 0.0  ;;  %v21701_v36 = vld [vmem:[#allocation156_spill] sm:$0xff]  ;;  %10813 = vst [vmem:[#allocation10 + $0x3f0] sm:$0xff] %v10341_v43   ;;  %v21716_v3 = vmax.f32 %v21102_v18, 0.0  ;;  %v21719_v43 = vmax.f32 %v21103_v32, 0.0 }
 0x7ed   :  { %v10356_v12 = vpack.c.bf16 %v21697_v54, %v21696_v26  ;;  %v21702_v4 = vmax.f32 %v21701_v36, 0.0  ;;  %v21704_v59 = vld [vmem:[#allocation160_spill] sm:$0xff]  ;;  %10814 = vst [vmem:[#allocation10 + $0x3f8] sm:$0xff] %v10346_v25   ;;  %v21722_v54 = vmax.f32 %v21104_v38, 0.0 }
 0x7ee   :  { %v10361_v11 = vpack.c.bf16 %v21700_v29, %v21699_v1  ;;  %v21705_v39 = vmax.f32 %v21704_v59, 0.0  ;;  %10815 = vst [vmem:[#allocation10 + $0x400] sm:$0xff] %v10351_v62   ;;  %v21707_v13 = vld [vmem:[#allocation164_spill] sm:$0xff]  ;;  %v21725_v29 = vmax.f32 %v21105_v57, 0.0 }
 0x7ef   :  { %v10366_v17 = vpack.c.bf16 %v21703_v0, %v21702_v4  ;;  %v21708_v2 = vmax.f32 %v21707_v13, 0.0  ;;  %v21711_v5 = vld [vmem:[#allocation168_spill] sm:$0xff]  ;;  %10816 = vst [vmem:[#allocation10 + $0x408] sm:$0xff] %v10356_v12   ;;  %v21728_v0 = vmax.f32 %v21107_v61, 0.0 }
 0x7f0   :  { %v10371_v7 = vpack.c.bf16 %v21706_v60, %v21705_v39  ;;  %v21712_v19 = vmax.f32 %v21711_v5, 0.0  ;;  %v21714_v16 = vld [vmem:[#allocation172_spill] sm:$0xff]  ;;  %10817 = vst [vmem:[#allocation10 + $0x410] sm:$0xff] %v10361_v11   ;;  %v21731_v11 = vmax.f32 %v21108_v58, 0.0  ;;  %v21734_v60 = vmax.f32 %v21109_v52, 0.0 }
 0x7f1   :  { %v10376_v35 = vpack.c.bf16 %v21710_v33, %v21708_v2  ;;  %v21715_v47 = vmax.f32 %v21714_v16, 0.0  ;;  %v21717_v20 = vld [vmem:[#allocation176_spill] sm:$0xff]  ;;  %10818 = vst [vmem:[#allocation10 + $0x418] sm:$0xff] %v10366_v17   ;;  %v21737_v2 = vmax.f32 %v21110_v27, 0.0  ;;  %v21740_v5 = vmax.f32 %v21111_v46, 0.0 }
 0x7f2   :  { %v10381_v22 = vpack.c.bf16 %v21713_v48, %v21712_v19  ;;  %v21718_v34 = vmax.f32 %v21717_v20, 0.0  ;;  %10819 = vst [vmem:[#allocation10 + $0x420] sm:$0xff] %v10371_v7   ;;  %v21720_v62 = vld [vmem:[#allocation180_spill] sm:$0xff]  ;;  %v21743_v48 = vmax.f32 %v21112_v31, 0.0  ;;  %v21749_v20 = vmax.f32 %v21114_v56, 0.0 }
 0x7f3   :  { %v10386_v41 = vpack.c.bf16 %v21716_v3, %v21715_v47  ;;  %v21721_v26 = vmax.f32 %v21720_v62, 0.0  ;;  %v21723_v49 = vld [vmem:[#allocation184_spill] sm:$0xff]  ;;  %10820 = vst [vmem:[#allocation10 + $0x428] sm:$0xff] %v10376_v35   ;;  %v21746_v47 = vmax.f32 %v21113_v50, 0.0  ;;  %v21747_v3 = vld [vmem:[#allocation371_spill] sm:$0xff]  ;;  %v21758_v50 = vld [vmem:[#allocation374_spill] sm:$0xff] }
 0x7f4   :  { %v10391_v25 = vpack.c.bf16 %v21719_v43, %v21718_v34  ;;  %v21724_v1 = vmax.f32 %v21723_v49, 0.0  ;;  %v21726_v36 = vld [vmem:[#allocation188_spill] sm:$0xff]  ;;  %10821 = vst [vmem:[#allocation10 + $0x430] sm:$0xff] %v10381_v22  }
 0x7f5   :  { %v10396_v15 = vpack.c.bf16 %v21722_v54, %v21721_v26  ;;  %v21727_v4 = vmax.f32 %v21726_v36, 0.0  ;;  %v21729_v59 = vld [vmem:[#allocation192_spill] sm:$0xff]  ;;  %10822 = vst [vmem:[#allocation10 + $0x438] sm:$0xff] %v10386_v41   ;;  %v21748_v41 = vmax.f32 %v21747_v3, 0.0  ;;  %v21754_v26 = vld [vmem:[#allocation373_spill] sm:$0xff] }
 0x7f6   :  { %v10401_v18 = vpack.c.bf16 %v21725_v29, %v21724_v1  ;;  %v21730_v12 = vmax.f32 %v21729_v59, 0.0  ;;  %10823 = vst [vmem:[#allocation10 + $0x440] sm:$0xff] %v10391_v25   ;;  %v21732_v38 = vld [vmem:[#allocation196_spill] sm:$0xff]  ;;  %v21752_v25 = vld [vmem:[#allocation218_spill] sm:$0xff]  ;;  %v21755_v54 = vmax.f32 %v21754_v26, 0.0  ;;  %v21759_v29 = vmax.f32 %v21758_v50, 0.0 }
 0x7f7   :  { %v10406_v32 = vpack.c.bf16 %v21728_v0, %v21727_v4  ;;  %v21733_v39 = vmax.f32 %v21732_v38, 0.0  ;;  %v21735_v7 = vld [vmem:[#allocation200_spill] sm:$0xff]  ;;  %10824 = vst [vmem:[#allocation10 + $0x448] sm:$0xff] %v10396_v15   ;;  %v10441_v46 = vpack.c.bf16 %v21749_v20, %v21748_v41  ;;  %v21753_v62 = vmax.f32 %v21752_v25, 0.0  ;;  %v21762_v4 = vld [vmem:[#allocation375_spill] sm:$0xff]  ;;  %v21768_v38 = vld [vmem:[#allocation226_spill] sm:$0xff] }
 0x7f8   :  { %v10411_v17 = vpack.c.bf16 %v21731_v11, %v21730_v12  ;;  %v21736_v13 = vmax.f32 %v21735_v7, 0.0  ;;  %v21738_v55 = vld [vmem:[#allocation204_spill] sm:$0xff]  ;;  %10825 = vst [vmem:[#allocation10 + $0x450] sm:$0xff] %v10401_v18   ;;  %v21760_v18 = vld [vmem:[#allocation222_spill] sm:$0xff]  ;;  %v21763_v0 = vmax.f32 %v21762_v4, 0.0  ;;  %v21770_v7 = vld [vmem:[#allocation377_spill] sm:$0xff] }
 0x7f9   :  { %v10416_v57 = vpack.c.bf16 %v21734_v60, %v21733_v39  ;;  %v21739_v33 = vmax.f32 %v21738_v55, 0.0  ;;  %v21741_v19 = vld [vmem:[#allocation208_spill] sm:$0xff]  ;;  %10826 = vst [vmem:[#allocation10 + $0x458] sm:$0xff] %v10406_v32   ;;  %v21761_v36 = vmax.f32 %v21760_v18, 0.0  ;;  %v21769_v39 = vmax.f32 %v21768_v38, 0.0  ;;  %10833 = vst [vmem:[#allocation10 + $0x490] sm:$0xff] %v10441_v46  }
 0x7fa   :  { %v10421_v61 = vpack.c.bf16 %v21737_v2, %v21736_v13  ;;  %v21742_v35 = vmax.f32 %v21741_v19, 0.0  ;;  %10827 = vst [vmem:[#allocation10 + $0x460] sm:$0xff] %v10411_v17   ;;  %v21744_v52 = vld [vmem:[#allocation212_spill] sm:$0xff]  ;;  %v21774_v55 = vld [vmem:[#allocation378_spill] sm:$0xff] }
 0x7fb   :  { %v10426_v58 = vpack.c.bf16 %v21740_v5, %v21739_v33  ;;  %v21745_v16 = vmax.f32 %v21744_v52, 0.0  ;;  %v21750_v34 = vld [vmem:[#allocation372_spill] sm:$0xff]  ;;  %10828 = vst [vmem:[#allocation10 + $0x468] sm:$0xff] %v10416_v57   ;;  %v10456_v56 = vpack.c.bf16 %v21761_v36, %v21759_v29  ;;  %v21771_v57 = vmax.f32 %v21770_v7, 0.0  ;;  %v21776_v5 = vld [vmem:[#allocation230_spill] sm:$0xff]  ;;  %v21797_v36 = vld [vmem:[#allocation257_spill] sm:$0xff] }
 0x7fc   :  { %v10431_v22 = vpack.c.bf16 %v21743_v48, %v21742_v35  ;;  %v21751_v43 = vmax.f32 %v21750_v34, 0.0  ;;  %v21756_v15 = vld [vmem:[#allocation220_spill] sm:$0xff]  ;;  %10829 = vst [vmem:[#allocation10 + $0x470] sm:$0xff] %v10421_v61   ;;  %v21775_v33 = vmax.f32 %v21774_v55, 0.0  ;;  %v21778_v35 = vld [vmem:[#allocation379_spill] sm:$0xff]  ;;  %v21784_v41 = vld [vmem:[#allocation234_spill] sm:$0xff] }
 0x7fd   :  { %v10436_v27 = vpack.c.bf16 %v21746_v47, %v21745_v16  ;;  %v21757_v49 = vmax.f32 %v21756_v15, 0.0  ;;  %10830 = vst [vmem:[#allocation10 + $0x478] sm:$0xff] %v10426_v58   ;;  %v21764_v32 = vld [vmem:[#allocation224_spill] sm:$0xff]  ;;  %v21777_v58 = vmax.f32 %v21776_v5, 0.0  ;;  %v21779_v48 = vmax.f32 %v21778_v35, 0.0  ;;  %v21788_v46 = vld [vmem:[#allocation242_spill] sm:$0xff] }
 0x7fe   :  { %v10446_v31 = vpack.c.bf16 %v21753_v62, %v21751_v43  ;;  %10831 = vst [vmem:[#allocation10 + $0x480] sm:$0xff] %v10431_v22   ;;  %v21765_v59 = vmax.f32 %v21764_v32, 0.0  ;;  %v21766_v11 = vld [vmem:[#allocation376_spill] sm:$0xff]  ;;  %v21785_v20 = vmax.f32 %v21784_v41, 0.0  ;;  %v21786_v43 = vld [vmem:[#allocation238_spill] sm:$0xff]  ;;  %v21789_v25 = vmax.f32 %v21788_v46, 0.0 }
 0x7ff   :  { %v10451_v1 = vpack.c.bf16 %v21757_v49, %v21755_v54  ;;  %v21767_v17 = vmax.f32 %v21766_v11, 0.0  ;;  %v21772_v13 = vld [vmem:[#allocation228_spill] sm:$0xff]  ;;  %10832 = vst [vmem:[#allocation10 + $0x488] sm:$0xff] %v10436_v27   ;;  %v10476_v19 = vpack.c.bf16 %v21777_v58, %v21775_v33  ;;  %v21787_v27 = vmax.f32 %v21786_v43, 0.0  ;;  %10836 = vst [vmem:[#allocation10 + $0x4a8] sm:$0xff] %v10456_v56   ;;  %v21793_v49 = vld [vmem:[#allocation251_spill] sm:$0xff] }
 0x800   :  { %v10461_v12 = vpack.c.bf16 %v21765_v59, %v21763_v0  ;;  %v21773_v2 = vmax.f32 %v21772_v13, 0.0  ;;  %10834 = vst [vmem:[#allocation10 + $0x498] sm:$0xff] %v10446_v31   ;;  %v21780_v22 = vld [vmem:[#allocation232_spill] sm:$0xff]  ;;  %v21790_v31 = vld [vmem:[#allocation245_spill] sm:$0xff]  ;;  %v21792_v54 = vmax.f32 %v21130_v10, 0.0  ;;  %v21795_v50 = vld [vmem:[#allocation254_spill] sm:$0xff] }
 0x801   :  { %v10466_v60 = vpack.c.bf16 %v21769_v39, %v21767_v17  ;;  %10835 = vst [vmem:[#allocation10 + $0x4a0] sm:$0xff] %v10451_v1   ;;  %v21781_v52 = vmax.f32 %v21780_v22, 0.0  ;;  %v21782_v47 = vld [vmem:[#allocation380_spill] sm:$0xff]  ;;  %v10491_v62 = vpack.c.bf16 %v21789_v25, %v21787_v27  ;;  %v21791_v26 = vmax.f32 %v21790_v31, 0.0  ;;  %v21801_v11 = vld [vmem:[#allocation262_spill] sm:$0xff]  ;;  %10840 = vst [vmem:[#allocation10 + $0x4c8] sm:$0xff] %v10476_v19  }
 0x802   :  { %v10471_v61 = vpack.c.bf16 %v21773_v2, %v21771_v57  ;;  %v21783_v3 = vmax.f32 %v21782_v47, 0.0  ;;  %10837 = vst [vmem:[#allocation10 + $0x4b0] sm:$0xff] %v10461_v12   ;;  %v21794_v1 = vmax.f32 %v21793_v49, 0.0  ;;  %v21796_v29 = vmax.f32 %v21795_v50, 0.0  ;;  %v21799_v0 = vld [vmem:[#allocation260_spill] sm:$0xff]  ;;  %v21805_v10 = vld [vmem:[#allocation267_spill] sm:$0xff] }
 0x803   :  { %v10481_v16 = vpack.c.bf16 %v21781_v52, %v21779_v48  ;;  %10838 = vst [vmem:[#allocation10 + $0x4b8] sm:$0xff] %v10466_v60   ;;  %v10496_v15 = vpack.c.bf16 %v21792_v54, %v21791_v26  ;;  %v21798_v4 = vmax.f32 %v21797_v36, 0.0  ;;  %v21800_v32 = vmax.f32 %v21799_v0, 0.0  ;;  %v21803_v12 = vld [vmem:[#allocation264_spill] sm:$0xff]  ;;  %10843 = vst [vmem:[#allocation10 + $0x4e0] sm:$0xff] %v10491_v62   ;;  %v21807_v60 = vld [vmem:[#allocation270_spill] sm:$0xff] }
 0x804   :  { %v10486_v34 = vpack.c.bf16 %v21785_v20, %v21783_v3  ;;  %10839 = vst [vmem:[#allocation10 + $0x4c0] sm:$0xff] %v10471_v61   ;;  %v10501_v18 = vpack.c.bf16 %v21796_v29, %v21794_v1  ;;  %v21802_v56 = vmax.f32 %v21801_v11, 0.0  ;;  %v21804_v17 = vmax.f32 %v21803_v12, 0.0  ;;  %v21809_v13 = vld [vmem:[#allocation273_spill] sm:$0xff]  ;;  %v21813_v5 = vld [vmem:[#allocation280_spill] sm:$0xff]  ;;  %v21815_v35 = vld [vmem:[#allocation283_spill] sm:$0xff] }
 0x805   :  { %v10506_v59 = vpack.c.bf16 %v21800_v32, %v21798_v4  ;;  %10841 = vst [vmem:[#allocation10 + $0x4d0] sm:$0xff] %v10481_v16   ;;  %v21806_v39 = vmax.f32 %v21805_v10, 0.0  ;;  %v21808_v7 = vmax.f32 %v21807_v60, 0.0  ;;  %v21810_v2 = vmax.f32 %v21809_v13, 0.0  ;;  %v21811_v61 = vld [vmem:[#allocation277_spill] sm:$0xff]  ;;  %v21817_v52 = vld [vmem:[#allocation286_spill] sm:$0xff] }
 0x806   :  { %v10511_v38 = vpack.c.bf16 %v21804_v17, %v21802_v56  ;;  %10842 = vst [vmem:[#allocation10 + $0x4d8] sm:$0xff] %v10486_v34   ;;  %v21812_v55 = vmax.f32 %v21811_v61, 0.0  ;;  %v21814_v58 = vmax.f32 %v21813_v5, 0.0  ;;  %v21816_v48 = vmax.f32 %v21815_v35, 0.0  ;;  %v21819_v16 = vld [vmem:[#allocation289_spill] sm:$0xff]  ;;  %10844 = vst [vmem:[#allocation10 + $0x4e8] sm:$0xff] %v10496_v15  }
 0x807   :  { %v10516_v57 = vpack.c.bf16 %v21808_v7, %v21806_v39  ;;  %v21818_v19 = vmax.f32 %v21817_v52, 0.0  ;;  %v21820_v47 = vmax.f32 %v21819_v16, 0.0  ;;  %10845 = vst [vmem:[#allocation10 + $0x4f0] sm:$0xff] %v10501_v18   ;;  %10846 = vst [vmem:[#allocation10 + $0x4f8] sm:$0xff] %v10506_v59   ;;  %v21821_v41 = vld [vmem:[#allocation292_spill] sm:$0xff]  ;;  %v21823_v34 = vld [vmem:[#allocation295_spill] sm:$0xff] }
 0x808   :  { %v10521_v33 = vpack.c.bf16 %v21812_v55, %v21810_v2  ;;  %v10526_v22 = vpack.c.bf16 %v21816_v48, %v21814_v58  ;;  %10847 = vst [vmem:[#allocation10 + $0x500] sm:$0xff] %v10511_v38   ;;  %v21822_v20 = vmax.f32 %v21821_v41, 0.0  ;;  %v21824_v43 = vmax.f32 %v21823_v34, 0.0  ;;  %v21825_v46 = vld [vmem:[#allocation381_spill] sm:$0xff]  ;;  %v21827_v62 = vld [vmem:[#allocation298_spill] sm:$0xff]  ;;  %v21831_v1 = vld [vmem:[#allocation304_spill] sm:$0xff] }
 0x809   :  { %v10531_v3 = vpack.c.bf16 %v21820_v47, %v21818_v19  ;;  %v21826_v25 = vmax.f32 %v21825_v46, 0.0  ;;  %v21828_v31 = vmax.f32 %v21827_v62, 0.0  ;;  %v21829_v54 = vld [vmem:[#allocation301_spill] sm:$0xff]  ;;  %v21832_v50 = vmax.f32 %v21831_v1, 0.0  ;;  %v21833_v36 = vld [vmem:[#allocation306_spill] sm:$0xff]  ;;  %v21835_v18 = vld [vmem:[#allocation308_spill] sm:$0xff] }
 0x80a   :  { %v10536_v27 = vpack.c.bf16 %v21824_v43, %v21822_v20  ;;  %v21830_v49 = vmax.f32 %v21829_v54, 0.0  ;;  %v21834_v15 = vmax.f32 %v21833_v36, 0.0  ;;  %v21836_v4 = vmax.f32 %v21835_v18, 0.0  ;;  %10848 = vst [vmem:[#allocation10 + $0x508] sm:$0xff] %v10516_v57   ;;  %10849 = vst [vmem:[#allocation10 + $0x510] sm:$0xff] %v10521_v33   ;;  %v21837_v32 = vld [vmem:[#allocation310_spill] sm:$0xff] }
 0x80b   :  { %v10541_v26 = vpack.c.bf16 %v21828_v31, %v21826_v25  ;;  %10850 = vst [vmem:[#allocation10 + $0x518] sm:$0xff] %v10526_v22   ;;  %10851 = vst [vmem:[#allocation10 + $0x520] sm:$0xff] %v10531_v3   ;;  %v21838_v59 = vmax.f32 %v21837_v32, 0.0  ;;  %v21839_v11 = vld [vmem:[#allocation312_spill] sm:$0xff]  ;;  %v21841_v17 = vmax.f32 %v21154_v6, 0.0  ;;  %v21842_v38 = vmax.f32 %v21155_v21, 0.0 }
 0x80c   :  { %v10546_v29 = vpack.c.bf16 %v21832_v50, %v21830_v49  ;;  %v10551_v0 = vpack.c.bf16 %v21836_v4, %v21834_v15  ;;  %v21840_v56 = vmax.f32 %v21839_v11, 0.0  ;;  %v21843_v39 = vmax.f32 %v21156_v42, 0.0  ;;  %10852 = vst [vmem:[#allocation10 + $0x528] sm:$0xff] %v10536_v27   ;;  %v21860_v22 = vld [vmem:[#allocation331_spill] sm:$0xff]  ;;  %v21864_v16 = vld [vmem:[#allocation333_spill] sm:$0xff]  ;;  %v21866_v3 = vld [vmem:[#allocation334_spill] sm:$0xff] }
 0x80d   :  { %v10561_v10 = vpack.c.bf16 %v21842_v38, %v21841_v17  ;;  %v21844_v60 = vmax.f32 %v21157_v37, 0.0  ;;  %v21845_v57 = vmax.f32 %v21158_v63, 0.0  ;;  %v21846_v13 = vmax.f32 %v21159_v44, 0.0  ;;  %10853 = vst [vmem:[#allocation10 + $0x530] sm:$0xff] %v10541_v26   ;;  %v21872_v27 = vld [vmem:[#allocation383_spill] sm:$0xff]  ;;  %v21874_v25 = vld [vmem:[#allocation384_spill] sm:$0xff] }
 0x80e   :  { %v10556_v12 = vpack.c.bf16 %v21840_v56, %v21838_v59  ;;  %10854 = vst [vmem:[#allocation10 + $0x538] sm:$0xff] %v10546_v29   ;;  %10855 = vst [vmem:[#allocation10 + $0x540] sm:$0xff] %v10551_v0   ;;  %v21847_v61 = vmax.f32 %v21160_v53, 0.0  ;;  %v21848_v6 = vmax.f32 %v21161_v24, 0.0  ;;  %v21849_v55 = vmax.f32 %v21162_v40, 0.0  ;;  %v21876_v26 = vld [vmem:[#allocation385_spill] sm:$0xff] }
 0x80f   :  { %v10566_v7 = vpack.c.bf16 %v21844_v60, %v21843_v39  ;;  %v10571_v2 = vpack.c.bf16 %v21846_v13, %v21845_v57  ;;  %v21850_v42 = vmax.f32 %v21163_v8, 0.0  ;;  %v21851_v33 = vmax.f32 %v21164_v28, 0.0  ;;  %10857 = vst [vmem:[#allocation10 + $0x550] sm:$0xff] %v10561_v10   ;;  %v21858_v28 = vld [vmem:[#allocation330_spill] sm:$0xff]  ;;  %v21880_v29 = vld [vmem:[#allocation387_spill] sm:$0xff]  ;;  %v21882_v15 = vld [vmem:[#allocation388_spill] sm:$0xff] }
 0x810   :  { %v10576_v21 = vpack.c.bf16 %v21848_v6, %v21847_v61  ;;  %v21852_v63 = vmax.f32 %v16657_v9, 0.0  ;;  %v21853_v5 = vmax.f32 %v16661_v30, 0.0  ;;  %v21854_v58 = vmax.f32 %v16665_v51, 0.0  ;;  %10856 = vst [vmem:[#allocation10 + $0x548] sm:$0xff] %v10556_v12   ;;  %v21862_v30 = vld [vmem:[#allocation332_spill] sm:$0xff]  ;;  %v21878_v49 = vld [vmem:[#allocation386_spill] sm:$0xff] }
 0x811   :  { %v10581_v37 = vpack.c.bf16 %v21850_v42, %v21849_v55  ;;  %10858 = vst [vmem:[#allocation10 + $0x558] sm:$0xff] %v10566_v7   ;;  %10859 = vst [vmem:[#allocation10 + $0x560] sm:$0xff] %v10571_v2   ;;  %v21855_v24 = vmax.f32 %v16669_v45, 0.0  ;;  %v21856_v53 = vmax.f32 %v16673_v23, 0.0  ;;  %v21857_v40 = vmax.f32 %v16677_v14, 0.0  ;;  %v21868_v45 = vld [vmem:[#allocation336_spill] sm:$0xff] }
 0x812   :  { %v10586_v44 = vpack.c.bf16 %v21852_v63, %v21851_v33  ;;  %v10591_v35 = vpack.c.bf16 %v21854_v58, %v21853_v5  ;;  %v21859_v48 = vmax.f32 %v21858_v28, 0.0  ;;  %v21861_v52 = vmax.f32 %v21860_v22, 0.0  ;;  %10860 = vst [vmem:[#allocation10 + $0x568] sm:$0xff] %v10576_v21   ;;  %v21870_v14 = vld [vmem:[#allocation382_spill] sm:$0xff]  ;;  %v21884_v0 = vld [vmem:[#allocation389_spill] sm:$0xff]  ;;  %v21888_v12 = vld [vmem:[#allocation391_spill] sm:$0xff] }
 0x813   :  { %v10596_v8 = vpack.c.bf16 %v21856_v53, %v21855_v24  ;;  %v21863_v19 = vmax.f32 %v21862_v30, 0.0  ;;  %v21865_v47 = vmax.f32 %v21864_v16, 0.0  ;;  %v21867_v41 = vmax.f32 %v21866_v3, 0.0  ;;  %10861 = vst [vmem:[#allocation10 + $0x570] sm:$0xff] %v10581_v37   ;;  %v21886_v59 = vld [vmem:[#allocation390_spill] sm:$0xff]  ;;  %v21890_v38 = vld [vmem:[#allocation392_spill] sm:$0xff] }
 0x814   :  { %v10601_v9 = vpack.c.bf16 %v21859_v48, %v21857_v40  ;;  %10862 = vst [vmem:[#allocation10 + $0x578] sm:$0xff] %v10586_v44   ;;  %10863 = vst [vmem:[#allocation10 + $0x580] sm:$0xff] %v10591_v35   ;;  %v21869_v23 = vmax.f32 %v21868_v45, 0.0  ;;  %v21871_v34 = vmax.f32 %v21870_v14, 0.0  ;;  %v21873_v46 = vmax.f32 %v21872_v27, 0.0  ;;  %v21892_v60 = vld [vmem:[#allocation337_spill] sm:$0xff] }
 0x815   :  { %v10606_v51 = vpack.c.bf16 %v21863_v19, %v21861_v52  ;;  %v10611_v20 = vpack.c.bf16 %v21867_v41, %v21865_v47  ;;  %v21875_v62 = vmax.f32 %v21874_v25, 0.0  ;;  %v21877_v54 = vmax.f32 %v21876_v26, 0.0  ;;  %10864 = vst [vmem:[#allocation10 + $0x588] sm:$0xff] %v10596_v8   ;;  %v21894_v57 = vld [vmem:[#allocation338_spill] sm:$0xff]  ;;  %v21896_v61 = vld [vmem:[#allocation339_spill] sm:$0xff]  ;;  %v21898_v21 = vld [vmem:[#allocation340_spill] sm:$0xff] }
 0x816   :  { %v10616_v43 = vpack.c.bf16 %v21871_v34, %v21869_v23  ;;  %v21879_v1 = vmax.f32 %v21878_v49, 0.0  ;;  %v21881_v36 = vmax.f32 %v21880_v29, 0.0  ;;  %v21883_v18 = vmax.f32 %v21882_v15, 0.0  ;;  %10865 = vst [vmem:[#allocation10 + $0x590] sm:$0xff] %v10601_v9   ;;  %v21900_v37 = vld [vmem:[#allocation341_spill] sm:$0xff]  ;;  %v21902_v63 = vld [vmem:[#allocation342_spill] sm:$0xff] }
 0x817   :  { %v10621_v31 = vpack.c.bf16 %v21875_v62, %v21873_v46  ;;  %10866 = vst [vmem:[#allocation10 + $0x598] sm:$0xff] %v10606_v51   ;;  %10867 = vst [vmem:[#allocation10 + $0x5a0] sm:$0xff] %v10611_v20   ;;  %v21885_v32 = vmax.f32 %v21884_v0, 0.0  ;;  %v21887_v11 = vmax.f32 %v21886_v59, 0.0  ;;  %v21889_v17 = vmax.f32 %v21888_v12, 0.0  ;;  %v21904_v58 = vld [vmem:[#allocation343_spill] sm:$0xff] }
 0x818   :  { %v10626_v50 = vpack.c.bf16 %v21879_v1, %v21877_v54  ;;  %v10631_v4 = vpack.c.bf16 %v21883_v18, %v21881_v36  ;;  %v21891_v10 = vmax.f32 %v21890_v38, 0.0  ;;  %v21893_v7 = vmax.f32 %v21892_v60, 0.0  ;;  %10868 = vst [vmem:[#allocation10 + $0x5a8] sm:$0xff] %v10616_v43   ;;  %v21906_v24 = vld [vmem:[#allocation344_spill] sm:$0xff]  ;;  %v21908_v40 = vld [vmem:[#allocation345_spill] sm:$0xff]  ;;  %v21910_v48 = vld [vmem:[#allocation346_spill] sm:$0xff] }
 0x819   :  { %v10636_v56 = vpack.c.bf16 %v21887_v11, %v21885_v32  ;;  %v21895_v13 = vmax.f32 %v21894_v57, 0.0  ;;  %v21897_v6 = vmax.f32 %v21896_v61, 0.0  ;;  %v21899_v55 = vmax.f32 %v21898_v21, 0.0  ;;  %10869 = vst [vmem:[#allocation10 + $0x5b0] sm:$0xff] %v10621_v31   ;;  %v21912_v52 = vld [vmem:[#allocation393_spill] sm:$0xff]  ;;  %v21914_v19 = vld [vmem:[#allocation394_spill] sm:$0xff] }
 0x81a   :  { %v10641_v39 = vpack.c.bf16 %v21891_v10, %v21889_v17  ;;  %10870 = vst [vmem:[#allocation10 + $0x5b8] sm:$0xff] %v10626_v50   ;;  %10871 = vst [vmem:[#allocation10 + $0x5c0] sm:$0xff] %v10631_v4   ;;  %v21901_v33 = vmax.f32 %v21900_v37, 0.0  ;;  %v21903_v44 = vmax.f32 %v21902_v63, 0.0  ;;  %v21905_v35 = vmax.f32 %v21904_v58, 0.0  ;;  %v21916_v47 = vld [vmem:[#allocation395_spill] sm:$0xff] }
 0x81b   :  { %v10646_v2 = vpack.c.bf16 %v21895_v13, %v21893_v7  ;;  %v10651_v42 = vpack.c.bf16 %v21899_v55, %v21897_v6  ;;  %v21907_v53 = vmax.f32 %v21906_v24, 0.0  ;;  %v21909_v28 = vmax.f32 %v21908_v40, 0.0  ;;  %10872 = vst [vmem:[#allocation10 + $0x5c8] sm:$0xff] %v10636_v56   ;;  %v21918_v41 = vld [vmem:[#allocation396_spill] sm:$0xff]  ;;  %v21920_v23 = vld [vmem:[#allocation397_spill] sm:$0xff]  ;;  %v21922_v34 = vld [vmem:[#allocation398_spill] sm:$0xff] }
 0x81c   :  { %v10656_v5 = vpack.c.bf16 %v21903_v44, %v21901_v33  ;;  %v21911_v9 = vmax.f32 %v21910_v48, 0.0  ;;  %v21913_v30 = vmax.f32 %v21912_v52, 0.0  ;;  %v21915_v51 = vmax.f32 %v21914_v19, 0.0  ;;  %10873 = vst [vmem:[#allocation10 + $0x5d0] sm:$0xff] %v10641_v39  }
 0x81d   :  { %v10661_v8 = vpack.c.bf16 %v21907_v53, %v21905_v35  ;;  %10874 = vst [vmem:[#allocation10 + $0x5d8] sm:$0xff] %v10646_v2   ;;  %10875 = vst [vmem:[#allocation10 + $0x5e0] sm:$0xff] %v10651_v42   ;;  %v21917_v3 = vmax.f32 %v21916_v47, 0.0  ;;  %v21919_v20 = vmax.f32 %v21918_v41, 0.0  ;;  %v21921_v14 = vmax.f32 %v21920_v23, 0.0 }
 0x81e   :  { %v10666_v22 = vpack.c.bf16 %v21911_v9, %v21909_v28  ;;  %v10671_v16 = vpack.c.bf16 %v21915_v51, %v21913_v30  ;;  %v21923_v43 = vmax.f32 %v21922_v34, 0.0  ;;  %10876 = vst [vmem:[#allocation10 + $0x5e8] sm:$0xff] %v10656_v5  }
 0x81f   :  { %v10676_v45 = vpack.c.bf16 %v21919_v20, %v21917_v3  ;;  %10877 = vst [vmem:[#allocation10 + $0x5f0] sm:$0xff] %v10661_v8  }
 0x820   :  { %v10681_v27 = vpack.c.bf16 %v21923_v43, %v21921_v14  ;;  %10878 = vst [vmem:[#allocation10 + $0x5f8] sm:$0xff] %v10666_v22   ;;  %10879 = vst [vmem:[#allocation10 + $0x600] sm:$0xff] %v10671_v16  }
 0x821   :  { %10880 = vst [vmem:[#allocation10 + $0x608] sm:$0xff] %v10676_v45  }
 0x822   :  { %10881 = vst [vmem:[#allocation10 + $0x610] sm:$0xff] %v10681_v27  }
 0x823   :  { %11622 = shalt.err (!%p11619_p10)
}
 0x824   :  { %8508 = dma.vmem_to_hbm [thread:$0]  %s8503_s3, 25088, %s17991_s4, [#allocation4], %s11640_s18, %s11640_s18, %s11641_s19  }
 0x825   :  { %11637 = dma.done.wait [#allocation4], 25088  }
 0x826   :  { %11638 = vsyncadd [#allocation4], 4294942208 }
 0x827   :  { %8512 = vsyncpa [#allocation3], 1 }
 0x828   :  { %8513 = vsyncpa [#allocation6], 1 }
 0x829   :  { %8514 = vsyncpa [#allocation9], 1 }
 0x82a   :  { %8515 = vsyncpa [#allocation4], 1 }

</bundles_post_ra>
